<compile_context>
chip_gen: v6e
topology: v6e:2x2x1
jax: 0.10.0
libtpu: 0.0.40
codegen_flags: <defaults>
</compile_context>

<pallas_src>
import functools

import jax
import jax.numpy as jnp
import numpy as np
from jax.experimental import pallas as pl
from jax.experimental.pallas import tpu as pltpu

BN_EPS = 1e-5

# Scoped-VMEM budget: well above v5e's 16 MiB default (needed once the batch
# tile is in the 1-4K range) and comfortably below v7x's 64 MiB physical VMEM.
_VMEM_LIMIT_BYTES = 40 * 1024 * 1024


def _round_up(n, m):
    return ((n + m - 1) // m) * m


def _activation(name, x):
    if name == "relu":
        return jnp.maximum(x, 0.0)
    if name == "relu6":
        return jnp.clip(x, 0.0, 6.0)
    if name == "sigmoid":
        return 1.0 / (1.0 + jnp.exp(-x))
    if name == "tanh":
        return jnp.tanh(x)
    if name == "selu":
        alpha = 1.6732632423543772
        scale = 1.0507009873554805
        return scale * jnp.where(x > 0, x, alpha * (jnp.exp(x) - 1.0))
    if name == "elu":
        return jnp.where(x > 0, x, jnp.exp(x) - 1.0)
    if name == "lrelu":
        return jnp.where(x > 0, x, 0.01 * x)
    raise ValueError("Unknown non-linearity type")


def _autoencoder_kernel(act_name, layer_meta, *refs):
    """One batch tile through the full 8-layer chain, weights resident in VMEM.

    refs = (x_ref, w0_ref..w7_ref, bias_ref, out_ref)
      x_ref    : (TB, in_pad) bf16 tile (streamed).
      w_li     : (in_pad, out_pad) bf16 weights with the eval-mode BN of the
                 *previous* layer folded in at pack time; VMEM-resident.
      bias_ref : (8, 256) f32 blob, one BN-folded bias row per layer.
    """
    n_layers = len(layer_meta)
    x_ref = refs[0]
    w_refs = refs[1:1 + n_layers]
    bias_ref = refs[1 + n_layers]
    out_ref = refs[2 + n_layers]

    h = x_ref[...]                                   # bf16, fed straight to the MXU
    for li, m in enumerate(layer_meta):
        out_pad = m["out_pad"]
        w = w_refs[li][...]                          # (in_pad, out_pad) bf16
        b = bias_ref[li:li + 1, :out_pad]            # (1, out_pad) f32, static slice
        # MXU matmul in bf16, f32 accumulation; bias + activation stay in f32.
        y = jnp.dot(h, w, preferred_element_type=jnp.float32) + b
        if m["act"]:
            y = _activation(act_name, y)
        if li + 1 < n_layers:
            # Carry the activation between layers in the matmul dtype (bf16):
            # halves the inter-layer VMEM ld/st bytes; the next dot would cast
            # to bf16 anyway.
            h = y.astype(w_refs[li + 1].dtype)
        else:
            out_ref[...] = y.astype(out_ref.dtype)


def init_autoencoder_params(key, n_input):
    """Per-layer params in natural (unpadded) shapes.

    Linear: W (in,out), b (out,) ~ U(-1/sqrt(fan_in), +1/sqrt(fan_in)) (PyTorch).
    BatchNorm1d buffers (gamma/beta/running_mean/running_var) are randomized
    (instead of PyTorch's fresh 1/0/0/1 init) so the eval-mode-BN fold is
    actually exercised by the correctness check; the math is identical to
    PyTorch eval-mode BN for any buffer values.
    """
    dims = [n_input, 200, 100, 50, 25, 50, 100, 200, n_input]
    bn_layers = (0, 1, 2, 4, 5, 6)  # Linear layers followed by activation + BatchNorm1d
    layer_params = []
    for li in range(len(dims) - 1):
        fan_in, fan_out = dims[li], dims[li + 1]
        key, kw, kb = jax.random.split(key, 3)
        bound = 1.0 / np.sqrt(fan_in)
        p = {
            "w": jax.random.uniform(kw, (fan_in, fan_out), jnp.float32, -bound, bound),
            "b": jax.random.uniform(kb, (fan_out,), jnp.float32, -bound, bound),
        }
        if li in bn_layers:
            key, kg, kbt, km, kv = jax.random.split(key, 5)
            p["gamma"] = jax.random.uniform(kg, (fan_out,), jnp.float32, 0.5, 1.5)
            p["beta"] = jax.random.uniform(kbt, (fan_out,), jnp.float32, -0.1, 0.1)
            p["mean"] = jax.random.uniform(km, (fan_out,), jnp.float32, -0.1, 0.1)
            p["var"] = jax.random.uniform(kv, (fan_out,), jnp.float32, 0.5, 1.5)
        layer_params.append(p)
    return layer_params, dims, bn_layers


def pack_params(layer_params, dims, bn_layers, matmul_dtype=jnp.bfloat16):
    """Fold eval-mode BN of layer l into (W, b) of layer l+1 (in f32), zero-pad
    feature dims to multiples of 128 lanes, cast weights to `matmul_dtype`
    LAST, and pack the 8 folded biases into one (8, 256) f32 blob.

    Zero padding is exact: padded weight rows/cols and bias lanes are 0, so
    padded lanes can never leak into real outputs (even for sigmoid, whose
    nonzero act(0)=0.5 on padded lanes multiplies zero weight rows).
    """
    n_layers = len(dims) - 1
    pads = [_round_up(d, 128) for d in dims]
    vec_w = max(pads[1:])

    # --- BN fold (f32) ---
    w_eff, b_eff = [], []
    for li in range(n_layers):
        w = layer_params[li]["w"].astype(jnp.float32)
        b = layer_params[li]["b"].astype(jnp.float32)
        if (li - 1) in bn_layers:
            prev = layer_params[li - 1]
            scale = prev["gamma"] * jax.lax.rsqrt(prev["var"] + BN_EPS)
            shift = prev["beta"] - prev["mean"] * scale
            b = b + shift @ w              # uses the *unscaled* W of this layer
            w = scale[:, None] * w
        w_eff.append(w)
        b_eff.append(b)

    # --- pad + pack ---
    w_list, bias_rows, layer_meta = [], [], []
    for li in range(n_layers):
        in_d, out_d = dims[li], dims[li + 1]
        in_p, out_p = pads[li], pads[li + 1]
        w_pad = jnp.zeros((in_p, out_p), jnp.float32).at[:in_d, :out_d].set(w_eff[li])
        w_list.append(w_pad.astype(matmul_dtype))          # cast to bf16 last
        bias_rows.append(jnp.zeros((vec_w,), jnp.float32).at[:out_d].set(b_eff[li]))
        layer_meta.append({"in_pad": in_p, "out_pad": out_p, "act": li in bn_layers})

    while len(bias_rows) % 8:               # sublane-multiple row count
        bias_rows.append(jnp.zeros((vec_w,), jnp.float32))
    bias_blob = jnp.stack(bias_rows)         # (8, 256) f32
    return w_list, bias_blob, tuple(layer_meta)


def _choose_tb(batch, tb_request):
    """Pick a batch tile that (a) divides the 8-rounded batch whenever a
    reasonably large divisor exists -- so the wrapper never materializes a
    padded HBM copy of x or a sliced copy of the output -- and (b) yields an
    even number of grid steps (>= 2) so v7x's two TensorCores split the
    "parallel" batch axis evenly."""
    b8 = _round_up(max(batch, 1), 8)
    cap = max(8, min(_round_up(tb_request, 8), b8))
    divs = [t for t in range(8, cap + 1, 8) if b8 % t == 0]
    even = [t for t in divs if (b8 // t) % 2 == 0]
    if even and max(even) >= cap // 4:
        tb = max(even)
    elif divs and max(divs) >= cap // 4:
        tb = max(divs)
    else:
        tb = cap                             # ragged batch: fall back to padding
    return tb, _round_up(b8, tb)


def autoencoder_forward(x, packed, *, act_name="selu", tb=2048):
    """Batch-tiled forward pass (PyTorch model.eval() semantics).

    tb: requested batch tile.  2048 amortizes the ~0.35 us per-grid-step
    overhead; with bf16 x and bf16 inter-layer activations the footprint
    (x/out double buffers, resident weights, live f32 intermediates) stays
    around ~16 MiB -- inside v7x's 64 MiB VMEM and the 40 MiB scoped limit.
    """
    w_list, bias_blob, layer_meta = packed
    B, n_in = x.shape
    in_pad = layer_meta[0]["in_pad"]
    out_pad_final = layer_meta[-1]["out_pad"]
    out_dtype = x.dtype

    tb_eff, b_pad = _choose_tb(B, tb)

    # Stream x in bf16: halves the x HBM read and its double buffer (the first
    # matmul ran in bf16 anyway).  Pad only when actually needed so we do not
    # materialize an extra HBM copy of x.
    x_in = x.astype(jnp.bfloat16)
    if b_pad != B or in_pad != n_in:
        x_in = jnp.pad(x_in, ((0, b_pad - B), (0, in_pad - n_in)))

    kernel = functools.partial(_autoencoder_kernel, act_name, layer_meta)
    grid = (b_pad // tb_eff,)

    def _call(resident_kwargs):
        in_specs = [pl.BlockSpec((tb_eff, in_pad), lambda i: (i, 0))]       # streamed x
        # Weights + bias blob: constant index_map -> DMA'd once, VMEM-resident.
        in_specs += [pl.BlockSpec(w.shape, lambda i: (0, 0), **resident_kwargs)
                     for w in w_list]
        in_specs += [pl.BlockSpec(bias_blob.shape, lambda i: (0, 0),
                                  **resident_kwargs)]
        out_spec = pl.BlockSpec((tb_eff, out_pad_final), lambda i: (i, 0))
        return pl.pallas_call(
            kernel,
            out_shape=jax.ShapeDtypeStruct((b_pad, out_pad_final), out_dtype),
            grid=grid,
            in_specs=in_specs,
            out_specs=out_spec,
            compiler_params=pltpu.CompilerParams(
                # Rows are independent (eval-mode BN is pre-folded), so the
                # batch axis is "parallel" and v7x can split the even grid
                # across its two TensorCores.
                # TODO(synk): if plain "parallel" does not shard across v7x
                # TensorCores, switch to pltpu.CORE_PARALLEL.
                dimension_semantics=("parallel",),
                vmem_limit_bytes=_VMEM_LIMIT_BYTES),
        )(x_in, *w_list, bias_blob)

    try:
        # Resident operands do not need a second pipeline buffer; Buffered(1)
        # frees ~0.5 MiB of VMEM headroom (matters most on v7x).
        out_padded = _call({"pipeline_mode": pl.Buffered(1)})
    except Exception:
        # Fallback for Pallas versions that reject single-buffered BlockSpecs.
        out_padded = _call({})

    if b_pad != B or out_pad_final != n_in:
        out_padded = out_padded[:B, :n_in]
    return out_padded


def autoencoder_reference(x, layer_params, dims, bn_layers, act_name="selu"):
    """Plain-JAX f32 reference with the original (unfolded) eval-mode BN."""
    h = x.astype(jnp.float32)
    for li in range(len(dims) - 1):
        p = layer_params[li]
        h = h @ p["w"] + p["b"]
        if li in bn_layers:
            h = _activation(act_name, h)
            h = (h - p["mean"]) * jax.lax.rsqrt(p["var"] + BN_EPS) * p["gamma"] + p["beta"]
    return h.astype(x.dtype)


if __name__ == "__main__":
    batch = 512
    n_input = 256
    act = "selu"

    key = jax.random.PRNGKey(0)
    key, kx = jax.random.split(key)
    x = jax.random.normal(kx, (batch, n_input), jnp.float32)

    layer_params, dims, bn_layers = init_autoencoder_params(key, n_input)
    packed = pack_params(layer_params, dims, bn_layers, matmul_dtype=jnp.bfloat16)

    # Default tile request (2048) -> tb=256 here, i.e. a 2-step even "parallel"
    # grid; second call uses a small tile to exercise a deeper pipeline.
    out = jax.block_until_ready(autoencoder_forward(x, packed, act_name=act))
    out_small = jax.block_until_ready(
        autoencoder_forward(x, packed, act_name=act, tb=64))

    ref = autoencoder_reference(x, layer_params, dims, bn_layers, act_name=act)
    np.testing.assert_allclose(np.asarray(out), np.asarray(ref), rtol=5e-2, atol=5e-2)
    np.testing.assert_allclose(np.asarray(out_small), np.asarray(ref),
                               rtol=5e-2, atol=5e-2)

    assert out.shape == (batch, n_input) and out.dtype == jnp.float32
    print("KERNEL_OK")
</pallas_src>

<mosaic_0001>
module attributes {stable_mosaic.version = 11 : i64} {
  func.func @_autoencoder_kernel(%arg0: i32, %arg1: memref<256x256xbf16, #tpu.memory_space<vmem>>, %arg2: memref<256x256xbf16, #tpu.memory_space<vmem>>, %arg3: memref<256x128xbf16, #tpu.memory_space<vmem>>, %arg4: memref<128x128xbf16, #tpu.memory_space<vmem>>, %arg5: memref<128x128xbf16, #tpu.memory_space<vmem>>, %arg6: memref<128x128xbf16, #tpu.memory_space<vmem>>, %arg7: memref<128x128xbf16, #tpu.memory_space<vmem>>, %arg8: memref<128x256xbf16, #tpu.memory_space<vmem>>, %arg9: memref<256x256xbf16, #tpu.memory_space<vmem>>, %arg10: memref<8x256xf32, #tpu.memory_space<vmem>>, %arg11: memref<256x256xf32, #tpu.memory_space<vmem>>) attributes {dimension_semantics = [#tpu.dimension_semantics<parallel>], iteration_bounds = array<i64: 2>, scalar_prefetch = 0 : i64, scratch_operands = 0 : i64, tpu.core_type = #tpu.core_type<tc>, window_params = [{transform_indices = @transform_0, window_bounds = array<i64: 256, 256>}, {pipeline_mode = #tpu.pipeline_mode<synchronous>, transform_indices = @transform_1, window_bounds = array<i64: 256, 256>}, {pipeline_mode = #tpu.pipeline_mode<synchronous>, transform_indices = @transform_2, window_bounds = array<i64: 256, 128>}, {pipeline_mode = #tpu.pipeline_mode<synchronous>, transform_indices = @transform_3, window_bounds = array<i64: 128, 128>}, {pipeline_mode = #tpu.pipeline_mode<synchronous>, transform_indices = @transform_4, window_bounds = array<i64: 128, 128>}, {pipeline_mode = #tpu.pipeline_mode<synchronous>, transform_indices = @transform_5, window_bounds = array<i64: 128, 128>}, {pipeline_mode = #tpu.pipeline_mode<synchronous>, transform_indices = @transform_6, window_bounds = array<i64: 128, 128>}, {pipeline_mode = #tpu.pipeline_mode<synchronous>, transform_indices = @transform_7, window_bounds = array<i64: 128, 256>}, {pipeline_mode = #tpu.pipeline_mode<synchronous>, transform_indices = @transform_8, window_bounds = array<i64: 256, 256>}, {pipeline_mode = #tpu.pipeline_mode<synchronous>, transform_indices = @transform_9, window_bounds = array<i64: 8, 256>}, {transform_indices = @transform_10, window_bounds = array<i64: 256, 256>}]} {
    %c0 = arith.constant 0 : index
    %c0_0 = arith.constant 0 : index
    %0 = vector.load %arg1[%c0, %c0_0] : memref<256x256xbf16, #tpu.memory_space<vmem>>, vector<256x256xbf16>
    %c0_1 = arith.constant 0 : index
    %c0_2 = arith.constant 0 : index
    %1 = vector.load %arg2[%c0_1, %c0_2] : memref<256x256xbf16, #tpu.memory_space<vmem>>, vector<256x256xbf16>
    %c0_3 = arith.constant 0 : index
    %c0_4 = arith.constant 0 : index
    %2 = vector.load %arg10[%c0_3, %c0_4] : memref<8x256xf32, #tpu.memory_space<vmem>>, vector<1x256xf32>
    %cst = arith.constant dense<0.000000e+00> : vector<256x256xf32>
    %3 = tpu.matmul %0, %1, %cst {dimension_numbers = #tpu.dot_dimension_numbers<[1], [0], [0], [1], [0, 0, 1, 1], [], []>} : vector<256x256xbf16>, vector<256x256xbf16>, vector<256x256xf32> -> vector<256x256xf32>
    %4 = vector.broadcast %2 : vector<1x256xf32> to vector<256x256xf32>
    %5 = arith.addf %3, %4 : vector<256x256xf32>
    %cst_5 = arith.constant 0.000000e+00 : f32
    %6 = vector.broadcast %cst_5 : f32 to vector<256x256xf32>
    %7 = arith.cmpf ogt, %5, %6 : vector<256x256xf32>
    %8 = math.exp %5 : vector<256x256xf32>
    %cst_6 = arith.constant 1.000000e+00 : f32
    %9 = vector.broadcast %cst_6 : f32 to vector<256x256xf32>
    %10 = arith.subf %8, %9 : vector<256x256xf32>
    %cst_7 = arith.constant 1.67326319 : f32
    %11 = vector.broadcast %cst_7 : f32 to vector<256x256xf32>
    %12 = arith.mulf %11, %10 : vector<256x256xf32>
    %13 = arith.select %7, %5, %12 : vector<256x256xi1>, vector<256x256xf32>
    %cst_8 = arith.constant 1.05070102 : f32
    %14 = vector.broadcast %cst_8 : f32 to vector<256x256xf32>
    %15 = arith.mulf %14, %13 : vector<256x256xf32>
    %16 = arith.truncf %15 : vector<256x256xf32> to vector<256x256xbf16>
    %c0_9 = arith.constant 0 : index
    %c0_10 = arith.constant 0 : index
    %17 = vector.load %arg3[%c0_9, %c0_10] : memref<256x128xbf16, #tpu.memory_space<vmem>>, vector<256x128xbf16>
    %c1 = arith.constant 1 : index
    %c0_11 = arith.constant 0 : index
    %18 = vector.load %arg10[%c1, %c0_11] : memref<8x256xf32, #tpu.memory_space<vmem>>, vector<1x128xf32>
    %cst_12 = arith.constant dense<0.000000e+00> : vector<256x128xf32>
    %19 = tpu.matmul %16, %17, %cst_12 {dimension_numbers = #tpu.dot_dimension_numbers<[1], [0], [0], [1], [0, 0, 1, 1], [], []>} : vector<256x256xbf16>, vector<256x128xbf16>, vector<256x128xf32> -> vector<256x128xf32>
    %20 = vector.broadcast %18 : vector<1x128xf32> to vector<256x128xf32>
    %21 = arith.addf %19, %20 : vector<256x128xf32>
    %cst_13 = arith.constant 0.000000e+00 : f32
    %22 = vector.broadcast %cst_13 : f32 to vector<256x128xf32>
    %23 = arith.cmpf ogt, %21, %22 : vector<256x128xf32>
    %24 = math.exp %21 : vector<256x128xf32>
    %cst_14 = arith.constant 1.000000e+00 : f32
    %25 = vector.broadcast %cst_14 : f32 to vector<256x128xf32>
    %26 = arith.subf %24, %25 : vector<256x128xf32>
    %cst_15 = arith.constant 1.67326319 : f32
    %27 = vector.broadcast %cst_15 : f32 to vector<256x128xf32>
    %28 = arith.mulf %27, %26 : vector<256x128xf32>
    %29 = arith.select %23, %21, %28 : vector<256x128xi1>, vector<256x128xf32>
    %cst_16 = arith.constant 1.05070102 : f32
    %30 = vector.broadcast %cst_16 : f32 to vector<256x128xf32>
    %31 = arith.mulf %30, %29 : vector<256x128xf32>
    %32 = arith.truncf %31 : vector<256x128xf32> to vector<256x128xbf16>
    %c0_17 = arith.constant 0 : index
    %c0_18 = arith.constant 0 : index
    %33 = vector.load %arg4[%c0_17, %c0_18] : memref<128x128xbf16, #tpu.memory_space<vmem>>, vector<128x128xbf16>
    %c2 = arith.constant 2 : index
    %c0_19 = arith.constant 0 : index
    %34 = vector.load %arg10[%c2, %c0_19] : memref<8x256xf32, #tpu.memory_space<vmem>>, vector<1x128xf32>
    %cst_20 = arith.constant dense<0.000000e+00> : vector<256x128xf32>
    %35 = tpu.matmul %32, %33, %cst_20 {dimension_numbers = #tpu.dot_dimension_numbers<[1], [0], [0], [1], [0, 0, 1, 1], [], []>} : vector<256x128xbf16>, vector<128x128xbf16>, vector<256x128xf32> -> vector<256x128xf32>
    %36 = vector.broadcast %34 : vector<1x128xf32> to vector<256x128xf32>
    %37 = arith.addf %35, %36 : vector<256x128xf32>
    %cst_21 = arith.constant 0.000000e+00 : f32
    %38 = vector.broadcast %cst_21 : f32 to vector<256x128xf32>
    %39 = arith.cmpf ogt, %37, %38 : vector<256x128xf32>
    %40 = math.exp %37 : vector<256x128xf32>
    %cst_22 = arith.constant 1.000000e+00 : f32
    %41 = vector.broadcast %cst_22 : f32 to vector<256x128xf32>
    %42 = arith.subf %40, %41 : vector<256x128xf32>
    %cst_23 = arith.constant 1.67326319 : f32
    %43 = vector.broadcast %cst_23 : f32 to vector<256x128xf32>
    %44 = arith.mulf %43, %42 : vector<256x128xf32>
    %45 = arith.select %39, %37, %44 : vector<256x128xi1>, vector<256x128xf32>
    %cst_24 = arith.constant 1.05070102 : f32
    %46 = vector.broadcast %cst_24 : f32 to vector<256x128xf32>
    %47 = arith.mulf %46, %45 : vector<256x128xf32>
    %48 = arith.truncf %47 : vector<256x128xf32> to vector<256x128xbf16>
    %c0_25 = arith.constant 0 : index
    %c0_26 = arith.constant 0 : index
    %49 = vector.load %arg5[%c0_25, %c0_26] : memref<128x128xbf16, #tpu.memory_space<vmem>>, vector<128x128xbf16>
    %c3 = arith.constant 3 : index
    %c0_27 = arith.constant 0 : index
    %50 = vector.load %arg10[%c3, %c0_27] : memref<8x256xf32, #tpu.memory_space<vmem>>, vector<1x128xf32>
    %cst_28 = arith.constant dense<0.000000e+00> : vector<256x128xf32>
    %51 = tpu.matmul %48, %49, %cst_28 {dimension_numbers = #tpu.dot_dimension_numbers<[1], [0], [0], [1], [0, 0, 1, 1], [], []>} : vector<256x128xbf16>, vector<128x128xbf16>, vector<256x128xf32> -> vector<256x128xf32>
    %52 = vector.broadcast %50 : vector<1x128xf32> to vector<256x128xf32>
    %53 = arith.addf %51, %52 : vector<256x128xf32>
    %54 = arith.truncf %53 : vector<256x128xf32> to vector<256x128xbf16>
    %c0_29 = arith.constant 0 : index
    %c0_30 = arith.constant 0 : index
    %55 = vector.load %arg6[%c0_29, %c0_30] : memref<128x128xbf16, #tpu.memory_space<vmem>>, vector<128x128xbf16>
    %c4 = arith.constant 4 : index
    %c0_31 = arith.constant 0 : index
    %56 = vector.load %arg10[%c4, %c0_31] : memref<8x256xf32, #tpu.memory_space<vmem>>, vector<1x128xf32>
    %cst_32 = arith.constant dense<0.000000e+00> : vector<256x128xf32>
    %57 = tpu.matmul %54, %55, %cst_32 {dimension_numbers = #tpu.dot_dimension_numbers<[1], [0], [0], [1], [0, 0, 1, 1], [], []>} : vector<256x128xbf16>, vector<128x128xbf16>, vector<256x128xf32> -> vector<256x128xf32>
    %58 = vector.broadcast %56 : vector<1x128xf32> to vector<256x128xf32>
    %59 = arith.addf %57, %58 : vector<256x128xf32>
    %cst_33 = arith.constant 0.000000e+00 : f32
    %60 = vector.broadcast %cst_33 : f32 to vector<256x128xf32>
    %61 = arith.cmpf ogt, %59, %60 : vector<256x128xf32>
    %62 = math.exp %59 : vector<256x128xf32>
    %cst_34 = arith.constant 1.000000e+00 : f32
    %63 = vector.broadcast %cst_34 : f32 to vector<256x128xf32>
    %64 = arith.subf %62, %63 : vector<256x128xf32>
    %cst_35 = arith.constant 1.67326319 : f32
    %65 = vector.broadcast %cst_35 : f32 to vector<256x128xf32>
    %66 = arith.mulf %65, %64 : vector<256x128xf32>
    %67 = arith.select %61, %59, %66 : vector<256x128xi1>, vector<256x128xf32>
    %cst_36 = arith.constant 1.05070102 : f32
    %68 = vector.broadcast %cst_36 : f32 to vector<256x128xf32>
    %69 = arith.mulf %68, %67 : vector<256x128xf32>
    %70 = arith.truncf %69 : vector<256x128xf32> to vector<256x128xbf16>
    %c0_37 = arith.constant 0 : index
    %c0_38 = arith.constant 0 : index
    %71 = vector.load %arg7[%c0_37, %c0_38] : memref<128x128xbf16, #tpu.memory_space<vmem>>, vector<128x128xbf16>
    %c5 = arith.constant 5 : index
    %c0_39 = arith.constant 0 : index
    %72 = vector.load %arg10[%c5, %c0_39] : memref<8x256xf32, #tpu.memory_space<vmem>>, vector<1x128xf32>
    %cst_40 = arith.constant dense<0.000000e+00> : vector<256x128xf32>
    %73 = tpu.matmul %70, %71, %cst_40 {dimension_numbers = #tpu.dot_dimension_numbers<[1], [0], [0], [1], [0, 0, 1, 1], [], []>} : vector<256x128xbf16>, vector<128x128xbf16>, vector<256x128xf32> -> vector<256x128xf32>
    %74 = vector.broadcast %72 : vector<1x128xf32> to vector<256x128xf32>
    %75 = arith.addf %73, %74 : vector<256x128xf32>
    %cst_41 = arith.constant 0.000000e+00 : f32
    %76 = vector.broadcast %cst_41 : f32 to vector<256x128xf32>
    %77 = arith.cmpf ogt, %75, %76 : vector<256x128xf32>
    %78 = math.exp %75 : vector<256x128xf32>
    %cst_42 = arith.constant 1.000000e+00 : f32
    %79 = vector.broadcast %cst_42 : f32 to vector<256x128xf32>
    %80 = arith.subf %78, %79 : vector<256x128xf32>
    %cst_43 = arith.constant 1.67326319 : f32
    %81 = vector.broadcast %cst_43 : f32 to vector<256x128xf32>
    %82 = arith.mulf %81, %80 : vector<256x128xf32>
    %83 = arith.select %77, %75, %82 : vector<256x128xi1>, vector<256x128xf32>
    %cst_44 = arith.constant 1.05070102 : f32
    %84 = vector.broadcast %cst_44 : f32 to vector<256x128xf32>
    %85 = arith.mulf %84, %83 : vector<256x128xf32>
    %86 = arith.truncf %85 : vector<256x128xf32> to vector<256x128xbf16>
    %c0_45 = arith.constant 0 : index
    %c0_46 = arith.constant 0 : index
    %87 = vector.load %arg8[%c0_45, %c0_46] : memref<128x256xbf16, #tpu.memory_space<vmem>>, vector<128x256xbf16>
    %c6 = arith.constant 6 : index
    %c0_47 = arith.constant 0 : index
    %88 = vector.load %arg10[%c6, %c0_47] : memref<8x256xf32, #tpu.memory_space<vmem>>, vector<1x256xf32>
    %cst_48 = arith.constant dense<0.000000e+00> : vector<256x256xf32>
    %89 = tpu.matmul %86, %87, %cst_48 {dimension_numbers = #tpu.dot_dimension_numbers<[1], [0], [0], [1], [0, 0, 1, 1], [], []>} : vector<256x128xbf16>, vector<128x256xbf16>, vector<256x256xf32> -> vector<256x256xf32>
    %90 = vector.broadcast %88 : vector<1x256xf32> to vector<256x256xf32>
    %91 = arith.addf %89, %90 : vector<256x256xf32>
    %cst_49 = arith.constant 0.000000e+00 : f32
    %92 = vector.broadcast %cst_49 : f32 to vector<256x256xf32>
    %93 = arith.cmpf ogt, %91, %92 : vector<256x256xf32>
    %94 = math.exp %91 : vector<256x256xf32>
    %cst_50 = arith.constant 1.000000e+00 : f32
    %95 = vector.broadcast %cst_50 : f32 to vector<256x256xf32>
    %96 = arith.subf %94, %95 : vector<256x256xf32>
    %cst_51 = arith.constant 1.67326319 : f32
    %97 = vector.broadcast %cst_51 : f32 to vector<256x256xf32>
    %98 = arith.mulf %97, %96 : vector<256x256xf32>
    %99 = arith.select %93, %91, %98 : vector<256x256xi1>, vector<256x256xf32>
    %cst_52 = arith.constant 1.05070102 : f32
    %100 = vector.broadcast %cst_52 : f32 to vector<256x256xf32>
    %101 = arith.mulf %100, %99 : vector<256x256xf32>
    %102 = arith.truncf %101 : vector<256x256xf32> to vector<256x256xbf16>
    %c0_53 = arith.constant 0 : index
    %c0_54 = arith.constant 0 : index
    %103 = vector.load %arg9[%c0_53, %c0_54] : memref<256x256xbf16, #tpu.memory_space<vmem>>, vector<256x256xbf16>
    %c7 = arith.constant 7 : index
    %c0_55 = arith.constant 0 : index
    %104 = vector.load %arg10[%c7, %c0_55] : memref<8x256xf32, #tpu.memory_space<vmem>>, vector<1x256xf32>
    %cst_56 = arith.constant dense<0.000000e+00> : vector<256x256xf32>
    %105 = tpu.matmul %102, %103, %cst_56 {dimension_numbers = #tpu.dot_dimension_numbers<[1], [0], [0], [1], [0, 0, 1, 1], [], []>} : vector<256x256xbf16>, vector<256x256xbf16>, vector<256x256xf32> -> vector<256x256xf32>
    %106 = vector.broadcast %104 : vector<1x256xf32> to vector<256x256xf32>
    %107 = arith.addf %105, %106 : vector<256x256xf32>
    %c0_57 = arith.constant 0 : index
    %c0_58 = arith.constant 0 : index
    %108 = vector.load %arg11[%c0_57, %c0_58] : memref<256x256xf32, #tpu.memory_space<vmem>>, vector<256x256xf32>
    tpu.vector_store %arg11[%c0_57, %c0_58], %107 {strides = array<i32>} : memref<256x256xf32, #tpu.memory_space<vmem>>, vector<256x256xf32>,
    return
  }
  func.func @transform_0(%arg0: i32) -> (i32, i32) {
    %c0_i32 = arith.constant 0 : i32
    %c0_i32_0 = arith.constant 0 : i32
    return %arg0, %c0_i32 : i32, i32
  }
  func.func @transform_1(%arg0: i32) -> (i32, i32) {
    %c0_i32 = arith.constant 0 : i32
    %c0_i32_0 = arith.constant 0 : i32
    %c0_i32_1 = arith.constant 0 : i32
    return %c0_i32, %c0_i32_0 : i32, i32
  }
  func.func @transform_2(%arg0: i32) -> (i32, i32) {
    %c0_i32 = arith.constant 0 : i32
    %c0_i32_0 = arith.constant 0 : i32
    %c0_i32_1 = arith.constant 0 : i32
    return %c0_i32, %c0_i32_0 : i32, i32
  }
  func.func @transform_3(%arg0: i32) -> (i32, i32) {
    %c0_i32 = arith.constant 0 : i32
    %c0_i32_0 = arith.constant 0 : i32
    %c0_i32_1 = arith.constant 0 : i32
    return %c0_i32, %c0_i32_0 : i32, i32
  }
  func.func @transform_4(%arg0: i32) -> (i32, i32) {
    %c0_i32 = arith.constant 0 : i32
    %c0_i32_0 = arith.constant 0 : i32
    %c0_i32_1 = arith.constant 0 : i32
    return %c0_i32, %c0_i32_0 : i32, i32
  }
  func.func @transform_5(%arg0: i32) -> (i32, i32) {
    %c0_i32 = arith.constant 0 : i32
    %c0_i32_0 = arith.constant 0 : i32
    %c0_i32_1 = arith.constant 0 : i32
    return %c0_i32, %c0_i32_0 : i32, i32
  }
  func.func @transform_6(%arg0: i32) -> (i32, i32) {
    %c0_i32 = arith.constant 0 : i32
    %c0_i32_0 = arith.constant 0 : i32
    %c0_i32_1 = arith.constant 0 : i32
    return %c0_i32, %c0_i32_0 : i32, i32
  }
  func.func @transform_7(%arg0: i32) -> (i32, i32) {
    %c0_i32 = arith.constant 0 : i32
    %c0_i32_0 = arith.constant 0 : i32
    %c0_i32_1 = arith.constant 0 : i32
    return %c0_i32, %c0_i32_0 : i32, i32
  }
  func.func @transform_8(%arg0: i32) -> (i32, i32) {
    %c0_i32 = arith.constant 0 : i32
    %c0_i32_0 = arith.constant 0 : i32
    %c0_i32_1 = arith.constant 0 : i32
    return %c0_i32, %c0_i32_0 : i32, i32
  }
  func.func @transform_9(%arg0: i32) -> (i32, i32) {
    %c0_i32 = arith.constant 0 : i32
    %c0_i32_0 = arith.constant 0 : i32
    %c0_i32_1 = arith.constant 0 : i32
    return %c0_i32, %c0_i32_0 : i32, i32
  }
  func.func @transform_10(%arg0: i32) -> (i32, i32) {
    %c0_i32 = arith.constant 0 : i32
    %c0_i32_0 = arith.constant 0 : i32
    return %arg0, %c0_i32 : i32, i32
  }
}

module attributes {stable_mosaic.version = 11 : i64} {
  func.func @_autoencoder_kernel(%arg0: i32, %arg1: memref<256x256xbf16, #tpu.memory_space<vmem>>, %arg2: memref<256x256xbf16, #tpu.memory_space<vmem>>, %arg3: memref<256x128xbf16, #tpu.memory_space<vmem>>, %arg4: memref<128x128xbf16, #tpu.memory_space<vmem>>, %arg5: memref<128x128xbf16, #tpu.memory_space<vmem>>, %arg6: memref<128x128xbf16, #tpu.memory_space<vmem>>, %arg7: memref<128x128xbf16, #tpu.memory_space<vmem>>, %arg8: memref<128x256xbf16, #tpu.memory_space<vmem>>, %arg9: memref<256x256xbf16, #tpu.memory_space<vmem>>, %arg10: memref<8x256xf32, #tpu.memory_space<vmem>>, %arg11: memref<256x256xf32, #tpu.memory_space<vmem>>) attributes {dimension_semantics = [#tpu.dimension_semantics<parallel>], iteration_bounds = array<i64: 2>, scalar_prefetch = 0 : i64, scratch_operands = 0 : i64, tpu.core_type = #tpu.core_type<tc>, window_params = [{transform_indices = @transform_0, window_bounds = array<i64: 256, 256>}, {pipeline_mode = #tpu.pipeline_mode<synchronous>, transform_indices = @transform_1, window_bounds = array<i64: 256, 256>}, {pipeline_mode = #tpu.pipeline_mode<synchronous>, transform_indices = @transform_2, window_bounds = array<i64: 256, 128>}, {pipeline_mode = #tpu.pipeline_mode<synchronous>, transform_indices = @transform_3, window_bounds = array<i64: 128, 128>}, {pipeline_mode = #tpu.pipeline_mode<synchronous>, transform_indices = @transform_4, window_bounds = array<i64: 128, 128>}, {pipeline_mode = #tpu.pipeline_mode<synchronous>, transform_indices = @transform_5, window_bounds = array<i64: 128, 128>}, {pipeline_mode = #tpu.pipeline_mode<synchronous>, transform_indices = @transform_6, window_bounds = array<i64: 128, 128>}, {pipeline_mode = #tpu.pipeline_mode<synchronous>, transform_indices = @transform_7, window_bounds = array<i64: 128, 256>}, {pipeline_mode = #tpu.pipeline_mode<synchronous>, transform_indices = @transform_8, window_bounds = array<i64: 256, 256>}, {pipeline_mode = #tpu.pipeline_mode<synchronous>, transform_indices = @transform_9, window_bounds = array<i64: 8, 256>}, {transform_indices = @transform_10, window_bounds = array<i64: 256, 256>}]} {
    %c0 = arith.constant 0 : index
    %c0_0 = arith.constant 0 : index
    %0 = vector.load %arg1[%c0, %c0_0] : memref<256x256xbf16, #tpu.memory_space<vmem>>, vector<256x256xbf16>
    %c0_1 = arith.constant 0 : index
    %c0_2 = arith.constant 0 : index
    %1 = vector.load %arg2[%c0_1, %c0_2] : memref<256x256xbf16, #tpu.memory_space<vmem>>, vector<256x256xbf16>
    %c0_3 = arith.constant 0 : index
    %c0_4 = arith.constant 0 : index
    %2 = vector.load %arg10[%c0_3, %c0_4] : memref<8x256xf32, #tpu.memory_space<vmem>>, vector<1x256xf32>
    %cst = arith.constant dense<0.000000e+00> : vector<256x256xf32>
    %3 = tpu.matmul %0, %1, %cst {dimension_numbers = #tpu.dot_dimension_numbers<[1], [0], [0], [1], [0, 0, 1, 1], [], []>} : vector<256x256xbf16>, vector<256x256xbf16>, vector<256x256xf32> -> vector<256x256xf32>
    %4 = vector.broadcast %2 : vector<1x256xf32> to vector<256x256xf32>
    %5 = arith.addf %3, %4 : vector<256x256xf32>
    %cst_5 = arith.constant 0.000000e+00 : f32
    %6 = vector.broadcast %cst_5 : f32 to vector<256x256xf32>
    %7 = arith.cmpf ogt, %5, %6 : vector<256x256xf32>
    %8 = math.exp %5 : vector<256x256xf32>
    %cst_6 = arith.constant 1.000000e+00 : f32
    %9 = vector.broadcast %cst_6 : f32 to vector<256x256xf32>
    %10 = arith.subf %8, %9 : vector<256x256xf32>
    %cst_7 = arith.constant 1.67326319 : f32
    %11 = vector.broadcast %cst_7 : f32 to vector<256x256xf32>
    %12 = arith.mulf %11, %10 : vector<256x256xf32>
    %13 = arith.select %7, %5, %12 : vector<256x256xi1>, vector<256x256xf32>
    %cst_8 = arith.constant 1.05070102 : f32
    %14 = vector.broadcast %cst_8 : f32 to vector<256x256xf32>
    %15 = arith.mulf %14, %13 : vector<256x256xf32>
    %16 = arith.truncf %15 : vector<256x256xf32> to vector<256x256xbf16>
    %c0_9 = arith.constant 0 : index
    %c0_10 = arith.constant 0 : index
    %17 = vector.load %arg3[%c0_9, %c0_10] : memref<256x128xbf16, #tpu.memory_space<vmem>>, vector<256x128xbf16>
    %c1 = arith.constant 1 : index
    %c0_11 = arith.constant 0 : index
    %18 = vector.load %arg10[%c1, %c0_11] : memref<8x256xf32, #tpu.memory_space<vmem>>, vector<1x128xf32>
    %cst_12 = arith.constant dense<0.000000e+00> : vector<256x128xf32>
    %19 = tpu.matmul %16, %17, %cst_12 {dimension_numbers = #tpu.dot_dimension_numbers<[1], [0], [0], [1], [0, 0, 1, 1], [], []>} : vector<256x256xbf16>, vector<256x128xbf16>, vector<256x128xf32> -> vector<256x128xf32>
    %20 = vector.broadcast %18 : vector<1x128xf32> to vector<256x128xf32>
    %21 = arith.addf %19, %20 : vector<256x128xf32>
    %cst_13 = arith.constant 0.000000e+00 : f32
    %22 = vector.broadcast %cst_13 : f32 to vector<256x128xf32>
    %23 = arith.cmpf ogt, %21, %22 : vector<256x128xf32>
    %24 = math.exp %21 : vector<256x128xf32>
    %cst_14 = arith.constant 1.000000e+00 : f32
    %25 = vector.broadcast %cst_14 : f32 to vector<256x128xf32>
    %26 = arith.subf %24, %25 : vector<256x128xf32>
    %cst_15 = arith.constant 1.67326319 : f32
    %27 = vector.broadcast %cst_15 : f32 to vector<256x128xf32>
    %28 = arith.mulf %27, %26 : vector<256x128xf32>
    %29 = arith.select %23, %21, %28 : vector<256x128xi1>, vector<256x128xf32>
    %cst_16 = arith.constant 1.05070102 : f32
    %30 = vector.broadcast %cst_16 : f32 to vector<256x128xf32>
    %31 = arith.mulf %30, %29 : vector<256x128xf32>
    %32 = arith.truncf %31 : vector<256x128xf32> to vector<256x128xbf16>
    %c0_17 = arith.constant 0 : index
    %c0_18 = arith.constant 0 : index
    %33 = vector.load %arg4[%c0_17, %c0_18] : memref<128x128xbf16, #tpu.memory_space<vmem>>, vector<128x128xbf16>
    %c2 = arith.constant 2 : index
    %c0_19 = arith.constant 0 : index
    %34 = vector.load %arg10[%c2, %c0_19] : memref<8x256xf32, #tpu.memory_space<vmem>>, vector<1x128xf32>
    %cst_20 = arith.constant dense<0.000000e+00> : vector<256x128xf32>
    %35 = tpu.matmul %32, %33, %cst_20 {dimension_numbers = #tpu.dot_dimension_numbers<[1], [0], [0], [1], [0, 0, 1, 1], [], []>} : vector<256x128xbf16>, vector<128x128xbf16>, vector<256x128xf32> -> vector<256x128xf32>
    %36 = vector.broadcast %34 : vector<1x128xf32> to vector<256x128xf32>
    %37 = arith.addf %35, %36 : vector<256x128xf32>
    %cst_21 = arith.constant 0.000000e+00 : f32
    %38 = vector.broadcast %cst_21 : f32 to vector<256x128xf32>
    %39 = arith.cmpf ogt, %37, %38 : vector<256x128xf32>
    %40 = math.exp %37 : vector<256x128xf32>
    %cst_22 = arith.constant 1.000000e+00 : f32
    %41 = vector.broadcast %cst_22 : f32 to vector<256x128xf32>
    %42 = arith.subf %40, %41 : vector<256x128xf32>
    %cst_23 = arith.constant 1.67326319 : f32
    %43 = vector.broadcast %cst_23 : f32 to vector<256x128xf32>
    %44 = arith.mulf %43, %42 : vector<256x128xf32>
    %45 = arith.select %39, %37, %44 : vector<256x128xi1>, vector<256x128xf32>
    %cst_24 = arith.constant 1.05070102 : f32
    %46 = vector.broadcast %cst_24 : f32 to vector<256x128xf32>
    %47 = arith.mulf %46, %45 : vector<256x128xf32>
    %48 = arith.truncf %47 : vector<256x128xf32> to vector<256x128xbf16>
    %c0_25 = arith.constant 0 : index
    %c0_26 = arith.constant 0 : index
    %49 = vector.load %arg5[%c0_25, %c0_26] : memref<128x128xbf16, #tpu.memory_space<vmem>>, vector<128x128xbf16>
    %c3 = arith.constant 3 : index
    %c0_27 = arith.constant 0 : index
    %50 = vector.load %arg10[%c3, %c0_27] : memref<8x256xf32, #tpu.memory_space<vmem>>, vector<1x128xf32>
    %cst_28 = arith.constant dense<0.000000e+00> : vector<256x128xf32>
    %51 = tpu.matmul %48, %49, %cst_28 {dimension_numbers = #tpu.dot_dimension_numbers<[1], [0], [0], [1], [0, 0, 1, 1], [], []>} : vector<256x128xbf16>, vector<128x128xbf16>, vector<256x128xf32> -> vector<256x128xf32>
    %52 = vector.broadcast %50 : vector<1x128xf32> to vector<256x128xf32>
    %53 = arith.addf %51, %52 : vector<256x128xf32>
    %54 = arith.truncf %53 : vector<256x128xf32> to vector<256x128xbf16>
    %c0_29 = arith.constant 0 : index
    %c0_30 = arith.constant 0 : index
    %55 = vector.load %arg6[%c0_29, %c0_30] : memref<128x128xbf16, #tpu.memory_space<vmem>>, vector<128x128xbf16>
    %c4 = arith.constant 4 : index
    %c0_31 = arith.constant 0 : index
    %56 = vector.load %arg10[%c4, %c0_31] : memref<8x256xf32, #tpu.memory_space<vmem>>, vector<1x128xf32>
    %cst_32 = arith.constant dense<0.000000e+00> : vector<256x128xf32>
    %57 = tpu.matmul %54, %55, %cst_32 {dimension_numbers = #tpu.dot_dimension_numbers<[1], [0], [0], [1], [0, 0, 1, 1], [], []>} : vector<256x128xbf16>, vector<128x128xbf16>, vector<256x128xf32> -> vector<256x128xf32>
    %58 = vector.broadcast %56 : vector<1x128xf32> to vector<256x128xf32>
    %59 = arith.addf %57, %58 : vector<256x128xf32>
    %cst_33 = arith.constant 0.000000e+00 : f32
    %60 = vector.broadcast %cst_33 : f32 to vector<256x128xf32>
    %61 = arith.cmpf ogt, %59, %60 : vector<256x128xf32>
    %62 = math.exp %59 : vector<256x128xf32>
    %cst_34 = arith.constant 1.000000e+00 : f32
    %63 = vector.broadcast %cst_34 : f32 to vector<256x128xf32>
    %64 = arith.subf %62, %63 : vector<256x128xf32>
    %cst_35 = arith.constant 1.67326319 : f32
    %65 = vector.broadcast %cst_35 : f32 to vector<256x128xf32>
    %66 = arith.mulf %65, %64 : vector<256x128xf32>
    %67 = arith.select %61, %59, %66 : vector<256x128xi1>, vector<256x128xf32>
    %cst_36 = arith.constant 1.05070102 : f32
    %68 = vector.broadcast %cst_36 : f32 to vector<256x128xf32>
    %69 = arith.mulf %68, %67 : vector<256x128xf32>
    %70 = arith.truncf %69 : vector<256x128xf32> to vector<256x128xbf16>
    %c0_37 = arith.constant 0 : index
    %c0_38 = arith.constant 0 : index
    %71 = vector.load %arg7[%c0_37, %c0_38] : memref<128x128xbf16, #tpu.memory_space<vmem>>, vector<128x128xbf16>
    %c5 = arith.constant 5 : index
    %c0_39 = arith.constant 0 : index
    %72 = vector.load %arg10[%c5, %c0_39] : memref<8x256xf32, #tpu.memory_space<vmem>>, vector<1x128xf32>
    %cst_40 = arith.constant dense<0.000000e+00> : vector<256x128xf32>
    %73 = tpu.matmul %70, %71, %cst_40 {dimension_numbers = #tpu.dot_dimension_numbers<[1], [0], [0], [1], [0, 0, 1, 1], [], []>} : vector<256x128xbf16>, vector<128x128xbf16>, vector<256x128xf32> -> vector<256x128xf32>
    %74 = vector.broadcast %72 : vector<1x128xf32> to vector<256x128xf32>
    %75 = arith.addf %73, %74 : vector<256x128xf32>
    %cst_41 = arith.constant 0.000000e+00 : f32
    %76 = vector.broadcast %cst_41 : f32 to vector<256x128xf32>
    %77 = arith.cmpf ogt, %75, %76 : vector<256x128xf32>
    %78 = math.exp %75 : vector<256x128xf32>
    %cst_42 = arith.constant 1.000000e+00 : f32
    %79 = vector.broadcast %cst_42 : f32 to vector<256x128xf32>
    %80 = arith.subf %78, %79 : vector<256x128xf32>
    %cst_43 = arith.constant 1.67326319 : f32
    %81 = vector.broadcast %cst_43 : f32 to vector<256x128xf32>
    %82 = arith.mulf %81, %80 : vector<256x128xf32>
    %83 = arith.select %77, %75, %82 : vector<256x128xi1>, vector<256x128xf32>
    %cst_44 = arith.constant 1.05070102 : f32
    %84 = vector.broadcast %cst_44 : f32 to vector<256x128xf32>
    %85 = arith.mulf %84, %83 : vector<256x128xf32>
    %86 = arith.truncf %85 : vector<256x128xf32> to vector<256x128xbf16>
    %c0_45 = arith.constant 0 : index
    %c0_46 = arith.constant 0 : index
    %87 = vector.load %arg8[%c0_45, %c0_46] : memref<128x256xbf16, #tpu.memory_space<vmem>>, vector<128x256xbf16>
    %c6 = arith.constant 6 : index
    %c0_47 = arith.constant 0 : index
    %88 = vector.load %arg10[%c6, %c0_47] : memref<8x256xf32, #tpu.memory_space<vmem>>, vector<1x256xf32>
    %cst_48 = arith.constant dense<0.000000e+00> : vector<256x256xf32>
    %89 = tpu.matmul %86, %87, %cst_48 {dimension_numbers = #tpu.dot_dimension_numbers<[1], [0], [0], [1], [0, 0, 1, 1], [], []>} : vector<256x128xbf16>, vector<128x256xbf16>, vector<256x256xf32> -> vector<256x256xf32>
    %90 = vector.broadcast %88 : vector<1x256xf32> to vector<256x256xf32>
    %91 = arith.addf %89, %90 : vector<256x256xf32>
    %cst_49 = arith.constant 0.000000e+00 : f32
    %92 = vector.broadcast %cst_49 : f32 to vector<256x256xf32>
    %93 = arith.cmpf ogt, %91, %92 : vector<256x256xf32>
    %94 = math.exp %91 : vector<256x256xf32>
    %cst_50 = arith.constant 1.000000e+00 : f32
    %95 = vector.broadcast %cst_50 : f32 to vector<256x256xf32>
    %96 = arith.subf %94, %95 : vector<256x256xf32>
    %cst_51 = arith.constant 1.67326319 : f32
    %97 = vector.broadcast %cst_51 : f32 to vector<256x256xf32>
    %98 = arith.mulf %97, %96 : vector<256x256xf32>
    %99 = arith.select %93, %91, %98 : vector<256x256xi1>, vector<256x256xf32>
    %cst_52 = arith.constant 1.05070102 : f32
    %100 = vector.broadcast %cst_52 : f32 to vector<256x256xf32>
    %101 = arith.mulf %100, %99 : vector<256x256xf32>
    %102 = arith.truncf %101 : vector<256x256xf32> to vector<256x256xbf16>
    %c0_53 = arith.constant 0 : index
    %c0_54 = arith.constant 0 : index
    %103 = vector.load %arg9[%c0_53, %c0_54] : memref<256x256xbf16, #tpu.memory_space<vmem>>, vector<256x256xbf16>
    %c7 = arith.constant 7 : index
    %c0_55 = arith.constant 0 : index
    %104 = vector.load %arg10[%c7, %c0_55] : memref<8x256xf32, #tpu.memory_space<vmem>>, vector<1x256xf32>
    %cst_56 = arith.constant dense<0.000000e+00> : vector<256x256xf32>
    %105 = tpu.matmul %102, %103, %cst_56 {dimension_numbers = #tpu.dot_dimension_numbers<[1], [0], [0], [1], [0, 0, 1, 1], [], []>} : vector<256x256xbf16>, vector<256x256xbf16>, vector<256x256xf32> -> vector<256x256xf32>
    %106 = vector.broadcast %104 : vector<1x256xf32> to vector<256x256xf32>
    %107 = arith.addf %105, %106 : vector<256x256xf32>
    %c0_57 = arith.constant 0 : index
    %c0_58 = arith.constant 0 : index
    %108 = vector.load %arg11[%c0_57, %c0_58] : memref<256x256xf32, #tpu.memory_space<vmem>>, vector<256x256xf32>
    tpu.vector_store %arg11[%c0_57, %c0_58], %107 {strides = array<i32>} : memref<256x256xf32, #tpu.memory_space<vmem>>, vector<256x256xf32>,
    return
  }
  func.func @transform_0(%arg0: i32) -> (i32, i32) {
    %c0_i32 = arith.constant 0 : i32
    %c0_i32_0 = arith.constant 0 : i32
    return %arg0, %c0_i32 : i32, i32
  }
  func.func @transform_1(%arg0: i32) -> (i32, i32) {
    %c0_i32 = arith.constant 0 : i32
    %c0_i32_0 = arith.constant 0 : i32
    %c0_i32_1 = arith.constant 0 : i32
    return %c0_i32, %c0_i32_0 : i32, i32
  }
  func.func @transform_2(%arg0: i32) -> (i32, i32) {
    %c0_i32 = arith.constant 0 : i32
    %c0_i32_0 = arith.constant 0 : i32
    %c0_i32_1 = arith.constant 0 : i32
    return %c0_i32, %c0_i32_0 : i32, i32
  }
  func.func @transform_3(%arg0: i32) -> (i32, i32) {
    %c0_i32 = arith.constant 0 : i32
    %c0_i32_0 = arith.constant 0 : i32
    %c0_i32_1 = arith.constant 0 : i32
    return %c0_i32, %c0_i32_0 : i32, i32
  }
  func.func @transform_4(%arg0: i32) -> (i32, i32) {
    %c0_i32 = arith.constant 0 : i32
    %c0_i32_0 = arith.constant 0 : i32
    %c0_i32_1 = arith.constant 0 : i32
    return %c0_i32, %c0_i32_0 : i32, i32
  }
  func.func @transform_5(%arg0: i32) -> (i32, i32) {
    %c0_i32 = arith.constant 0 : i32
    %c0_i32_0 = arith.constant 0 : i32
    %c0_i32_1 = arith.constant 0 : i32
    return %c0_i32, %c0_i32_0 : i32, i32
  }
  func.func @transform_6(%arg0: i32) -> (i32, i32) {
    %c0_i32 = arith.constant 0 : i32
    %c0_i32_0 = arith.constant 0 : i32
    %c0_i32_1 = arith.constant 0 : i32
    return %c0_i32, %c0_i32_0 : i32, i32
  }
  func.func @transform_7(%arg0: i32) -> (i32, i32) {
    %c0_i32 = arith.constant 0 : i32
    %c0_i32_0 = arith.constant 0 : i32
    %c0_i32_1 = arith.constant 0 : i32
    return %c0_i32, %c0_i32_0 : i32, i32
  }
  func.func @transform_8(%arg0: i32) -> (i32, i32) {
    %c0_i32 = arith.constant 0 : i32
    %c0_i32_0 = arith.constant 0 : i32
    %c0_i32_1 = arith.constant 0 : i32
    return %c0_i32, %c0_i32_0 : i32, i32
  }
  func.func @transform_9(%arg0: i32) -> (i32, i32) {
    %c0_i32 = arith.constant 0 : i32
    %c0_i32_0 = arith.constant 0 : i32
    %c0_i32_1 = arith.constant 0 : i32
    return %c0_i32, %c0_i32_0 : i32, i32
  }
  func.func @transform_10(%arg0: i32) -> (i32, i32) {
    %c0_i32 = arith.constant 0 : i32
    %c0_i32_0 = arith.constant 0 : i32
    return %arg0, %c0_i32 : i32, i32
  }
}

</mosaic_0001>

<bundles_post_ra>
// kernel: tpu_custom_call.1
= control target key start
LH: loop header
LB: loop body
LE: loop exit
PB: predicated region body
PF: predicated region fallthrough
CT: control target
= control target key end

     0   :  { %s9340_s0 = inlined_call_operand.hbm [shape: bf16[512,256], index: 0, kind: input, shape index: {}]   ;;  %s9341_s1 = inlined_call_operand.hbm [shape: bf16[256,256], index: 1, kind: input, shape index: {}]   ;;  %s9342_s2 = inlined_call_operand.hbm [shape: bf16[256,128], index: 2, kind: input, shape index: {}]   ;;  %s9343_s3 = inlined_call_operand.hbm [shape: bf16[128,128], index: 3, kind: input, shape index: {}]   ;;  %s9344_s4 = inlined_call_operand.hbm [shape: bf16[128,128], index: 4, kind: input, shape index: {}]   ;;  %s9345_s5 = inlined_call_operand.hbm [shape: bf16[128,128], index: 5, kind: input, shape index: {}]   ;;  %s9346_s6 = inlined_call_operand.hbm [shape: bf16[128,128], index: 6, kind: input, shape index: {}]   ;;  %s9347_s7 = inlined_call_operand.hbm [shape: bf16[128,256], index: 7, kind: input, shape index: {}]   ;;  %s9348_s8 = inlined_call_operand.hbm [shape: bf16[256,256], index: 8, kind: input, shape index: {}]   ;;  %s9349_s9 = inlined_call_operand.vmem [shape: f32[8,256], index: 9, kind: input, shape index: {}]   ;;  %s9350_s10 = inlined_call_operand.hbm [shape: f32[512,256], index: 10, kind: output, shape index: {}]  }
   0x1   :  { %9359 = sst [smem:[#allocation24_spill]] %s9341_s1 }
   0x2   :  { %9360 = sst [smem:[#allocation25_spill]] %s9342_s2 }
   0x3   :  { %9361 = sst [smem:[#allocation26_spill]] %s9343_s3 }
   0x4   :  { %9362 = sst [smem:[#allocation27_spill]] %s9344_s4 }
   0x5   :  { %9363 = sst [smem:[#allocation28_spill]] %s9345_s5 }
   0x6   :  { %9364 = sst [smem:[#allocation29_spill]] %s9346_s6 }
   0x7   :  { %15 = vsyncpa [#allocation3], 0 }
   0x8   :  { %17 = vsyncpa [#allocation3 + $0x1], 0 }
   0x9   :  { %18 = vsyncpa [#allocation6], 0 }
   0xa   :  { %19 = vsyncpa [#allocation9], 0 }
   0xb   :  { %20 = vsyncpa [#allocation12], 0 }
   0xc   :  { %21 = vsyncpa [#allocation15], 0 }
   0xd   :  { %22 = vsyncpa [#allocation4], 0 }
   0xe   :  { %24 = vsyncpa [#allocation4 + $0x1], 0  ;;  %s7283_s13 = smov 0   ;;  %s7285_s14 = smov 0  }
   0xf   :  { %s7287_s15 = smov 0   ;;  %s7289_s16 = smov 0  }
  0x10 LB: > { %s7211_s17 = smov [#allocation5]   ;;  %s7304_s19 = sadd.s32 4294967295, %s7209_s16   ;;  %s7209_s16 = sphi %s7289_s16, %s9397_s16   ;;  %s7205_s15 = sphi %s7287_s15, %s9396_s15   ;;  %s7201_s14 = sphi %s7285_s14, %s9395_s14   ;;  %s7197_s13 = sphi %s7283_s13, %s9394_s13  }
  0x11   : > { %s288_s18 = sshll.u32 %s7211_s17, 4  ;;  %p5146_p0 = scmp.ge.s32.totalorder %s7209_s16, 1  ;;  %s289_s18 = int_to_ptr.vmem [resolvable:$true] %s288_s18 }
  0x12   : > { %p9355_p1 = scmp.eq.s32.totalorder %s7304_s19, 0  ;;  %p276_p2 = scmp.lt.s32.totalorder %s7209_s16, 3 }
  0x13   : > { %s7212_s22 = smov [#allocation8]   ;;  %s7213_s24 = smov [#allocation11]  }
  0x14   : > { %p7309_p3 = pnand %p5146_p0, %p276_p2  ;;  %s314_s23 = sshll.u32 %s7212_s22, 4  ;;  %s7322_s23 = int_to_ptr.vmem [resolvable:$true] %s314_s23 }
  0x15   : > { %s7324_s25 = sshll.u32 %s7213_s24, 4  ;;  %s6904_s27 = scalar_lea.vmem %s289_s18, 4096  ;;  %s341_s25 = int_to_ptr.vmem [resolvable:$true] %s7324_s25 }
  0x16   : > { %s9365_s20 = scalar_select %p7309_p3, 1, 0 }
  0x17   : > { %p6067_p5 = pneg %p7309_p3  ;;  %p6905_p8 = scmp.ne.s32.totalorder %s289_s18, %s6904_s27 }
  0x18   : > { %p6912_p11 = scmp.lt.s32.totalorder %s289_s18, %s289_s18  ;;  %p6913_p12 = scmp.lt.s32.totalorder %s6904_s27, %s6904_s27 }
  0x19   : > { %p7318_p6 = pnand %p6067_p5, %p9355_p1 }
  0x1a   : > { %p6914_p13 = por %p6913_p12, %p6912_p11 }
  0x1b   : > { %p7328_p7 = pneg %p7318_p6 }
  0x1d   : > { %p6907_p9 = pnand %p6905_p8, %p7328_p7 }
  0x1f   : > { %p6908_p10 = pneg %p6907_p9 }
  0x21   : > { %p6915_p0 = pnand %p6914_p13, %p6908_p10 }
  0x23   : > { %6918 = shalt.err (!%p6915_p0)
}
  0x24   : > { %s9351_s28 = smov 128   ;;  %s9353_s29 = smov 8  }
  0x25   : > { %s9368_s1 = sld [smem:[#allocation24_spill]]  ;;  %s6930_s12 = scalar_lea.vmem %s7322_s23, 1024 }
  0x26   : > { %p6931_p2 = scmp.ne.s32.totalorder %s7322_s23, %s6930_s12  ;;  %p6938_p9 = scmp.lt.s32.totalorder %s7322_s23, %s7322_s23 }
  0x27   : > { %p6939_p10 = scmp.lt.s32.totalorder %s6930_s12, %s6930_s12 }
  0x28   : > { %p6933_p5 = pnand %p6931_p2, %p7328_p7 }
  0x29   : > { %p6940_p11 = por %p6939_p10, %p6938_p9 }
  0x2a   : > { %p6934_p8 = pneg %p6933_p5 }
  0x2b   : > { %6070 = dma.hbm_to_vmem [thread:$0]  (!%p7318_p6), %s9368_s1, 4096, %s289_s18, [#allocation6], %s9351_s28, %s9351_s28, %s9353_s29  }
  0x2c   : > { %p6941_p12 = pnand %p6940_p11, %p6934_p8 }
  0x2e   : > { %6944 = shalt.err (!%p6941_p12)
}
  0x2f   : > { %s7216_s17 = smov 64   ;;  %s7217_s22 = smov 4  }
  0x30   : > { %s9369_s3 = sld [smem:[#allocation26_spill]]  ;;  %s6956_s27 = scalar_lea.vmem %s341_s25, 1024 }
  0x31   : > { %p6957_p13 = scmp.ne.s32.totalorder %s341_s25, %s6956_s27  ;;  %p6964_p5 = scmp.lt.s32.totalorder %s341_s25, %s341_s25 }
  0x32   : > { %p6965_p8 = scmp.lt.s32.totalorder %s6956_s27, %s6956_s27 }
  0x33   : > { %p6959_p0 = pnand %p6957_p13, %p7328_p7 }
  0x34   : > { %p6966_p9 = por %p6965_p8, %p6964_p5 }
  0x35   : > { %p6960_p2 = pneg %p6959_p0 }
  0x36   : > { %6076 = dma.hbm_to_vmem [thread:$0]  (!%p7318_p6), %s9369_s3, 1024, %s7322_s23, [#allocation9], %s7216_s17, %s7216_s17, %s7217_s22  }
  0x37   : > { %p6967_p10 = pnand %p6966_p9, %p6960_p2 }
  0x39   : > { %6970 = shalt.err (!%p6967_p10)
}
  0x3a   : > { %s9370_s5 = sld [smem:[#allocation28_spill]]  ;;  %s7218_s23 = smov [#allocation14]  }
  0x3b   : > { %s366_s12 = sshll.u32 %s7218_s23, 4  ;;  %s7219_s18 = smov [#allocation7]   ;;  %s367_s12 = int_to_ptr.vmem [resolvable:$true] %s366_s12 }
  0x3c   : > { %s301_s24 = sshll.u32 %s7219_s18, 4  ;;  %s6982_s28 = scalar_lea.vmem %s367_s12, 2048  ;;  %s302_s24 = int_to_ptr.vmem [resolvable:$true] %s301_s24 }
  0x3d   : > { %p6983_p11 = scmp.ne.s32.totalorder %s367_s12, %s6982_s28  ;;  %p6990_p0 = scmp.lt.s32.totalorder %s367_s12, %s367_s12 }
  0x3e   : > { %p6991_p2 = scmp.lt.s32.totalorder %s6982_s28, %s6982_s28 }
  0x3f   : > { %p6985_p12 = pnand %p6983_p11, %p7328_p7 }
  0x40   : > { %6082 = dma.hbm_to_vmem [thread:$0]  (!%p7318_p6), %s9370_s5, 1024, %s341_s25, [#allocation12], %s7216_s17, %s7216_s17, %s7217_s22  }
  0x41   : > { %p6986_p13 = pneg %p6985_p12  ;;  %p6992_p5 = por %p6991_p2, %p6990_p0 }
  0x43   : > { %p6993_p8 = pnand %p6992_p5, %p6986_p13 }
  0x45   : > { %6996 = shalt.err (!%p6993_p8)
}
  0x46   : > { %s9371_s27 = smov 128   ;;  %s7008_s11 = scalar_lea.vmem %s302_s24, 2048 }
  0x47   : > { %6088 = dma.hbm_to_vmem [thread:$0]  (!%p7318_p6), %s9347_s7, 2048, %s367_s12, [#allocation15], %s9371_s27, %s9371_s27, %s9353_s29  }
  0x48   : > { %p7009_p9 = scmp.ne.s32.totalorder %s302_s24, %s7008_s11  ;;  %p7016_p12 = scmp.lt.s32.totalorder %s302_s24, %s302_s24 }
  0x49   : > { %p7017_p0 = scmp.lt.s32.totalorder %s7008_s11, %s7008_s11 }
  0x4a   : > { %p7011_p10 = pnand %p7009_p9, %p7328_p7 }
  0x4b   : > { %p7018_p13 = por %p7017_p0, %p7016_p12 }
  0x4c   : > { %p7012_p11 = pneg %p7011_p10 }
  0x4e   : > { %p7019_p2 = pnand %p7018_p13, %p7012_p11 }
  0x50   : > { %7022 = shalt.err (!%p7019_p2)
}
  0x51   : > { %s9372_s2 = sld [smem:[#allocation25_spill]]  ;;  %s7220_s12 = smov [#allocation10]  }
  0x52   : > { %s327_s18 = sshll.u32 %s7220_s12, 4  ;;  %s7221_s25 = smov [#allocation13]   ;;  %s328_s18 = int_to_ptr.vmem [resolvable:$true] %s327_s18 }
  0x53   : > { %s353_s30 = sshll.u32 %s7221_s25, 4  ;;  %s7034_s29 = scalar_lea.vmem %s328_s18, 1024  ;;  %s354_s30 = int_to_ptr.vmem [resolvable:$true] %s353_s30 }
  0x54   : > { %p7035_p5 = scmp.ne.s32.totalorder %s328_s18, %s7034_s29  ;;  %p7042_p10 = scmp.lt.s32.totalorder %s328_s18, %s328_s18 }
  0x55   : > { %p7043_p11 = scmp.lt.s32.totalorder %s7034_s29, %s7034_s29 }
  0x56   : > { %p7037_p8 = pnand %p7035_p5, %p7328_p7 }
  0x57   : > { %6073 = dma.hbm_to_vmem [thread:$0]  (!%p7318_p6), %s9372_s2, 2048, %s302_s24, [#allocation6], %s7216_s17, %s7216_s17, %s7217_s22  }
  0x58   : > { %p7038_p9 = pneg %p7037_p8  ;;  %p7044_p12 = por %p7043_p11, %p7042_p10 }
  0x5a   : > { %p7045_p0 = pnand %p7044_p12, %p7038_p9 }
  0x5c   : > { %7048 = shalt.err (!%p7045_p0)
}
  0x5d   : > { %s9373_s4 = sld [smem:[#allocation27_spill]]  ;;  %s7060_s28 = scalar_lea.vmem %s354_s30, 1024 }
  0x5e   : > { %p7061_p13 = scmp.ne.s32.totalorder %s354_s30, %s7060_s28  ;;  %p7068_p8 = scmp.lt.s32.totalorder %s354_s30, %s354_s30 }
  0x5f   : > { %p7069_p10 = scmp.lt.s32.totalorder %s7060_s28, %s7060_s28 }
  0x60   : > { %p7063_p2 = pnand %p7061_p13, %p7328_p7 }
  0x61   : > { %p7070_p9 = por %p7069_p10, %p7068_p8 }
  0x62   : > { %p7064_p5 = pneg %p7063_p2 }
  0x63   : > { %6079 = dma.hbm_to_vmem [thread:$0]  (!%p7318_p6), %s9373_s4, 1024, %s328_s18, [#allocation9], %s7216_s17, %s7216_s17, %s7217_s22  }
  0x64   : > { %p7071_p11 = pnand %p7070_p9, %p7064_p5 }
  0x66   : > { %7074 = shalt.err (!%p7071_p11)
}
  0x67   : > { %s9374_s6 = sld [smem:[#allocation29_spill]]  ;;  %s7222_s12 = smov [#allocation16]  }
  0x68   : > { %s379_s18 = sshll.u32 %s7222_s12, 4  ;;  %s380_s18 = int_to_ptr.vmem [resolvable:$true] %s379_s18 }
  0x69   : > { %s7086_s25 = scalar_lea.vmem %s380_s18, 4096  ;;  %p7094_p2 = scmp.lt.s32.totalorder %s380_s18, %s380_s18 }
  0x6a   : > { %p7087_p12 = scmp.ne.s32.totalorder %s380_s18, %s7086_s25  ;;  %p7095_p5 = scmp.lt.s32.totalorder %s7086_s25, %s7086_s25 }
  0x6c   : > { %p7089_p0 = pnand %p7087_p12, %p7328_p7  ;;  %p7096_p8 = por %p7095_p5, %p7094_p2 }
  0x6d   : > { %6085 = dma.hbm_to_vmem [thread:$0]  (!%p7318_p6), %s9374_s6, 1024, %s354_s30, [#allocation12], %s7216_s17, %s7216_s17, %s7217_s22  }
  0x6e   : > { %p7090_p13 = pneg %p7089_p0 }
  0x70   : > { %p7097_p10 = pnand %p7096_p8, %p7090_p13 }
  0x72   : > { %7100 = shalt.err (!%p7097_p10)
}
  0x73   : > { %s9375_s24 = smov 8   ;;  %s5145_s21 = sadd.s32 4294967294, %s7209_s16  }
  0x74   : > { %6091 = dma.hbm_to_vmem [thread:$0]  (!%p7318_p6), %s9348_s8, 4096, %s380_s18, [#allocation15], %s9371_s27, %s9371_s27, %s9375_s24  }
  0x75   : > { %s7420_s26 = sadd.s32 1, %s7209_s16   ;;  %s37_s30 = sadd.s32 1, %s7205_s15 }
  0x76   : > { %s34_s22 = ssub.s32 %s7209_s16, %s7420_s26  ;;  %p44_p9 = scmp.ne.s32.totalorder %s7205_s15, %s7201_s14 }
  0x77   : > { %p35_p7 = scmp.eq.s32.totalorder %s34_s22, 0  ;;  %p45_p11 = scmp.eq.s32.totalorder %s7209_s16, 0 }
  0x78   : > { %p50_p12 = scmp.ne.s32.totalorder %s7201_s14, %s7197_s13  ;;  %p263_p13 = scmp.eq.s32.totalorder %s7304_s19, 1 }
  0x79   : > { %s7431_s28 = scalar_select %p35_p7, %s7205_s15, %s37_s30  }
  0x7a   : > { %p7433_p0 = por %p45_p11, %p44_p9  ;;  %p7439_p6 = por %p9355_p1, %p50_p12 }
  0x7b   : > { %p269_p2 = scmp.eq.s32.totalorder %s5145_s21, 1  ;;  %p6108_p5 = scmp.lt.s32.totalorder %s7209_s16, 2 }
  0x7c   : > { %s9377_s23 = scalar_select %p7439_p6, 1, 0 }
  0x7d   : > { %s396_s12 = sand.u32 1, %s7205_s15   ;;  %p7446_p8 = por %p263_p13, %p44_p9 }
  0x7e   : > { %p7450_p10 = por %p269_p2, %p50_p12  ;;  %s5156_s11 = sshll.u32 %s396_s12, 8 }
  0x7f   : > { %s9378_s18 = scalar_select %p7446_p8, 1, 0 }
  0x80   : > { %s9379_s25 = scalar_select %p7450_p10, 1, 0 }
  0x81   : > { %s5596_s17 = sshll.u32 %s7209_s16, 12  ;;  %s400_s21 = scalar_lea.vmem [#allocation2], %s5156_s11 }
  0x82   : > { %s7458_s1 = scalar_lea.hbm %s9340_s0, %s5596_s17  ;;  %s408_s2 = sshll.u32 %s400_s21, 4  ;;  %s7460_s2 = int_to_ptr.vmem [resolvable:$true] %s408_s2 }
  0x83   : > { %p7464_p7 = pnand %p6108_p5, %p7433_p0  ;;  %s7468_s4 = scalar_lea.sflag [#allocation3], %s396_s12 }
  0x84   : > { %s7101_s5 = scalar_lea.hbm %s7458_s1, 4096  ;;  %s7106_s11 = scalar_lea.hbm %s9340_s0, 8192 }
  0x85   : > { %p7102_p9 = scmp.ne.s32.totalorder %s7458_s1, %s7101_s5  ;;  %p7103_p11 = pneg %p7464_p7 }
  0x86   : > { %p7107_p0 = scmp.lt.s32.totalorder %s7458_s1, %s9340_s0  ;;  %p7108_p2 = scmp.lt.s32.totalorder %s7106_s11, %s7101_s5 }
  0x87   : > { %p7104_p12 = pnand %p7103_p11, %p7102_p9 }
  0x88   : > { %p7109_p5 = por %p7108_p2, %p7107_p0 }
  0x89   : > { %p7105_p13 = pneg %p7104_p12 }
  0x8b   : > { %p7110_p4 = pnand %p7109_p5, %p7105_p13 }
  0x8d   : > { %7113 = shalt.err (!%p7110_p4)
}
  0x8e   : > { %s7114_s29 = scalar_lea.vmem %s7460_s2, 4096  ;;  %s7223_s12 = smov [#allocation2]  }
  0x8f   : > { %p7115_p1 = scmp.ne.s32.totalorder %s7460_s2, %s7114_s29  ;;  %s7119_s6 = sshll.u32 %s7223_s12, 4  ;;  %s7120_s6 = int_to_ptr.vmem [resolvable:$false] %s7119_s6 }
  0x90   : > { %s7121_s17 = scalar_lea.vmem %s7120_s6, 8192  ;;  %p7122_p12 = scmp.lt.s32.totalorder %s7460_s2, %s7120_s6 }
  0x91   : > { %p7117_p10 = pnand %p7115_p1, %p7103_p11  ;;  %p7123_p8 = scmp.lt.s32.totalorder %s7121_s17, %s7114_s29 }
  0x93   : > { %p7118_p9 = pneg %p7117_p10  ;;  %p7124_p6 = por %p7123_p8, %p7122_p12 }
  0x95   : > { %p7125_p3 = pnand %p7124_p6, %p7118_p9 }
  0x97   : > { %7128 = shalt.err (!%p7125_p3)
}
  0x98   : > { %6095 = dma.hbm_to_vmem [thread:$0]  (!%p7464_p7), %s7458_s1, 4096, %s7460_s2, %s7468_s4, %s9371_s27, %s9371_s27, %s9375_s24  }
  0x99   : > { %p9381_p1 = scmp.ne.s32.totalorder %s9365_s20, 0 }
  0x9a   : > { %s7495_s5 = sand.u32 (!%p9381_p1), 1, %s7201_s14   ;;  %p9382_p3 = scmp.ne.s32.totalorder (!%p9381_p1), %s9377_s23, 0 }
  0x9b   : > { %420 = sbr.rel (%p9381_p1) target bundleno = 2156 (0x86c), region = 60  ;;  %s5161_s6 = sshll.u32 (!%p9381_p1), %s7495_s5, 8 }
  0x9c   : > { %s423_s22 = scalar_lea.sflag (!%p9381_p1), [#allocation3], %s7495_s5  ;;  %s7499_s11 = scalar_lea.vmem (!%p9381_p1), [#allocation2], %s5161_s6 }
  0xa0   : > { %7172 = dma.done.wait (%p9382_p3), %s423_s22, 4096  }
  0xa1   : > { %7174 = vsyncadd (%p9382_p3), %s423_s22, 4294963200  ;;  %p9383_p4 = scmp.eq.s32.totalorder %s7304_s19, 0 }
  0xa3   : > { %7176 = dma.done.wait (%p9383_p4), [#allocation6], 6144   ;;  %p9384_p6 = pmov %p9383_p4 }
  0xa4   : > { %p9385_p8 = pmov %p9383_p4 }
  0xa5   : > { %7178 = vsyncadd (%p9384_p6), [#allocation6], 4294961152 }
  0xa6   : > { %7180 = dma.done.wait (%p9385_p8), [#allocation9], 2048   ;;  %p9386_p10 = pmov %p9383_p4 }
  0xa7   : > { %p9387_p7 = pmov %p9383_p4 }
  0xa8   : > { %7182 = vsyncadd (%p9386_p10), [#allocation9], 4294965248 }
  0xa9   : > { %7184 = dma.done.wait (%p9387_p7), [#allocation12], 2048   ;;  %p9388_p11 = pmov %p9383_p4 }
  0xaa   : > { %p9389_p13 = pmov %p9383_p4 }
  0xab   : > { %7186 = vsyncadd (%p9388_p11), [#allocation12], 4294965248 }
  0xac   : > { %7188 = dma.done.wait (%p9389_p13), [#allocation15], 6144   ;;  %p9390_p0 = pmov %p9383_p4 }
  0xad   : > { %v6165_v0 = vld [vmem:[#allocation5 + $0x74] ss:$8 sps:$4 sm:$0xff]   ;;  %v6167_v1 = vld [vmem:[#allocation5 + $0x70] ss:$8 sps:$4 sm:$0xff]   ;;  %v6168_v2 = vld [vmem:[#allocation5 + $0x64] ss:$8 sps:$4 sm:$0xff]  }
  0xae   : > { %7190 = vsyncadd (%p9390_p0), [#allocation15], 4294961152  ;;  %894 = vmatprep.subr.bf16.mxu0 %v6165_v0  ;;  %v6170_v3 = vld [vmem:[#allocation5 + $0x60] ss:$8 sps:$4 sm:$0xff]   ;;  %v6171_v4 = vld [vmem:[#allocation5 + $0x54] ss:$8 sps:$4 sm:$0xff]  }
  0xaf   : > { %895 = vmatpush1.bf16.msra.mxu0 %v6167_v1  ;;  %v6173_v5 = vld [vmem:[#allocation5 + $0x50] ss:$8 sps:$4 sm:$0xff]   ;;  %v6174_v6 = vld [vmem:[#allocation5 + $0x44] ss:$8 sps:$4 sm:$0xff]   ;;  %v6176_v7 = vld [vmem:[#allocation5 + $0x40] ss:$8 sps:$4 sm:$0xff]  }
  0xb0   : > { %896 = vmatprep.subr.bf16.mxu0 %v6168_v2  ;;  %v6177_v8 = vld [vmem:[#allocation5 + $0x34] ss:$8 sps:$4 sm:$0xff]   ;;  %v6179_v9 = vld [vmem:[#allocation5 + $0x30] ss:$8 sps:$4 sm:$0xff]   ;;  %v6180_v10 = vld [vmem:[#allocation5 + $0x24] ss:$8 sps:$4 sm:$0xff]  }
  0xb1   : > { %v6182_v11 = vld [vmem:[#allocation5 + $0x20] ss:$8 sps:$4 sm:$0xff]   ;;  %v6183_v12 = vld [vmem:[#allocation5 + $0x14] ss:$8 sps:$4 sm:$0xff]   ;;  %v6215_v13 = vld [vmem:[%s7499_s11 + $0x4] ss:$8 sps:$4 sm:$0xff]  }
  0xb2   : > { %v6185_v14 = vld [vmem:[#allocation5 + $0x10] ss:$8 sps:$4 sm:$0xff]   ;;  %v6186_v15 = vld [vmem:[#allocation5 + $0x4] ss:$8 sps:$4 sm:$0xff]   ;;  %926 = vmatprep.mubr.bf16.mxu0 %v6215_v13  ;;  %v6188_v16 = vld [vmem:[#allocation5] ss:$8 sps:$4 sm:$0xff]  }
  0xb3   : > { %897 = vmatpush1.bf16.msra.mxu0 %v6170_v3  ;;  %v6189_v17 = vld [vmem:[#allocation5 + $0xf4] ss:$8 sps:$4 sm:$0xff]   ;;  %v6191_v18 = vld [vmem:[#allocation5 + $0xf0] ss:$8 sps:$4 sm:$0xff]   ;;  %v6192_v19 = vld [vmem:[#allocation5 + $0xe4] ss:$8 sps:$4 sm:$0xff]  }
  0xb4   : > { %898 = vmatprep.subr.bf16.mxu0 %v6171_v4  ;;  %v6194_v20 = vld [vmem:[#allocation5 + $0xe0] ss:$8 sps:$4 sm:$0xff]   ;;  %v6195_v21 = vld [vmem:[#allocation5 + $0xd4] ss:$8 sps:$4 sm:$0xff]   ;;  %v6197_v22 = vld [vmem:[#allocation5 + $0xd0] ss:$8 sps:$4 sm:$0xff]  }
  0xb5   : > { %v6198_v23 = vld [vmem:[#allocation5 + $0xc4] ss:$8 sps:$4 sm:$0xff]   ;;  %v6200_v24 = vld [vmem:[#allocation5 + $0xc0] ss:$8 sps:$4 sm:$0xff]   ;;  %v6201_v25 = vld [vmem:[#allocation5 + $0xb4] ss:$8 sps:$4 sm:$0xff]  }
  0xb6   : > { %v6203_v26 = vld [vmem:[#allocation5 + $0xb0] ss:$8 sps:$4 sm:$0xff]   ;;  %v6204_v27 = vld [vmem:[#allocation5 + $0xa4] ss:$8 sps:$4 sm:$0xff]   ;;  %v6206_v28 = vld [vmem:[#allocation5 + $0xa0] ss:$8 sps:$4 sm:$0xff]  }
  0xb7   : > { %899 = vmatpush1.bf16.msra.mxu0 %v6173_v5  ;;  %v6207_v29 = vld [vmem:[#allocation5 + $0x94] ss:$8 sps:$4 sm:$0xff]   ;;  %v6209_v30 = vld [vmem:[#allocation5 + $0x90] ss:$8 sps:$4 sm:$0xff]   ;;  %v6210_v31 = vld [vmem:[#allocation5 + $0x84] ss:$8 sps:$4 sm:$0xff]  }
  0xb8   : > { %900 = vmatprep.subr.bf16.mxu0 %v6174_v6  ;;  %v6212_v32 = vld [vmem:[#allocation5 + $0x80] ss:$8 sps:$4 sm:$0xff]   ;;  %v6216_v34 = vld [vmem:[%s7499_s11 + $0x14] ss:$8 sps:$4 sm:$0xff]   ;;  %v6218_v35 = vld [vmem:[%s7499_s11 + $0x10] ss:$8 sps:$4 sm:$0xff]  }
  0xb9   : > { %v6213_v33 = vld [vmem:[%s7499_s11] ss:$8 sps:$4 sm:$0xff]   ;;  %v6219_v36 = vld [vmem:[%s7499_s11 + $0x24] ss:$8 sps:$4 sm:$0xff]   ;;  %v6222_v38 = vld [vmem:[%s7499_s11 + $0x34] ss:$8 sps:$4 sm:$0xff]  }
  0xba   : > { %v6221_v37 = vld [vmem:[%s7499_s11 + $0x20] ss:$8 sps:$4 sm:$0xff]   ;;  %v6224_v39 = vld [vmem:[%s7499_s11 + $0x30] ss:$8 sps:$4 sm:$0xff]   ;;  %v6225_v40 = vld [vmem:[%s7499_s11 + $0x44] ss:$8 sps:$4 sm:$0xff]  }
  0xbb   : > { %901 = vmatpush1.bf16.msra.mxu0 %v6176_v7  ;;  %v6227_v41 = vld [vmem:[%s7499_s11 + $0x40] ss:$8 sps:$4 sm:$0xff]   ;;  %v6228_v42 = vld [vmem:[%s7499_s11 + $0x54] ss:$8 sps:$4 sm:$0xff]   ;;  %v6230_v43 = vld [vmem:[%s7499_s11 + $0x50] ss:$8 sps:$4 sm:$0xff]  }
  0xbc   : > { %902 = vmatprep.subr.bf16.mxu0 %v6177_v8  ;;  %v6231_v44 = vld [vmem:[%s7499_s11 + $0x64] ss:$8 sps:$4 sm:$0xff]   ;;  %v6233_v45 = vld [vmem:[%s7499_s11 + $0x60] ss:$8 sps:$4 sm:$0xff]   ;;  %v6234_v46 = vld [vmem:[%s7499_s11 + $0x74] ss:$8 sps:$4 sm:$0xff]  }
  0xbd   : > { %v6236_v47 = vld [vmem:[%s7499_s11 + $0x70] ss:$8 sps:$4 sm:$0xff]   ;;  %v6237_v48 = vld [vmem:[%s7499_s11 + $0x84] ss:$8 sps:$4 sm:$0xff]   ;;  %v6239_v49 = vld [vmem:[%s7499_s11 + $0x80] ss:$8 sps:$4 sm:$0xff]  }
  0xbe   : > { %v6240_v50 = vld [vmem:[%s7499_s11 + $0x94] ss:$8 sps:$4 sm:$0xff]   ;;  %v6242_v53 = vld [vmem:[%s7499_s11 + $0x90] ss:$8 sps:$4 sm:$0xff]   ;;  %v6243_v54 = vld [vmem:[%s7499_s11 + $0xa4] ss:$8 sps:$4 sm:$0xff]  }
  0xbf   : > { %903 = vmatpush1.bf16.msra.mxu0 %v6179_v9  ;;  %v6261_v51 = vld [vmem:[#allocation7 + $0x78] sm:$0xff]   ;;  %v6263_v55 = vld [vmem:[#allocation7 + $0x70] sm:$0xff]   ;;  %v6265_v57 = vld [vmem:[#allocation7 + $0x68] sm:$0xff]   ;;  %s5170_s1 = sshll.u32 %s7495_s5, 9  ;;  %s5598_s3 = sshll.u32 %s7304_s19, 13 }
  0xc0   : > { %904 = vmatprep.subr.bf16.mxu0 %v6180_v10  ;;  %v6262_v52 = vld [vmem:[#allocation7 + $0x38] sm:$0xff]   ;;  %5599 = vmatprep.subr.bf16.mxu1 %v6261_v51  ;;  %v6264_v56 = vld [vmem:[#allocation7 + $0x30] sm:$0xff]   ;;  %v6266_v58 = vld [vmem:[#allocation7 + $0x28] sm:$0xff]   ;;  %s9161_s2 = scalar_lea.vmem [#allocation17], %s5170_s1  ;;  %s9292_s24 = scalar_lea.hbm %s9350_s10, %s5598_s3 }
  0xc1   : > { %5600 = vmatpush3.bf16.msra.mxu1 %v6262_v52  ;;  %v6245_v59 = vld [vmem:[%s7499_s11 + $0xa0] ss:$8 sps:$4 sm:$0xff]   ;;  %v6246_v60 = vld [vmem:[%s7499_s11 + $0xb4] ss:$8 sps:$4 sm:$0xff]   ;;  %v6248_v1 = vld [vmem:[%s7499_s11 + $0xb0] ss:$8 sps:$4 sm:$0xff]  }
  0xc2   : > { %5601 = vmatprep.subr.bf16.mxu1 %v6263_v55  ;;  %v6267_v61 = vld [vmem:[#allocation7 + $0x60] sm:$0xff]   ;;  %v6269_v63 = vld [vmem:[#allocation7 + $0x58] sm:$0xff]   ;;  %v6271_v3 = vld [vmem:[#allocation7 + $0x50] sm:$0xff]   ;;  %s4996_s4 = sshll.u32 %s9161_s2, 4  ;;  %s4982_s19 = scalar_lea.sflag [#allocation4], %s7495_s5  ;;  %s9294_s4 = int_to_ptr.vmem [resolvable:$true] %s4996_s4 }
  0xc3   : > { %905 = vmatpush1.bf16.msra.mxu0 %v6182_v11  ;;  %v6268_v62 = vld [vmem:[#allocation7 + $0x20] sm:$0xff]   ;;  %v6270_v0 = vld [vmem:[#allocation7 + $0x18] sm:$0xff]   ;;  %v6272_v4 = vld [vmem:[#allocation7 + $0x10] sm:$0xff]   ;;  %s7129_s23 = scalar_lea.vmem %s9294_s4, 8192  ;;  %p9391_p5 = scmp.ne.s32.totalorder %s9378_s18, 0 }
  0xc4   : > { %906 = vmatprep.subr.bf16.mxu0 %v6183_v12  ;;  %v6249_v2 = vld [vmem:[%s7499_s11 + $0xc4] ss:$8 sps:$4 sm:$0xff]   ;;  %v6251_v7 = vld [vmem:[%s7499_s11 + $0xc0] ss:$8 sps:$4 sm:$0xff]   ;;  %v6252_v8 = vld [vmem:[%s7499_s11 + $0xd4] ss:$8 sps:$4 sm:$0xff]   ;;  %p7130_p2 = scmp.ne.s32.totalorder %s9294_s4, %s7129_s23 }
  0xc5   : > { %5602 = vmatpush3.bf16.msra.mxu1 %v6264_v56  ;;  %v6273_v5 = vld [vmem:[#allocation7 + $0x48] sm:$0xff]   ;;  %v6275_v9 = vld [vmem:[#allocation7 + $0x40] sm:$0xff]   ;;  %v6254_v11 = vld [vmem:[%s7499_s11 + $0xd0] ss:$8 sps:$4 sm:$0xff]   ;;  %s7225_s30 = smov [#allocation17]  }
  0xc6   : > { %5603 = vmatprep.subr.bf16.mxu1 %v6265_v57  ;;  %v6274_v6 = vld [vmem:[#allocation7 + $0x8] sm:$0xff]   ;;  %v6276_v10 = vld [vmem:[#allocation7] sm:$0xff]   ;;  %p7131_p9 = pnand %p7130_p2, %p9391_p5  ;;  %s7133_s21 = sshll.u32 %s7225_s30, 4  ;;  %s7134_s21 = int_to_ptr.vmem [resolvable:$false] %s7133_s21 }
  0xc7   : > { %907 = vmatpush1.bf16.msra.mxu0 %v6185_v14  ;;  %v6255_v12 = vld [vmem:[%s7499_s11 + $0xe4] ss:$8 sps:$4 sm:$0xff]   ;;  %v6257_v13 = vld [vmem:[%s7499_s11 + $0xe0] ss:$8 sps:$4 sm:$0xff]   ;;  %v6258_v14 = vld [vmem:[%s7499_s11 + $0xf4] ss:$8 sps:$4 sm:$0xff]   ;;  %p7136_p1 = scmp.lt.s32.totalorder %s9294_s4, %s7134_s21 }
  0xc8   : > { %908 = vmatprep.subr.bf16.mxu0 %v6186_v15  ;;  %v6260_v15 = vld [vmem:[%s7499_s11 + $0xf0] ss:$8 sps:$4 sm:$0xff]   ;;  %p7132_p12 = pneg %p7131_p9  ;;  %s7135_s29 = scalar_lea.vmem %s7134_s21, 16384 }
  0xc9   : > { %5604 = vmatpush3.bf16.msra.mxu1 %v6266_v58  ;;  %p7137_p3 = scmp.lt.s32.totalorder %s7135_s29, %s7129_s23 }
  0xca   : > { %5605 = vmatprep.subr.bf16.mxu1 %v6267_v61 }
  0xcb   : > { %909 = vmatpush1.bf16.msra.mxu0 %v6188_v16  ;;  %v564_v16 = vlaneseq  ;;  %p7138_p4 = por %p7137_p3, %p7136_p1 }
  0xcc   : > { %910 = vmatprep.subr.bf16.mxu0 %v6189_v17 }
  0xcd   : > { %5606 = vmatpush3.bf16.msra.mxu1 %v6268_v62  ;;  %v565_v17 = vshrl.u32 %v564_v16, 7  ;;  %p7139_p6 = pnand %p7138_p4, %p7132_p12 }
  0xce   : > { %5607 = vmatprep.subr.bf16.mxu1 %v6269_v63 }
  0xcf   : > { %911 = vmatpush2.bf16.msra.mxu0 %v6191_v18  ;;  %v7553_v18 = vsub.s32 0, %v565_v17 }
  0xd0   : > { %912 = vmatprep.subr.bf16.mxu0 %v6192_v19  ;;  %v562_v19 = vld [vmem:[%s9349_s9] ss:$8 sm:$0x3] }
  0xd1   : > { %5608 = vmatpush3.bf16.msra.mxu1 %v6270_v0 }
  0xd2   : > { %5609 = vmatprep.subr.bf16.mxu1 %v6271_v3 }
  0xd3   : > { %913 = vmatpush2.bf16.msra.mxu0 %v6194_v20  ;;  %v7558_v20 = vsub.s32 1, %v565_v17 }
  0xd4   : > { %914 = vmatprep.subr.bf16.mxu0 %v6195_v21  ;;  %v7561_v21 = vrot.slane %v562_v19, %v7553_v18 }
  0xd5   : > { %5610 = vmatpush3.bf16.msra.mxu1 %v6272_v4 }
  0xd6   : > { %5611 = vmatprep.subr.bf16.mxu1 %v6273_v5 }
  0xd7   : > { %915 = vmatpush2.bf16.msra.mxu0 %v6197_v22  ;;  %v7564_v22 = vrot.slane %v562_v19, %v7558_v20 }
  0xd8   : > { %916 = vmatprep.subr.bf16.mxu0 %v6198_v23 }
  0xd9   : > { %5612 = vmatpush3.bf16.msra.mxu1 %v6274_v6 }
  0xda   : > { %5613 = vmatprep.subr.bf16.mxu1 %v6275_v9 }
  0xdb   : > { %917 = vmatpush2.bf16.msra.mxu0 %v6200_v24 }
  0xdc   : > { %918 = vmatprep.subr.bf16.mxu0 %v6201_v25 }
  0xdd   : > { %5614 = vmatpush3.bf16.msra.mxu1 %v6276_v10 }
  0xdf   : > { %919 = vmatpush2.bf16.msra.mxu0 %v6203_v26 }
  0xe0   : > { %920 = vmatprep.subr.bf16.mxu0 %v6204_v27 }
  0xe3   : > { %921 = vmatpush2.bf16.msra.mxu0 %v6206_v28 }
  0xe4   : > { %922 = vmatprep.subr.bf16.mxu0 %v6207_v29 }
  0xe7   : > { %923 = vmatpush2.bf16.msra.mxu0 %v6209_v30 }
  0xe8   : > { %924 = vmatprep.subr.bf16.mxu0 %v6210_v31 }
  0xeb   : > { %925 = vmatpush2.bf16.msra.mxu0 %v6212_v32 }
  0xee   : > { %927 = vmatmul.mubr.bf16.vlgmr.msra.gmra.mxu0 %v6213_v33 }
  0xef   : > { %936 = vmatprep.mubr.bf16.mxu0 %v6216_v34 }
  0xf6   : > { %937 = vmatmul.mubr.bf16.gmra.mxu0 %v6218_v35 }
  0xf7   : > { %946 = vmatprep.mubr.bf16.mxu0 %v6219_v36 }
  0xfe   : > { %947 = vmatmul.mubr.bf16.gmra.mxu0 %v6221_v37 }
  0xff   : > { %956 = vmatprep.mubr.bf16.mxu0 %v6222_v38 }
 0x106   : > { %957 = vmatmul.mubr.bf16.gmra.mxu0 %v6224_v39 }
 0x107   : > { %966 = vmatprep.mubr.bf16.mxu0 %v6225_v40 }
 0x10e   : > { %967 = vmatmul.mubr.bf16.gmra.mxu0 %v6227_v41 }
 0x10f   : > { %976 = vmatprep.mubr.bf16.mxu0 %v6228_v42 }
 0x116   : > { %977 = vmatmul.mubr.bf16.gmra.mxu0 %v6230_v43 }
 0x117   : > { %986 = vmatprep.mubr.bf16.mxu0 %v6231_v44 }
 0x11e   : > { %987 = vmatmul.mubr.bf16.gmra.mxu0 %v6233_v45 }
 0x11f   : > { %996 = vmatprep.mubr.bf16.mxu0 %v6234_v46 }
 0x126   : > { %997 = vmatmul.mubr.bf16.gmra.mxu0 %v6236_v47 }
 0x127   : > { %1006 = vmatprep.mubr.bf16.mxu0 %v6237_v48 }
 0x12e   : > { %1007 = vmatmul.mubr.bf16.gmra.mxu0 %v6239_v49 }
 0x12f   : > { %1016 = vmatprep.mubr.bf16.mxu0 %v6240_v50 }
 0x136   : > { %1017 = vmatmul.mubr.bf16.gmra.mxu0 %v6242_v53 }
 0x137   : > { %1026 = vmatprep.mubr.bf16.mxu0 %v6243_v54 }
 0x13e   : > { %1027 = vmatmul.mubr.bf16.gmra.mxu0 %v6245_v59 }
 0x13f   : > { %1036 = vmatprep.mubr.bf16.mxu0 %v6246_v60 }
 0x146   : > { %1037 = vmatmul.mubr.bf16.gmra.mxu0 %v6248_v1 }
 0x147   : > { %1046 = vmatprep.mubr.bf16.mxu0 %v6249_v2 }
 0x14e   : > { %1047 = vmatmul.mubr.bf16.gmra.mxu0 %v6251_v7 }
 0x14f   : > { %1056 = vmatprep.mubr.bf16.mxu0 %v6252_v8  ;;  %v7617_v8 = vld [vmem:[#allocation8 + $0x38] sm:$0xff]  }
 0x150   : > { %5807 = vmatprep.subr.bf16.mxu1 %v7617_v8 }
 0x156   : > { %1057 = vmatmul.mubr.bf16.gmra.mxu0 %v6254_v11 }
 0x157   : > { %1066 = vmatprep.mubr.bf16.mxu0 %v6255_v12 }
 0x15e   : > { %1067 = vmatmul.mubr.bf16.gmra.mxu0 %v6257_v13 }
 0x15f   : > { %1076 = vmatprep.mubr.bf16.mxu0 %v6258_v14 }
 0x166   : > { %1077 = vmatmul.mubr.bf16.gmra.mxu0 %v6260_v15 }
 0x1ae   : > { %v928_v23 = vpop.f32.mrf.mxu0 }
 0x1af   : > { %v7567_v24 = vadd.f32 %v928_v23, %v7561_v21 }
 0x1b0   : > { %v930_v25 = vpop.f32.mrf.mxu0 }
 0x1b1   : > { %v1151_v26 = vmul.f32 1.442695, %v7567_v24  ;;  %v7571_v27 = vadd.f32 %v930_v25, %v7564_v22  ;;  %vm1087_vm0 = vcmp.gt.f32.partialorder %v7567_v24, 0.0 }
 0x1b2   : > { %v932_v28 = vpop.f32.mrf.mxu0 }
 0x1b3   : > { %v1153_v29 = vmul.f32 1.442695, %v7571_v27  ;;  %v7575_v30 = vadd.f32 %v932_v28, %v7561_v21  ;;  %6381 = vpow2.f32 %v1151_v26  ;;  %vm1088_vm1 = vcmp.gt.f32.partialorder %v7571_v27, 0.0 }
 0x1b4   : > { %v934_v31 = vpop.f32.mrf.mxu0 }
 0x1b5   : > { %6383 = vpow2.f32 %v1153_v29  ;;  %v1155_v32 = vmul.f32 1.442695, %v7575_v30  ;;  %v7579_v33 = vadd.f32 %v934_v31, %v7564_v22  ;;  %vm1089_vm2 = vcmp.gt.f32.partialorder %v7575_v30, 0.0 }
 0x1b6   : > { %v938_v34 = vpop.f32.mrf.mxu0 }
 0x1b7   : > { %6385 = vpow2.f32 %v1155_v32  ;;  %v1157_v35 = vmul.f32 1.442695, %v7579_v33  ;;  %v7583_v36 = vadd.f32 %v938_v34, %v7561_v21  ;;  %vm1090_vm3 = vcmp.gt.f32.partialorder %v7579_v33, 0.0 }
 0x1b8   : > { %v940_v37 = vpop.f32.mrf.mxu0 }
 0x1b9   : > { %6387 = vpow2.f32 %v1157_v35  ;;  %v7586_v38 = vadd.f32 %v940_v37, %v7564_v22  ;;  %v1159_v42 = vmul.f32 1.442695, %v7583_v36  ;;  %vm1091_vm6 = vcmp.gt.f32.partialorder %v7583_v36, 0.0 }
 0x1ba   : > { %v942_v39 = vpop.f32.mrf.mxu0 }
 0x1bb   : > { %v1161_v40 = vmul.f32 1.442695, %v7586_v38  ;;  %v7590_v41 = vadd.f32 %v942_v39, %v7561_v21  ;;  %vm1092_vm4 = vcmp.gt.f32.partialorder %v7586_v38, 0.0 }
 0x1bc   : > { %v944_v43 = vpop.f32.mrf.mxu0 }
 0x1bd   : > { %6389 = vpow2.f32 %v1161_v40  ;;  %v1163_v44 = vmul.f32 1.442695, %v7590_v41  ;;  %v7595_v45 = vadd.f32 %v944_v43, %v7564_v22  ;;  %vm1093_vm5 = vcmp.gt.f32.partialorder %v7590_v41, 0.0 }
 0x1be   : > { %v948_v46 = vpop.f32.mrf.mxu0 }
 0x1bf   : > { %6391 = vpow2.f32 %v1163_v44  ;;  %v1165_v47 = vmul.f32 1.442695, %v7595_v45  ;;  %v7599_v48 = vadd.f32 %v948_v46, %v7561_v21  ;;  %vm1094_vm7 = vcmp.gt.f32.partialorder %v7595_v45, 0.0 }
 0x1c0   : > { %6393 = vpow2.f32 %v1159_v42  ;;  %v950_v49 = vpop.f32.mrf.mxu0  ;;  %v6382_v50 = vpop.eup %6381 }
 0x1c1   : > { %v1167_v51 = vmul.f32 1.442695, %v7599_v48  ;;  %v7603_v53 = vadd.f32 %v950_v49, %v7564_v22  ;;  %6395 = vpow2.f32 %v1165_v47  ;;  %v5235_v59 = vadd.f32 -1.0, %v6382_v50 }
 0x1c2   : > { %v6384_v52 = vpop.eup %6383  ;;  %v952_v54 = vpop.f32.mrf.mxu0  ;;  %vm1095_vm8 = vcmp.gt.f32.partialorder %v7599_v48, 0.0 }
 0x1c3   : > { %v7606_v55 = vadd.f32 %v952_v54, %v7561_v21  ;;  %v1169_v57 = vmul.f32 1.442695, %v7603_v53  ;;  %6397 = vpow2.f32 %v1167_v51  ;;  %v5236_v61 = vadd.f32 -1.0, %v6384_v52 }
 0x1c4   : > { %v6386_v56 = vpop.eup %6385  ;;  %v954_v58 = vpop.f32.mrf.mxu0  ;;  %v1343_v6 = vmul.f32 1.6732632, %v5235_v59  ;;  %vm1096_vm9 = vcmp.gt.f32.partialorder %v7603_v53, 0.0 }
 0x1c5   : > { %v1171_v60 = vmul.f32 1.442695, %v7606_v55  ;;  %v5237_v63 = vadd.f32 -1.0, %v6386_v56  ;;  %6399 = vpow2.f32 %v1169_v57  ;;  %v7611_v0 = vadd.f32 %v954_v58, %v7564_v22 }
 0x1c6   : > { %v6388_v62 = vpop.eup %6387  ;;  %v958_v1 = vpop.f32.mrf.mxu0  ;;  %v1344_v7 = vmul.f32 1.6732632, %v5236_v61  ;;  %v1407_v23 = vsel %vm1087_vm0, %v7567_v24, %v1343_v6  ;;  %vm1097_vm10 = vcmp.gt.f32.partialorder %v7606_v55, 0.0 }
 0x1c7   : > { %v5238_v2 = vadd.f32 -1.0, %v6388_v62  ;;  %6401 = vpow2.f32 %v1171_v60  ;;  %v1173_v3 = vmul.f32 1.442695, %v7611_v0  ;;  %v7615_v4 = vadd.f32 %v958_v1, %v7561_v21 }
 0x1c8   : > { %v960_v5 = vpop.f32.mrf.mxu0  ;;  %v1345_v10 = vmul.f32 1.6732632, %v5237_v63  ;;  %v1408_v28 = vsel %vm1088_vm1, %v7571_v27, %v1344_v7  ;;  %v1471_v40 = vmul.f32 1.050701, %v1407_v23  ;;  %vm1098_vm11 = vcmp.gt.f32.partialorder %v7611_v0, 0.0 }
 0x1c9   : > { %v7620_v11 = vadd.f32 %v960_v5, %v7564_v22  ;;  %v1346_v14 = vmul.f32 1.6732632, %v5238_v2  ;;  %6403 = vpow2.f32 %v1173_v3  ;;  %v1175_v16 = vmul.f32 1.442695, %v7615_v4 }
 0x1ca   : > { %v6390_v9 = vpop.eup %6389  ;;  %v962_v12 = vpop.f32.mrf.mxu0  ;;  %v1409_v29 = vsel %vm1089_vm2, %v7575_v30, %v1345_v10  ;;  %v1472_v30 = vmul.f32 1.050701, %v1408_v28  ;;  %vm1099_vm12 = vcmp.gt.f32.partialorder %v7615_v4, 0.0 }
 0x1cb   : > { %v7624_v13 = vadd.f32 %v962_v12, %v7561_v21  ;;  %v5240_v25 = vadd.f32 -1.0, %v6390_v9  ;;  %v1177_v26 = vmul.f32 1.442695, %v7620_v11  ;;  %v1410_v39 = vsel %vm1090_vm3, %v7579_v33, %v1346_v14 }
 0x1cc   : > { %v6392_v15 = vpop.eup %6391  ;;  %v964_v17 = vpop.f32.mrf.mxu0  ;;  %6405 = vpow2.f32 %v1175_v16  ;;  %v1473_v27 = vmul.f32 1.050701, %v1409_v29  ;;  %v1474_v50 = vmul.f32 1.050701, %v1410_v39  ;;  %vm1100_vm13 = vcmp.gt.f32.partialorder %v7620_v11, 0.0 }
 0x1cd   : > { %v6394_v19 = vpop.eup %6393  ;;  %v5241_v31 = vadd.f32 -1.0, %v6392_v15  ;;  %v1179_v32 = vmul.f32 1.442695, %v7624_v13  ;;  %v7637_v34 = vadd.f32 %v964_v17, %v7564_v22  ;;  %v1348_v44 = vmul.f32 1.6732632, %v5240_v25 }
 0x1ce   : > { %v968_v35 = vpop.f32.mrf.mxu0  ;;  %v6396_v24 = vpop.eup %6395  ;;  %v5239_v42 = vadd.f32 -1.0, %v6394_v19  ;;  %6407 = vpow2.f32 %v1177_v26  ;;  %v1536_v58 = vpack.c.bf16 %v1474_v50, %v1472_v30  ;;  %v1535_v62 = vpack.c.bf16 %v1473_v27, %v1471_v40 }
 0x1cf   : > { %v7640_v37 = vadd.f32 %v968_v35, %v7561_v21  ;;  %v1349_v47 = vmul.f32 1.6732632, %v5241_v31  ;;  %6409 = vpow2.f32 %v1179_v32  ;;  %v1181_v49 = vmul.f32 1.442695, %v7637_v34 }
 0x1d0   : > { %v970_v43 = vpop.f32.mrf.mxu0  ;;  %v6398_v46 = vpop.eup %6397  ;;  %v5242_v54 = vadd.f32 -1.0, %v6396_v24  ;;  %v1347_v61 = vmul.f32 1.6732632, %v5239_v42  ;;  %v1412_v1 = vsel %vm1092_vm4, %v7586_v38, %v1348_v44  ;;  %1728 = vmatprep.mubr.bf16.mxu1 %v1536_v58  ;;  %v6278_v38 = vld [vmem:[#allocation8 + $0x30] sm:$0xff]   ;;  %vm1101_vm14 = vcmp.gt.f32.partialorder %v7624_v13, 0.0 }
 0x1d1   : > { %v1183_v33 = vmul.f32 1.442695, %v7640_v37  ;;  %v7646_v56 = vadd.f32 %v970_v43, %v7564_v22  ;;  %v5243_v2 = vadd.f32 -1.0, %v6398_v46  ;;  %6411 = vpow2.f32 %v1181_v49  ;;  %1729 = vmatmul.mubr.bf16.vlgmr.msra.gmra.mxu1 %v1535_v62  ;;  %v6280_v43 = vld [vmem:[#allocation8 + $0x20] sm:$0xff]  }
 0x1d2   : > { %v972_v51 = vpop.f32.mrf.mxu0  ;;  %v6400_v52 = vpop.eup %6399  ;;  %v1413_v6 = vsel %vm1093_vm5, %v7590_v41, %v1349_v47  ;;  %v1350_v9 = vmul.f32 1.6732632, %v5242_v54  ;;  %5808 = vmatpush3.bf16.msra.mxu1 %v7617_v8  ;;  %v1411_v16 = vsel %vm1091_vm6, %v7583_v36, %v1347_v61  ;;  %v1476_v17 = vmul.f32 1.050701, %v1412_v1  ;;  %v6279_v41 = vld [vmem:[#allocation8 + $0x28] sm:$0xff]  }
 0x1d3   : > { %v7649_v57 = vadd.f32 %v972_v51, %v7561_v21  ;;  %v5244_v3 = vadd.f32 -1.0, %v6400_v52  ;;  %6413 = vpow2.f32 %v1183_v33  ;;  %v1185_v7 = vmul.f32 1.442695, %v7646_v56  ;;  %5809 = vmatprep.subr.bf16.mxu1 %v6278_v38 }
 0x1d4   : > { %v974_v59 = vpop.f32.mrf.mxu0  ;;  %v6402_v60 = vpop.eup %6401  ;;  %v1477_v19 = vmul.f32 1.050701, %v1413_v6  ;;  %v1351_v23 = vmul.f32 1.6732632, %v5243_v2  ;;  %v1414_v29 = vsel %vm1094_vm7, %v7595_v45, %v1350_v9  ;;  %v1475_v44 = vmul.f32 1.050701, %v1411_v16 }
 0x1d5   : > { %v1187_v63 = vmul.f32 1.442695, %v7649_v57  ;;  %v5245_v10 = vadd.f32 -1.0, %v6402_v60  ;;  %v7659_v12 = vadd.f32 %v974_v59, %v7564_v22  ;;  %v1352_v25 = vmul.f32 1.6732632, %v5244_v3  ;;  %v6281_v60 = vld [vmem:[#allocation8 + $0x18] sm:$0xff]  }
 0x1d6   : > { %v978_v5 = vpop.f32.mrf.mxu0  ;;  %v6404_v15 = vpop.eup %6403  ;;  %5810 = vmatpush3.bf16.msra.mxu1 %v6278_v38  ;;  %v1478_v42 = vmul.f32 1.050701, %v1414_v29  ;;  %v1415_v47 = vsel %vm1095_vm8, %v7599_v48, %v1351_v23  ;;  %v1537_v51 = vpack.c.bf16 %v1477_v19, %v1475_v44  ;;  %vm1102_vm15 = vcmp.gt.f32.partialorder %v7637_v34, 0.0 }
 0x1d7   : > { %6415 = vpow2.f32 %v1187_v63  ;;  %v7668_v8 = vadd.f32 %v978_v5, %v7561_v21  ;;  %v1353_v31 = vmul.f32 1.6732632, %v5245_v10  ;;  %v5246_v32 = vadd.f32 -1.0, %v6404_v15  ;;  %5811 = vmatprep.subr.bf16.mxu1 %v6279_v41  ;;  %v6282_v15 = vld [vmem:[#allocation8 + $0x10] sm:$0xff]  }
 0x1d8   : > { %v980_v14 = vpop.f32.mrf.mxu0  ;;  %6417 = vpow2.f32 %v1185_v7  ;;  %v1189_v35 = vmul.f32 1.442695, %v7659_v12  ;;  %v1538_v50 = vpack.c.bf16 %v1478_v42, %v1476_v17  ;;  %v1416_v58 = vsel %vm1096_vm9, %v7603_v53, %v1352_v25 }
 0x1d9   : > { %v7665_v26 = vadd.f32 %v980_v14, %v7564_v22  ;;  %v6406_v24 = vpop.eup %6405  ;;  %v1191_v49 = vmul.f32 1.442695, %v7668_v8  ;;  %v1354_v33 = vmul.f32 1.6732632, %v5246_v32  ;;  %v1417_v59 = vsel %vm1097_vm10, %v7606_v55, %v1353_v31 }
 0x1da   : > { %v982_v28 = vpop.f32.mrf.mxu0  ;;  %6419 = vpow2.f32 %v1189_v35  ;;  %5812 = vmatpush3.bf16.msra.mxu1 %v6279_v41  ;;  %1736 = vmatprep.mubr.bf16.mxu1 %v1538_v50  ;;  %v5247_v61 = vadd.f32 -1.0, %v6406_v24  ;;  %v1479_v3 = vmul.f32 1.050701, %v1415_v47  ;;  %v1480_v5 = vmul.f32 1.050701, %v1416_v58 }
 0x1db   : > { %v7672_v36 = vadd.f32 %v982_v28, %v7561_v21  ;;  %v1193_v40 = vmul.f32 1.442695, %v7665_v26  ;;  %v6408_v27 = vpop.eup %6407  ;;  %5813 = vmatprep.subr.bf16.mxu1 %v6280_v43  ;;  %1737 = vmatmul.mubr.bf16.gmra.mxu1 %v1537_v51  ;;  %v1418_v53 = vsel %vm1098_vm11, %v7611_v0, %v1354_v33  ;;  %v1481_v6 = vmul.f32 1.050701, %v1417_v59 }
 0x1dc   : > { %v984_v39 = vpop.f32.mrf.mxu0  ;;  %v6410_v46 = vpop.eup %6409  ;;  %v5248_v62 = vadd.f32 -1.0, %v6408_v27  ;;  %v1482_v38 = vmul.f32 1.050701, %v1418_v53  ;;  %v1355_v17 = vmul.f32 1.6732632, %v5247_v61  ;;  %vm1103_vm0 = vcmp.gt.f32.partialorder %v7640_v37, 0.0 }
 0x1dd   : > { %v1195_v45 = vmul.f32 1.442695, %v7672_v36  ;;  %v7684_v52 = vadd.f32 %v984_v39, %v7564_v22  ;;  %6421 = vpow2.f32 %v1193_v40  ;;  %v5249_v63 = vadd.f32 -1.0, %v6410_v46 }
 0x1de   : > { %v988_v30 = vpop.f32.mrf.mxu0  ;;  %v6412_v2 = vpop.eup %6411  ;;  %5814 = vmatpush3.bf16.msra.mxu1 %v6280_v43  ;;  %v1356_v0 = vmul.f32 1.6732632, %v5248_v62  ;;  %v1540_v29 = vpack.c.bf16 %v1482_v38, %v1480_v5  ;;  %v1539_v39 = vpack.c.bf16 %v1481_v6, %v1479_v3  ;;  %v1419_v43 = vsel %vm1099_vm12, %v7615_v4, %v1355_v17 }
 0x1df   : > { %v7689_v48 = vadd.f32 %v988_v30, %v7561_v21  ;;  %6423 = vpow2.f32 %v1195_v45  ;;  %v1197_v7 = vmul.f32 1.442695, %v7684_v52  ;;  %5815 = vmatprep.subr.bf16.mxu1 %v6281_v60  ;;  %v1357_v41 = vmul.f32 1.6732632, %v5249_v63 }
 0x1e0   : > { %v990_v54 = vpop.f32.mrf.mxu0  ;;  %6425 = vpow2.f32 %v1191_v49  ;;  %v6414_v55 = vpop.eup %6413  ;;  %v5250_v25 = vadd.f32 -1.0, %v6412_v2  ;;  %1744 = vmatprep.mubr.bf16.mxu1 %v1540_v29  ;;  %vm1104_vm1 = vcmp.gt.f32.partialorder %v7646_v56, 0.0  ;;  %v1420_v49 = vsel %vm1100_vm13, %v7620_v11, %v1356_v0 }
 0x1e1   : > { %v7697_v9 = vadd.f32 %v990_v54, %v7564_v22  ;;  %v1199_v14 = vmul.f32 1.442695, %v7689_v48  ;;  %v5251_v28 = vadd.f32 -1.0, %v6414_v55  ;;  %6427 = vpow2.f32 %v1197_v7 }
 0x1e2   : > { %v992_v1 = vpop.f32.mrf.mxu0  ;;  %5816 = vmatpush3.bf16.msra.mxu1 %v6281_v60  ;;  %v1421_v27 = vsel %vm1101_vm14, %v7624_v13, %v1357_v41  ;;  %v1358_v47 = vmul.f32 1.6732632, %v5250_v25  ;;  %v1483_v54 = vmul.f32 1.050701, %v1419_v43  ;;  %vm1105_vm2 = vcmp.gt.f32.partialorder %v7649_v57, 0.0 }
 0x1e3   : > { %v7702_v19 = vadd.f32 %v992_v1, %v7561_v21  ;;  %v1201_v35 = vmul.f32 1.442695, %v7697_v9  ;;  %6429 = vpow2.f32 %v1199_v14  ;;  %5817 = vmatprep.subr.bf16.mxu1 %v6282_v15  ;;  %1745 = vmatmul.mubr.bf16.gmra.mxu1 %v1539_v39  ;;  %v1359_v30 = vmul.f32 1.6732632, %v5251_v28 }
 0x1e4   : > { %v994_v10 = vpop.f32.mrf.mxu0  ;;  %v6416_v16 = vpop.eup %6415  ;;  %vm1106_vm3 = vcmp.gt.f32.partialorder %v7659_v12, 0.0  ;;  %v1485_v59 = vmul.f32 1.050701, %v1421_v27  ;;  %v1422_v60 = vsel %vm1102_vm15, %v7637_v34, %v1358_v47  ;;  %v1484_v63 = vmul.f32 1.050701, %v1420_v49 }
 0x1e5   : > { %v7705_v31 = vadd.f32 %v994_v10, %v7564_v22  ;;  %v6418_v32 = vpop.eup %6417  ;;  %v1203_v24 = vmul.f32 1.442695, %v7702_v19  ;;  %v5253_v42 = vadd.f32 -1.0, %v6416_v16  ;;  %v1423_v1 = vsel %vm1103_vm0, %v7640_v37, %v1359_v30 }
 0x1e6   : > { %v998_v23 = vpop.f32.mrf.mxu0  ;;  %v5252_v46 = vadd.f32 -1.0, %v6418_v32  ;;  %5818 = vmatpush3.bf16.msra.mxu1 %v6282_v15  ;;  %v1486_v3 = vmul.f32 1.050701, %v1422_v60  ;;  %vm1108_vm4 = vcmp.gt.f32.partialorder %v7665_v26, 0.0  ;;  %v1541_v16 = vpack.c.bf16 %v1485_v59, %v1483_v54 }
 0x1e7   : > { %v1205_v44 = vmul.f32 1.442695, %v7705_v31  ;;  %6431 = vpow2.f32 %v1203_v24  ;;  %v6420_v51 = vpop.eup %6419  ;;  %v1361_v33 = vmul.f32 1.6732632, %v5253_v42  ;;  %v7730_v11 = vadd.f32 %v998_v23, %v7561_v21 }
 0x1e8   : > { %v1000_v40 = vpop.f32.mrf.mxu0  ;;  %6433 = vpow2.f32 %v1201_v35  ;;  %v1360_v2 = vmul.f32 1.6732632, %v5252_v46  ;;  %v5254_v55 = vadd.f32 -1.0, %v6420_v51  ;;  %v1542_v37 = vpack.c.bf16 %v1486_v3, %v1484_v63 }
 0x1e9   : > { %v7722_v4 = vadd.f32 %v1000_v40, %v7564_v22  ;;  %6435 = vpow2.f32 %v1205_v44  ;;  %v1425_v34 = vsel %vm1105_vm2, %v7649_v57, %v1361_v33  ;;  %v1207_v15 = vmul.f32 1.442695, %v7730_v11 }
 0x1ea   : > { %v1002_v45 = vpop.f32.mrf.mxu0  ;;  %v6422_v58 = vpop.eup %6421  ;;  %v1487_v0 = vmul.f32 1.050701, %v1423_v1  ;;  %vm1107_vm5 = vcmp.gt.f32.partialorder %v7668_v8, 0.0  ;;  %vm1109_vm6 = vcmp.gt.f32.partialorder %v7672_v36, 0.0  ;;  %1752 = vmatprep.mubr.bf16.mxu1 %v1542_v37  ;;  %v1424_v57 = vsel %vm1104_vm1, %v7646_v56, %v1360_v2 }
 0x1eb   : > { %v7725_v13 = vadd.f32 %v1002_v45, %v7561_v21  ;;  %v1209_v5 = vmul.f32 1.442695, %v7722_v4  ;;  %v5256_v14 = vadd.f32 -1.0, %v6422_v58  ;;  %1753 = vmatmul.mubr.bf16.gmra.mxu1 %v1541_v16  ;;  %v1362_v28 = vmul.f32 1.6732632, %v5254_v55 }
 0x1ec   : > { %v1004_v50 = vpop.f32.mrf.mxu0  ;;  %v6424_v62 = vpop.eup %6423  ;;  %v1489_v35 = vmul.f32 1.050701, %v1425_v34  ;;  %vm1110_vm7 = vcmp.gt.f32.partialorder %v7684_v52, 0.0  ;;  %v1488_v45 = vmul.f32 1.050701, %v1424_v57  ;;  %vm1111_vm8 = vcmp.gt.f32.partialorder %v7689_v48, 0.0 }
 0x1ed   : > { %v6426_v53 = vpop.eup %6425  ;;  %v1211_v6 = vmul.f32 1.442695, %v7725_v13  ;;  %v7741_v7 = vadd.f32 %v1004_v50, %v7564_v22  ;;  %v5257_v38 = vadd.f32 -1.0, %v6424_v62  ;;  %v1364_v39 = vmul.f32 1.6732632, %v5256_v14 }
 0x1ee   : > { %v1008_v61 = vpop.f32.mrf.mxu0  ;;  %v5255_v41 = vadd.f32 -1.0, %v6426_v53  ;;  %v6428_v32 = vpop.eup %6427  ;;  %v1426_v27 = vsel %vm1106_vm3, %v7659_v12, %v1362_v28  ;;  %v1543_v62 = vpack.c.bf16 %v1489_v35, %v1487_v0  ;;  %vm1112_vm9 = vcmp.gt.f32.partialorder %v7697_v9, 0.0 }
 0x1ef   : > { %6437 = vpow2.f32 %v1211_v6  ;;  %v1213_v25 = vmul.f32 1.442695, %v7741_v7  ;;  %v7759_v24 = vadd.f32 %v1008_v61, %v7561_v21  ;;  %v1365_v43 = vmul.f32 1.6732632, %v5257_v38 }
 0x1f0   : > { %v1010_v10 = vpop.f32.mrf.mxu0  ;;  %6439 = vpow2.f32 %v1209_v5  ;;  %v6430_v42 = vpop.eup %6429  ;;  %v1363_v30 = vmul.f32 1.6732632, %v5255_v41  ;;  %v1490_v46 = vmul.f32 1.050701, %v1426_v27  ;;  %v5258_v49 = vadd.f32 -1.0, %v6428_v32 }
 0x1f1   : > { %v7751_v23 = vadd.f32 %v1010_v10, %v7564_v22  ;;  %6441 = vpow2.f32 %v1207_v15  ;;  %v1428_v58 = vsel %vm1108_vm4, %v7665_v26, %v1364_v39  ;;  %v5259_v59 = vadd.f32 -1.0, %v6430_v42 }
 0x1f2   : > { %v1012_v17 = vpop.f32.mrf.mxu0  ;;  %6443 = vpow2.f32 %v1213_v25  ;;  %v1215_v12 = vmul.f32 1.442695, %v7759_v24  ;;  %v1544_v60 = vpack.c.bf16 %v1490_v46, %v1488_v45  ;;  %v1429_v61 = vsel %vm1109_vm6, %v7672_v36, %v1365_v43 }
 0x1f3   : > { %v7762_v40 = vadd.f32 %v1012_v17, %v7561_v21  ;;  %v1217_v56 = vmul.f32 1.442695, %v7751_v23  ;;  %v1427_v53 = vsel %vm1107_vm5, %v7668_v8, %v1363_v30  ;;  %v1366_v5 = vmul.f32 1.6732632, %v5258_v49 }
 0x1f4   : > { %v1014_v29 = vpop.f32.mrf.mxu0  ;;  %v6432_v47 = vpop.eup %6431  ;;  %1760 = vmatprep.mubr.bf16.mxu1 %v1544_v60  ;;  %v1492_v10 = vmul.f32 1.050701, %v1428_v58  ;;  %v1493_v34 = vmul.f32 1.050701, %v1429_v61  ;;  %v1367_v14 = vmul.f32 1.6732632, %v5259_v59 }
 0x1f5   : > { %v1219_v50 = vmul.f32 1.442695, %v7762_v40  ;;  %v7770_v51 = vadd.f32 %v1014_v29, %v7564_v22  ;;  %v6434_v33 = vpop.eup %6433  ;;  %6445 = vpow2.f32 %v1217_v56  ;;  %v5261_v3 = vadd.f32 -1.0, %v6432_v47  ;;  %1761 = vmatmul.mubr.bf16.gmra.mxu1 %v1543_v62 }
 0x1f6   : > { %v1018_v44 = vpop.f32.mrf.mxu0  ;;  %v6436_v2 = vpop.eup %6435  ;;  %v5260_v36 = vadd.f32 -1.0, %v6434_v33  ;;  %v1430_v15 = vsel %vm1110_vm7, %v7684_v52, %v1366_v5  ;;  %v1491_v25 = vmul.f32 1.050701, %v1427_v53  ;;  %vm1113_vm10 = vcmp.gt.f32.partialorder %v7702_v19, 0.0 }
 0x1f7   : > { %v7780_v63 = vadd.f32 %v1018_v44, %v7561_v21  ;;  %6447 = vpow2.f32 %v1219_v50  ;;  %v1221_v55 = vmul.f32 1.442695, %v7770_v51  ;;  %v5262_v37 = vadd.f32 -1.0, %v6436_v2 }
 0x1f8   : > { %v1020_v54 = vpop.f32.mrf.mxu0  ;;  %6449 = vpow2.f32 %v1215_v12  ;;  %v1369_v0 = vmul.f32 1.6732632, %v5261_v3  ;;  %v1494_v57 = vmul.f32 1.050701, %v1430_v15  ;;  %v1368_v28 = vmul.f32 1.6732632, %v5260_v36 }
 0x1f9   : > { %v7784_v26 = vadd.f32 %v1020_v54, %v7564_v22  ;;  %v1223_v38 = vmul.f32 1.442695, %v7780_v63  ;;  %6451 = vpow2.f32 %v1221_v55  ;;  %v1431_v42 = vsel %vm1111_vm8, %v7689_v48, %v1367_v14 }
 0x1fa   : > { %v1022_v1 = vpop.f32.mrf.mxu0  ;;  %v1546_v35 = vpack.c.bf16 %v1494_v57, %v1492_v10  ;;  %v1545_v56 = vpack.c.bf16 %v1493_v34, %v1491_v25  ;;  %v1433_v45 = vsel %vm1113_vm10, %v7702_v19, %v1369_v0  ;;  %vm1114_vm11 = vcmp.gt.f32.partialorder %v7705_v31, 0.0 }
 0x1fb   : > { %v7795_v16 = vadd.f32 %v1022_v1, %v7561_v21  ;;  %v1225_v41 = vmul.f32 1.442695, %v7784_v26  ;;  %6453 = vpow2.f32 %v1223_v38  ;;  %v1370_v30 = vmul.f32 1.6732632, %v5262_v37 }
 0x1fc   : > { %v1024_v6 = vpop.f32.mrf.mxu0  ;;  %v6438_v17 = vpop.eup %6437  ;;  %1768 = vmatprep.mubr.bf16.mxu1 %v1546_v35  ;;  %v1432_v46 = vsel %vm1112_vm9, %v7697_v9, %v1368_v28  ;;  %v1495_v54 = vmul.f32 1.050701, %v1431_v42  ;;  %vm1115_vm12 = vcmp.gt.f32.partialorder %v7730_v11, 0.0  ;;  %vm1116_vm13 = vcmp.gt.f32.partialorder %v7722_v4, 0.0 }
 0x1fd   : > { %v6440_v32 = vpop.eup %6439  ;;  %v1227_v52 = vmul.f32 1.442695, %v7795_v16  ;;  %v7802_v39 = vadd.f32 %v1024_v6, %v7564_v22  ;;  %v5265_v43 = vadd.f32 -1.0, %v6438_v17  ;;  %6455 = vpow2.f32 %v1225_v41  ;;  %1769 = vmatmul.mubr.bf16.gmra.mxu1 %v1545_v56 }
 0x1fe   : > { %v1028_v8 = vpop.f32.mrf.mxu0  ;;  %v6442_v44 = vpop.eup %6441  ;;  %v5264_v47 = vadd.f32 -1.0, %v6440_v32  ;;  %vm1117_vm14 = vcmp.gt.f32.partialorder %v7725_v13, 0.0  ;;  %v1497_v33 = vmul.f32 1.050701, %v1433_v45  ;;  %v1434_v59 = vsel %vm1114_vm11, %v7705_v31, %v1370_v30 }
 0x1ff   : > { %6457 = vpow2.f32 %v1227_v52  ;;  %v6444_v50 = vpop.eup %6443  ;;  %v1229_v19 = vmul.f32 1.442695, %v7802_v39  ;;  %v5263_v58 = vadd.f32 -1.0, %v6442_v44  ;;  %v1373_v9 = vmul.f32 1.6732632, %v5265_v43 }
 0x200   : > { %v1030_v29 = vpop.f32.mrf.mxu0  ;;  %v1496_v61 = vmul.f32 1.050701, %v1432_v46  ;;  %v7823_v62 = vadd.f32 %v1028_v8, %v7561_v21  ;;  %v1498_v1 = vmul.f32 1.050701, %v1434_v59  ;;  %v1372_v53 = vmul.f32 1.6732632, %v5264_v47 }
 0x201   : > { %v7813_v48 = vadd.f32 %v1030_v29, %v7564_v22  ;;  %vm1118_vm15 = vcmp.gt.f32.partialorder %v7741_v7, 0.0  ;;  %v5266_v36 = vadd.f32 -1.0, %v6444_v50  ;;  %vm1120_vm0 = vcmp.gt.f32.partialorder %v7751_v23, 0.0 }
 0x202   : > { %v1032_v27 = vpop.f32.mrf.mxu0  ;;  %v6446_v60 = vpop.eup %6445  ;;  %6459 = vpow2.f32 %v1229_v19  ;;  %v1548_v31 = vpack.c.bf16 %v1498_v1, %v1496_v61  ;;  %v1371_v34 = vmul.f32 1.6732632, %v5263_v58  ;;  %v1437_v14 = vsel %vm1117_vm14, %v7725_v13, %v1373_v9 }
 0x203   : > { %v7826_v2 = vadd.f32 %v1032_v27, %v7561_v21  ;;  %v1233_v55 = vmul.f32 1.442695, %v7813_v48  ;;  %v5268_v37 = vadd.f32 -1.0, %v6446_v60  ;;  %v1547_v38 = vpack.c.bf16 %v1497_v33, %v1495_v54 }
 0x204   : > { %v1034_v49 = vpop.f32.mrf.mxu0  ;;  %v6448_v3 = vpop.eup %6447  ;;  %v1231_v17 = vmul.f32 1.442695, %v7823_v62  ;;  %1776 = vmatprep.mubr.bf16.mxu1 %v1548_v31  ;;  %v1436_v57 = vsel %vm1116_vm13, %v7722_v4, %v1372_v53  ;;  %vm1121_vm1 = vcmp.gt.f32.partialorder %v7762_v40, 0.0  ;;  %v1374_v13 = vmul.f32 1.6732632, %v5266_v36 }
 0x205   : > { %v7832_v6 = vadd.f32 %v1034_v49, %v7564_v22  ;;  %v6450_v10 = vpop.eup %6449  ;;  %v5269_v8 = vadd.f32 -1.0, %v6448_v3  ;;  %v1235_v0 = vmul.f32 1.442695, %v7826_v2  ;;  %6461 = vpow2.f32 %v1233_v55  ;;  %1777 = vmatmul.mubr.bf16.gmra.mxu1 %v1547_v38 }
 0x206   : > { %v1038_v12 = vpop.f32.mrf.mxu0  ;;  %v6452_v28 = vpop.eup %6451  ;;  %vm1119_vm2 = vcmp.gt.f32.partialorder %v7759_v24, 0.0  ;;  %v5267_v29 = vadd.f32 -1.0, %v6450_v10  ;;  %v1435_v4 = vsel %vm1115_vm12, %v7730_v11, %v1371_v34  ;;  %v1501_v52 = vmul.f32 1.050701, %v1437_v14 }
 0x207   : > { %v7840_v41 = vadd.f32 %v1038_v12, %v7561_v21  ;;  %6463 = vpow2.f32 %v1235_v0  ;;  %v1237_v32 = vmul.f32 1.442695, %v7832_v6  ;;  %v1376_v42 = vmul.f32 1.6732632, %v5268_v37 }
 0x208   : > { %v1040_v5 = vpop.f32.mrf.mxu0  ;;  %v6454_v27 = vpop.eup %6453  ;;  %v1377_v44 = vmul.f32 1.6732632, %v5269_v8  ;;  %6465 = vpow2.f32 %v1231_v17  ;;  %v1438_v45 = vsel %vm1118_vm15, %v7741_v7, %v1374_v13  ;;  %v1500_v47 = vmul.f32 1.050701, %v1436_v57 }
 0x209   : > { %v7849_v35 = vadd.f32 %v1040_v5, %v7564_v22  ;;  %v1239_v43 = vmul.f32 1.442695, %v7840_v41  ;;  %vm1122_vm3 = vcmp.gt.f32.partialorder %v7770_v51, 0.0  ;;  %v5270_v11 = vadd.f32 -1.0, %v6452_v28 }
 0x20a   : > { %v1042_v15 = vpop.f32.mrf.mxu0  ;;  %v6456_v46 = vpop.eup %6455  ;;  %v1502_v49 = vmul.f32 1.050701, %v1438_v45  ;;  %v1499_v19 = vmul.f32 1.050701, %v1435_v4  ;;  %v1375_v33 = vmul.f32 1.6732632, %v5267_v29  ;;  %6467 = vpow2.f32 %v1237_v32 }
 0x20b   : > { %v7859_v30 = vadd.f32 %v1042_v15, %v7561_v21  ;;  %v1241_v58 = vmul.f32 1.442695, %v7849_v35  ;;  %v1440_v7 = vsel %vm1120_vm0, %v7751_v23, %v1376_v42  ;;  %v5271_v9 = vadd.f32 -1.0, %v6454_v27 }
 0x20c   : > { %v1044_v25 = vpop.f32.mrf.mxu0  ;;  %v6458_v54 = vpop.eup %6457  ;;  %6469 = vpow2.f32 %v1239_v43  ;;  %v1550_v59 = vpack.c.bf16 %v1502_v49, %v1500_v47  ;;  %v1441_v60 = vsel %vm1121_vm1, %v7762_v40, %v1377_v44  ;;  %v1549_v61 = vpack.c.bf16 %v1501_v52, %v1499_v19 }
 0x20d   : > { %v1243_v1 = vmul.f32 1.442695, %v7859_v30  ;;  %v7871_v3 = vadd.f32 %v1044_v25, %v7564_v22  ;;  %v5272_v53 = vadd.f32 -1.0, %v6456_v46  ;;  %v5273_v36 = vadd.f32 -1.0, %v6458_v54 }
 0x20e   : > { %v1048_v56 = vpop.f32.mrf.mxu0  ;;  %1784 = vmatprep.mubr.bf16.mxu1 %v1550_v59  ;;  %v1378_v23 = vmul.f32 1.6732632, %v5270_v11  ;;  %vm1123_vm4 = vcmp.gt.f32.partialorder %v7780_v63, 0.0  ;;  %vm1124_vm5 = vcmp.gt.f32.partialorder %v7784_v26, 0.0  ;;  %6471 = vpow2.f32 %v1241_v58 }
 0x20f   : > { %1785 = vmatmul.mubr.bf16.gmra.mxu1 %v1549_v61  ;;  %v7879_v40 = vadd.f32 %v1048_v56, %v7561_v21  ;;  %v6460_v31 = vpop.eup %6459  ;;  %v1439_v10 = vsel %vm1119_vm2, %v7759_v24, %v1375_v33  ;;  %v1504_v34 = vmul.f32 1.050701, %v1440_v7  ;;  %v1505_v14 = vmul.f32 1.050701, %v1441_v60 }
 0x210   : > { %v1050_v50 = vpop.f32.mrf.mxu0  ;;  %v1379_v37 = vmul.f32 1.6732632, %v5271_v9  ;;  %6473 = vpow2.f32 %v1243_v1  ;;  %v1245_v15 = vmul.f32 1.442695, %v7871_v3  ;;  %v1442_v17 = vsel %vm1122_vm3, %v7770_v51, %v1378_v23 }
 0x211   : > { %v7874_v55 = vadd.f32 %v1050_v50, %v7564_v22  ;;  %v1380_v0 = vmul.f32 1.6732632, %v5272_v53  ;;  %v1381_v57 = vmul.f32 1.6732632, %v5273_v36  ;;  %v1506_v13 = vmul.f32 1.050701, %v1442_v17 }
 0x212   : > { %v1052_v12 = vpop.f32.mrf.mxu0  ;;  %v6462_v28 = vpop.eup %6461  ;;  %v1503_v29 = vmul.f32 1.050701, %v1439_v10  ;;  %v5274_v32 = vadd.f32 -1.0, %v6460_v31  ;;  %v1247_v4 = vmul.f32 1.442695, %v7879_v40  ;;  %vm1125_vm6 = vcmp.gt.f32.partialorder %v7795_v16, 0.0 }
 0x213   : > { %v1249_v8 = vmul.f32 1.442695, %v7874_v55  ;;  %v7890_v25 = vadd.f32 %v1052_v12, %v7561_v21  ;;  %vm1126_vm7 = vcmp.gt.f32.partialorder %v7802_v39, 0.0  ;;  %v1552_v51 = vpack.c.bf16 %v1506_v13, %v1504_v34 }
 0x214   : > { %v1054_v5 = vpop.f32.mrf.mxu0  ;;  %v6464_v42 = vpop.eup %6463  ;;  %v1443_v56 = vsel %vm1123_vm4, %v7780_v63, %v1379_v37  ;;  %v1551_v27 = vpack.c.bf16 %v1505_v14, %v1503_v29  ;;  %v1444_v46 = vsel %vm1124_vm5, %v7784_v26, %v1380_v0  ;;  %v1445_v47 = vsel %vm1125_vm6, %v7795_v16, %v1381_v57 }
 0x215   : > { %v7894_v52 = vadd.f32 %v1054_v5, %v7564_v22  ;;  %6475 = vpow2.f32 %v1249_v8  ;;  %v1251_v44 = vmul.f32 1.442695, %v7890_v25  ;;  %v6466_v45 = vpop.eup %6465  ;;  %v5276_v11 = vadd.f32 -1.0, %v6462_v28  ;;  %1792 = vmatprep.mubr.bf16.mxu1 %v1552_v51 }
 0x216   : > { %v1058_v38 = vpop.f32.mrf.mxu0  ;;  %6477 = vpow2.f32 %v1245_v15  ;;  %v5277_v54 = vadd.f32 -1.0, %v6464_v42  ;;  %v1382_v19 = vmul.f32 1.6732632, %v5274_v32  ;;  %v1507_v58 = vmul.f32 1.050701, %v1443_v56 }
 0x217   : > { %v1253_v49 = vmul.f32 1.442695, %v7894_v52  ;;  %6479 = vpow2.f32 %v1247_v4  ;;  %1793 = vmatmul.mubr.bf16.gmra.mxu1 %v1551_v27  ;;  %v6468_v33 = vpop.eup %6467  ;;  %vm1127_vm8 = vcmp.gt.f32.partialorder %v7823_v62, 0.0  ;;  %v1508_v9 = vmul.f32 1.050701, %v1444_v46 }
 0x218   : > { %v1060_v24 = vpop.f32.mrf.mxu0  ;;  %6481 = vpow2.f32 %v1251_v44  ;;  %v1509_v59 = vmul.f32 1.050701, %v1445_v47  ;;  %v5275_v12 = vadd.f32 -1.0, %v6466_v45  ;;  %v1384_v60 = vmul.f32 1.6732632, %v5276_v11 }
 0x219   : > { %v7908_v63 = vadd.f32 %v1060_v24, %v7564_v22  ;;  %v6470_v7 = vpop.eup %6469  ;;  %6483 = vpow2.f32 %v1253_v49  ;;  %v7915_v61 = vadd.f32 %v1058_v38, %v7561_v21  ;;  %v1446_v53 = vsel %vm1126_vm7, %v7802_v39, %v1382_v19 }
 0x21a   : > { %v1062_v43 = vpop.f32.mrf.mxu0  ;;  %vm1128_vm9 = vcmp.gt.f32.partialorder %v7813_v48, 0.0  ;;  %v1385_v23 = vmul.f32 1.6732632, %v5277_v54  ;;  %v5278_v5 = vadd.f32 -1.0, %v6468_v33  ;;  %v1510_v31 = vmul.f32 1.050701, %v1446_v53 }
 0x21b   : > { %v7912_v26 = vadd.f32 %v1062_v43, %v7561_v21  ;;  %v1257_v1 = vmul.f32 1.442695, %v7908_v63  ;;  %v6472_v10 = vpop.eup %6471  ;;  %v5279_v34 = vadd.f32 -1.0, %v6470_v7  ;;  %v1383_v15 = vmul.f32 1.6732632, %v5275_v12 }
 0x21c   : > { %v1064_v50 = vpop.f32.mrf.mxu0  ;;  %vm1129_vm10 = vcmp.gt.f32.partialorder %v7826_v2, 0.0  ;;  %vm1130_vm11 = vcmp.gt.f32.partialorder %v7832_v6, 0.0  ;;  %v1554_v39 = vpack.c.bf16 %v1510_v31, %v1508_v9  ;;  %v1448_v17 = vsel %vm1128_vm9, %v7813_v48, %v1384_v60 }
 0x21d   : > { %6485 = vpow2.f32 %v1257_v1  ;;  %v1259_v14 = vmul.f32 1.442695, %v7912_v26  ;;  %v7924_v37 = vadd.f32 %v1064_v50, %v7564_v22  ;;  %v6474_v8 = vpop.eup %6473  ;;  %vm1131_vm12 = vcmp.gt.f32.partialorder %v7840_v41, 0.0 }
 0x21e   : > { %v1068_v16 = vpop.f32.mrf.mxu0  ;;  %v1255_v0 = vmul.f32 1.442695, %v7915_v61  ;;  %v1553_v57 = vpack.c.bf16 %v1509_v59, %v1507_v58  ;;  %v1449_v24 = vsel %vm1129_vm10, %v7826_v2, %v1385_v23  ;;  %vm1132_vm13 = vcmp.gt.f32.partialorder %v7849_v35, 0.0  ;;  %1800 = vmatprep.mubr.bf16.mxu1 %v1554_v39 }
 0x21f   : > { %v5280_v28 = vadd.f32 -1.0, %v6472_v10  ;;  %v1261_v29 = vmul.f32 1.442695, %v7924_v37  ;;  %v1387_v32 = vmul.f32 1.6732632, %v5279_v34  ;;  %vm1133_vm14 = vcmp.gt.f32.partialorder %v7859_v30, 0.0 }
 0x220   : > { %v1070_v36 = vpop.f32.mrf.mxu0  ;;  %1801 = vmatmul.mubr.bf16.gmra.mxu1 %v1553_v57  ;;  %6487 = vpow2.f32 %v1259_v14  ;;  %v1386_v4 = vmul.f32 1.6732632, %v5278_v5  ;;  %v1447_v2 = vsel %vm1127_vm8, %v7823_v62, %v1383_v15  ;;  %v1512_v43 = vmul.f32 1.050701, %v1448_v17 }
 0x221   : > { %v7936_v48 = vadd.f32 %v1070_v36, %v7564_v22  ;;  %v5281_v56 = vadd.f32 -1.0, %v6474_v8  ;;  %6489 = vpow2.f32 %v1261_v29  ;;  %v1513_v44 = vmul.f32 1.050701, %v1449_v24 }
 0x222   : > { %v1072_v38 = vpop.f32.mrf.mxu0  ;;  %v6476_v51 = vpop.eup %6475  ;;  %6491 = vpow2.f32 %v1255_v0  ;;  %v1450_v46 = vsel %vm1130_vm11, %v7832_v6, %v1386_v4  ;;  %v1388_v11 = vmul.f32 1.6732632, %v5280_v28  ;;  %v7946_v49 = vadd.f32 %v1068_v16, %v7561_v21 }
 0x223   : > { %v6478_v27 = vpop.eup %6477  ;;  %v1265_v45 = vmul.f32 1.442695, %v7936_v48  ;;  %v1514_v50 = vmul.f32 1.050701, %v1450_v46  ;;  %v7949_v62 = vadd.f32 %v1072_v38, %v7561_v21  ;;  %v1511_v19 = vmul.f32 1.050701, %v1447_v2 }
 0x224   : > { %v1074_v13 = vpop.f32.mrf.mxu0  ;;  %v6480_v54 = vpop.eup %6479  ;;  %v1451_v33 = vsel %vm1131_vm12, %v7840_v41, %v1387_v32  ;;  %v5284_v58 = vadd.f32 -1.0, %v6476_v51  ;;  %v1389_v9 = vmul.f32 1.6732632, %v5281_v56  ;;  %v5282_v59 = vadd.f32 -1.0, %v6478_v27 }
 0x225   : > { %v7955_v7 = vadd.f32 %v1074_v13, %v7564_v22  ;;  %v6482_v6 = vpop.eup %6481  ;;  %6493 = vpow2.f32 %v1265_v45  ;;  %v1556_v16 = vpack.c.bf16 %v1514_v50, %v1512_v43  ;;  %vm1134_vm15 = vcmp.gt.f32.partialorder %v7871_v3, 0.0 }
 0x226   : > { %v1078_v42 = vpop.f32.mrf.mxu0  ;;  %v6484_v12 = vpop.eup %6483  ;;  %vm1136_vm0 = vcmp.gt.f32.partialorder %v7874_v55, 0.0  ;;  %v1555_v60 = vpack.c.bf16 %v1513_v44, %v1511_v19  ;;  %v1267_v1 = vmul.f32 1.442695, %v7949_v62  ;;  %v1515_v36 = vmul.f32 1.050701, %v1451_v33 }
 0x227   : > { %v1452_v41 = vsel %vm1132_vm13, %v7849_v35, %v1388_v11  ;;  %vm1137_vm1 = vcmp.gt.f32.partialorder %v7890_v25, 0.0  ;;  %vm1138_vm2 = vcmp.gt.f32.partialorder %v7894_v52, 0.0  ;;  %v1263_v23 = vmul.f32 1.442695, %v7946_v49  ;;  %1808 = vmatprep.mubr.bf16.mxu1 %v1556_v16 }
 0x228   : > { %v1080_v47 = vpop.f32.mrf.mxu0  ;;  %v1269_v5 = vmul.f32 1.442695, %v7955_v7  ;;  %v1392_v31 = vmul.f32 1.6732632, %v5284_v58  ;;  %v5285_v10 = vadd.f32 -1.0, %v6482_v6  ;;  %1809 = vmatmul.mubr.bf16.gmra.mxu1 %v1555_v60  ;;  %6495 = vpow2.f32 %v1267_v1 }
 0x229   : > { %v7968_v34 = vadd.f32 %v1080_v47, %v7564_v22  ;;  %v1453_v35 = vsel %vm1133_vm14, %v7859_v30, %v1389_v9  ;;  %vm1135_vm3 = vcmp.gt.f32.partialorder %v7879_v40, 0.0  ;;  %v5286_v38 = vadd.f32 -1.0, %v6484_v12 }
 0x22a   : > { %v1082_v53 = vpop.f32.mrf.mxu0  ;;  %v6486_v14 = vpop.eup %6485  ;;  %vm1140_vm4 = vcmp.gt.f32.partialorder %v7908_v63, 0.0  ;;  %6497 = vpow2.f32 %v1269_v5  ;;  %v1390_v15 = vmul.f32 1.6732632, %v5282_v59  ;;  %v1516_v39 = vmul.f32 1.050701, %v1452_v41 }
 0x22b   : > { %v5283_v8 = vadd.f32 -1.0, %v6480_v54  ;;  %v5288_v17 = vadd.f32 -1.0, %v6486_v14  ;;  %vm1142_vm5 = vcmp.gt.f32.partialorder %v7924_v37, 0.0  ;;  %6499 = vpow2.f32 %v1263_v23 }
 0x22c   : > { %v1084_v0 = vpop.f32.mrf.mxu0  ;;  %v7977_v57 = vadd.f32 %v1078_v42, %v7561_v21  ;;  %v1273_v13 = vmul.f32 1.442695, %v7968_v34  ;;  %v1454_v30 = vsel %vm1134_vm15, %v7871_v3, %v1390_v15  ;;  %v1517_v24 = vmul.f32 1.050701, %v1453_v35  ;;  %v6283_v35 = vld [vmem:[#allocation8 + $0x8] sm:$0xff]  }
 0x22d   : > { %v1456_v28 = vsel %vm1136_vm0, %v7874_v55, %v1392_v31  ;;  %v1393_v29 = vmul.f32 1.6732632, %v5285_v10  ;;  %v7987_v32 = vadd.f32 %v1082_v53, %v7561_v21  ;;  %v6488_v4 = vpop.eup %6487  ;;  %v1518_v51 = vmul.f32 1.050701, %v1454_v30  ;;  %5819 = vmatprep.subr.bf16.mxu1 %v6283_v35 }
 0x22e   : > { %6501 = vpow2.f32 %v1273_v13  ;;  %v7990_v42 = vadd.f32 %v1084_v0, %v7564_v22  ;;  %v1394_v2 = vmul.f32 1.6732632, %v5286_v38  ;;  %v6490_v43 = vpop.eup %6489  ;;  %v1391_v56 = vmul.f32 1.6732632, %v5283_v8  ;;  %5820 = vmatpush3.bf16.msra.mxu1 %v6283_v35 }
 0x22f   : > { %v1396_v27 = vmul.f32 1.6732632, %v5288_v17  ;;  %v1275_v3 = vmul.f32 1.442695, %v7987_v32  ;;  %v6492_v44 = vpop.eup %6491  ;;  %v1520_v45 = vmul.f32 1.050701, %v1456_v28  ;;  %v1558_v47 = vpack.c.bf16 %v1518_v51, %v1516_v39 }
 0x230   : > { %v5290_v46 = vadd.f32 -1.0, %v6490_v43  ;;  %v1271_v55 = vmul.f32 1.442695, %v7977_v57  ;;  %v1457_v21 = vsel %vm1137_vm1, %v7890_v25, %v1393_v29  ;;  %v1557_v11 = vpack.c.bf16 %v1517_v24, %v1515_v36 }
 0x231   : > { %v1277_v22 = vmul.f32 1.442695, %v7990_v42  ;;  %v1458_v50 = vsel %vm1138_vm2, %v7894_v52, %v1394_v2  ;;  %v5289_v54 = vadd.f32 -1.0, %v6488_v4  ;;  %1816 = vmatprep.mubr.bf16.mxu1 %v1558_v47  ;;  %6503 = vpow2.f32 %v1275_v3 }
 0x232   : > { %v1522_v19 = vmul.f32 1.050701, %v1458_v50  ;;  %v1398_v33 = vmul.f32 1.6732632, %v5290_v46  ;;  %v6494_v58 = vpop.eup %6493  ;;  %v1455_v6 = vsel %vm1135_vm3, %v7879_v40, %v1391_v56  ;;  %v5287_v9 = vadd.f32 -1.0, %v6492_v44  ;;  %1817 = vmatmul.mubr.bf16.gmra.mxu1 %v1557_v11  ;;  %v6284_v44 = vld [vmem:[#allocation8] sm:$0xff]  }
 0x233   : > { %v1460_v25 = vsel %vm1140_vm4, %v7908_v63, %v1396_v27  ;;  %6505 = vpow2.f32 %v1277_v22  ;;  %v5292_v59 = vadd.f32 -1.0, %v6494_v58  ;;  %v1521_v12 = vmul.f32 1.050701, %v1457_v21  ;;  %5821 = vmatprep.subr.bf16.mxu1 %v6284_v44 }
 0x234   : > { %6507 = vpow2.f32 %v1271_v55  ;;  %v1560_v52 = vpack.c.bf16 %v1522_v19, %v1520_v45  ;;  %v1462_v16 = vsel %vm1142_vm5, %v7924_v37, %v1398_v33  ;;  %v1524_v53 = vmul.f32 1.050701, %v1460_v25  ;;  %5822 = vmatpush3.bf16.msra.mxu1 %v6284_v44 }
 0x235   : > { %v1526_v60 = vmul.f32 1.050701, %v1462_v16  ;;  %v6496_v1 = vpop.eup %6495  ;;  %v1397_v36 = vmul.f32 1.6732632, %v5289_v54  ;;  %v1519_v41 = vmul.f32 1.050701, %v1455_v6 }
 0x236   : > { %1824 = vmatprep.mubr.bf16.mxu1 %v1560_v52  ;;  %v1400_v23 = vmul.f32 1.6732632, %v5292_v59  ;;  %v1395_v5 = vmul.f32 1.6732632, %v5287_v9  ;;  %vm1141_vm6 = vcmp.gt.f32.partialorder %v7912_v26, 0.0  ;;  %vm1144_vm7 = vcmp.gt.f32.partialorder %v7936_v48, 0.0 }
 0x237   : > { %v6498_v40 = vpop.eup %6497  ;;  %v1562_v31 = vpack.c.bf16 %v1526_v60, %v1524_v53  ;;  %v1559_v14 = vpack.c.bf16 %v1521_v12, %v1519_v41  ;;  %v1461_v38 = vsel %vm1141_vm6, %v7912_v26, %v1397_v36  ;;  %v5293_v37 = vadd.f32 -1.0, %v6496_v1  ;;  %v8033_v52 = vld [vmem:[%s9349_s9 + $0x1] ss:$0 sm:$0xff] }
 0x238   : > { %v5294_v63 = vadd.f32 -1.0, %v6498_v40  ;;  %v6500_v10 = vpop.eup %6499  ;;  %vm1139_vm8 = vcmp.gt.f32.partialorder %v7915_v61, 0.0  ;;  %v1464_v8 = vsel %vm1144_vm7, %v7936_v48, %v1400_v23  ;;  %vm1146_vm9 = vcmp.gt.f32.partialorder %v7955_v7, 0.0 }
 0x239   : > { %v1459_v17 = vsel %vm1139_vm8, %v7915_v61, %v1395_v5  ;;  %v5291_v0 = vadd.f32 -1.0, %v6500_v10  ;;  %v1525_v30 = vmul.f32 1.050701, %v1461_v38  ;;  %v1528_v28 = vmul.f32 1.050701, %v1464_v8 }
 0x23a   : > { %v1402_v15 = vmul.f32 1.6732632, %v5294_v63  ;;  %1825 = vmatmul.mubr.bf16.gmra.mxu1 %v1559_v14  ;;  %v1401_v29 = vmul.f32 1.6732632, %v5293_v37  ;;  %v1523_v51 = vmul.f32 1.050701, %v1459_v17 }
 0x23b   : > { %v6502_v39 = vpop.eup %6501  ;;  %1832 = vmatprep.mubr.bf16.mxu1 %v1562_v31  ;;  %v1399_v43 = vmul.f32 1.6732632, %v5291_v0  ;;  %vm1145_vm10 = vcmp.gt.f32.partialorder %v7949_v62, 0.0  ;;  %vm1148_vm11 = vcmp.gt.f32.partialorder %v7968_v34, 0.0  ;;  %vm1143_vm12 = vcmp.gt.f32.partialorder %v7946_v49, 0.0 }
 0x23c   : > { %v5296_v13 = vadd.f32 -1.0, %v6502_v39  ;;  %v1466_v26 = vsel %vm1146_vm9, %v7955_v7, %v1402_v15  ;;  %v1561_v3 = vpack.c.bf16 %v1525_v30, %v1523_v51  ;;  %v1465_v45 = vsel %vm1145_vm10, %v7949_v62, %v1401_v29  ;;  %v6285_v30 = vld [vmem:[#allocation10 + $0x38] sm:$0xff]  }
 0x23d   : > { %v1530_v24 = vmul.f32 1.050701, %v1466_v26  ;;  %v1463_v47 = vsel %vm1143_vm12, %v7946_v49, %v1399_v43  ;;  %vm1150_vm13 = vcmp.gt.f32.partialorder %v7990_v42, 0.0  ;;  %v1529_v11 = vmul.f32 1.050701, %v1465_v45  ;;  %5855 = vmatprep.subr.bf16.mxu0 %v6285_v30 }
 0x23e   : > { %v6504_v4 = vpop.eup %6503  ;;  %v1404_v2 = vmul.f32 1.6732632, %v5296_v13  ;;  %v1527_v19 = vmul.f32 1.050701, %v1463_v47  ;;  %vm1149_vm14 = vcmp.gt.f32.partialorder %v7987_v32, 0.0  ;;  %vm1147_vm15 = vcmp.gt.f32.partialorder %v7977_v57, 0.0  ;;  %5856 = vmatpush3.bf16.msra.mxu0 %v6285_v30 }
 0x23f   : > { %v1564_v56 = vpack.c.bf16 %v1530_v24, %v1528_v28  ;;  %v5297_v7 = vadd.f32 -1.0, %v6504_v4 }
 0x240   : > { %v6506_v48 = vpop.eup %6505  ;;  %v1468_v46 = vsel %vm1148_vm11, %v7968_v34, %v1404_v2  ;;  %v1563_v34 = vpack.c.bf16 %v1529_v11, %v1527_v19 }
 0x241   : > { %v6508_v27 = vpop.eup %6507  ;;  %v5298_v61 = vadd.f32 -1.0, %v6506_v48  ;;  %v1532_v22 = vmul.f32 1.050701, %v1468_v46  ;;  %v1405_v50 = vmul.f32 1.6732632, %v5297_v7 }
 0x242   : > { %1833 = vmatmul.mubr.bf16.gmra.mxu1 %v1561_v3  ;;  %v5295_v21 = vadd.f32 -1.0, %v6508_v27 }
 0x243   : > { %v1406_v55 = vmul.f32 1.6732632, %v5298_v61  ;;  %1840 = vmatprep.mubr.bf16.mxu1 %v1564_v56  ;;  %v1469_v6 = vsel %vm1149_vm14, %v7987_v32, %v1405_v50 }
 0x244   : > { %v1403_v33 = vmul.f32 1.6732632, %v5295_v21  ;;  %v1533_v9 = vmul.f32 1.050701, %v1469_v6  ;;  %v6287_v6 = vld [vmem:[#allocation10 + $0x28] sm:$0xff]  }
 0x245   : > { %v1470_v62 = vsel %vm1150_vm13, %v7990_v42, %v1406_v55 }
 0x246   : > { %v1534_v54 = vmul.f32 1.050701, %v1470_v62  ;;  %v1467_v49 = vsel %vm1147_vm15, %v7977_v57, %v1403_v33 }
 0x247   : > { %v1531_v25 = vmul.f32 1.050701, %v1467_v49 }
 0x248   : > { %v1566_v58 = vpack.c.bf16 %v1534_v54, %v1532_v22 }
 0x249   : > { %v1565_v42 = vpack.c.bf16 %v1533_v9, %v1531_v25 }
 0x24a   : > { %1841 = vmatmul.mubr.bf16.gmra.mxu1 %v1563_v34  ;;  %v6286_v34 = vld [vmem:[#allocation10 + $0x30] sm:$0xff]  }
 0x24b   : > { %1848 = vmatprep.mubr.bf16.mxu1 %v1566_v58  ;;  %5857 = vmatprep.subr.bf16.mxu0 %v6286_v34 }
 0x24c   : > { %5858 = vmatpush3.bf16.msra.mxu0 %v6286_v34 }
 0x24d   : > { %5859 = vmatprep.subr.bf16.mxu0 %v6287_v6 }
 0x250   : > { %5860 = vmatpush3.bf16.msra.mxu0 %v6287_v6 }
 0x252   : > { %1849 = vmatmul.mubr.bf16.gmra.mxu1 %v1565_v42 }
 0x291   : > { %v5615_v59 = vpop.f32.mrf.mxu1 }
 0x293   : > { %v5616_v16 = vpop.f32.mrf.mxu1 }
 0x294   : > { %v5617_v12 = vadd.f32 %v5616_v16, %v5615_v59 }
 0x295   : > { %v5618_v60 = vpop.f32.mrf.mxu1 }
 0x296   : > { %v1731_v32 = vadd.f32 %v5617_v12, %v8033_v52 }
 0x297   : > { %v5619_v1 = vpop.f32.mrf.mxu1 }
 0x298   : > { %v1889_v53 = vmul.f32 1.442695, %v1731_v32  ;;  %v5620_v36 = vadd.f32 %v5619_v1, %v5618_v60  ;;  %vm1857_vm0 = vcmp.gt.f32.partialorder %v1731_v32, 0.0  ;;  %v6288_v1 = vld [vmem:[#allocation10 + $0x20] sm:$0xff]  }
 0x299   : > { %5861 = vmatprep.subr.bf16.mxu0 %v6288_v1 }
 0x29a   : > { %6509 = vpow2.f32 %v1889_v53  ;;  %v1734_v57 = vadd.f32 %v5620_v36, %v8033_v52  ;;  %5862 = vmatpush3.bf16.msra.mxu0 %v6288_v1 }
 0x29b   : > { %v5621_v41 = vpop.f32.mrf.mxu1 }
 0x29c   : > { %v1891_v40 = vmul.f32 1.442695, %v1734_v57  ;;  %vm1858_vm1 = vcmp.gt.f32.partialorder %v1734_v57, 0.0 }
 0x29d   : > { %v5622_v23 = vpop.f32.mrf.mxu1 }
 0x29e   : > { %6511 = vpow2.f32 %v1891_v40  ;;  %v5623_v5 = vadd.f32 %v5622_v23, %v5621_v41 }
 0x29f   : > { %v5624_v63 = vpop.f32.mrf.mxu1 }
 0x2a0   : > { %v1739_v31 = vadd.f32 %v5623_v5, %v8033_v52 }
 0x2a1   : > { %v5625_v10 = vpop.f32.mrf.mxu1 }
 0x2a2   : > { %v1893_v14 = vmul.f32 1.442695, %v1739_v31  ;;  %v5626_v35 = vadd.f32 %v5625_v10, %v5624_v63  ;;  %vm1859_vm2 = vcmp.gt.f32.partialorder %v1739_v31, 0.0 }
 0x2a3   : > { %v5627_v38 = vpop.f32.mrf.mxu1 }
 0x2a4   : > { %6513 = vpow2.f32 %v1893_v14  ;;  %v8039_v37 = vadd.f32 %v5626_v35, %v8033_v52 }
 0x2a5   : > { %v5628_v15 = vpop.f32.mrf.mxu1 }
 0x2a6   : > { %v1895_v8 = vmul.f32 1.442695, %v8039_v37  ;;  %v5629_v17 = vadd.f32 %v5628_v15, %v5627_v38  ;;  %vm1860_vm3 = vcmp.gt.f32.partialorder %v8039_v37, 0.0  ;;  %v6289_v38 = vld [vmem:[#allocation10 + $0x18] sm:$0xff]  }
 0x2a7   : > { %v6510_v39 = vpop.eup %6509  ;;  %v5630_v13 = vpop.f32.mrf.mxu1  ;;  %5863 = vmatprep.subr.bf16.mxu0 %v6289_v38 }
 0x2a8   : > { %v5315_v0 = vadd.f32 -1.0, %v6510_v39  ;;  %6515 = vpow2.f32 %v1895_v8  ;;  %v8043_v26 = vadd.f32 %v5629_v17, %v8033_v52  ;;  %5864 = vmatpush3.bf16.msra.mxu0 %v6289_v38 }
 0x2a9   : > { %v5631_v24 = vpop.f32.mrf.mxu1 }
 0x2aa   : > { %v1985_v28 = vmul.f32 1.6732632, %v5315_v0  ;;  %v1897_v4 = vmul.f32 1.442695, %v8043_v26  ;;  %v5632_v51 = vadd.f32 %v5631_v24, %v5630_v13  ;;  %vm1861_vm4 = vcmp.gt.f32.partialorder %v8043_v26, 0.0  ;;  %v6290_v24 = vld [vmem:[#allocation10 + $0x10] sm:$0xff]  }
 0x2ab   : > { %v6512_v29 = vpop.eup %6511  ;;  %v5633_v43 = vpop.f32.mrf.mxu1  ;;  %5865 = vmatprep.subr.bf16.mxu0 %v6290_v24 }
 0x2ac   : > { %v5316_v2 = vadd.f32 -1.0, %v6512_v29  ;;  %6517 = vpow2.f32 %v1897_v4  ;;  %v8047_v48 = vadd.f32 %v5632_v51, %v8033_v52  ;;  %v2017_v27 = vsel %vm1857_vm0, %v1731_v32, %v1985_v28  ;;  %5866 = vmatpush3.bf16.msra.mxu0 %v6290_v24 }
 0x2ad   : > { %v5634_v3 = vpop.f32.mrf.mxu1  ;;  %v2049_v7 = vmul.f32 1.050701, %v2017_v27 }
 0x2ae   : > { %v1986_v56 = vmul.f32 1.6732632, %v5316_v2  ;;  %v1899_v61 = vmul.f32 1.442695, %v8047_v48  ;;  %v5635_v45 = vadd.f32 %v5634_v3, %v5633_v43  ;;  %vm1862_vm5 = vcmp.gt.f32.partialorder %v8047_v48, 0.0 }
 0x2af   : > { %v5636_v47 = vpop.f32.mrf.mxu1 }
 0x2b0   : > { %v2018_v44 = vsel %vm1858_vm1, %v1734_v57, %v1986_v56  ;;  %6519 = vpow2.f32 %v1899_v61  ;;  %v8051_v11 = vadd.f32 %v5635_v45, %v8033_v52 }
 0x2b1   : > { %v2050_v46 = vmul.f32 1.050701, %v2018_v44  ;;  %v6514_v55 = vpop.eup %6513  ;;  %v5637_v22 = vpop.f32.mrf.mxu1 }
 0x2b2   : > { %v5317_v21 = vadd.f32 -1.0, %v6514_v55  ;;  %v1901_v54 = vmul.f32 1.442695, %v8051_v11  ;;  %v5638_v19 = vadd.f32 %v5637_v22, %v5636_v47  ;;  %vm1863_vm6 = vcmp.gt.f32.partialorder %v8051_v11, 0.0 }
 0x2b3   : > { %v2081_v62 = vpack.c.bf16 %v2050_v46, %v2049_v7 }
 0x2b4   : > { %v1987_v50 = vmul.f32 1.6732632, %v5317_v21  ;;  %6521 = vpow2.f32 %v1901_v54  ;;  %v8055_v9 = vadd.f32 %v5638_v19, %v8033_v52 }
 0x2b5   : > { %5823 = vmatprep.mubr.bf16.mxu1 %v2081_v62  ;;  %v6516_v33 = vpop.eup %6515  ;;  %v5639_v58 = vpop.f32.mrf.mxu1 }
 0x2b6   : > { %v5318_v49 = vadd.f32 -1.0, %v6516_v33  ;;  %v2019_v42 = vsel %vm1859_vm2, %v1739_v31, %v1987_v50  ;;  %v1903_v16 = vmul.f32 1.442695, %v8055_v9  ;;  %vm1864_vm7 = vcmp.gt.f32.partialorder %v8055_v9, 0.0 }
 0x2b7   : > { %v5640_v25 = vpop.f32.mrf.mxu1  ;;  %v2051_v40 = vmul.f32 1.050701, %v2019_v42 }
 0x2b8   : > { %v1988_v59 = vmul.f32 1.6732632, %v5318_v49  ;;  %v5641_v12 = vadd.f32 %v5640_v25, %v5639_v58  ;;  %6523 = vpow2.f32 %v1903_v16 }
 0x2b9   : > { %v6518_v60 = vpop.eup %6517  ;;  %v5642_v32 = vpop.f32.mrf.mxu1 }
 0x2ba   : > { %v2020_v53 = vsel %vm1860_vm3, %v8039_v37, %v1988_v59  ;;  %v5319_v36 = vadd.f32 -1.0, %v6518_v60  ;;  %v8061_v57 = vadd.f32 %v5641_v12, %v8033_v52 }
 0x2bb   : > { %v2052_v41 = vmul.f32 1.050701, %v2020_v53  ;;  %v5643_v23 = vpop.f32.mrf.mxu1 }
 0x2bc   : > { %v1905_v5 = vmul.f32 1.442695, %v8061_v57  ;;  %v5644_v63 = vadd.f32 %v5643_v23, %v5642_v32  ;;  %v1989_v31 = vmul.f32 1.6732632, %v5319_v36  ;;  %vm1865_vm8 = vcmp.gt.f32.partialorder %v8061_v57, 0.0 }
 0x2bd   : > { %v6520_v10 = vpop.eup %6519  ;;  %v2082_v14 = vpack.c.bf16 %v2052_v41, %v2051_v40  ;;  %v5645_v35 = vpop.f32.mrf.mxu1 }
 0x2be   : > { %6525 = vpow2.f32 %v1905_v5  ;;  %v8065_v37 = vadd.f32 %v5644_v63, %v8033_v52  ;;  %v5320_v15 = vadd.f32 -1.0, %v6520_v10  ;;  %v2021_v13 = vsel %vm1861_vm4, %v8043_v26, %v1989_v31 }
 0x2bf   : > { %v5646_v39 = vpop.f32.mrf.mxu1  ;;  %5824 = vmatmul.mubr.bf16.vlgmr.msra.gmra.mxu1 %v2082_v14  ;;  %v2053_v2 = vmul.f32 1.050701, %v2021_v13 }
 0x2c0   : > { %v1907_v8 = vmul.f32 1.442695, %v8065_v37  ;;  %v5647_v17 = vadd.f32 %v5646_v39, %v5645_v35  ;;  %v1990_v0 = vmul.f32 1.6732632, %v5320_v15  ;;  %vm1866_vm9 = vcmp.gt.f32.partialorder %v8065_v37, 0.0 }
 0x2c1   : > { %v5648_v30 = vpop.f32.mrf.mxu1  ;;  %v6522_v4 = vpop.eup %6521 }
 0x2c2   : > { %6527 = vpow2.f32 %v1907_v8  ;;  %v8072_v28 = vadd.f32 %v5647_v17, %v8033_v52  ;;  %v2022_v29 = vsel %vm1862_vm5, %v8047_v48, %v1990_v0  ;;  %v5321_v56 = vadd.f32 -1.0, %v6522_v4 }
 0x2c3   : > { %v5649_v51 = vpop.f32.mrf.mxu1  ;;  %v2054_v43 = vmul.f32 1.050701, %v2022_v29 }
 0x2c4   : > { %v1909_v27 = vmul.f32 1.442695, %v8072_v28  ;;  %v5650_v26 = vadd.f32 %v5649_v51, %v5648_v30  ;;  %v1991_v45 = vmul.f32 1.6732632, %v5321_v56  ;;  %vm1867_vm10 = vcmp.gt.f32.partialorder %v8072_v28, 0.0 }
 0x2c5   : > { %v5651_v61 = vpop.f32.mrf.mxu1  ;;  %v2083_v3 = vpack.c.bf16 %v2054_v43, %v2053_v2  ;;  %v6524_v7 = vpop.eup %6523 }
 0x2c6   : > { %6529 = vpow2.f32 %v1909_v27  ;;  %v8077_v44 = vadd.f32 %v5650_v26, %v8033_v52  ;;  %v5322_v47 = vadd.f32 -1.0, %v6524_v7  ;;  %v2023_v50 = vsel %vm1863_vm6, %v8051_v11, %v1991_v45 }
 0x2c7   : > { %v5652_v46 = vpop.f32.mrf.mxu1  ;;  %5827 = vmatprep.mubr.bf16.mxu1 %v2083_v3  ;;  %v2055_v49 = vmul.f32 1.050701, %v2023_v50 }
 0x2c8   : > { %v1911_v48 = vmul.f32 1.442695, %v8077_v44  ;;  %v5653_v55 = vadd.f32 %v5652_v46, %v5651_v61  ;;  %v1992_v22 = vmul.f32 1.6732632, %v5322_v47  ;;  %vm1868_vm11 = vcmp.gt.f32.partialorder %v8077_v44, 0.0 }
 0x2c9   : > { %v5654_v21 = vpop.f32.mrf.mxu1 }
 0x2ca   : > { %6531 = vpow2.f32 %v1911_v48  ;;  %v8082_v62 = vadd.f32 %v5653_v55, %v8033_v52  ;;  %v2024_v6 = vsel %vm1864_vm7, %v8055_v9, %v1992_v22 }
 0x2cb   : > { %v6526_v54 = vpop.eup %6525  ;;  %v5655_v19 = vpop.f32.mrf.mxu1  ;;  %v2056_v59 = vmul.f32 1.050701, %v2024_v6 }
 0x2cc   : > { %v5323_v33 = vadd.f32 -1.0, %v6526_v54  ;;  %v1913_v58 = vmul.f32 1.442695, %v8082_v62  ;;  %v5656_v34 = vadd.f32 %v5655_v19, %v5654_v21  ;;  %vm1869_vm12 = vcmp.gt.f32.partialorder %v8082_v62, 0.0 }
 0x2cd   : > { %v2084_v32 = vpack.c.bf16 %v2056_v59, %v2055_v49 }
 0x2ce   : > { %6533 = vpow2.f32 %v1913_v58  ;;  %v8089_v25 = vadd.f32 %v5656_v34, %v8033_v52  ;;  %v1993_v16 = vmul.f32 1.6732632, %v5323_v33 }
 0x2cf   : > { %v5657_v42 = vpop.f32.mrf.mxu1  ;;  %v6528_v12 = vpop.eup %6527  ;;  %5828 = vmatmul.mubr.bf16.gmra.mxu1 %v2084_v32 }
 0x2d0   : > { %v1915_v11 = vmul.f32 1.442695, %v8089_v25  ;;  %v5324_v1 = vadd.f32 -1.0, %v6528_v12  ;;  %v2025_v40 = vsel %vm1865_vm8, %v8061_v57, %v1993_v16  ;;  %vm1870_vm13 = vcmp.gt.f32.partialorder %v8089_v25, 0.0 }
 0x2d1   : > { %v5658_v60 = vpop.f32.mrf.mxu1  ;;  %v2057_v35 = vmul.f32 1.050701, %v2025_v40 }
 0x2d2   : > { %v5659_v53 = vadd.f32 %v5658_v60, %v5657_v42  ;;  %6535 = vpow2.f32 %v1915_v11  ;;  %v1994_v9 = vmul.f32 1.6732632, %v5324_v1 }
 0x2d3   : > { %v5660_v36 = vpop.f32.mrf.mxu1  ;;  %v6530_v41 = vpop.eup %6529 }
 0x2d4   : > { %v8096_v23 = vadd.f32 %v5659_v53, %v8033_v52  ;;  %v5325_v5 = vadd.f32 -1.0, %v6530_v41  ;;  %v2026_v31 = vsel %vm1866_vm9, %v8065_v37, %v1994_v9 }
 0x2d5   : > { %v5661_v63 = vpop.f32.mrf.mxu1  ;;  %v2058_v38 = vmul.f32 1.050701, %v2026_v31 }
 0x2d6   : > { %v1917_v10 = vmul.f32 1.442695, %v8096_v23  ;;  %v5662_v14 = vadd.f32 %v5661_v63, %v5660_v36  ;;  %v1995_v39 = vmul.f32 1.6732632, %v5325_v5  ;;  %vm1871_vm14 = vcmp.gt.f32.partialorder %v8096_v23, 0.0 }
 0x2d7   : > { %v5663_v15 = vpop.f32.mrf.mxu1  ;;  %v6532_v8 = vpop.eup %6531  ;;  %v2085_v17 = vpack.c.bf16 %v2058_v38, %v2057_v35 }
 0x2d8   : > { %6537 = vpow2.f32 %v1917_v10  ;;  %v8101_v57 = vadd.f32 %v5662_v14, %v8033_v52  ;;  %v5326_v13 = vadd.f32 -1.0, %v6532_v8  ;;  %v2027_v4 = vsel %vm1867_vm10, %v8072_v28, %v1995_v39 }
 0x2d9   : > { %v5664_v0 = vpop.f32.mrf.mxu1  ;;  %5831 = vmatprep.mubr.bf16.mxu1 %v2085_v17  ;;  %v2059_v3 = vmul.f32 1.050701, %v2027_v4 }
 0x2da   : > { %v1919_v30 = vmul.f32 1.442695, %v8101_v57  ;;  %v5665_v37 = vadd.f32 %v5664_v0, %v5663_v15  ;;  %v1996_v29 = vmul.f32 1.6732632, %v5326_v13  ;;  %vm1872_vm15 = vcmp.gt.f32.partialorder %v8101_v57, 0.0 }
 0x2db   : > { %v5666_v24 = vpop.f32.mrf.mxu1  ;;  %v6534_v51 = vpop.eup %6533 }
 0x2dc   : > { %6539 = vpow2.f32 %v1919_v30  ;;  %v8108_v2 = vadd.f32 %v5665_v37, %v8033_v52  ;;  %v5327_v43 = vadd.f32 -1.0, %v6534_v51  ;;  %v2028_v27 = vsel %vm1868_vm11, %v8077_v44, %v1996_v29 }
 0x2dd   : > { %v5667_v56 = vpop.f32.mrf.mxu1  ;;  %v2060_v45 = vmul.f32 1.050701, %v2028_v27 }
 0x2de   : > { %v1921_v26 = vmul.f32 1.442695, %v8108_v2  ;;  %v5668_v61 = vadd.f32 %v5667_v56, %v5666_v24  ;;  %v1997_v7 = vmul.f32 1.6732632, %v5327_v43  ;;  %vm1873_vm0 = vcmp.gt.f32.partialorder %v8108_v2, 0.0 }
 0x2df   : > { %v6536_v46 = vpop.eup %6535  ;;  %v2086_v55 = vpack.c.bf16 %v2060_v45, %v2059_v3 }
 0x2e0   : > { %6541 = vpow2.f32 %v1921_v26  ;;  %v8113_v28 = vadd.f32 %v5668_v61, %v8033_v52  ;;  %v5669_v48 = vpop.f32.mrf.mxu1  ;;  %v5328_v47 = vadd.f32 -1.0, %v6536_v46  ;;  %v2029_v54 = vsel %vm1869_vm12, %v8082_v62, %v1997_v7 }
 0x2e1   : > { %5832 = vmatmul.mubr.bf16.gmra.mxu1 %v2086_v55  ;;  %v2061_v42 = vmul.f32 1.050701, %v2029_v54 }
 0x2e2   : > { %v1923_v21 = vmul.f32 1.442695, %v8113_v28  ;;  %v5670_v22 = vpop.f32.mrf.mxu1  ;;  %v1998_v50 = vmul.f32 1.6732632, %v5328_v47  ;;  %vm1874_vm1 = vcmp.gt.f32.partialorder %v8113_v28, 0.0 }
 0x2e3   : > { %v5671_v44 = vadd.f32 %v5670_v22, %v5669_v48 }
 0x2e4   : > { %6543 = vpow2.f32 %v1923_v21  ;;  %v5672_v19 = vpop.f32.mrf.mxu1  ;;  %v2030_v34 = vsel %vm1870_vm13, %v8089_v25, %v1998_v50 }
 0x2e5   : > { %v6538_v33 = vpop.eup %6537  ;;  %v8120_v58 = vadd.f32 %v5671_v44, %v8033_v52  ;;  %v2062_v59 = vmul.f32 1.050701, %v2030_v34 }
 0x2e6   : > { %v5329_v6 = vadd.f32 -1.0, %v6538_v33  ;;  %v5673_v49 = vpop.f32.mrf.mxu1 }
 0x2e7   : > { %v1925_v16 = vmul.f32 1.442695, %v8120_v58  ;;  %v5674_v12 = vadd.f32 %v5673_v49, %v5672_v19  ;;  %v2087_v60 = vpack.c.bf16 %v2062_v59, %v2061_v42  ;;  %vm1875_vm2 = vcmp.gt.f32.partialorder %v8120_v58, 0.0 }
 0x2e8   : > { %v5675_v11 = vpop.f32.mrf.mxu1  ;;  %v1999_v62 = vmul.f32 1.6732632, %v5329_v6 }
 0x2e9   : > { %v6540_v32 = vpop.eup %6539  ;;  %6545 = vpow2.f32 %v1925_v16  ;;  %v8125_v1 = vadd.f32 %v5674_v12, %v8033_v52  ;;  %5835 = vmatprep.mubr.bf16.mxu1 %v2087_v60 }
 0x2ea   : > { %v5676_v53 = vpop.f32.mrf.mxu1  ;;  %v5330_v36 = vadd.f32 -1.0, %v6540_v32  ;;  %v2031_v5 = vsel %vm1871_vm14, %v8096_v23, %v1999_v62 }
 0x2eb   : > { %v1927_v25 = vmul.f32 1.442695, %v8125_v1  ;;  %v5677_v9 = vadd.f32 %v5676_v53, %v5675_v11  ;;  %v2063_v39 = vmul.f32 1.050701, %v2031_v5  ;;  %vm1876_vm3 = vcmp.gt.f32.partialorder %v8125_v1, 0.0 }
 0x2ec   : > { %v5678_v40 = vpop.f32.mrf.mxu1  ;;  %v2000_v41 = vmul.f32 1.6732632, %v5330_v36 }
 0x2ed   : > { %v6542_v63 = vpop.eup %6541  ;;  %6547 = vpow2.f32 %v1927_v25  ;;  %v8132_v31 = vadd.f32 %v5677_v9, %v8033_v52 }
 0x2ee   : > { %v5331_v10 = vadd.f32 -1.0, %v6542_v63  ;;  %v5679_v14 = vpop.f32.mrf.mxu1  ;;  %v2032_v35 = vsel %vm1872_vm15, %v8101_v57, %v2000_v41 }
 0x2ef   : > { %v1929_v38 = vmul.f32 1.442695, %v8132_v31  ;;  %v5680_v15 = vadd.f32 %v5679_v14, %v5678_v40  ;;  %v2064_v8 = vmul.f32 1.050701, %v2032_v35  ;;  %vm1877_vm4 = vcmp.gt.f32.partialorder %v8132_v31, 0.0 }
 0x2f0   : > { %v2001_v17 = vmul.f32 1.6732632, %v5331_v10 }
 0x2f1   : > { %v6544_v0 = vpop.eup %6543  ;;  %6549 = vpow2.f32 %v1929_v38  ;;  %v8137_v23 = vadd.f32 %v5680_v15, %v8033_v52  ;;  %v2088_v13 = vpack.c.bf16 %v2064_v8, %v2063_v39 }
 0x2f2   : > { %v5681_v30 = vpop.f32.mrf.mxu1  ;;  %v5332_v37 = vadd.f32 -1.0, %v6544_v0  ;;  %v2033_v4 = vsel %vm1873_vm0, %v8108_v2, %v2001_v17 }
 0x2f3   : > { %v1931_v24 = vmul.f32 1.442695, %v8137_v23  ;;  %5836 = vmatmul.mubr.bf16.gmra.mxu1 %v2088_v13  ;;  %v2065_v3 = vmul.f32 1.050701, %v2033_v4  ;;  %vm1878_vm5 = vcmp.gt.f32.partialorder %v8137_v23, 0.0 }
 0x2f4   : > { %v5682_v57 = vpop.f32.mrf.mxu1  ;;  %v2002_v29 = vmul.f32 1.6732632, %v5332_v37 }
 0x2f5   : > { %6551 = vpow2.f32 %v1931_v24  ;;  %v5683_v51 = vadd.f32 %v5682_v57, %v5681_v30 }
 0x2f6   : > { %v6546_v43 = vpop.eup %6545  ;;  %v5684_v56 = vpop.f32.mrf.mxu1  ;;  %v2034_v27 = vsel %vm1874_vm1, %v8113_v28, %v2002_v29 }
 0x2f7   : > { %v5333_v26 = vadd.f32 -1.0, %v6546_v43  ;;  %v8145_v61 = vadd.f32 %v5683_v51, %v8033_v52  ;;  %v2066_v45 = vmul.f32 1.050701, %v2034_v27 }
 0x2f8   : > { %v5685_v7 = vpop.f32.mrf.mxu1 }
 0x2f9   : > { %v1933_v46 = vmul.f32 1.442695, %v8145_v61  ;;  %v5686_v48 = vadd.f32 %v5685_v7, %v5684_v56  ;;  %v2089_v55 = vpack.c.bf16 %v2066_v45, %v2065_v3  ;;  %v2003_v21 = vmul.f32 1.6732632, %v5333_v26 }
 0x2fa   : > { %v6548_v2 = vpop.eup %6547  ;;  %v5687_v47 = vpop.f32.mrf.mxu1  ;;  %vm1879_vm6 = vcmp.gt.f32.partialorder %v8145_v61, 0.0 }
 0x2fb   : > { %6553 = vpow2.f32 %v1933_v46  ;;  %v8149_v22 = vadd.f32 %v5686_v48, %v8033_v52  ;;  %5839 = vmatprep.mubr.bf16.mxu1 %v2089_v55  ;;  %v5334_v28 = vadd.f32 -1.0, %v6548_v2  ;;  %v2035_v33 = vsel %vm1875_vm2, %v8120_v58, %v2003_v21 }
 0x2fc   : > { %v5688_v44 = vpop.f32.mrf.mxu1  ;;  %v2067_v12 = vmul.f32 1.050701, %v2035_v33 }
 0x2fd   : > { %v1935_v50 = vmul.f32 1.442695, %v8149_v22  ;;  %v5689_v54 = vadd.f32 %v5688_v44, %v5687_v47  ;;  %v2004_v19 = vmul.f32 1.6732632, %v5334_v28  ;;  %vm1880_vm7 = vcmp.gt.f32.partialorder %v8149_v22, 0.0 }
 0x2fe   : > { %v6550_v34 = vpop.eup %6549  ;;  %v5690_v6 = vpop.f32.mrf.mxu1 }
 0x2ff   : > { %v5335_v49 = vadd.f32 -1.0, %v6550_v34  ;;  %6555 = vpow2.f32 %v1935_v50  ;;  %v8156_v42 = vadd.f32 %v5689_v54, %v8033_v52  ;;  %v2036_v59 = vsel %vm1876_vm3, %v8125_v1, %v2004_v19 }
 0x300   : > { %v5691_v16 = vpop.f32.mrf.mxu1  ;;  %v2068_v11 = vmul.f32 1.050701, %v2036_v59 }
 0x301   : > { %v1937_v60 = vmul.f32 1.442695, %v8156_v42  ;;  %v5692_v62 = vadd.f32 %v5691_v16, %v5690_v6  ;;  %v2005_v32 = vmul.f32 1.6732632, %v5335_v49  ;;  %vm1881_vm8 = vcmp.gt.f32.partialorder %v8156_v42, 0.0 }
 0x302   : > { %v6552_v53 = vpop.eup %6551  ;;  %v5693_v58 = vpop.f32.mrf.mxu1  ;;  %v2090_v36 = vpack.c.bf16 %v2068_v11, %v2067_v12 }
 0x303   : > { %6557 = vpow2.f32 %v1937_v60  ;;  %v8161_v25 = vadd.f32 %v5692_v62, %v8033_v52  ;;  %v5336_v9 = vadd.f32 -1.0, %v6552_v53  ;;  %v2037_v63 = vsel %vm1877_vm4, %v8132_v31, %v2005_v32 }
 0x304   : > { %v5694_v40 = vpop.f32.mrf.mxu1  ;;  %5840 = vmatmul.mubr.bf16.gmra.mxu1 %v2090_v36  ;;  %v2069_v39 = vmul.f32 1.050701, %v2037_v63 }
 0x305   : > { %v1939_v1 = vmul.f32 1.442695, %v8161_v25  ;;  %v5695_v41 = vadd.f32 %v5694_v40, %v5693_v58  ;;  %v2006_v5 = vmul.f32 1.6732632, %v5336_v9  ;;  %vm1882_vm9 = vcmp.gt.f32.partialorder %v8161_v25, 0.0  ;;  %v6291_v58 = vld [vmem:[#allocation10 + $0x8] sm:$0xff]  }
 0x306   : > { %v5696_v10 = vpop.f32.mrf.mxu1  ;;  %5867 = vmatprep.subr.bf16.mxu0 %v6291_v58 }
 0x307   : > { %6559 = vpow2.f32 %v1939_v1  ;;  %v8168_v14 = vadd.f32 %v5695_v41, %v8033_v52  ;;  %v2038_v35 = vsel %vm1878_vm5, %v8137_v23, %v2006_v5  ;;  %5868 = vmatpush3.bf16.msra.mxu0 %v6291_v58 }
 0x308   : > { %v6554_v38 = vpop.eup %6553  ;;  %v5697_v15 = vpop.f32.mrf.mxu1  ;;  %v2070_v8 = vmul.f32 1.050701, %v2038_v35 }
 0x309   : > { %v5337_v17 = vadd.f32 -1.0, %v6554_v38  ;;  %v1941_v0 = vmul.f32 1.442695, %v8168_v14  ;;  %v5698_v13 = vadd.f32 %v5697_v15, %v5696_v10  ;;  %vm1883_vm10 = vcmp.gt.f32.partialorder %v8168_v14, 0.0 }
 0x30a   : > { %v5699_v30 = vpop.f32.mrf.mxu1  ;;  %v2091_v37 = vpack.c.bf16 %v2070_v8, %v2069_v39 }
 0x30b   : > { %6561 = vpow2.f32 %v1941_v0  ;;  %v8173_v31 = vadd.f32 %v5698_v13, %v8033_v52  ;;  %v2007_v24 = vmul.f32 1.6732632, %v5337_v17  ;;  %v6292_v0 = vld [vmem:[#allocation10] sm:$0xff]  }
 0x30c   : > { %v6556_v57 = vpop.eup %6555  ;;  %v5700_v29 = vpop.f32.mrf.mxu1  ;;  %5843 = vmatprep.mubr.bf16.mxu1 %v2091_v37  ;;  %5869 = vmatprep.subr.bf16.mxu0 %v6292_v0 }
 0x30d   : > { %v1943_v23 = vmul.f32 1.442695, %v8173_v31  ;;  %v5701_v4 = vadd.f32 %v5700_v29, %v5699_v30  ;;  %v5338_v51 = vadd.f32 -1.0, %v6556_v57  ;;  %v2039_v26 = vsel %vm1879_vm6, %v8145_v61, %v2007_v24  ;;  %5870 = vmatpush3.bf16.msra.mxu0 %v6292_v0 }
 0x30e   : > { %v5702_v43 = vpop.f32.mrf.mxu1  ;;  %v2071_v47 = vmul.f32 1.050701, %v2039_v26  ;;  %vm1884_vm11 = vcmp.gt.f32.partialorder %v8173_v31, 0.0 }
 0x30f   : > { %6563 = vpow2.f32 %v1943_v23  ;;  %v8178_v56 = vadd.f32 %v5701_v4, %v8033_v52  ;;  %v2008_v27 = vmul.f32 1.6732632, %v5338_v51 }
 0x310   : > { %v6558_v3 = vpop.eup %6557  ;;  %v5703_v45 = vpop.f32.mrf.mxu1 }
 0x311   : > { %v5339_v7 = vadd.f32 -1.0, %v6558_v3  ;;  %v1945_v46 = vmul.f32 1.442695, %v8178_v56  ;;  %v5704_v48 = vadd.f32 %v5703_v45, %v5702_v43  ;;  %v2040_v2 = vsel %vm1880_vm7, %v8149_v22, %v2008_v27 }
 0x312   : > { %v5705_v55 = vpop.f32.mrf.mxu1  ;;  %v2072_v28 = vmul.f32 1.050701, %v2040_v2  ;;  %vm1885_vm12 = vcmp.gt.f32.partialorder %v8178_v56, 0.0 }
 0x313   : > { %6565 = vpow2.f32 %v1945_v46  ;;  %v1846_v21 = vadd.f32 %v5704_v48, %v8033_v52  ;;  %v2009_v44 = vmul.f32 1.6732632, %v5339_v7  ;;  %v8200_v46 = vld [vmem:[%s9349_s9 + $0x2] ss:$0 sm:$0xff] }
 0x314   : > { %v6560_v50 = vpop.eup %6559  ;;  %v5706_v54 = vpop.f32.mrf.mxu1  ;;  %v2092_v33 = vpack.c.bf16 %v2072_v28, %v2071_v47 }
 0x315   : > { %v1947_v61 = vmul.f32 1.442695, %v1846_v21  ;;  %v5707_v19 = vadd.f32 %v5706_v54, %v5705_v55  ;;  %v5340_v6 = vadd.f32 -1.0, %v6560_v50  ;;  %v2041_v22 = vsel %vm1881_vm8, %v8156_v42, %v2009_v44 }
 0x316   : > { %v5708_v34 = vpop.f32.mrf.mxu1  ;;  %5844 = vmatmul.mubr.bf16.gmra.mxu1 %v2092_v33  ;;  %v2073_v53 = vmul.f32 1.050701, %v2041_v22  ;;  %vm1886_vm13 = vcmp.gt.f32.partialorder %v1846_v21, 0.0 }
 0x317   : > { %6567 = vpow2.f32 %v1947_v61  ;;  %v1851_v49 = vadd.f32 %v5707_v19, %v8033_v52  ;;  %v2010_v12 = vmul.f32 1.6732632, %v5340_v6 }
 0x318   : > { %v6562_v59 = vpop.eup %6561  ;;  %v5709_v16 = vpop.f32.mrf.mxu1 }
 0x319   : > { %v5341_v11 = vadd.f32 -1.0, %v6562_v59  ;;  %v1949_v60 = vmul.f32 1.442695, %v1851_v49  ;;  %v5710_v62 = vadd.f32 %v5709_v16, %v5708_v34  ;;  %v2042_v32 = vsel %vm1882_vm9, %v8161_v25, %v2010_v12 }
 0x31a   : > { %v2074_v9 = vmul.f32 1.050701, %v2042_v32  ;;  %vm1887_vm14 = vcmp.gt.f32.partialorder %v1851_v49, 0.0 }
 0x31b   : > { %6569 = vpow2.f32 %v1949_v60  ;;  %v1854_v36 = vadd.f32 %v5710_v62, %v8033_v52  ;;  %v2011_v40 = vmul.f32 1.6732632, %v5341_v11 }
 0x31c   : > { %v6564_v1 = vpop.eup %6563  ;;  %v2093_v41 = vpack.c.bf16 %v2074_v9, %v2073_v53 }
 0x31d   : > { %v1951_v42 = vmul.f32 1.442695, %v1854_v36  ;;  %v5342_v5 = vadd.f32 -1.0, %v6564_v1  ;;  %v2043_v25 = vsel %vm1883_vm10, %v8168_v14, %v2011_v40  ;;  %vm1888_vm15 = vcmp.gt.f32.partialorder %v1854_v36, 0.0 }
 0x31e   : > { %5847 = vmatprep.mubr.bf16.mxu1 %v2093_v41  ;;  %v2075_v38 = vmul.f32 1.050701, %v2043_v25  ;;  %v6294_v25 = vld [vmem:[#allocation11 + $0x30] sm:$0xff]  }
 0x31f   : > { %6571 = vpow2.f32 %v1951_v42  ;;  %v2012_v63 = vmul.f32 1.6732632, %v5342_v5 }
 0x320   : > { %v6566_v10 = vpop.eup %6565 }
 0x321   : > { %v5343_v35 = vadd.f32 -1.0, %v6566_v10  ;;  %v2044_v52 = vsel %vm1884_vm11, %v8173_v31, %v2012_v63  ;;  %v6293_v63 = vld [vmem:[#allocation11 + $0x38] sm:$0xff]  }
 0x322   : > { %v2076_v15 = vmul.f32 1.050701, %v2044_v52  ;;  %5903 = vmatprep.subr.bf16.mxu1 %v6293_v63 }
 0x323   : > { %v2013_v39 = vmul.f32 1.6732632, %v5343_v35  ;;  %5904 = vmatpush3.bf16.msra.mxu1 %v6293_v63 }
 0x324   : > { %v6568_v8 = vpop.eup %6567  ;;  %v2094_v17 = vpack.c.bf16 %v2076_v15, %v2075_v38  ;;  %5905 = vmatprep.subr.bf16.mxu1 %v6294_v25 }
 0x325   : > { %v5344_v13 = vadd.f32 -1.0, %v6568_v8  ;;  %v2045_v14 = vsel %vm1885_vm12, %v8178_v56, %v2013_v39 }
 0x326   : > { %5848 = vmatmul.mubr.bf16.gmra.mxu1 %v2094_v17  ;;  %v2077_v31 = vmul.f32 1.050701, %v2045_v14 }
 0x327   : > { %v2014_v30 = vmul.f32 1.6732632, %v5344_v13  ;;  %v6295_v13 = vld [vmem:[#allocation11 + $0x28] sm:$0xff]   ;;  %5906 = vmatpush3.bf16.msra.mxu1 %v6294_v25 }
 0x328   : > { %v6570_v37 = vpop.eup %6569  ;;  %5907 = vmatprep.subr.bf16.mxu1 %v6295_v13 }
 0x329   : > { %v5345_v24 = vadd.f32 -1.0, %v6570_v37  ;;  %v2046_v57 = vsel %vm1886_vm13, %v1846_v21, %v2014_v30 }
 0x32a   : > { %v2078_v29 = vmul.f32 1.050701, %v2046_v57 }
 0x32b   : > { %v2015_v23 = vmul.f32 1.6732632, %v5345_v24  ;;  %5908 = vmatpush3.bf16.msra.mxu1 %v6295_v13 }
 0x32c   : > { %v6572_v4 = vpop.eup %6571  ;;  %v2095_v51 = vpack.c.bf16 %v2078_v29, %v2077_v31  ;;  %v6296_v31 = vld [vmem:[#allocation11 + $0x20] sm:$0xff]  }
 0x32d   : > { %v5346_v43 = vadd.f32 -1.0, %v6572_v4  ;;  %v2047_v26 = vsel %vm1887_vm14, %v1851_v49, %v2015_v23  ;;  %5909 = vmatprep.subr.bf16.mxu1 %v6296_v31 }
 0x32e   : > { %5851 = vmatprep.mubr.bf16.mxu1 %v2095_v51  ;;  %v2079_v45 = vmul.f32 1.050701, %v2047_v26  ;;  %v6297_v26 = vld [vmem:[#allocation11 + $0x18] sm:$0xff]  }
 0x32f   : > { %v2016_v27 = vmul.f32 1.6732632, %v5346_v43  ;;  %5910 = vmatpush3.bf16.msra.mxu1 %v6296_v31 }
 0x330   : > { %5911 = vmatprep.subr.bf16.mxu1 %v6297_v26 }
 0x331   : > { %v2048_v3 = vsel %vm1888_vm15, %v1854_v36, %v2016_v27 }
 0x332   : > { %v2080_v7 = vmul.f32 1.050701, %v2048_v3 }
 0x333   : > { %5912 = vmatpush3.bf16.msra.mxu1 %v6297_v26 }
 0x334   : > { %v2096_v56 = vpack.c.bf16 %v2080_v7, %v2079_v45 }
 0x336   : > { %5852 = vmatmul.mubr.bf16.gmra.mxu1 %v2096_v56 }
 0x37f   : > { %v5825_v48 = vpop.f32.mrf.mxu1 }
 0x380   : > { %v2205_v55 = vadd.f32 %v5825_v48, %v8200_v46 }
 0x381   : > { %v2196_v2 = vpop.f32.mrf.mxu1 }
 0x382   : > { %v2359_v47 = vmul.f32 1.442695, %v2205_v55  ;;  %v2197_v21 = vadd.f32 %v2196_v2, %v8200_v46  ;;  %vm2325_vm0 = vcmp.gt.f32.partialorder %v2205_v55, 0.0 }
 0x383   : > { %v5826_v28 = vpop.f32.mrf.mxu1 }
 0x384   : > { %6573 = vpow2.f32 %v2359_v47  ;;  %v2355_v44 = vmul.f32 1.442695, %v2197_v21  ;;  %v2208_v50 = vadd.f32 %v5826_v28, %v8200_v46  ;;  %vm2323_vm1 = vcmp.gt.f32.partialorder %v2197_v21, 0.0  ;;  %v6298_v28 = vld [vmem:[#allocation11 + $0x10] sm:$0xff]  }
 0x385   : > { %v2199_v54 = vpop.f32.mrf.mxu1  ;;  %5913 = vmatprep.subr.bf16.mxu1 %v6298_v28 }
 0x386   : > { %6575 = vpow2.f32 %v2355_v44  ;;  %v2361_v61 = vmul.f32 1.442695, %v2208_v50  ;;  %v2200_v19 = vadd.f32 %v2199_v54, %v8200_v46  ;;  %vm2326_vm2 = vcmp.gt.f32.partialorder %v2208_v50, 0.0  ;;  %5914 = vmatpush3.bf16.msra.mxu1 %v6298_v28 }
 0x388   : > { %6577 = vpow2.f32 %v2361_v61  ;;  %v2357_v33 = vmul.f32 1.442695, %v2200_v19  ;;  %vm2324_vm3 = vcmp.gt.f32.partialorder %v2200_v19, 0.0 }
 0x38a   : > { %6579 = vpow2.f32 %v2357_v33 }
 0x38f   : > { %v5829_v6 = vpop.f32.mrf.mxu1 }
 0x390   : > { %v8207_v59 = vadd.f32 %v5829_v6, %v8200_v46 }
 0x391   : > { %v6574_v34 = vpop.eup %6573  ;;  %v2212_v12 = vpop.f32.mrf.mxu1 }
 0x392   : > { %v5357_v22 = vadd.f32 -1.0, %v6574_v34  ;;  %v2367_v60 = vmul.f32 1.442695, %v8207_v59  ;;  %v8211_v62 = vadd.f32 %v2212_v12, %v8200_v46  ;;  %vm2329_vm4 = vcmp.gt.f32.partialorder %v8207_v59, 0.0 }
 0x393   : > { %v6576_v49 = vpop.eup %6575  ;;  %v5830_v58 = vpop.f32.mrf.mxu1 }
 0x394   : > { %v5355_v16 = vadd.f32 -1.0, %v6576_v49  ;;  %v2453_v9 = vmul.f32 1.6732632, %v5357_v22  ;;  %6581 = vpow2.f32 %v2367_v60  ;;  %v2363_v40 = vmul.f32 1.442695, %v8211_v62  ;;  %v6299_v49 = vld [vmem:[#allocation11 + $0x8] sm:$0xff]  }
 0x395   : > { %v6578_v11 = vpop.eup %6577  ;;  %v8215_v41 = vadd.f32 %v5830_v58, %v8200_v46  ;;  %v2215_v5 = vpop.f32.mrf.mxu1  ;;  %vm2327_vm5 = vcmp.gt.f32.partialorder %v8211_v62, 0.0  ;;  %5915 = vmatprep.subr.bf16.mxu1 %v6299_v49 }
 0x396   : > { %v2451_v32 = vmul.f32 1.6732632, %v5355_v16  ;;  %v5358_v53 = vadd.f32 -1.0, %v6578_v11  ;;  %6583 = vpow2.f32 %v2363_v40  ;;  %v8218_v10 = vadd.f32 %v2215_v5, %v8200_v46  ;;  %5916 = vmatpush3.bf16.msra.mxu1 %v6299_v49 }
 0x397   : > { %v6580_v36 = vpop.eup %6579  ;;  %v2369_v38 = vmul.f32 1.442695, %v8215_v41  ;;  %v2485_v39 = vsel %vm2325_vm0, %v2205_v55, %v2453_v9  ;;  %vm2330_vm6 = vcmp.gt.f32.partialorder %v8215_v41, 0.0 }
 0x398   : > { %v2454_v1 = vmul.f32 1.6732632, %v5358_v53  ;;  %v5356_v42 = vadd.f32 -1.0, %v6580_v36  ;;  %v2483_v35 = vsel %vm2323_vm1, %v2197_v21, %v2451_v32  ;;  %v2365_v8 = vmul.f32 1.442695, %v8218_v10 }
 0x399   : > { %6585 = vpow2.f32 %v2369_v38  ;;  %v2515_v30 = vmul.f32 1.050701, %v2483_v35  ;;  %v2517_v37 = vmul.f32 1.050701, %v2485_v39  ;;  %vm2328_vm7 = vcmp.gt.f32.partialorder %v8218_v10, 0.0 }
 0x39a   : > { %v2486_v52 = vsel %vm2326_vm2, %v2208_v50, %v2454_v1  ;;  %v2452_v15 = vmul.f32 1.6732632, %v5356_v42  ;;  %6587 = vpow2.f32 %v2365_v8 }
 0x39b   : > { %v2518_v17 = vmul.f32 1.050701, %v2486_v52 }
 0x39c   : > { %v2484_v0 = vsel %vm2324_vm3, %v2200_v19, %v2452_v15 }
 0x39d   : > { %v2516_v14 = vmul.f32 1.050701, %v2484_v0  ;;  %v2548_v57 = vpack.c.bf16 %v2518_v17, %v2517_v37 }
 0x39f   : > { %v2547_v24 = vpack.c.bf16 %v2516_v14, %v2515_v30 }
 0x3a1   : > { %v5833_v29 = vpop.f32.mrf.mxu1  ;;  %5871 = vmatprep.mubr.bf16.mxu0 %v2547_v24  ;;  %v6582_v51 = vpop.eup %6581 }
 0x3a2   : > { %v8224_v23 = vadd.f32 %v5833_v29, %v8200_v46  ;;  %5872 = vmatmul.mubr.bf16.vlgmr.msra.gmra.mxu0 %v2548_v57  ;;  %v5361_v7 = vadd.f32 -1.0, %v6582_v51 }
 0x3a3   : > { %v2228_v4 = vpop.f32.mrf.mxu1  ;;  %v6584_v45 = vpop.eup %6583 }
 0x3a4   : > { %v2375_v43 = vmul.f32 1.442695, %v8224_v23  ;;  %v8228_v27 = vadd.f32 %v2228_v4, %v8200_v46  ;;  %v5359_v55 = vadd.f32 -1.0, %v6584_v45  ;;  %v2457_v61 = vmul.f32 1.6732632, %v5361_v7 }
 0x3a5   : > { %v5834_v3 = vpop.f32.mrf.mxu1  ;;  %vm2333_vm10 = vcmp.gt.f32.partialorder %v8224_v23, 0.0 }
 0x3a6   : > { %6589 = vpow2.f32 %v2375_v43  ;;  %v2371_v56 = vmul.f32 1.442695, %v8228_v27  ;;  %v8232_v48 = vadd.f32 %v5834_v3, %v8200_v46  ;;  %v6586_v44 = vpop.eup %6585  ;;  %v2455_v50 = vmul.f32 1.6732632, %v5359_v55 }
 0x3a7   : > { %v2231_v2 = vpop.f32.mrf.mxu1  ;;  %v6588_v54 = vpop.eup %6587  ;;  %v5362_v19 = vadd.f32 -1.0, %v6586_v44  ;;  %v2489_v12 = vsel %vm2329_vm4, %v8207_v59, %v2457_v61  ;;  %vm2331_vm9 = vcmp.gt.f32.partialorder %v8228_v27, 0.0 }
 0x3a8   : > { %6591 = vpow2.f32 %v2371_v56  ;;  %v2377_v47 = vmul.f32 1.442695, %v8232_v48  ;;  %v8236_v21 = vadd.f32 %v2231_v2, %v8200_v46  ;;  %v5360_v33 = vadd.f32 -1.0, %v6588_v54 }
 0x3a9   : > { %v2458_v6 = vmul.f32 1.6732632, %v5362_v19  ;;  %v2487_v22 = vsel %vm2327_vm5, %v8211_v62, %v2455_v50  ;;  %v2521_v36 = vmul.f32 1.050701, %v2489_v12  ;;  %vm2334_vm8 = vcmp.gt.f32.partialorder %v8232_v48, 0.0 }
 0x3aa   : > { %6593 = vpow2.f32 %v2377_v47  ;;  %v2373_v34 = vmul.f32 1.442695, %v8236_v21  ;;  %v2456_v16 = vmul.f32 1.6732632, %v5360_v33  ;;  %v2519_v53 = vmul.f32 1.050701, %v2487_v22 }
 0x3ab   : > { %v2490_v11 = vsel %vm2330_vm6, %v8215_v41, %v2458_v6  ;;  %vm2332_vm11 = vcmp.gt.f32.partialorder %v8236_v21, 0.0 }
 0x3ac   : > { %6595 = vpow2.f32 %v2373_v34  ;;  %v2522_v60 = vmul.f32 1.050701, %v2490_v11  ;;  %v2488_v32 = vsel %vm2328_vm7, %v8218_v10, %v2456_v16 }
 0x3ad   : > { %v2520_v58 = vmul.f32 1.050701, %v2488_v32 }
 0x3ae   : > { %v2550_v42 = vpack.c.bf16 %v2522_v60, %v2521_v36 }
 0x3af   : > { %v2549_v62 = vpack.c.bf16 %v2520_v58, %v2519_v53 }
 0x3b1   : > { %5875 = vmatprep.mubr.bf16.mxu0 %v2549_v62 }
 0x3b2   : > { %5876 = vmatmul.mubr.bf16.gmra.mxu0 %v2550_v42 }
 0x3b3   : > { %v5837_v9 = vpop.f32.mrf.mxu1  ;;  %v6590_v40 = vpop.eup %6589 }
 0x3b4   : > { %v8248_v1 = vadd.f32 %v5837_v9, %v8200_v46  ;;  %v5365_v25 = vadd.f32 -1.0, %v6590_v40 }
 0x3b5   : > { %v2244_v59 = vpop.f32.mrf.mxu1  ;;  %v6592_v41 = vpop.eup %6591 }
 0x3b6   : > { %v2383_v5 = vmul.f32 1.442695, %v8248_v1  ;;  %v8252_v63 = vadd.f32 %v2244_v59, %v8200_v46  ;;  %v5363_v10 = vadd.f32 -1.0, %v6592_v41  ;;  %v2461_v30 = vmul.f32 1.6732632, %v5365_v25 }
 0x3b7   : > { %v5838_v35 = vpop.f32.mrf.mxu1  ;;  %v6594_v52 = vpop.eup %6593  ;;  %vm2337_vm14 = vcmp.gt.f32.partialorder %v8248_v1, 0.0 }
 0x3b8   : > { %6597 = vpow2.f32 %v2383_v5  ;;  %v2379_v38 = vmul.f32 1.442695, %v8252_v63  ;;  %v2256_v15 = vadd.f32 %v5838_v35, %v8200_v46  ;;  %v5366_v39 = vadd.f32 -1.0, %v6594_v52 }
 0x3b9   : > { %v2247_v8 = vpop.f32.mrf.mxu1  ;;  %v2459_v17 = vmul.f32 1.6732632, %v5363_v10  ;;  %v6596_v13 = vpop.eup %6595  ;;  %v2493_v51 = vsel %vm2333_vm10, %v8224_v23, %v2461_v30  ;;  %vm2335_vm13 = vcmp.gt.f32.partialorder %v8252_v63, 0.0 }
 0x3ba   : > { %6599 = vpow2.f32 %v2379_v38  ;;  %v2385_v0 = vmul.f32 1.442695, %v2256_v15  ;;  %v2462_v14 = vmul.f32 1.6732632, %v5366_v39  ;;  %v2248_v37 = vadd.f32 %v2247_v8, %v8200_v46 }
 0x3bb   : > { %v5364_v24 = vadd.f32 -1.0, %v6596_v13  ;;  %v2491_v29 = vsel %vm2331_vm9, %v8228_v27, %v2459_v17  ;;  %v2525_v7 = vmul.f32 1.050701, %v2493_v51  ;;  %vm2338_vm12 = vcmp.gt.f32.partialorder %v2256_v15, 0.0 }
 0x3bc   : > { %6601 = vpow2.f32 %v2385_v0  ;;  %v2494_v57 = vsel %vm2334_vm8, %v8232_v48, %v2462_v14  ;;  %v2381_v31 = vmul.f32 1.442695, %v2248_v37  ;;  %v2523_v3 = vmul.f32 1.050701, %v2491_v29 }
 0x3bd   : > { %v2460_v4 = vmul.f32 1.6732632, %v5364_v24  ;;  %v2526_v43 = vmul.f32 1.050701, %v2494_v57  ;;  %vm2336_vm15 = vcmp.gt.f32.partialorder %v2248_v37, 0.0 }
 0x3be   : > { %6603 = vpow2.f32 %v2381_v31 }
 0x3bf   : > { %v2492_v26 = vsel %vm2332_vm11, %v8236_v21, %v2460_v4  ;;  %v2552_v48 = vpack.c.bf16 %v2526_v43, %v2525_v7 }
 0x3c0   : > { %v2524_v45 = vmul.f32 1.050701, %v2492_v26 }
 0x3c2   : > { %v2551_v56 = vpack.c.bf16 %v2524_v45, %v2523_v3 }
 0x3c4   : > { %v5841_v55 = vpop.f32.mrf.mxu1  ;;  %5879 = vmatprep.mubr.bf16.mxu0 %v2551_v56 }
 0x3c5   : > { %v6598_v2 = vpop.eup %6597  ;;  %v8266_v47 = vadd.f32 %v5841_v55, %v8200_v46  ;;  %5880 = vmatmul.mubr.bf16.gmra.mxu0 %v2552_v48 }
 0x3c6   : > { %v2260_v27 = vpop.f32.mrf.mxu1  ;;  %v5369_v21 = vadd.f32 -1.0, %v6598_v2 }
 0x3c7   : > { %v6600_v23 = vpop.eup %6599  ;;  %v2391_v28 = vmul.f32 1.442695, %v8266_v47  ;;  %v8270_v44 = vadd.f32 %v2260_v27, %v8200_v46  ;;  %vm2341_vm2 = vcmp.gt.f32.partialorder %v8266_v47, 0.0 }
 0x3c8   : > { %v5367_v50 = vadd.f32 -1.0, %v6600_v23  ;;  %v5842_v54 = vpop.f32.mrf.mxu1  ;;  %v2465_v12 = vmul.f32 1.6732632, %v5369_v21 }
 0x3c9   : > { %v6602_v61 = vpop.eup %6601  ;;  %v2387_v19 = vmul.f32 1.442695, %v8270_v44  ;;  %v2272_v33 = vadd.f32 %v5842_v54, %v8200_v46  ;;  %6605 = vpow2.f32 %v2391_v28  ;;  %vm2339_vm1 = vcmp.gt.f32.partialorder %v8270_v44, 0.0  ;;  %v6300_v54 = vld [vmem:[#allocation11] sm:$0xff]  }
 0x3ca   : > { %v5370_v34 = vadd.f32 -1.0, %v6602_v61  ;;  %v2263_v6 = vpop.f32.mrf.mxu1  ;;  %v2463_v49 = vmul.f32 1.6732632, %v5367_v50  ;;  %v2497_v62 = vsel %vm2337_vm14, %v8248_v1, %v2465_v12  ;;  %5917 = vmatprep.subr.bf16.mxu1 %v6300_v54 }
 0x3cb   : > { %6607 = vpow2.f32 %v2387_v19  ;;  %v2393_v22 = vmul.f32 1.442695, %v2272_v33  ;;  %v6604_v16 = vpop.eup %6603  ;;  %v2264_v60 = vadd.f32 %v2263_v6, %v8200_v46  ;;  %v2529_v5 = vmul.f32 1.050701, %v2497_v62  ;;  %5918 = vmatpush3.bf16.msra.mxu1 %v6300_v54 }
 0x3cc   : > { %v2466_v11 = vmul.f32 1.6732632, %v5370_v34  ;;  %v5368_v32 = vadd.f32 -1.0, %v6604_v16  ;;  %v2495_v36 = vsel %vm2335_vm13, %v8252_v63, %v2463_v49  ;;  %vm2342_vm0 = vcmp.gt.f32.partialorder %v2272_v33, 0.0 }
 0x3cd   : > { %6609 = vpow2.f32 %v2393_v22  ;;  %v2389_v58 = vmul.f32 1.442695, %v2264_v60  ;;  %v2527_v59 = vmul.f32 1.050701, %v2495_v36  ;;  %vm2340_vm3 = vcmp.gt.f32.partialorder %v2264_v60, 0.0 }
 0x3ce   : > { %v2498_v53 = vsel %vm2338_vm12, %v2256_v15, %v2466_v11  ;;  %v2464_v9 = vmul.f32 1.6732632, %v5368_v32 }
 0x3cf   : > { %6611 = vpow2.f32 %v2389_v58  ;;  %v2530_v40 = vmul.f32 1.050701, %v2498_v53 }
 0x3d0   : > { %v2496_v42 = vsel %vm2336_vm15, %v2248_v37, %v2464_v9 }
 0x3d1   : > { %v2528_v41 = vmul.f32 1.050701, %v2496_v42  ;;  %v2554_v10 = vpack.c.bf16 %v2530_v40, %v2529_v5 }
 0x3d3   : > { %v2553_v25 = vpack.c.bf16 %v2528_v41, %v2527_v59 }
 0x3d5   : > { %5883 = vmatprep.mubr.bf16.mxu0 %v2553_v25 }
 0x3d6   : > { %v6606_v35 = vpop.eup %6605  ;;  %v5845_v52 = vpop.f32.mrf.mxu1  ;;  %5884 = vmatmul.mubr.bf16.gmra.mxu0 %v2554_v10 }
 0x3d7   : > { %v8280_v15 = vadd.f32 %v5845_v52, %v8200_v46  ;;  %v5373_v8 = vadd.f32 -1.0, %v6606_v35 }
 0x3d8   : > { %v6608_v38 = vpop.eup %6607  ;;  %v2276_v39 = vpop.f32.mrf.mxu1 }
 0x3d9   : > { %v5371_v63 = vadd.f32 -1.0, %v6608_v38  ;;  %v2399_v17 = vmul.f32 1.442695, %v8280_v15  ;;  %v8284_v0 = vadd.f32 %v2276_v39, %v8200_v46  ;;  %v2469_v4 = vmul.f32 1.6732632, %v5373_v8 }
 0x3da   : > { %v6610_v1 = vpop.eup %6609  ;;  %v5846_v30 = vpop.f32.mrf.mxu1  ;;  %vm2345_vm4 = vcmp.gt.f32.partialorder %v8280_v15, 0.0 }
 0x3db   : > { %v5374_v13 = vadd.f32 -1.0, %v6610_v1  ;;  %6613 = vpow2.f32 %v2399_v17  ;;  %v2395_v14 = vmul.f32 1.442695, %v8284_v0  ;;  %v2467_v24 = vmul.f32 1.6732632, %v5371_v63 }
 0x3dc   : > { %v6612_v37 = vpop.eup %6611  ;;  %v8288_v31 = vadd.f32 %v5846_v30, %v8200_v46  ;;  %v2279_v29 = vpop.f32.mrf.mxu1  ;;  %v2501_v55 = vsel %vm2341_vm2, %v8266_v47, %v2469_v4  ;;  %vm2343_vm5 = vcmp.gt.f32.partialorder %v8284_v0, 0.0 }
 0x3dd   : > { %v2470_v57 = vmul.f32 1.6732632, %v5374_v13  ;;  %v5372_v51 = vadd.f32 -1.0, %v6612_v37  ;;  %6615 = vpow2.f32 %v2395_v14  ;;  %v2280_v43 = vadd.f32 %v2279_v29, %v8200_v46 }
 0x3de   : > { %v2401_v26 = vmul.f32 1.442695, %v8288_v31  ;;  %v2499_v7 = vsel %vm2339_vm1, %v8270_v44, %v2467_v24  ;;  %v2533_v28 = vmul.f32 1.050701, %v2501_v55  ;;  %vm2346_vm6 = vcmp.gt.f32.partialorder %v8288_v31, 0.0 }
 0x3df   : > { %v2502_v3 = vsel %vm2342_vm0, %v2272_v33, %v2470_v57  ;;  %v2397_v45 = vmul.f32 1.442695, %v2280_v43  ;;  %v2468_v56 = vmul.f32 1.6732632, %v5372_v51  ;;  %v2531_v27 = vmul.f32 1.050701, %v2499_v7 }
 0x3e0   : > { %6617 = vpow2.f32 %v2401_v26  ;;  %v2534_v48 = vmul.f32 1.050701, %v2502_v3  ;;  %vm2344_vm7 = vcmp.gt.f32.partialorder %v2280_v43, 0.0 }
 0x3e1   : > { %6619 = vpow2.f32 %v2397_v45  ;;  %v2500_v2 = vsel %vm2340_vm3, %v2264_v60, %v2468_v56 }
 0x3e2   : > { %v2532_v23 = vmul.f32 1.050701, %v2500_v2  ;;  %v2556_v19 = vpack.c.bf16 %v2534_v48, %v2533_v28 }
 0x3e4   : > { %v2555_v50 = vpack.c.bf16 %v2532_v23, %v2531_v27 }
 0x3e6   : > { %v5849_v21 = vpop.f32.mrf.mxu1  ;;  %5887 = vmatprep.mubr.bf16.mxu0 %v2555_v50 }
 0x3e7   : > { %v8297_v61 = vadd.f32 %v5849_v21, %v8200_v46  ;;  %5888 = vmatmul.mubr.bf16.gmra.mxu0 %v2556_v19 }
 0x3e8   : > { %v2292_v33 = vpop.f32.mrf.mxu1  ;;  %v6614_v44 = vpop.eup %6613 }
 0x3e9   : > { %v2407_v47 = vmul.f32 1.442695, %v8297_v61  ;;  %v8301_v34 = vadd.f32 %v2292_v33, %v8200_v46  ;;  %v5377_v22 = vadd.f32 -1.0, %v6614_v44  ;;  %vm2349_vm10 = vcmp.gt.f32.partialorder %v8297_v61, 0.0 }
 0x3ea   : > { %v5850_v6 = vpop.f32.mrf.mxu1  ;;  %v6616_v49 = vpop.eup %6615 }
 0x3eb   : > { %6621 = vpow2.f32 %v2407_v47  ;;  %v2403_v16 = vmul.f32 1.442695, %v8301_v34  ;;  %v2304_v12 = vadd.f32 %v5850_v6, %v8200_v46  ;;  %v5375_v11 = vadd.f32 -1.0, %v6616_v49 }
 0x3ec   : > { %v2295_v60 = vpop.f32.mrf.mxu1  ;;  %v2473_v62 = vmul.f32 1.6732632, %v5377_v22  ;;  %vm2347_vm9 = vcmp.gt.f32.partialorder %v8301_v34, 0.0 }
 0x3ed   : > { %6623 = vpow2.f32 %v2403_v16  ;;  %v2409_v32 = vmul.f32 1.442695, %v2304_v12  ;;  %v8306_v53 = vadd.f32 %v2295_v60, %v8200_v46  ;;  %v6618_v58 = vpop.eup %6617  ;;  %v2471_v36 = vmul.f32 1.6732632, %v5375_v11 }
 0x3ee   : > { %v6620_v9 = vpop.eup %6619  ;;  %v5378_v40 = vadd.f32 -1.0, %v6618_v58  ;;  %v2505_v10 = vsel %vm2345_vm4, %v8280_v15, %v2473_v62  ;;  %vm2350_vm8 = vcmp.gt.f32.partialorder %v2304_v12, 0.0 }
 0x3ef   : > { %6625 = vpow2.f32 %v2409_v32  ;;  %v5376_v42 = vadd.f32 -1.0, %v6620_v9  ;;  %v2405_v59 = vmul.f32 1.442695, %v8306_v53  ;;  %v2503_v5 = vsel %vm2343_vm5, %v8284_v0, %v2471_v36 }
 0x3f0   : > { %v2474_v41 = vmul.f32 1.6732632, %v5378_v40  ;;  %v2535_v63 = vmul.f32 1.050701, %v2503_v5  ;;  %v2537_v1 = vmul.f32 1.050701, %v2505_v10 }
 0x3f1   : > { %6627 = vpow2.f32 %v2405_v59  ;;  %v2472_v25 = vmul.f32 1.6732632, %v5376_v42  ;;  %vm2348_vm11 = vcmp.gt.f32.partialorder %v8306_v53, 0.0 }
 0x3f2   : > { %v2506_v35 = vsel %vm2346_vm6, %v8288_v31, %v2474_v41 }
 0x3f3   : > { %v2538_v52 = vmul.f32 1.050701, %v2506_v35  ;;  %v2504_v38 = vsel %vm2344_vm7, %v2280_v43, %v2472_v25 }
 0x3f4   : > { %v2536_v39 = vmul.f32 1.050701, %v2504_v38 }
 0x3f5   : > { %v2558_v14 = vpack.c.bf16 %v2538_v52, %v2537_v1  ;;  %v6302_v1 = vld [vmem:[#allocation13 + $0x30] sm:$0xff]  }
 0x3f6   : > { %v5853_v8 = vpop.f32.mrf.mxu1  ;;  %v2557_v13 = vpack.c.bf16 %v2536_v39, %v2535_v63  ;;  %v6301_v39 = vld [vmem:[#allocation13 + $0x38] sm:$0xff]  }
 0x3f7   : > { %v8316_v17 = vadd.f32 %v5853_v8, %v8200_v46  ;;  %5951 = vmatprep.subr.bf16.mxu0 %v6301_v39 }
 0x3f8   : > { %v6622_v0 = vpop.eup %6621  ;;  %v2308_v30 = vpop.f32.mrf.mxu1  ;;  %5891 = vmatprep.mubr.bf16.mxu0 %v2557_v13  ;;  %5952 = vmatpush3.bf16.msra.mxu0 %v6301_v39 }
 0x3f9   : > { %v2415_v37 = vmul.f32 1.442695, %v8316_v17  ;;  %v2309_v15 = vadd.f32 %v2308_v30, %v8200_v46  ;;  %5892 = vmatmul.mubr.bf16.gmra.mxu0 %v2558_v14  ;;  %v5381_v31 = vadd.f32 -1.0, %v6622_v0  ;;  %vm2353_vm13 = vcmp.gt.f32.partialorder %v8316_v17, 0.0  ;;  %5953 = vmatprep.subr.bf16.mxu0 %v6302_v1  ;;  %v6303_v30 = vld [vmem:[#allocation13 + $0x28] sm:$0xff]  }
 0x3fa   : > { %v6624_v24 = vpop.eup %6623  ;;  %v5854_v57 = vpop.f32.mrf.mxu1 }
 0x3fb   : > { %v5379_v29 = vadd.f32 -1.0, %v6624_v24  ;;  %6629 = vpow2.f32 %v2415_v37  ;;  %v2411_v51 = vmul.f32 1.442695, %v2309_v15  ;;  %v2320_v43 = vadd.f32 %v5854_v57, %v8200_v46 }
 0x3fc   : > { %v6626_v4 = vpop.eup %6625  ;;  %v2311_v26 = vpop.f32.mrf.mxu1  ;;  %v2477_v48 = vmul.f32 1.6732632, %v5381_v31  ;;  %vm2351_vm12 = vcmp.gt.f32.partialorder %v2309_v15, 0.0  ;;  %5954 = vmatpush3.bf16.msra.mxu0 %v6302_v1  ;;  %v6304_v31 = vld [vmem:[#allocation13 + $0x20] sm:$0xff]   ;;  %v6305_v1 = vld [vmem:[#allocation13 + $0x18] sm:$0xff]  }
 0x3fd   : > { %v5382_v3 = vadd.f32 -1.0, %v6626_v4  ;;  %v2312_v45 = vadd.f32 %v2311_v26, %v8200_v46  ;;  %v2475_v7 = vmul.f32 1.6732632, %v5379_v29  ;;  %6631 = vpow2.f32 %v2411_v51  ;;  %5955 = vmatprep.subr.bf16.mxu0 %v6303_v30 }
 0x3fe   : > { %v2417_v56 = vmul.f32 1.442695, %v2320_v43  ;;  %v6628_v55 = vpop.eup %6627  ;;  %v2509_v46 = vsel %vm2349_vm10, %v8297_v61, %v2477_v48  ;;  %vm2354_vm14 = vcmp.gt.f32.partialorder %v2320_v43, 0.0 }
 0x3ff   : > { %v2478_v2 = vmul.f32 1.6732632, %v5382_v3  ;;  %v2413_v27 = vmul.f32 1.442695, %v2312_v45  ;;  %v5380_v23 = vadd.f32 -1.0, %v6628_v55  ;;  %v2507_v21 = vsel %vm2347_vm9, %v8301_v34, %v2475_v7 }
 0x400   : > { %6633 = vpow2.f32 %v2417_v56  ;;  %v2539_v33 = vmul.f32 1.050701, %v2507_v21  ;;  %v2541_v47 = vmul.f32 1.050701, %v2509_v46  ;;  %vm2352_vm15 = vcmp.gt.f32.partialorder %v2312_v45, 0.0  ;;  %5956 = vmatpush3.bf16.msra.mxu0 %v6303_v30 }
 0x401   : > { %v2510_v28 = vsel %vm2350_vm8, %v2304_v12, %v2478_v2  ;;  %6635 = vpow2.f32 %v2413_v27  ;;  %v2476_v50 = vmul.f32 1.6732632, %v5380_v23  ;;  %5957 = vmatprep.subr.bf16.mxu0 %v6304_v31 }
 0x402   : > { %v2542_v54 = vmul.f32 1.050701, %v2510_v28 }
 0x403   : > { %v2508_v19 = vsel %vm2348_vm11, %v8306_v53, %v2476_v50 }
 0x404   : > { %v2540_v44 = vmul.f32 1.050701, %v2508_v19  ;;  %v2560_v22 = vpack.c.bf16 %v2542_v54, %v2541_v47  ;;  %5958 = vmatpush3.bf16.msra.mxu0 %v6304_v31 }
 0x405   : > { %5959 = vmatprep.subr.bf16.mxu0 %v6305_v1 }
 0x406   : > { %v2559_v6 = vpack.c.bf16 %v2540_v44, %v2539_v33 }
 0x408   : > { %v6630_v49 = vpop.eup %6629  ;;  %5895 = vmatprep.mubr.bf16.mxu0 %v2559_v6  ;;  %5960 = vmatpush3.bf16.msra.mxu0 %v6305_v1 }
 0x409   : > { %v5385_v16 = vadd.f32 -1.0, %v6630_v49  ;;  %5896 = vmatmul.mubr.bf16.gmra.mxu0 %v2560_v22 }
 0x40a   : > { %v6632_v12 = vpop.eup %6631 }
 0x40b   : > { %v5383_v11 = vadd.f32 -1.0, %v6632_v12  ;;  %v2481_v32 = vmul.f32 1.6732632, %v5385_v16 }
 0x40d   : > { %v6634_v34 = vpop.eup %6633  ;;  %v2479_v61 = vmul.f32 1.6732632, %v5383_v11  ;;  %v2513_v40 = vsel %vm2353_vm13, %v8316_v17, %v2481_v32  ;;  %v8333_v17 = vld [vmem:[%s9349_s9 + $0x3] ss:$0 sm:$0xff] }
 0x40e   : > { %v6636_v60 = vpop.eup %6635  ;;  %v5386_v58 = vadd.f32 -1.0, %v6634_v34  ;;  %v2545_v10 = vmul.f32 1.050701, %v2513_v40 }
 0x40f   : > { %v5384_v36 = vadd.f32 -1.0, %v6636_v60  ;;  %v2511_v53 = vsel %vm2351_vm12, %v2309_v15, %v2479_v61 }
 0x410   : > { %v2482_v9 = vmul.f32 1.6732632, %v5386_v58  ;;  %v2543_v5 = vmul.f32 1.050701, %v2511_v53 }
 0x411   : > { %v2480_v62 = vmul.f32 1.6732632, %v5384_v36 }
 0x412   : > { %v2514_v42 = vsel %vm2354_vm14, %v2320_v43, %v2482_v9 }
 0x413   : > { %v2546_v59 = vmul.f32 1.050701, %v2514_v42  ;;  %v2512_v41 = vsel %vm2352_vm15, %v2312_v45, %v2480_v62 }
 0x414   : > { %v2544_v25 = vmul.f32 1.050701, %v2512_v41 }
 0x415   : > { %v2562_v52 = vpack.c.bf16 %v2546_v59, %v2545_v10 }
 0x416   : > { %v2561_v35 = vpack.c.bf16 %v2544_v25, %v2543_v5 }
 0x418   : > { %5899 = vmatprep.mubr.bf16.mxu0 %v2561_v35 }
 0x419   : > { %5900 = vmatmul.mubr.bf16.gmra.mxu0 %v2562_v52 }
 0x462   : > { %v5873_v38 = vpop.f32.mrf.mxu0 }
 0x463   : > { %v2671_v15 = vadd.f32 %v5873_v38, %v8333_v17 }
 0x464   : > { %v2662_v63 = vpop.f32.mrf.mxu0 }
 0x465   : > { %v2663_v14 = vadd.f32 %v2662_v63, %v8333_v17 }
 0x466   : > { %v5874_v8 = vpop.f32.mrf.mxu0 }
 0x467   : > { %v2674_v13 = vadd.f32 %v5874_v8, %v8333_v17 }
 0x468   : > { %v2665_v0 = vpop.f32.mrf.mxu0 }
 0x469   : > { %v2666_v37 = vadd.f32 %v2665_v0, %v8333_v17  ;;  %v2790_v57 = vpack.c.bf16 %v2674_v13, %v2671_v15  ;;  %v6306_v0 = vld [vmem:[#allocation13 + $0x10] sm:$0xff]   ;;  %v6307_v15 = vld [vmem:[#allocation13 + $0x8] sm:$0xff]  }
 0x46a   : > { %5961 = vmatprep.subr.bf16.mxu0 %v6306_v0 }
 0x46b   : > { %v2789_v24 = vpack.c.bf16 %v2666_v37, %v2663_v14  ;;  %5962 = vmatpush3.bf16.msra.mxu0 %v6306_v0 }
 0x46c   : > { %5963 = vmatprep.subr.bf16.mxu0 %v6307_v15 }
 0x46d   : > { %5919 = vmatprep.mubr.bf16.mxu1 %v2789_v24 }
 0x46e   : > { %5920 = vmatmul.mubr.bf16.vlgmr.msra.gmra.mxu1 %v2790_v57 }
 0x46f   : > { %5964 = vmatpush3.bf16.msra.mxu0 %v6307_v15  ;;  %v6314_v15 = vld [vmem:[#allocation14 + $0x64] ss:$8 sps:$4 sm:$0xff]  }
 0x472   : > { %v5877_v29 = vpop.f32.mrf.mxu0 }
 0x473   : > { %v2687_v7 = vadd.f32 %v5877_v29, %v8333_v17 }
 0x474   : > { %v2678_v4 = vpop.f32.mrf.mxu0 }
 0x475   : > { %v2679_v3 = vadd.f32 %v2678_v4, %v8333_v17 }
 0x476   : > { %v5878_v51 = vpop.f32.mrf.mxu0 }
 0x477   : > { %v2690_v43 = vadd.f32 %v5878_v51, %v8333_v17  ;;  %v6308_v51 = vld [vmem:[#allocation13] sm:$0xff]  }
 0x478   : > { %v2681_v26 = vpop.f32.mrf.mxu0  ;;  %5965 = vmatprep.subr.bf16.mxu0 %v6308_v51 }
 0x479   : > { %v2682_v45 = vadd.f32 %v2681_v26, %v8333_v17  ;;  %v2792_v55 = vpack.c.bf16 %v2690_v43, %v2687_v7  ;;  %5966 = vmatpush3.bf16.msra.mxu0 %v6308_v51 }
 0x47b   : > { %v2791_v56 = vpack.c.bf16 %v2682_v45, %v2679_v3 }
 0x47d   : > { %5923 = vmatprep.mubr.bf16.mxu1 %v2791_v56 }
 0x47e   : > { %5924 = vmatmul.mubr.bf16.gmra.mxu1 %v2792_v55 }
 0x485   : > { %v5881_v48 = vpop.f32.mrf.mxu0 }
 0x486   : > { %v2703_v46 = vadd.f32 %v5881_v48, %v8333_v17 }
 0x487   : > { %v2694_v2 = vpop.f32.mrf.mxu0 }
 0x488   : > { %v2695_v21 = vadd.f32 %v2694_v2, %v8333_v17 }
 0x489   : > { %v5882_v27 = vpop.f32.mrf.mxu0 }
 0x48a   : > { %v2706_v23 = vadd.f32 %v5882_v27, %v8333_v17 }
 0x48b   : > { %v2697_v28 = vpop.f32.mrf.mxu0 }
 0x48c   : > { %v2698_v50 = vadd.f32 %v2697_v28, %v8333_v17  ;;  %v2794_v19 = vpack.c.bf16 %v2706_v23, %v2703_v46  ;;  %v8370_v23 = vld [vmem:[%s9349_s9 + $0x4] ss:$0 sm:$0xff] }
 0x48e   : > { %v2793_v54 = vpack.c.bf16 %v2698_v50, %v2695_v21 }
 0x490   : > { %5927 = vmatprep.mubr.bf16.mxu1 %v2793_v54 }
 0x491   : > { %5928 = vmatmul.mubr.bf16.gmra.mxu1 %v2794_v19 }
 0x496   : > { %v5885_v33 = vpop.f32.mrf.mxu0 }
 0x497   : > { %v2719_v12 = vadd.f32 %v5885_v33, %v8333_v17 }
 0x498   : > { %v2710_v44 = vpop.f32.mrf.mxu0 }
 0x499   : > { %v2711_v22 = vadd.f32 %v2710_v44, %v8333_v17 }
 0x49a   : > { %v5886_v47 = vpop.f32.mrf.mxu0 }
 0x49b   : > { %v2722_v6 = vadd.f32 %v5886_v47, %v8333_v17 }
 0x49c   : > { %v2713_v49 = vpop.f32.mrf.mxu0 }
 0x49d   : > { %v2714_v16 = vadd.f32 %v2713_v49, %v8333_v17  ;;  %v2796_v34 = vpack.c.bf16 %v2722_v6, %v2719_v12 }
 0x49f   : > { %v2795_v11 = vpack.c.bf16 %v2714_v16, %v2711_v22 }
 0x4a1   : > { %5931 = vmatprep.mubr.bf16.mxu1 %v2795_v11 }
 0x4a2   : > { %5932 = vmatmul.mubr.bf16.gmra.mxu1 %v2796_v34 }
 0x4a7   : > { %v5889_v60 = vpop.f32.mrf.mxu0 }
 0x4a8   : > { %v2735_v62 = vadd.f32 %v5889_v60, %v8333_v17 }
 0x4a9   : > { %v2726_v32 = vpop.f32.mrf.mxu0 }
 0x4aa   : > { %v2727_v9 = vadd.f32 %v2726_v32, %v8333_v17 }
 0x4ab   : > { %v5890_v61 = vpop.f32.mrf.mxu0 }
 0x4ac   : > { %v2738_v58 = vadd.f32 %v5890_v61, %v8333_v17 }
 0x4ad   : > { %v2729_v36 = vpop.f32.mrf.mxu0 }
 0x4ae   : > { %v2730_v53 = vadd.f32 %v2729_v36, %v8333_v17  ;;  %v2798_v42 = vpack.c.bf16 %v2738_v58, %v2735_v62 }
 0x4b0   : > { %v2797_v40 = vpack.c.bf16 %v2730_v53, %v2727_v9 }
 0x4b2   : > { %5935 = vmatprep.mubr.bf16.mxu1 %v2797_v40 }
 0x4b3   : > { %5936 = vmatmul.mubr.bf16.gmra.mxu1 %v2798_v42 }
 0x4b9   : > { %v5893_v59 = vpop.f32.mrf.mxu0 }
 0x4ba   : > { %v2751_v38 = vadd.f32 %v5893_v59, %v8333_v17 }
 0x4bb   : > { %v2742_v41 = vpop.f32.mrf.mxu0 }
 0x4bc   : > { %v2743_v35 = vadd.f32 %v2742_v41, %v8333_v17 }
 0x4bd   : > { %v5894_v5 = vpop.f32.mrf.mxu0 }
 0x4be   : > { %v2754_v25 = vadd.f32 %v5894_v5, %v8333_v17 }
 0x4bf   : > { %v2745_v10 = vpop.f32.mrf.mxu0 }
 0x4c0   : > { %v2746_v52 = vadd.f32 %v2745_v10, %v8333_v17  ;;  %v2800_v39 = vpack.c.bf16 %v2754_v25, %v2751_v38  ;;  %v6311_v38 = vld [vmem:[#allocation14 + $0x74] ss:$8 sps:$4 sm:$0xff]  }
 0x4c1   : > { %3846 = vmatprep.subr.bf16.mxu1 %v6311_v38 }
 0x4c2   : > { %v2799_v63 = vpack.c.bf16 %v2746_v52, %v2743_v35  ;;  %v6309_v52 = vld [vmem:[#allocation14 + $0x70] ss:$8 sps:$4 sm:$0xff]  }
 0x4c3   : > { %3847 = vmatpush1.bf16.msra.mxu1 %v6309_v52 }
 0x4c4   : > { %5939 = vmatprep.mubr.bf16.mxu1 %v2799_v63  ;;  %3848 = vmatprep.subr.bf16.mxu1 %v6314_v15 }
 0x4c5   : > { %5940 = vmatmul.mubr.bf16.gmra.mxu1 %v2800_v39 }
 0x4c9   : > { %v5897_v8 = vpop.f32.mrf.mxu0 }
 0x4ca   : > { %v2767_v31 = vadd.f32 %v5897_v8, %v8333_v17 }
 0x4cb   : > { %v2758_v13 = vpop.f32.mrf.mxu0 }
 0x4cc   : > { %v2759_v24 = vadd.f32 %v2758_v13, %v8333_v17 }
 0x4cd   : > { %v5898_v30 = vpop.f32.mrf.mxu0 }
 0x4ce   : > { %v2770_v14 = vadd.f32 %v5898_v30, %v8333_v17 }
 0x4cf   : > { %v2761_v37 = vpop.f32.mrf.mxu0 }
 0x4d0   : > { %v2762_v57 = vadd.f32 %v2761_v37, %v8333_v17  ;;  %v2802_v4 = vpack.c.bf16 %v2770_v14, %v2767_v31  ;;  %v6312_v37 = vld [vmem:[#allocation14 + $0x60] ss:$8 sps:$4 sm:$0xff]   ;;  %v6317_v31 = vld [vmem:[#allocation14 + $0x54] ss:$8 sps:$4 sm:$0xff]  }
 0x4d1   : > { %3849 = vmatpush1.bf16.msra.mxu1 %v6312_v37 }
 0x4d2   : > { %v2801_v29 = vpack.c.bf16 %v2762_v57, %v2759_v24  ;;  %3850 = vmatprep.subr.bf16.mxu1 %v6317_v31 }
 0x4d4   : > { %5943 = vmatprep.mubr.bf16.mxu1 %v2801_v29 }
 0x4d5   : > { %5944 = vmatmul.mubr.bf16.gmra.mxu1 %v2802_v4 }
 0x4d9   : > { %v5901_v43 = vpop.f32.mrf.mxu0 }
 0x4da   : > { %v2783_v48 = vadd.f32 %v5901_v43, %v8333_v17  ;;  %v6315_v43 = vld [vmem:[#allocation14 + $0x50] ss:$8 sps:$4 sm:$0xff]  }
 0x4db   : > { %v2774_v26 = vpop.f32.mrf.mxu0  ;;  %3851 = vmatpush1.bf16.msra.mxu1 %v6315_v43 }
 0x4dc   : > { %v2775_v56 = vadd.f32 %v2774_v26, %v8333_v17  ;;  %v6320_v26 = vld [vmem:[#allocation14 + $0x44] ss:$8 sps:$4 sm:$0xff]  }
 0x4dd   : > { %v5902_v3 = vpop.f32.mrf.mxu0  ;;  %3852 = vmatprep.subr.bf16.mxu1 %v6320_v26 }
 0x4de   : > { %v2786_v45 = vadd.f32 %v5902_v3, %v8333_v17 }
 0x4df   : > { %v2777_v7 = vpop.f32.mrf.mxu0 }
 0x4e0   : > { %v2778_v55 = vadd.f32 %v2777_v7, %v8333_v17  ;;  %v2804_v27 = vpack.c.bf16 %v2786_v45, %v2783_v48 }
 0x4e2   : > { %v2803_v2 = vpack.c.bf16 %v2778_v55, %v2775_v56  ;;  %v6318_v55 = vld [vmem:[#allocation14 + $0x40] ss:$8 sps:$4 sm:$0xff]  }
 0x4e3   : > { %3853 = vmatpush1.bf16.msra.mxu1 %v6318_v55 }
 0x4e4   : > { %5947 = vmatprep.mubr.bf16.mxu1 %v2803_v2 }
 0x4e5   : > { %5948 = vmatmul.mubr.bf16.gmra.mxu1 %v2804_v27 }
 0x52e   : > { %v5921_v28 = vpop.f32.mrf.mxu1 }
 0x52f   : > { %v2913_v21 = vadd.f32 %v5921_v28, %v8370_v23 }
 0x530   : > { %v2904_v50 = vpop.f32.mrf.mxu1 }
 0x531   : > { %v3067_v46 = vmul.f32 1.442695, %v2913_v21  ;;  %v2905_v54 = vadd.f32 %v2904_v50, %v8370_v23  ;;  %vm3033_vm0 = vcmp.gt.f32.partialorder %v2913_v21, 0.0 }
 0x532   : > { %v5922_v19 = vpop.f32.mrf.mxu1 }
 0x533   : > { %6637 = vpow2.f32 %v3067_v46  ;;  %v3063_v33 = vmul.f32 1.442695, %v2905_v54  ;;  %v2916_v17 = vadd.f32 %v5922_v19, %v8370_v23  ;;  %vm3031_vm1 = vcmp.gt.f32.partialorder %v2905_v54, 0.0 }
 0x534   : > { %v2907_v44 = vpop.f32.mrf.mxu1 }
 0x535   : > { %6639 = vpow2.f32 %v3063_v33  ;;  %v3069_v47 = vmul.f32 1.442695, %v2916_v17  ;;  %v2908_v6 = vadd.f32 %v2907_v44, %v8370_v23  ;;  %vm3034_vm2 = vcmp.gt.f32.partialorder %v2916_v17, 0.0 }
 0x537   : > { %6641 = vpow2.f32 %v3069_v47  ;;  %v3065_v49 = vmul.f32 1.442695, %v2908_v6  ;;  %vm3032_vm3 = vcmp.gt.f32.partialorder %v2908_v6, 0.0 }
 0x539   : > { %6643 = vpow2.f32 %v3065_v49 }
 0x53e   : > { %v5925_v16 = vpop.f32.mrf.mxu1 }
 0x53f   : > { %v8377_v34 = vadd.f32 %v5925_v16, %v8370_v23 }
 0x540   : > { %v6638_v22 = vpop.eup %6637  ;;  %v2920_v32 = vpop.f32.mrf.mxu1 }
 0x541   : > { %v5405_v11 = vadd.f32 -1.0, %v6638_v22  ;;  %v3075_v58 = vmul.f32 1.442695, %v8377_v34  ;;  %v8381_v36 = vadd.f32 %v2920_v32, %v8370_v23  ;;  %vm3037_vm4 = vcmp.gt.f32.partialorder %v8377_v34, 0.0 }
 0x542   : > { %v6640_v12 = vpop.eup %6639  ;;  %v5926_v62 = vpop.f32.mrf.mxu1 }
 0x543   : > { %v5403_v60 = vadd.f32 -1.0, %v6640_v12  ;;  %v3161_v42 = vmul.f32 1.6732632, %v5405_v11  ;;  %6645 = vpow2.f32 %v3075_v58  ;;  %v3071_v59 = vmul.f32 1.442695, %v8381_v36 }
 0x544   : > { %v6642_v61 = vpop.eup %6641  ;;  %v8385_v25 = vadd.f32 %v5926_v62, %v8370_v23  ;;  %v2923_v10 = vpop.f32.mrf.mxu1  ;;  %vm3035_vm5 = vcmp.gt.f32.partialorder %v8381_v36, 0.0 }
 0x545   : > { %v3159_v9 = vmul.f32 1.6732632, %v5403_v60  ;;  %v5406_v53 = vadd.f32 -1.0, %v6642_v61  ;;  %6647 = vpow2.f32 %v3071_v59  ;;  %v8388_v35 = vadd.f32 %v2923_v10, %v8370_v23 }
 0x546   : > { %v6644_v40 = vpop.eup %6643  ;;  %v3077_v8 = vmul.f32 1.442695, %v8385_v25  ;;  %v3193_v13 = vsel %vm3033_vm0, %v2913_v21, %v3161_v42  ;;  %vm3038_vm6 = vcmp.gt.f32.partialorder %v8385_v25, 0.0 }
 0x547   : > { %v3162_v41 = vmul.f32 1.6732632, %v5406_v53  ;;  %v5404_v5 = vadd.f32 -1.0, %v6644_v40  ;;  %v3191_v63 = vsel %vm3031_vm1, %v2905_v54, %v3159_v9  ;;  %v3073_v0 = vmul.f32 1.442695, %v8388_v35 }
 0x548   : > { %6649 = vpow2.f32 %v3077_v8  ;;  %v3223_v24 = vmul.f32 1.050701, %v3191_v63  ;;  %v3225_v29 = vmul.f32 1.050701, %v3193_v13  ;;  %vm3036_vm7 = vcmp.gt.f32.partialorder %v8388_v35, 0.0 }
 0x549   : > { %v3194_v39 = vsel %vm3034_vm2, %v2916_v17, %v3162_v41  ;;  %v3160_v1 = vmul.f32 1.6732632, %v5404_v5  ;;  %6651 = vpow2.f32 %v3073_v0 }
 0x54a   : > { %v3226_v30 = vmul.f32 1.050701, %v3194_v39 }
 0x54b   : > { %v3192_v14 = vsel %vm3032_vm3, %v2908_v6, %v3160_v1 }
 0x54c   : > { %v3224_v57 = vmul.f32 1.050701, %v3192_v14  ;;  %v3256_v51 = vpack.c.bf16 %v3226_v30, %v3225_v29 }
 0x54e   : > { %v3255_v4 = vpack.c.bf16 %v3224_v57, %v3223_v24 }
 0x550   : > { %5967 = vmatprep.mubr.bf16.mxu0 %v3255_v4  ;;  %v6646_v7 = vpop.eup %6645 }
 0x551   : > { %v5929_v3 = vpop.f32.mrf.mxu1  ;;  %5968 = vmatmul.mubr.bf16.vlgmr.msra.gmra.mxu0 %v3256_v51  ;;  %v5409_v28 = vadd.f32 -1.0, %v6646_v7 }
 0x552   : > { %v8393_v45 = vadd.f32 %v5929_v3, %v8370_v23  ;;  %v6648_v27 = vpop.eup %6647 }
 0x553   : > { %v2936_v56 = vpop.f32.mrf.mxu1  ;;  %v5407_v50 = vadd.f32 -1.0, %v6648_v27  ;;  %v3165_v6 = vmul.f32 1.6732632, %v5409_v28 }
 0x554   : > { %v3083_v48 = vmul.f32 1.442695, %v8393_v45  ;;  %v8397_v2 = vadd.f32 %v2936_v56, %v8370_v23  ;;  %vm3041_vm8 = vcmp.gt.f32.partialorder %v8393_v45, 0.0 }
 0x555   : > { %v5930_v21 = vpop.f32.mrf.mxu1  ;;  %v6650_v33 = vpop.eup %6649  ;;  %v3163_v17 = vmul.f32 1.6732632, %v5407_v50  ;;  %v3197_v61 = vsel %vm3037_vm4, %v8377_v34, %v3165_v6 }
 0x556   : > { %6653 = vpow2.f32 %v3083_v48  ;;  %v3079_v46 = vmul.f32 1.442695, %v8397_v2  ;;  %v8401_v54 = vadd.f32 %v5930_v21, %v8370_v23  ;;  %v6652_v47 = vpop.eup %6651  ;;  %v5410_v49 = vadd.f32 -1.0, %v6650_v33 }
 0x557   : > { %v2939_v19 = vpop.f32.mrf.mxu1  ;;  %v5408_v22 = vadd.f32 -1.0, %v6652_v47  ;;  %v3195_v60 = vsel %vm3035_vm5, %v8381_v36, %v3163_v17  ;;  %v3229_v42 = vmul.f32 1.050701, %v3197_v61  ;;  %vm3039_vm9 = vcmp.gt.f32.partialorder %v8397_v2, 0.0 }
 0x558   : > { %v8404_v44 = vadd.f32 %v2939_v19, %v8370_v23  ;;  %6655 = vpow2.f32 %v3079_v46  ;;  %v3085_v16 = vmul.f32 1.442695, %v8401_v54  ;;  %v3166_v12 = vmul.f32 1.6732632, %v5410_v49 }
 0x559   : > { %v3164_v32 = vmul.f32 1.6732632, %v5408_v22  ;;  %v3227_v62 = vmul.f32 1.050701, %v3195_v60  ;;  %vm3042_vm10 = vcmp.gt.f32.partialorder %v8401_v54, 0.0 }
 0x55a   : > { %v3081_v11 = vmul.f32 1.442695, %v8404_v44  ;;  %6657 = vpow2.f32 %v3085_v16  ;;  %v3198_v58 = vsel %vm3038_vm6, %v8385_v25, %v3166_v12  ;;  %vm3040_vm11 = vcmp.gt.f32.partialorder %v8404_v44, 0.0 }
 0x55b   : > { %v3230_v9 = vmul.f32 1.050701, %v3198_v58  ;;  %v3196_v53 = vsel %vm3036_vm7, %v8388_v35, %v3164_v32 }
 0x55c   : > { %6659 = vpow2.f32 %v3081_v11  ;;  %v3228_v40 = vmul.f32 1.050701, %v3196_v53 }
 0x55d   : > { %v3258_v36 = vpack.c.bf16 %v3230_v9, %v3229_v42 }
 0x55e   : > { %v3257_v59 = vpack.c.bf16 %v3228_v40, %v3227_v62 }
 0x560   : > { %5971 = vmatprep.mubr.bf16.mxu0 %v3257_v59 }
 0x561   : > { %5972 = vmatmul.mubr.bf16.gmra.mxu0 %v3258_v36 }
 0x562   : > { %v5933_v41 = vpop.f32.mrf.mxu1 }
 0x563   : > { %v6654_v5 = vpop.eup %6653  ;;  %v8417_v10 = vadd.f32 %v5933_v41, %v8370_v23 }
 0x564   : > { %v2952_v34 = vpop.f32.mrf.mxu1  ;;  %v5413_v35 = vadd.f32 -1.0, %v6654_v5 }
 0x565   : > { %v3091_v25 = vmul.f32 1.442695, %v8417_v10  ;;  %v8421_v52 = vadd.f32 %v2952_v34, %v8370_v23  ;;  %v6656_v38 = vpop.eup %6655  ;;  %vm3045_vm12 = vcmp.gt.f32.partialorder %v8417_v10, 0.0 }
 0x566   : > { %v5934_v63 = vpop.f32.mrf.mxu1  ;;  %v5411_v39 = vadd.f32 -1.0, %v6656_v38  ;;  %v3169_v15 = vmul.f32 1.6732632, %v5413_v35 }
 0x567   : > { %6661 = vpow2.f32 %v3091_v25  ;;  %v3087_v1 = vmul.f32 1.442695, %v8421_v52  ;;  %v8425_v8 = vadd.f32 %v5934_v63, %v8370_v23  ;;  %v6658_v0 = vpop.eup %6657  ;;  %vm3043_vm13 = vcmp.gt.f32.partialorder %v8421_v52, 0.0 }
 0x568   : > { %v2955_v13 = vpop.f32.mrf.mxu1  ;;  %v3167_v30 = vmul.f32 1.6732632, %v5411_v39  ;;  %v5414_v24 = vadd.f32 -1.0, %v6658_v0  ;;  %v3201_v26 = vsel %vm3041_vm8, %v8393_v45, %v3169_v15 }
 0x569   : > { %6663 = vpow2.f32 %v3087_v1  ;;  %v8428_v14 = vadd.f32 %v2955_v13, %v8370_v23  ;;  %v6660_v37 = vpop.eup %6659  ;;  %v3093_v57 = vmul.f32 1.442695, %v8425_v8  ;;  %v3233_v27 = vmul.f32 1.050701, %v3201_v26 }
 0x56a   : > { %v5412_v31 = vadd.f32 -1.0, %v6660_v37  ;;  %v3170_v4 = vmul.f32 1.6732632, %v5414_v24  ;;  %v3199_v51 = vsel %vm3039_vm9, %v8397_v2, %v3167_v30  ;;  %vm3046_vm14 = vcmp.gt.f32.partialorder %v8425_v8, 0.0 }
 0x56b   : > { %v3089_v29 = vmul.f32 1.442695, %v8428_v14  ;;  %6665 = vpow2.f32 %v3093_v57  ;;  %v3231_v55 = vmul.f32 1.050701, %v3199_v51  ;;  %vm3044_vm15 = vcmp.gt.f32.partialorder %v8428_v14, 0.0 }
 0x56c   : > { %v3168_v43 = vmul.f32 1.6732632, %v5412_v31  ;;  %v3202_v3 = vsel %vm3042_vm10, %v8401_v54, %v3170_v4 }
 0x56d   : > { %6667 = vpow2.f32 %v3089_v29  ;;  %v3234_v7 = vmul.f32 1.050701, %v3202_v3 }
 0x56e   : > { %v3200_v56 = vsel %vm3040_vm11, %v8404_v44, %v3168_v43 }
 0x56f   : > { %v3232_v48 = vmul.f32 1.050701, %v3200_v56  ;;  %v3260_v21 = vpack.c.bf16 %v3234_v7, %v3233_v27 }
 0x571   : > { %v3259_v28 = vpack.c.bf16 %v3232_v48, %v3231_v55 }
 0x573   : > { %v5937_v2 = vpop.f32.mrf.mxu1  ;;  %5975 = vmatprep.mubr.bf16.mxu0 %v3259_v28 }
 0x574   : > { %v6662_v50 = vpop.eup %6661  ;;  %v8441_v46 = vadd.f32 %v5937_v2, %v8370_v23  ;;  %5976 = vmatmul.mubr.bf16.gmra.mxu0 %v3260_v21 }
 0x575   : > { %v5417_v19 = vadd.f32 -1.0, %v6662_v50  ;;  %v2968_v54 = vpop.f32.mrf.mxu1 }
 0x576   : > { %v6664_v45 = vpop.eup %6663  ;;  %v3099_v17 = vmul.f32 1.442695, %v8441_v46  ;;  %v8445_v44 = vadd.f32 %v2968_v54, %v8370_v23  ;;  %vm3049_vm2 = vcmp.gt.f32.partialorder %v8441_v46, 0.0 }
 0x577   : > { %v5415_v33 = vadd.f32 -1.0, %v6664_v45  ;;  %v5938_v47 = vpop.f32.mrf.mxu1  ;;  %v3173_v12 = vmul.f32 1.6732632, %v5417_v19 }
 0x578   : > { %v6666_v6 = vpop.eup %6665  ;;  %6669 = vpow2.f32 %v3099_v17  ;;  %v2980_v22 = vadd.f32 %v5938_v47, %v8370_v23  ;;  %v3095_v60 = vmul.f32 1.442695, %v8445_v44  ;;  %vm3047_vm1 = vcmp.gt.f32.partialorder %v8445_v44, 0.0 }
 0x579   : > { %v3171_v49 = vmul.f32 1.6732632, %v5415_v33  ;;  %v5418_v11 = vadd.f32 -1.0, %v6666_v6  ;;  %v2971_v32 = vpop.f32.mrf.mxu1  ;;  %v3205_v42 = vsel %vm3045_vm12, %v8417_v10, %v3173_v12 }
 0x57a   : > { %v6668_v16 = vpop.eup %6667  ;;  %v3101_v58 = vmul.f32 1.442695, %v2980_v22  ;;  %6671 = vpow2.f32 %v3095_v60  ;;  %v2972_v53 = vadd.f32 %v2971_v32, %v8370_v23  ;;  %v3237_v38 = vmul.f32 1.050701, %v3205_v42 }
 0x57b   : > { %v5416_v61 = vadd.f32 -1.0, %v6668_v16  ;;  %v3174_v9 = vmul.f32 1.6732632, %v5418_v11  ;;  %v3203_v62 = vsel %vm3043_vm13, %v8421_v52, %v3171_v49  ;;  %vm3050_vm0 = vcmp.gt.f32.partialorder %v2980_v22, 0.0 }
 0x57c   : > { %6673 = vpow2.f32 %v3101_v58  ;;  %v3097_v41 = vmul.f32 1.442695, %v2972_v53  ;;  %v3235_v34 = vmul.f32 1.050701, %v3203_v62  ;;  %vm3048_vm3 = vcmp.gt.f32.partialorder %v2972_v53, 0.0 }
 0x57d   : > { %v3172_v40 = vmul.f32 1.6732632, %v5416_v61  ;;  %v3206_v59 = vsel %vm3046_vm14, %v8425_v8, %v3174_v9 }
 0x57e   : > { %v3238_v36 = vmul.f32 1.050701, %v3206_v59  ;;  %6675 = vpow2.f32 %v3097_v41 }
 0x57f   : > { %v3204_v5 = vsel %vm3044_vm15, %v8428_v14, %v3172_v40 }
 0x580   : > { %v3236_v25 = vmul.f32 1.050701, %v3204_v5  ;;  %v3262_v52 = vpack.c.bf16 %v3238_v36, %v3237_v38 }
 0x582   : > { %v3261_v35 = vpack.c.bf16 %v3236_v25, %v3235_v34 }
 0x584   : > { %5979 = vmatprep.mubr.bf16.mxu0 %v3261_v35 }
 0x585   : > { %v5941_v63 = vpop.f32.mrf.mxu1  ;;  %5980 = vmatmul.mubr.bf16.gmra.mxu0 %v3262_v52  ;;  %v6670_v39 = vpop.eup %6669 }
 0x586   : > { %v8459_v10 = vadd.f32 %v5941_v63, %v8370_v23  ;;  %v5421_v30 = vadd.f32 -1.0, %v6670_v39 }
 0x587   : > { %v2984_v1 = vpop.f32.mrf.mxu1  ;;  %v6672_v0 = vpop.eup %6671 }
 0x588   : > { %v3107_v8 = vmul.f32 1.442695, %v8459_v10  ;;  %v8463_v13 = vadd.f32 %v2984_v1, %v8370_v23  ;;  %v5419_v15 = vadd.f32 -1.0, %v6672_v0  ;;  %v3177_v26 = vmul.f32 1.6732632, %v5421_v30 }
 0x589   : > { %v5942_v14 = vpop.f32.mrf.mxu1  ;;  %v6674_v37 = vpop.eup %6673  ;;  %vm3053_vm4 = vcmp.gt.f32.partialorder %v8459_v10, 0.0 }
 0x58a   : > { %6677 = vpow2.f32 %v3107_v8  ;;  %v3103_v24 = vmul.f32 1.442695, %v8463_v13  ;;  %v5422_v57 = vadd.f32 -1.0, %v6674_v37  ;;  %v8467_v31 = vadd.f32 %v5942_v14, %v8370_v23 }
 0x58b   : > { %v2987_v29 = vpop.f32.mrf.mxu1  ;;  %v3175_v4 = vmul.f32 1.6732632, %v5419_v15  ;;  %v6676_v43 = vpop.eup %6675  ;;  %v3209_v21 = vsel %vm3049_vm2, %v8441_v46, %v3177_v26  ;;  %vm3051_vm5 = vcmp.gt.f32.partialorder %v8463_v13, 0.0 }
 0x58c   : > { %6679 = vpow2.f32 %v3103_v24  ;;  %v8470_v51 = vadd.f32 %v2987_v29, %v8370_v23  ;;  %v3178_v3 = vmul.f32 1.6732632, %v5422_v57  ;;  %v3109_v7 = vmul.f32 1.442695, %v8467_v31 }
 0x58d   : > { %v5420_v56 = vadd.f32 -1.0, %v6676_v43  ;;  %v3207_v27 = vsel %vm3047_vm1, %v8445_v44, %v3175_v4  ;;  %v3241_v54 = vmul.f32 1.050701, %v3209_v21  ;;  %vm3054_vm6 = vcmp.gt.f32.partialorder %v8467_v31, 0.0  ;;  %v6321_v43 = vld [vmem:[#allocation14 + $0x30] ss:$8 sps:$4 sm:$0xff]  }
 0x58e   : > { %v3105_v55 = vmul.f32 1.442695, %v8470_v51  ;;  %v3210_v48 = vsel %vm3050_vm0, %v2980_v22, %v3178_v3  ;;  %6681 = vpow2.f32 %v3109_v7  ;;  %v3239_v45 = vmul.f32 1.050701, %v3207_v27  ;;  %v6323_v7 = vld [vmem:[#allocation14 + $0x34] ss:$8 sps:$4 sm:$0xff]  }
 0x58f   : > { %v3176_v28 = vmul.f32 1.6732632, %v5420_v56  ;;  %v3242_v50 = vmul.f32 1.050701, %v3210_v48  ;;  %vm3052_vm7 = vcmp.gt.f32.partialorder %v8470_v51, 0.0  ;;  %3854 = vmatprep.subr.bf16.mxu1 %v6323_v7 }
 0x590   : > { %6683 = vpow2.f32 %v3105_v55  ;;  %3855 = vmatpush1.bf16.msra.mxu1 %v6321_v43 }
 0x591   : > { %v3208_v2 = vsel %vm3048_vm3, %v2972_v53, %v3176_v28  ;;  %v3264_v47 = vpack.c.bf16 %v3242_v50, %v3241_v54 }
 0x592   : > { %v3240_v19 = vmul.f32 1.050701, %v3208_v2 }
 0x594   : > { %v3263_v17 = vpack.c.bf16 %v3240_v19, %v3239_v45  ;;  %v6326_v19 = vld [vmem:[#allocation14 + $0x24] ss:$8 sps:$4 sm:$0xff]  }
 0x595   : > { %v5945_v33 = vpop.f32.mrf.mxu1  ;;  %3856 = vmatprep.subr.bf16.mxu1 %v6326_v19 }
 0x596   : > { %v8479_v6 = vadd.f32 %v5945_v33, %v8370_v23  ;;  %5983 = vmatprep.mubr.bf16.mxu0 %v3263_v17  ;;  %v6324_v33 = vld [vmem:[#allocation14 + $0x20] ss:$8 sps:$4 sm:$0xff]  }
 0x597   : > { %v6678_v49 = vpop.eup %6677  ;;  %v3000_v22 = vpop.f32.mrf.mxu1  ;;  %5984 = vmatmul.mubr.bf16.gmra.mxu0 %v3264_v47  ;;  %3857 = vmatpush1.bf16.msra.mxu1 %v6324_v33 }
 0x598   : > { %v3115_v44 = vmul.f32 1.442695, %v8479_v6  ;;  %v8483_v16 = vadd.f32 %v3000_v22, %v8370_v23  ;;  %v5425_v12 = vadd.f32 -1.0, %v6678_v49  ;;  %vm3057_vm9 = vcmp.gt.f32.partialorder %v8479_v6, 0.0 }
 0x599   : > { %v6680_v46 = vpop.eup %6679  ;;  %v5946_v11 = vpop.f32.mrf.mxu1 }
 0x59a   : > { %v5423_v60 = vadd.f32 -1.0, %v6680_v46  ;;  %6685 = vpow2.f32 %v3115_v44  ;;  %v3111_v32 = vmul.f32 1.442695, %v8483_v16  ;;  %v8487_v61 = vadd.f32 %v5946_v11, %v8370_v23  ;;  %v6329_v44 = vld [vmem:[#allocation14 + $0x14] ss:$8 sps:$4 sm:$0xff]  }
 0x59b   : > { %v3003_v58 = vpop.f32.mrf.mxu1  ;;  %v6682_v9 = vpop.eup %6681  ;;  %v3181_v42 = vmul.f32 1.6732632, %v5425_v12  ;;  %vm3055_vm8 = vcmp.gt.f32.partialorder %v8483_v16, 0.0  ;;  %v6327_v11 = vld [vmem:[#allocation14 + $0x10] ss:$8 sps:$4 sm:$0xff]   ;;  %3858 = vmatprep.subr.bf16.mxu1 %v6329_v44 }
 0x59c   : > { %v3179_v53 = vmul.f32 1.6732632, %v5423_v60  ;;  %v8490_v62 = vadd.f32 %v3003_v58, %v8370_v23  ;;  %v5426_v59 = vadd.f32 -1.0, %v6682_v9  ;;  %6687 = vpow2.f32 %v3111_v32  ;;  %3859 = vmatpush1.bf16.msra.mxu1 %v6327_v11 }
 0x59d   : > { %v6684_v40 = vpop.eup %6683  ;;  %v3117_v36 = vmul.f32 1.442695, %v8487_v61  ;;  %v3213_v35 = vsel %vm3053_vm4, %v8459_v10, %v3181_v42  ;;  %vm3058_vm10 = vcmp.gt.f32.partialorder %v8487_v61, 0.0  ;;  %v6330_v42 = vld [vmem:[#allocation14] ss:$8 sps:$4 sm:$0xff]  }
 0x59e   : > { %v5424_v41 = vadd.f32 -1.0, %v6684_v40  ;;  %v3182_v5 = vmul.f32 1.6732632, %v5426_v59  ;;  %v3113_v34 = vmul.f32 1.442695, %v8490_v62  ;;  %v3211_v25 = vsel %vm3051_vm5, %v8463_v13, %v3179_v53 }
 0x59f   : > { %6689 = vpow2.f32 %v3117_v36  ;;  %v3243_v1 = vmul.f32 1.050701, %v3211_v25  ;;  %v3245_v0 = vmul.f32 1.050701, %v3213_v35  ;;  %vm3056_vm11 = vcmp.gt.f32.partialorder %v8490_v62, 0.0 }
 0x5a0   : > { %v3180_v38 = vmul.f32 1.6732632, %v5424_v41  ;;  %v3214_v52 = vsel %vm3054_vm6, %v8467_v31, %v3182_v5  ;;  %6691 = vpow2.f32 %v3113_v34  ;;  %v6332_v53 = vld [vmem:[#allocation14 + $0x4] ss:$8 sps:$4 sm:$0xff]   ;;  %v7224_v36 = vmov 0  }
 0x5a1   : > { %v3246_v63 = vmul.f32 1.050701, %v3214_v52  ;;  %3860 = vmatprep.subr.bf16.mxu1 %v6332_v53  ;;  %3878 = vmatprep.mubr.bf16.mxu1 %v7224_v36 }
 0x5a2   : > { %v3212_v39 = vsel %vm3052_vm7, %v8470_v51, %v3180_v38  ;;  %3861 = vmatpush1.bf16.msra.mxu1 %v6330_v42 }
 0x5a3   : > { %v3244_v8 = vmul.f32 1.050701, %v3212_v39  ;;  %v3266_v37 = vpack.c.bf16 %v3246_v63, %v3245_v0 }
 0x5a5   : > { %v5949_v30 = vpop.f32.mrf.mxu1  ;;  %v3265_v14 = vpack.c.bf16 %v3244_v8, %v3243_v1 }
 0x5a6   : > { %v8503_v13 = vadd.f32 %v5949_v30, %v8370_v23 }
 0x5a7   : > { %v3016_v15 = vpop.f32.mrf.mxu1  ;;  %v6686_v24 = vpop.eup %6685  ;;  %5987 = vmatprep.mubr.bf16.mxu0 %v3265_v14 }
 0x5a8   : > { %v3123_v10 = vmul.f32 1.442695, %v8503_v13  ;;  %v8507_v57 = vadd.f32 %v3016_v15, %v8370_v23  ;;  %5988 = vmatmul.mubr.bf16.gmra.mxu0 %v3266_v37  ;;  %v5429_v29 = vadd.f32 -1.0, %v6686_v24  ;;  %vm3061_vm14 = vcmp.gt.f32.partialorder %v8503_v13, 0.0 }
 0x5a9   : > { %v5950_v31 = vpop.f32.mrf.mxu1  ;;  %v6688_v26 = vpop.eup %6687 }
 0x5aa   : > { %6693 = vpow2.f32 %v3123_v10  ;;  %v3119_v4 = vmul.f32 1.442695, %v8507_v57  ;;  %v8511_v51 = vadd.f32 %v5950_v31, %v8370_v23  ;;  %v5427_v56 = vadd.f32 -1.0, %v6688_v26  ;;  %v8538_v10 = vld [vmem:[%s9349_s9 + $0x5] ss:$0 sm:$0xff] }
 0x5ab   : > { %v3019_v3 = vpop.f32.mrf.mxu1  ;;  %v3185_v28 = vmul.f32 1.6732632, %v5429_v29  ;;  %vm3059_vm13 = vcmp.gt.f32.partialorder %v8507_v57, 0.0 }
 0x5ac   : > { %6695 = vpow2.f32 %v3119_v4  ;;  %v3125_v55 = vmul.f32 1.442695, %v8511_v51  ;;  %v8515_v48 = vadd.f32 %v3019_v3, %v8370_v23  ;;  %v6690_v27 = vpop.eup %6689  ;;  %v3183_v21 = vmul.f32 1.6732632, %v5427_v56 }
 0x5ad   : > { %v6692_v50 = vpop.eup %6691  ;;  %v5430_v2 = vadd.f32 -1.0, %v6690_v27  ;;  %v3217_v49 = vsel %vm3057_vm9, %v8479_v6, %v3185_v28  ;;  %vm3062_vm12 = vcmp.gt.f32.partialorder %v8511_v51, 0.0 }
 0x5ae   : > { %6697 = vpow2.f32 %v3125_v55  ;;  %v3121_v45 = vmul.f32 1.442695, %v8515_v48  ;;  %v5428_v54 = vadd.f32 -1.0, %v6692_v50  ;;  %v3215_v23 = vsel %vm3055_vm8, %v8483_v16, %v3183_v21 }
 0x5af   : > { %v3186_v17 = vmul.f32 1.6732632, %v5430_v2  ;;  %v3247_v60 = vmul.f32 1.050701, %v3215_v23  ;;  %v3249_v58 = vmul.f32 1.050701, %v3217_v49 }
 0x5b0   : > { %6699 = vpow2.f32 %v3121_v45  ;;  %v3184_v47 = vmul.f32 1.6732632, %v5428_v54  ;;  %vm3060_vm15 = vcmp.gt.f32.partialorder %v8515_v48, 0.0 }
 0x5b1   : > { %v3218_v22 = vsel %vm3058_vm10, %v8487_v61, %v3186_v17 }
 0x5b2   : > { %v3250_v46 = vmul.f32 1.050701, %v3218_v22  ;;  %v3216_v12 = vsel %vm3056_vm11, %v8490_v62, %v3184_v47 }
 0x5b3   : > { %v3248_v32 = vmul.f32 1.050701, %v3216_v12 }
 0x5b4   : > { %v3268_v40 = vpack.c.bf16 %v3250_v46, %v3249_v58 }
 0x5b5   : > { %v3267_v9 = vpack.c.bf16 %v3248_v32, %v3247_v60 }
 0x5b7   : > { %v6694_v16 = vpop.eup %6693  ;;  %5991 = vmatprep.mubr.bf16.mxu0 %v3267_v9 }
 0x5b8   : > { %v5433_v61 = vadd.f32 -1.0, %v6694_v16  ;;  %5992 = vmatmul.mubr.bf16.gmra.mxu0 %v3268_v40 }
 0x5b9   : > { %v6696_v6 = vpop.eup %6695 }
 0x5ba   : > { %v5431_v59 = vadd.f32 -1.0, %v6696_v6  ;;  %v3189_v25 = vmul.f32 1.6732632, %v5433_v61 }
 0x5bb   : > { %v6698_v41 = vpop.eup %6697 }
 0x5bc   : > { %v5434_v62 = vadd.f32 -1.0, %v6698_v41  ;;  %v3187_v5 = vmul.f32 1.6732632, %v5431_v59  ;;  %v3221_v1 = vsel %vm3061_vm14, %v8503_v13, %v3189_v25 }
 0x5bd   : > { %v6700_v34 = vpop.eup %6699  ;;  %v3253_v37 = vmul.f32 1.050701, %v3221_v1 }
 0x5be   : > { %v3190_v38 = vmul.f32 1.6732632, %v5434_v62  ;;  %v5432_v35 = vadd.f32 -1.0, %v6700_v34  ;;  %v3219_v63 = vsel %vm3059_vm13, %v8507_v57, %v3187_v5  ;;  %v6333_v62 = vld [vmem:[#allocation16 + $0x70] ss:$8 sps:$4 sm:$0xff]  }
 0x5bf   : > { %v3251_v30 = vmul.f32 1.050701, %v3219_v63  ;;  %v6335_v5 = vld [vmem:[#allocation16 + $0x74] ss:$8 sps:$4 sm:$0xff]   ;;  %v6336_v63 = vld [vmem:[#allocation16 + $0x60] ss:$8 sps:$4 sm:$0xff]  }
 0x5c0   : > { %v3222_v52 = vsel %vm3062_vm12, %v8511_v51, %v3190_v38  ;;  %v3188_v39 = vmul.f32 1.6732632, %v5432_v35  ;;  %v6338_v38 = vld [vmem:[#allocation16 + $0x64] ss:$8 sps:$4 sm:$0xff]   ;;  %4724 = vmatprep.subr.bf16.mxu0 %v6335_v5  ;;  %5999 = vmatprep.subr.bf16.mxu1 %v6335_v5 }
 0x5c1   : > { %v3254_v8 = vmul.f32 1.050701, %v3222_v52  ;;  %4725 = vmatpush1.bf16.msra.mxu0 %v6333_v62 }
 0x5c2   : > { %v3220_v0 = vsel %vm3060_vm15, %v8515_v48, %v3188_v39  ;;  %4726 = vmatprep.subr.bf16.mxu0 %v6338_v38 }
 0x5c3   : > { %v3252_v14 = vmul.f32 1.050701, %v3220_v0  ;;  %v3270_v24 = vpack.c.bf16 %v3254_v8, %v3253_v37  ;;  %v6341_v0 = vld [vmem:[#allocation16 + $0x54] ss:$8 sps:$4 sm:$0xff]  }
 0x5c5   : > { %v3269_v15 = vpack.c.bf16 %v3252_v14, %v3251_v30  ;;  %4727 = vmatpush1.bf16.msra.mxu0 %v6336_v63 }
 0x5c6   : > { %4728 = vmatprep.subr.bf16.mxu0 %v6341_v0 }
 0x5c7   : > { %5995 = vmatprep.mubr.bf16.mxu0 %v3269_v15 }
 0x5c8   : > { %5996 = vmatmul.mubr.bf16.gmra.mxu0 %v3270_v24 }
 0x611   : > { %v5969_v57 = vpop.f32.mrf.mxu0 }
 0x612   : > { %v3379_v13 = vadd.f32 %v5969_v57, %v8538_v10 }
 0x613   : > { %v3370_v31 = vpop.f32.mrf.mxu0 }
 0x614   : > { %v3371_v29 = vadd.f32 %v3370_v31, %v8538_v10  ;;  %v3533_v26 = vmul.f32 1.442695, %v3379_v13  ;;  %vm3499_vm3 = vcmp.gt.f32.partialorder %v3379_v13, 0.0 }
 0x615   : > { %v5970_v4 = vpop.f32.mrf.mxu0 }
 0x616   : > { %v3529_v51 = vmul.f32 1.442695, %v3371_v29  ;;  %v3382_v43 = vadd.f32 %v5970_v4, %v8538_v10  ;;  %vm3497_vm0 = vcmp.gt.f32.partialorder %v3371_v29, 0.0  ;;  %v6339_v4 = vld [vmem:[#allocation16 + $0x50] ss:$8 sps:$4 sm:$0xff]  }
 0x617   : > { %v3373_v3 = vpop.f32.mrf.mxu0  ;;  %4729 = vmatpush1.bf16.msra.mxu0 %v6339_v4 }
 0x618   : > { %6701 = vpow2.f32 %v3529_v51  ;;  %v3535_v7 = vmul.f32 1.442695, %v3382_v43  ;;  %v3374_v56 = vadd.f32 %v3373_v3, %v8538_v10  ;;  %vm3500_vm2 = vcmp.gt.f32.partialorder %v3382_v43, 0.0 }
 0x61a   : > { %6703 = vpow2.f32 %v3535_v7  ;;  %v3531_v55 = vmul.f32 1.442695, %v3374_v56  ;;  %vm3498_vm1 = vcmp.gt.f32.partialorder %v3374_v56, 0.0 }
 0x61b   : > { %6705 = vpow2.f32 %v3533_v26  ;;  %v6344_v26 = vld [vmem:[#allocation16 + $0x44] ss:$8 sps:$4 sm:$0xff]  }
 0x61c   : > { %6707 = vpow2.f32 %v3531_v55  ;;  %4730 = vmatprep.subr.bf16.mxu0 %v6344_v26 }
 0x621   : > { %v5973_v48 = vpop.f32.mrf.mxu0 }
 0x622   : > { %v8545_v28 = vadd.f32 %v5973_v48, %v8538_v10 }
 0x623   : > { %v3386_v50 = vpop.f32.mrf.mxu0 }
 0x624   : > { %v8548_v45 = vadd.f32 %v3386_v50, %v8538_v10  ;;  %v3541_v23 = vmul.f32 1.442695, %v8545_v28  ;;  %vm3503_vm7 = vcmp.gt.f32.partialorder %v8545_v28, 0.0 }
 0x625   : > { %v6702_v27 = vpop.eup %6701  ;;  %v5974_v33 = vpop.f32.mrf.mxu0 }
 0x626   : > { %v5443_v21 = vadd.f32 -1.0, %v6702_v27  ;;  %v3537_v47 = vmul.f32 1.442695, %v8548_v45  ;;  %v8553_v44 = vadd.f32 %v5974_v33, %v8538_v10  ;;  %vm3501_vm4 = vcmp.gt.f32.partialorder %v8548_v45, 0.0 }
 0x627   : > { %v6704_v2 = vpop.eup %6703  ;;  %v3389_v46 = vpop.f32.mrf.mxu0 }
 0x628   : > { %v6706_v19 = vpop.eup %6705  ;;  %v3625_v54 = vmul.f32 1.6732632, %v5443_v21  ;;  %v5446_v49 = vadd.f32 -1.0, %v6704_v2  ;;  %6709 = vpow2.f32 %v3537_v47  ;;  %v8556_v12 = vadd.f32 %v3389_v46, %v8538_v10  ;;  %v6342_v2 = vld [vmem:[#allocation16 + $0x40] ss:$8 sps:$4 sm:$0xff]  }
 0x629   : > { %v6708_v17 = vpop.eup %6707  ;;  %v5445_v11 = vadd.f32 -1.0, %v6706_v19  ;;  %v3543_v58 = vmul.f32 1.442695, %v8553_v44  ;;  %6711 = vpow2.f32 %v3541_v23  ;;  %v6347_v19 = vld [vmem:[#allocation16 + $0x34] ss:$8 sps:$4 sm:$0xff]   ;;  %4731 = vmatpush1.bf16.msra.mxu0 %v6342_v2  ;;  %vm3504_vm6 = vcmp.gt.f32.partialorder %v8553_v44, 0.0 }
 0x62a   : > { %v5444_v22 = vadd.f32 -1.0, %v6708_v17  ;;  %v3657_v60 = vsel %vm3497_vm0, %v3371_v29, %v3625_v54  ;;  %v3539_v16 = vmul.f32 1.442695, %v8556_v12  ;;  %v3628_v9 = vmul.f32 1.6732632, %v5446_v49  ;;  %4732 = vmatprep.subr.bf16.mxu0 %v6347_v19 }
 0x62b   : > { %6713 = vpow2.f32 %v3543_v58  ;;  %v3689_v40 = vmul.f32 1.050701, %v3657_v60  ;;  %v3627_v6 = vmul.f32 1.6732632, %v5445_v11  ;;  %vm3502_vm5 = vcmp.gt.f32.partialorder %v8556_v12, 0.0 }
 0x62c   : > { %v3626_v32 = vmul.f32 1.6732632, %v5444_v22  ;;  %6715 = vpow2.f32 %v3539_v16  ;;  %v3660_v59 = vsel %vm3500_vm2, %v3382_v43, %v3628_v9  ;;  %v6345_v47 = vld [vmem:[#allocation16 + $0x30] ss:$8 sps:$4 sm:$0xff]   ;;  %v6350_v22 = vld [vmem:[#allocation16 + $0x24] ss:$8 sps:$4 sm:$0xff]  }
 0x62d   : > { %v3659_v41 = vsel %vm3499_vm3, %v3379_v13, %v3627_v6  ;;  %v3692_v34 = vmul.f32 1.050701, %v3660_v59  ;;  %4733 = vmatpush1.bf16.msra.mxu0 %v6345_v47  ;;  %v6348_v58 = vld [vmem:[#allocation16 + $0x20] ss:$8 sps:$4 sm:$0xff]  }
 0x62e   : > { %v3658_v53 = vsel %vm3498_vm1, %v3374_v56, %v3626_v32  ;;  %v3691_v35 = vmul.f32 1.050701, %v3659_v41  ;;  %4734 = vmatprep.subr.bf16.mxu0 %v6350_v22 }
 0x62f   : > { %v3690_v42 = vmul.f32 1.050701, %v3658_v53 }
 0x630   : > { %v3722_v30 = vpack.c.bf16 %v3692_v34, %v3691_v35 }
 0x631   : > { %v3721_v61 = vpack.c.bf16 %v3690_v42, %v3689_v40  ;;  %4735 = vmatpush1.bf16.msra.mxu0 %v6348_v58 }
 0x633   : > { %3879 = vmatmul.mubr.bf16.vlgmr.msra.gmra.mxu1 %v3721_v61 }
 0x634   : > { %3888 = vmatprep.mubr.bf16.mxu1 %v7224_v36  ;;  %v5977_v25 = vpop.f32.mrf.mxu0  ;;  %6015 = vmatpush1.bf16.msra.mxu1 %v6333_v62  ;;  %v6351_v62 = vld [vmem:[#allocation16 + $0x10] ss:$8 sps:$4 sm:$0xff]  }
 0x635   : > { %v6710_v39 = vpop.eup %6709  ;;  %v8562_v1 = vadd.f32 %v5977_v25, %v8538_v10  ;;  %6000 = vmatprep.subr.bf16.mxu1 %v6338_v38  ;;  %v6356_v38 = vld [vmem:[#allocation16 + $0x4] ss:$8 sps:$4 sm:$0xff]  }
 0x636   : > { %v3402_v52 = vpop.f32.mrf.mxu0  ;;  %v5447_v14 = vadd.f32 -1.0, %v6710_v39  ;;  %v6712_v15 = vpop.eup %6711 }
 0x637   : > { %v8565_v8 = vadd.f32 %v3402_v52, %v8538_v10  ;;  %v3549_v43 = vmul.f32 1.442695, %v8562_v1  ;;  %v5449_v48 = vadd.f32 -1.0, %v6712_v15  ;;  %vm3507_vm11 = vcmp.gt.f32.partialorder %v8562_v1, 0.0 }
 0x638   : > { %v5978_v37 = vpop.f32.mrf.mxu0  ;;  %v6714_v13 = vpop.eup %6713  ;;  %v3629_v31 = vmul.f32 1.6732632, %v5447_v14  ;;  %6016 = vmatpush1.bf16.msra.mxu1 %v6336_v63 }
 0x639   : > { %v3545_v24 = vmul.f32 1.442695, %v8565_v8  ;;  %v8569_v57 = vadd.f32 %v5978_v37, %v8538_v10  ;;  %v6716_v51 = vpop.eup %6715  ;;  %v5450_v3 = vadd.f32 -1.0, %v6714_v13  ;;  %6001 = vmatprep.subr.bf16.mxu1 %v6341_v0  ;;  %v6354_v37 = vld [vmem:[#allocation16] ss:$8 sps:$4 sm:$0xff]   ;;  %vm3505_vm8 = vcmp.gt.f32.partialorder %v8565_v8, 0.0 }
 0x63a   : > { %v3405_v29 = vpop.f32.mrf.mxu0  ;;  %v5448_v7 = vadd.f32 -1.0, %v6716_v51  ;;  %v3661_v27 = vsel %vm3501_vm4, %v8548_v45, %v3629_v31  ;;  %v3631_v45 = vmul.f32 1.6732632, %v5449_v48 }
 0x63b   : > { %3889 = vmatmul.mubr.bf16.gmra.mxu1 %v3722_v30  ;;  %6717 = vpow2.f32 %v3545_v24  ;;  %v3551_v56 = vmul.f32 1.442695, %v8569_v57  ;;  %v8575_v55 = vadd.f32 %v3405_v29, %v8538_v10  ;;  %v3632_v54 = vmul.f32 1.6732632, %v5450_v3 }
 0x63c   : > { %3898 = vmatprep.mubr.bf16.mxu1 %v7224_v36  ;;  %v3630_v21 = vmul.f32 1.6732632, %v5448_v7  ;;  %6017 = vmatpush1.bf16.msra.mxu1 %v6339_v4  ;;  %v3693_v17 = vmul.f32 1.050701, %v3661_v27  ;;  %vm3508_vm10 = vcmp.gt.f32.partialorder %v8569_v57, 0.0 }
 0x63d   : > { %6719 = vpow2.f32 %v3551_v56  ;;  %v3547_v50 = vmul.f32 1.442695, %v8575_v55  ;;  %6002 = vmatprep.subr.bf16.mxu1 %v6344_v26  ;;  %v3664_v46 = vsel %vm3504_vm6, %v8553_v44, %v3632_v54  ;;  %v6353_v44 = vld [vmem:[#allocation16 + $0x14] ss:$8 sps:$4 sm:$0xff]   ;;  %vm3506_vm9 = vcmp.gt.f32.partialorder %v8575_v55, 0.0 }
 0x63e   : > { %6721 = vpow2.f32 %v3549_v43  ;;  %v3662_v33 = vsel %vm3502_vm5, %v8556_v12, %v3630_v21  ;;  %v3663_v12 = vsel %vm3503_vm7, %v8545_v28, %v3631_v45  ;;  %v3696_v16 = vmul.f32 1.050701, %v3664_v46  ;;  %4736 = vmatprep.subr.bf16.mxu0 %v6353_v44 }
 0x63f   : > { %6723 = vpow2.f32 %v3547_v50  ;;  %v3694_v23 = vmul.f32 1.050701, %v3662_v33  ;;  %v3695_v42 = vmul.f32 1.050701, %v3663_v12  ;;  %4737 = vmatpush1.bf16.msra.mxu0 %v6351_v62 }
 0x640   : > { %6018 = vmatpush1.bf16.msra.mxu1 %v6342_v2  ;;  %4738 = vmatprep.subr.bf16.mxu0 %v6356_v38 }
 0x641   : > { %v3723_v49 = vpack.c.bf16 %v3694_v23, %v3693_v17  ;;  %6003 = vmatprep.subr.bf16.mxu1 %v6347_v19  ;;  %v3724_v34 = vpack.c.bf16 %v3696_v16, %v3695_v42 }
 0x643   : > { %3899 = vmatmul.mubr.bf16.gmra.mxu1 %v3723_v49  ;;  %4739 = vmatpush1.bf16.msra.mxu0 %v6354_v37 }
 0x644   : > { %3908 = vmatprep.mubr.bf16.mxu1 %v7224_v36  ;;  %6019 = vmatpush1.bf16.msra.mxu1 %v6345_v47 }
 0x645   : > { %v5981_v11 = vpop.f32.mrf.mxu0  ;;  %6004 = vmatprep.subr.bf16.mxu1 %v6350_v22 }
 0x646   : > { %v8587_v60 = vadd.f32 %v5981_v11, %v8538_v10 }
 0x647   : > { %v3418_v32 = vpop.f32.mrf.mxu0 }
 0x648   : > { %v8591_v9 = vadd.f32 %v3418_v32, %v8538_v10  ;;  %v6718_v53 = vpop.eup %6717  ;;  %v3557_v28 = vmul.f32 1.442695, %v8587_v60  ;;  %6020 = vmatpush1.bf16.msra.mxu1 %v6348_v58  ;;  %vm3511_vm15 = vcmp.gt.f32.partialorder %v8587_v60, 0.0 }
 0x649   : > { %v5982_v40 = vpop.f32.mrf.mxu0  ;;  %v5451_v6 = vadd.f32 -1.0, %v6718_v53  ;;  %6005 = vmatprep.subr.bf16.mxu1 %v6353_v44 }
 0x64a   : > { %v3553_v61 = vmul.f32 1.442695, %v8591_v9  ;;  %v8596_v59 = vadd.f32 %v5982_v40, %v8538_v10  ;;  %v6720_v5 = vpop.eup %6719  ;;  %vm3509_vm12 = vcmp.gt.f32.partialorder %v8591_v9, 0.0 }
 0x64b   : > { %v3421_v41 = vpop.f32.mrf.mxu0  ;;  %v6722_v35 = vpop.eup %6721  ;;  %v3633_v52 = vmul.f32 1.6732632, %v5451_v6  ;;  %3909 = vmatmul.mubr.bf16.gmra.mxu1 %v3724_v34  ;;  %v5454_v30 = vadd.f32 -1.0, %v6720_v5 }
 0x64c   : > { %v8599_v25 = vadd.f32 %v3421_v41, %v8538_v10  ;;  %6725 = vpow2.f32 %v3553_v61  ;;  %v6724_v63 = vpop.eup %6723  ;;  %v3559_v39 = vmul.f32 1.442695, %v8596_v59  ;;  %3918 = vmatprep.mubr.bf16.mxu1 %v7224_v36  ;;  %v5453_v15 = vadd.f32 -1.0, %v6722_v35  ;;  %6021 = vmatpush1.bf16.msra.mxu1 %v6351_v62 }
 0x64d   : > { %v5452_v14 = vadd.f32 -1.0, %v6724_v63  ;;  %6727 = vpow2.f32 %v3557_v28  ;;  %v3665_v24 = vsel %vm3505_vm8, %v8565_v8, %v3633_v52  ;;  %6006 = vmatprep.subr.bf16.mxu1 %v6356_v38  ;;  %v3636_v31 = vmul.f32 1.6732632, %v5454_v30 }
 0x64e   : > { %v3555_v0 = vmul.f32 1.442695, %v8599_v25  ;;  %6729 = vpow2.f32 %v3559_v39  ;;  %v3697_v4 = vmul.f32 1.050701, %v3665_v24  ;;  %v3635_v43 = vmul.f32 1.6732632, %v5453_v15 }
 0x64f   : > { %v3634_v13 = vmul.f32 1.6732632, %v5452_v14  ;;  %v3668_v3 = vsel %vm3508_vm10, %v8569_v57, %v3636_v31  ;;  %vm3510_vm13 = vcmp.gt.f32.partialorder %v8599_v25, 0.0  ;;  %vm3512_vm14 = vcmp.gt.f32.partialorder %v8596_v59, 0.0 }
 0x650   : > { %6731 = vpow2.f32 %v3555_v0  ;;  %6022 = vmatpush1.bf16.msra.mxu1 %v6354_v37  ;;  %v3667_v7 = vsel %vm3507_vm11, %v8562_v1, %v3635_v43 }
 0x651   : > { %v3666_v29 = vsel %vm3506_vm9, %v8575_v55, %v3634_v13  ;;  %v3700_v55 = vmul.f32 1.050701, %v3668_v3  ;;  %v3699_v57 = vmul.f32 1.050701, %v3667_v7 }
 0x652   : > { %v3698_v51 = vmul.f32 1.050701, %v3666_v29 }
 0x653   : > { %v3726_v23 = vpack.c.bf16 %v3700_v55, %v3699_v57 }
 0x654   : > { %v3725_v26 = vpack.c.bf16 %v3698_v51, %v3697_v4 }
 0x656   : > { %3919 = vmatmul.mubr.bf16.gmra.mxu1 %v3725_v26 }
 0x657   : > { %v5985_v8 = vpop.f32.mrf.mxu0  ;;  %3928 = vmatprep.mubr.bf16.mxu1 %v7224_v36 }
 0x658   : > { %v8614_v48 = vadd.f32 %v5985_v8, %v8538_v10 }
 0x659   : > { %v6726_v56 = vpop.eup %6725  ;;  %v3434_v27 = vpop.f32.mrf.mxu0 }
 0x65a   : > { %v5455_v21 = vadd.f32 -1.0, %v6726_v56  ;;  %v8617_v50 = vadd.f32 %v3434_v27, %v8538_v10  ;;  %v6728_v2 = vpop.eup %6727  ;;  %v3565_v1 = vmul.f32 1.442695, %v8614_v48  ;;  %vm3515_vm3 = vcmp.gt.f32.partialorder %v8614_v48, 0.0 }
 0x65b   : > { %v5986_v19 = vpop.f32.mrf.mxu0  ;;  %v6730_v54 = vpop.eup %6729  ;;  %v5457_v12 = vadd.f32 -1.0, %v6728_v2 }
 0x65c   : > { %v3637_v33 = vmul.f32 1.6732632, %v5455_v21  ;;  %v3561_v45 = vmul.f32 1.442695, %v8617_v50  ;;  %v8622_v47 = vadd.f32 %v5986_v19, %v8538_v10  ;;  %v5458_v22 = vadd.f32 -1.0, %v6730_v54 }
 0x65d   : > { %v6732_v17 = vpop.eup %6731  ;;  %v3437_v49 = vpop.f32.mrf.mxu0  ;;  %v3639_v28 = vmul.f32 1.6732632, %v5457_v12  ;;  %vm3513_vm0 = vcmp.gt.f32.partialorder %v8617_v50, 0.0 }
 0x65e   : > { %v5456_v46 = vadd.f32 -1.0, %v6732_v17  ;;  %v3438_v11 = vadd.f32 %v3437_v49, %v8538_v10  ;;  %6733 = vpow2.f32 %v3561_v45  ;;  %3929 = vmatmul.mubr.bf16.gmra.mxu1 %v3726_v23  ;;  %v3669_v32 = vsel %vm3509_vm12, %v8591_v9, %v3637_v33 }
 0x65f   : > { %v3567_v16 = vmul.f32 1.442695, %v8622_v47  ;;  %3938 = vmatprep.mubr.bf16.mxu1 %v7224_v36  ;;  %6735 = vpow2.f32 %v3565_v1  ;;  %v3640_v53 = vmul.f32 1.6732632, %v5458_v22  ;;  %v3701_v42 = vmul.f32 1.050701, %v3669_v32 }
 0x660   : > { %v3638_v58 = vmul.f32 1.6732632, %v5456_v46  ;;  %v3563_v44 = vmul.f32 1.442695, %v3438_v11  ;;  %v3671_v62 = vsel %vm3511_vm15, %v8587_v60, %v3639_v28  ;;  %vm3514_vm1 = vcmp.gt.f32.partialorder %v3438_v11, 0.0 }
 0x661   : > { %6737 = vpow2.f32 %v3567_v16  ;;  %v3672_v61 = vsel %vm3512_vm14, %v8596_v59, %v3640_v53  ;;  %v3703_v35 = vmul.f32 1.050701, %v3671_v62  ;;  %vm3516_vm2 = vcmp.gt.f32.partialorder %v8622_v47, 0.0  ;;  %v6359_v22 = vld [vmem:[#allocation16 + $0xf4] ss:$8 sps:$4 sm:$0xff]  }
 0x662   : > { %v3670_v40 = vsel %vm3510_vm13, %v8599_v25, %v3638_v58  ;;  %6739 = vpow2.f32 %v3563_v44  ;;  %v3704_v5 = vmul.f32 1.050701, %v3672_v61  ;;  %4740 = vmatprep.subr.bf16.mxu0 %v6359_v22  ;;  %6007 = vmatprep.subr.bf16.mxu1 %v6359_v22  ;;  %v6362_v28 = vld [vmem:[#allocation16 + $0xe4] ss:$8 sps:$4 sm:$0xff]  }
 0x663   : > { %v3702_v6 = vmul.f32 1.050701, %v3670_v40  ;;  %v6374_v22 = vld [vmem:[#allocation16 + $0xa4] ss:$8 sps:$4 sm:$0xff]  }
 0x664   : > { %v3728_v39 = vpack.c.bf16 %v3704_v5, %v3703_v35 }
 0x665   : > { %v3727_v9 = vpack.c.bf16 %v3702_v6, %v3701_v42 }
 0x667   : > { %3939 = vmatmul.mubr.bf16.gmra.mxu1 %v3727_v9 }
 0x668   : > { %v5989_v41 = vpop.f32.mrf.mxu0  ;;  %3948 = vmatprep.mubr.bf16.mxu1 %v7224_v36 }
 0x669   : > { %v8637_v34 = vadd.f32 %v5989_v41, %v8538_v10  ;;  %v6360_v41 = vld [vmem:[#allocation16 + $0xe0] ss:$8 sps:$4 sm:$0xff]  }
 0x66a   : > { %v3450_v25 = vpop.f32.mrf.mxu0 }
 0x66b   : > { %v8640_v38 = vadd.f32 %v3450_v25, %v8538_v10  ;;  %v6734_v63 = vpop.eup %6733  ;;  %v3573_v30 = vmul.f32 1.442695, %v8637_v34  ;;  %vm3519_vm7 = vcmp.gt.f32.partialorder %v8637_v34, 0.0 }
 0x66c   : > { %v5990_v52 = vpop.f32.mrf.mxu0  ;;  %v5459_v0 = vadd.f32 -1.0, %v6734_v63  ;;  %v6736_v37 = vpop.eup %6735 }
 0x66d   : > { %v3569_v59 = vmul.f32 1.442695, %v8640_v38  ;;  %v8645_v60 = vadd.f32 %v5990_v52, %v8538_v10  ;;  %v5461_v26 = vadd.f32 -1.0, %v6736_v37  ;;  %vm3517_vm4 = vcmp.gt.f32.partialorder %v8640_v38, 0.0  ;;  %v6365_v52 = vld [vmem:[#allocation16 + $0xd4] ss:$8 sps:$4 sm:$0xff]  }
 0x66e   : > { %v3453_v14 = vpop.f32.mrf.mxu0  ;;  %v6738_v24 = vpop.eup %6737  ;;  %v3641_v13 = vmul.f32 1.6732632, %v5459_v0 }
 0x66f   : > { %6741 = vpow2.f32 %v3569_v59  ;;  %v8648_v15 = vadd.f32 %v3453_v14, %v8538_v10  ;;  %3949 = vmatmul.mubr.bf16.gmra.mxu1 %v3728_v39  ;;  %v6740_v31 = vpop.eup %6739  ;;  %v3575_v29 = vmul.f32 1.442695, %v8645_v60  ;;  %v5462_v51 = vadd.f32 -1.0, %v6738_v24  ;;  %v6363_v39 = vld [vmem:[#allocation16 + $0xd0] ss:$8 sps:$4 sm:$0xff]  }
 0x670   : > { %3958 = vmatprep.mubr.bf16.mxu1 %v7224_v36  ;;  %v5460_v43 = vadd.f32 -1.0, %v6740_v31  ;;  %6743 = vpow2.f32 %v3573_v30  ;;  %v3673_v3 = vsel %vm3513_vm0, %v8617_v50, %v3641_v13  ;;  %v3643_v21 = vmul.f32 1.6732632, %v5461_v26  ;;  %v6368_v24 = vld [vmem:[#allocation16 + $0xc4] ss:$8 sps:$4 sm:$0xff]  }
 0x671   : > { %v3571_v4 = vmul.f32 1.442695, %v8648_v15  ;;  %6745 = vpow2.f32 %v3575_v29  ;;  %v3644_v7 = vmul.f32 1.6732632, %v5462_v51  ;;  %v3705_v55 = vmul.f32 1.050701, %v3673_v3 }
 0x672   : > { %v3642_v8 = vmul.f32 1.6732632, %v5460_v43  ;;  %v3675_v50 = vsel %vm3515_vm3, %v8614_v48, %v3643_v21  ;;  %vm3518_vm5 = vcmp.gt.f32.partialorder %v8648_v15, 0.0  ;;  %vm3520_vm6 = vcmp.gt.f32.partialorder %v8645_v60, 0.0  ;;  %v6366_v29 = vld [vmem:[#allocation16 + $0xc0] ss:$8 sps:$4 sm:$0xff]  }
 0x673   : > { %6747 = vpow2.f32 %v3571_v4  ;;  %v3676_v19 = vsel %vm3516_vm2, %v8622_v47, %v3644_v7  ;;  %v3707_v48 = vmul.f32 1.050701, %v3675_v50  ;;  %v6371_v7 = vld [vmem:[#allocation16 + $0xb4] ss:$8 sps:$4 sm:$0xff]  }
 0x674   : > { %v3674_v56 = vsel %vm3514_vm1, %v3438_v11, %v3642_v8  ;;  %v3708_v1 = vmul.f32 1.050701, %v3676_v19  ;;  %v6357_v11 = vld [vmem:[#allocation16 + $0xf0] ss:$8 sps:$4 sm:$0xff]  }
 0x675   : > { %v3706_v27 = vmul.f32 1.050701, %v3674_v56  ;;  %4741 = vmatpush2.bf16.msra.mxu0 %v6357_v11  ;;  %6023 = vmatpush2.bf16.msra.mxu1 %v6357_v11 }
 0x676   : > { %v3730_v42 = vpack.c.bf16 %v3708_v1, %v3707_v48  ;;  %4742 = vmatprep.subr.bf16.mxu0 %v6362_v28  ;;  %6008 = vmatprep.subr.bf16.mxu1 %v6362_v28  ;;  %v6380_v28 = vld [vmem:[#allocation16 + $0x84] ss:$8 sps:$4 sm:$0xff]  }
 0x677   : > { %v3729_v2 = vpack.c.bf16 %v3706_v27, %v3705_v55  ;;  %v6369_v27 = vld [vmem:[#allocation16 + $0xb0] ss:$8 sps:$4 sm:$0xff]  }
 0x678   : > { %v5993_v57 = vpop.f32.mrf.mxu0 }
 0x679   : > { %3959 = vmatmul.mubr.bf16.gmra.mxu1 %v3729_v2  ;;  %v8660_v17 = vadd.f32 %v5993_v57, %v8538_v10  ;;  %4743 = vmatpush2.bf16.msra.mxu0 %v6360_v41 }
 0x67a   : > { %v3466_v54 = vpop.f32.mrf.mxu0  ;;  %3968 = vmatprep.mubr.bf16.mxu1 %v7224_v36  ;;  %6024 = vmatpush2.bf16.msra.mxu1 %v6360_v41 }
 0x67b   : > { %v8663_v23 = vadd.f32 %v3466_v54, %v8538_v10  ;;  %v3581_v44 = vmul.f32 1.442695, %v8660_v17  ;;  %4744 = vmatprep.subr.bf16.mxu0 %v6365_v52  ;;  %6009 = vmatprep.subr.bf16.mxu1 %v6365_v52  ;;  %vm3523_vm11 = vcmp.gt.f32.partialorder %v8660_v17, 0.0 }
 0x67c   : > { %v6742_v33 = vpop.eup %6741  ;;  %v5994_v49 = vpop.f32.mrf.mxu0 }
 0x67d   : > { %v5463_v45 = vadd.f32 -1.0, %v6742_v33  ;;  %v3577_v47 = vmul.f32 1.442695, %v8663_v23  ;;  %v8668_v46 = vadd.f32 %v5994_v49, %v8538_v10  ;;  %v6744_v12 = vpop.eup %6743  ;;  %4745 = vmatpush2.bf16.msra.mxu0 %v6363_v39  ;;  %v6372_v49 = vld [vmem:[#allocation16 + $0xa0] ss:$8 sps:$4 sm:$0xff]   ;;  %vm3521_vm8 = vcmp.gt.f32.partialorder %v8663_v23, 0.0 }
 0x67e   : > { %v3469_v32 = vpop.f32.mrf.mxu0  ;;  %v6746_v58 = vpop.eup %6745  ;;  %v5465_v5 = vadd.f32 -1.0, %v6744_v12  ;;  %6025 = vmatpush2.bf16.msra.mxu1 %v6363_v39  ;;  %4746 = vmatprep.subr.bf16.mxu0 %v6368_v24 }
 0x67f   : > { %v3645_v16 = vmul.f32 1.6732632, %v5463_v45  ;;  %6749 = vpow2.f32 %v3577_v47  ;;  %v3583_v53 = vmul.f32 1.442695, %v8668_v46  ;;  %v8673_v6 = vadd.f32 %v3469_v32, %v8538_v10  ;;  %6010 = vmatprep.subr.bf16.mxu1 %v6368_v24  ;;  %v6377_v32 = vld [vmem:[#allocation16 + $0x94] ss:$8 sps:$4 sm:$0xff]  }
 0x680   : > { %v6748_v40 = vpop.eup %6747  ;;  %v5466_v9 = vadd.f32 -1.0, %v6746_v58  ;;  %v6375_v58 = vld [vmem:[#allocation16 + $0x90] ss:$8 sps:$4 sm:$0xff]   ;;  %vm3524_vm10 = vcmp.gt.f32.partialorder %v8668_v46, 0.0 }
 0x681   : > { %v5464_v61 = vadd.f32 -1.0, %v6748_v40  ;;  %6751 = vpow2.f32 %v3583_v53  ;;  %v3579_v62 = vmul.f32 1.442695, %v8673_v6  ;;  %3969 = vmatmul.mubr.bf16.gmra.mxu1 %v3730_v42  ;;  %v3677_v25 = vsel %vm3517_vm4, %v8640_v38, %v3645_v16  ;;  %4747 = vmatpush2.bf16.msra.mxu0 %v6366_v29 }
 0x682   : > { %6753 = vpow2.f32 %v3581_v44  ;;  %3978 = vmatprep.mubr.bf16.mxu1 %v7224_v36  ;;  %v3648_v63 = vmul.f32 1.6732632, %v5466_v9  ;;  %v3709_v0 = vmul.f32 1.050701, %v3677_v25  ;;  %v3647_v38 = vmul.f32 1.6732632, %v5465_v5  ;;  %6026 = vmatpush2.bf16.msra.mxu1 %v6366_v29 }
 0x683   : > { %v3646_v35 = vmul.f32 1.6732632, %v5464_v61  ;;  %6755 = vpow2.f32 %v3579_v62  ;;  %4748 = vmatprep.subr.bf16.mxu0 %v6371_v7  ;;  %6011 = vmatprep.subr.bf16.mxu1 %v6371_v7  ;;  %vm3522_vm9 = vcmp.gt.f32.partialorder %v8673_v6, 0.0  ;;  %v6378_v9 = vld [vmem:[#allocation16 + $0x80] ss:$8 sps:$4 sm:$0xff]  }
 0x684   : > { %v3680_v13 = vsel %vm3520_vm6, %v8645_v60, %v3648_v63  ;;  %v3679_v4 = vsel %vm3519_vm7, %v8637_v34, %v3647_v38 }
 0x685   : > { %v3678_v59 = vsel %vm3518_vm5, %v8648_v15, %v3646_v35  ;;  %v3712_v26 = vmul.f32 1.050701, %v3680_v13  ;;  %v3711_v34 = vmul.f32 1.050701, %v3679_v4  ;;  %4749 = vmatpush2.bf16.msra.mxu0 %v6369_v27 }
 0x686   : > { %v3710_v30 = vmul.f32 1.050701, %v3678_v59  ;;  %6027 = vmatpush2.bf16.msra.mxu1 %v6369_v27  ;;  %4750 = vmatprep.subr.bf16.mxu0 %v6374_v22 }
 0x687   : > { %v3732_v54 = vpack.c.bf16 %v3712_v26, %v3711_v34  ;;  %6012 = vmatprep.subr.bf16.mxu1 %v6374_v22 }
 0x688   : > { %v5997_v14 = vpop.f32.mrf.mxu0  ;;  %v3731_v37 = vpack.c.bf16 %v3710_v30, %v3709_v0 }
 0x689   : > { %v8690_v60 = vadd.f32 %v5997_v14, %v8538_v10  ;;  %4751 = vmatpush2.bf16.msra.mxu0 %v6372_v49 }
 0x68a   : > { %v3482_v31 = vpop.f32.mrf.mxu0  ;;  %3979 = vmatmul.mubr.bf16.gmra.mxu1 %v3731_v37  ;;  %4752 = vmatprep.subr.bf16.mxu0 %v6377_v32 }
 0x68b   : > { %v8685_v15 = vadd.f32 %v3482_v31, %v8538_v10  ;;  %3988 = vmatprep.mubr.bf16.mxu1 %v7224_v36  ;;  %v3589_v50 = vmul.f32 1.442695, %v8690_v60  ;;  %6028 = vmatpush2.bf16.msra.mxu1 %v6372_v49  ;;  %vm3527_vm15 = vcmp.gt.f32.partialorder %v8690_v60, 0.0 }
 0x68c   : > { %v5998_v51 = vpop.f32.mrf.mxu0  ;;  %v6750_v43 = vpop.eup %6749  ;;  %6013 = vmatprep.subr.bf16.mxu1 %v6377_v32 }
 0x68d   : > { %v3585_v3 = vmul.f32 1.442695, %v8685_v15  ;;  %v8694_v8 = vadd.f32 %v5998_v51, %v8538_v10  ;;  %v5467_v56 = vadd.f32 -1.0, %v6750_v43  ;;  %4753 = vmatpush2.bf16.msra.mxu0 %v6375_v58  ;;  %vm3525_vm12 = vcmp.gt.f32.partialorder %v8685_v15, 0.0 }
 0x68e   : > { %v3485_v55 = vpop.f32.mrf.mxu0  ;;  %v6752_v57 = vpop.eup %6751  ;;  %4754 = vmatprep.subr.bf16.mxu0 %v6380_v28 }
 0x68f   : > { %6757 = vpow2.f32 %v3585_v3  ;;  %v3591_v21 = vmul.f32 1.442695, %v8694_v8  ;;  %v8698_v2 = vadd.f32 %v3485_v55, %v8538_v10  ;;  %v6754_v19 = vpop.eup %6753  ;;  %v3649_v33 = vmul.f32 1.6732632, %v5467_v56  ;;  %6029 = vmatpush2.bf16.msra.mxu1 %v6375_v58 }
 0x690   : > { %v6756_v45 = vpop.eup %6755  ;;  %v5470_v47 = vadd.f32 -1.0, %v6752_v57  ;;  %v5469_v10 = vadd.f32 -1.0, %v6754_v19  ;;  %6014 = vmatprep.subr.bf16.mxu1 %v6380_v28  ;;  %vm3528_vm14 = vcmp.gt.f32.partialorder %v8694_v8, 0.0  ;;  %v5475_v3 = vld [vmem:[%s9349_s9 + $0x6] ss:$8 sm:$0x3] }
 0x691   : > { %v3587_v1 = vmul.f32 1.442695, %v8698_v2  ;;  %6759 = vpow2.f32 %v3591_v21  ;;  %v5468_v11 = vadd.f32 -1.0, %v6756_v45  ;;  %v3681_v12 = vsel %vm3521_vm8, %v8663_v23, %v3649_v33  ;;  %4755 = vmatpush2.bf16.msra.mxu0 %v6378_v9 }
 0x692   : > { %3989 = vmatmul.mubr.bf16.gmra.mxu1 %v3732_v54  ;;  %v3652_v16 = vmul.f32 1.6732632, %v5470_v47  ;;  %v3713_v53 = vmul.f32 1.050701, %v3681_v12  ;;  %v3651_v42 = vmul.f32 1.6732632, %v5469_v10  ;;  %v8726_v7 = vrot.slane %v5475_v3, %v7553_v18 }
 0x693   : > { %6761 = vpow2.f32 %v3587_v1  ;;  %3998 = vmatprep.mubr.bf16.mxu1 %v7224_v36  ;;  %v3650_v48 = vmul.f32 1.6732632, %v5468_v11  ;;  %6030 = vmatpush2.bf16.msra.mxu1 %v6378_v9  ;;  %vm3526_vm13 = vcmp.gt.f32.partialorder %v8698_v2, 0.0 }
 0x694   : > { %6763 = vpow2.f32 %v3589_v50  ;;  %v3684_v61 = vsel %vm3524_vm10, %v8668_v46, %v3652_v16 }
 0x695   : > { %v3682_v44 = vsel %vm3522_vm9, %v8673_v6, %v3650_v48  ;;  %v3683_v6 = vsel %vm3523_vm11, %v8660_v17, %v3651_v42  ;;  %v3716_v5 = vmul.f32 1.050701, %v3684_v61 }
 0x696   : > { %v3714_v40 = vmul.f32 1.050701, %v3682_v44  ;;  %v3715_v63 = vmul.f32 1.050701, %v3683_v6 }
 0x698   : > { %v3733_v23 = vpack.c.bf16 %v3714_v40, %v3713_v53  ;;  %v3734_v39 = vpack.c.bf16 %v3716_v5, %v3715_v63 }
 0x69a   : > { %3999 = vmatmul.mubr.bf16.gmra.mxu1 %v3733_v23 }
 0x69b   : > { %4008 = vmatprep.mubr.bf16.mxu1 %v7224_v36 }
 0x69c   : > { %v6758_v41 = vpop.eup %6757 }
 0x69d   : > { %v5471_v62 = vadd.f32 -1.0, %v6758_v41 }
 0x69e   : > { %v6760_v25 = vpop.eup %6759 }
 0x69f   : > { %v3653_v35 = vmul.f32 1.6732632, %v5471_v62  ;;  %v5474_v30 = vadd.f32 -1.0, %v6760_v25 }
 0x6a0   : > { %v6762_v52 = vpop.eup %6761 }
 0x6a1   : > { %v5472_v59 = vadd.f32 -1.0, %v6762_v52  ;;  %v6764_v46 = vpop.eup %6763  ;;  %v3685_v0 = vsel %vm3525_vm12, %v8685_v15, %v3653_v35  ;;  %v3656_v13 = vmul.f32 1.6732632, %v5474_v30 }
 0x6a2   : > { %4009 = vmatmul.mubr.bf16.gmra.mxu1 %v3734_v39  ;;  %v5473_v17 = vadd.f32 -1.0, %v6764_v46  ;;  %v3717_v37 = vmul.f32 1.050701, %v3685_v0 }
 0x6a3   : > { %v3654_v38 = vmul.f32 1.6732632, %v5472_v59  ;;  %4018 = vmatprep.mubr.bf16.mxu1 %v7224_v36  ;;  %v3688_v4 = vsel %vm3528_vm14, %v8694_v8, %v3656_v13  ;;  %v8729_v8 = vrot.slane %v5475_v3, %v7558_v20 }
 0x6a4   : > { %v3655_v29 = vmul.f32 1.6732632, %v5473_v17  ;;  %v3720_v51 = vmul.f32 1.050701, %v3688_v4 }
 0x6a5   : > { %v3686_v14 = vsel %vm3526_vm13, %v8698_v2, %v3654_v38 }
 0x6a6   : > { %v3718_v24 = vmul.f32 1.050701, %v3686_v14  ;;  %v3687_v15 = vsel %vm3527_vm15, %v8690_v60, %v3655_v29 }
 0x6a7   : > { %v3719_v43 = vmul.f32 1.050701, %v3687_v15 }
 0x6a8   : > { %v3735_v31 = vpack.c.bf16 %v3718_v24, %v3717_v37 }
 0x6a9   : > { %v3736_v26 = vpack.c.bf16 %v3720_v51, %v3719_v43 }
 0x6aa   : > { %4019 = vmatmul.mubr.bf16.gmra.mxu1 %v3735_v31 }
 0x6ab   : > { %4028 = vmatprep.mubr.bf16.mxu1 %v7224_v36 }
 0x6b2   : > { %4029 = vmatmul.mubr.bf16.gmra.mxu1 %v3736_v26 }
 0x6f3   : > { %v3880_v56 = vpop.f32.mrf.mxu1 }
 0x6f4   : > { %v8732_v55 = vadd.f32 %v3880_v56, %v8726_v7 }
 0x6f5   : > { %v3882_v60 = vpop.f32.mrf.mxu1 }
 0x6f6   : > { %v4103_v36 = vmul.f32 1.442695, %v8732_v55  ;;  %v3883_v27 = vadd.f32 %v3882_v60, %v8729_v8  ;;  %vm4039_vm0 = vcmp.gt.f32.partialorder %v8732_v55, 0.0 }
 0x6f7   : > { %v3884_v34 = vpop.f32.mrf.mxu1 }
 0x6f8   : > { %6765 = vpow2.f32 %v4103_v36  ;;  %v4105_v21 = vmul.f32 1.442695, %v3883_v27  ;;  %v3885_v2 = vadd.f32 %v3884_v34, %v8726_v7  ;;  %vm4040_vm2 = vcmp.gt.f32.partialorder %v3883_v27, 0.0 }
 0x6f9   : > { %v3886_v57 = vpop.f32.mrf.mxu1 }
 0x6fa   : > { %6767 = vpow2.f32 %v4105_v21  ;;  %v4107_v19 = vmul.f32 1.442695, %v3885_v2  ;;  %v3887_v54 = vadd.f32 %v3886_v57, %v8729_v8  ;;  %vm4041_vm1 = vcmp.gt.f32.partialorder %v3885_v2, 0.0 }
 0x6fb   : > { %v3890_v33 = vpop.f32.mrf.mxu1 }
 0x6fc   : > { %6769 = vpow2.f32 %v4107_v19  ;;  %v4109_v50 = vmul.f32 1.442695, %v3887_v54  ;;  %v8739_v1 = vadd.f32 %v3890_v33, %v8726_v7  ;;  %vm4042_vm3 = vcmp.gt.f32.partialorder %v3887_v54, 0.0 }
 0x6fd   : > { %v3892_v45 = vpop.f32.mrf.mxu1 }
 0x6fe   : > { %6771 = vpow2.f32 %v4109_v50  ;;  %v4111_v49 = vmul.f32 1.442695, %v8739_v1  ;;  %v8743_v22 = vadd.f32 %v3892_v45, %v8729_v8  ;;  %vm4043_vm6 = vcmp.gt.f32.partialorder %v8739_v1, 0.0 }
 0x6ff   : > { %v3894_v47 = vpop.f32.mrf.mxu1 }
 0x700   : > { %6773 = vpow2.f32 %v4111_v49  ;;  %v4113_v11 = vmul.f32 1.442695, %v8743_v22  ;;  %v8747_v10 = vadd.f32 %v3894_v47, %v8726_v7  ;;  %vm4044_vm4 = vcmp.gt.f32.partialorder %v8743_v22, 0.0 }
 0x701   : > { %v3896_v12 = vpop.f32.mrf.mxu1 }
 0x702   : > { %6775 = vpow2.f32 %v4113_v11  ;;  %v4115_v48 = vmul.f32 1.442695, %v8747_v10  ;;  %v8751_v32 = vadd.f32 %v3896_v12, %v8729_v8  ;;  %vm4045_vm5 = vcmp.gt.f32.partialorder %v8747_v10, 0.0 }
 0x703   : > { %v3900_v44 = vpop.f32.mrf.mxu1 }
 0x704   : > { %6777 = vpow2.f32 %v4115_v48  ;;  %v4117_v58 = vmul.f32 1.442695, %v8751_v32  ;;  %v8755_v42 = vadd.f32 %v3900_v44, %v8726_v7  ;;  %vm4046_vm7 = vcmp.gt.f32.partialorder %v8751_v32, 0.0 }
 0x705   : > { %v6766_v16 = vpop.eup %6765  ;;  %v3902_v23 = vpop.f32.mrf.mxu1 }
 0x706   : > { %6779 = vpow2.f32 %v4117_v58  ;;  %v5492_v40 = vadd.f32 -1.0, %v6766_v16  ;;  %v4119_v61 = vmul.f32 1.442695, %v8755_v42  ;;  %v8759_v41 = vadd.f32 %v3902_v23, %v8729_v8 }
 0x707   : > { %v6768_v53 = vpop.eup %6767  ;;  %v3904_v62 = vpop.f32.mrf.mxu1  ;;  %vm4047_vm8 = vcmp.gt.f32.partialorder %v8755_v42, 0.0 }
 0x708   : > { %v5493_v28 = vadd.f32 -1.0, %v6768_v53  ;;  %v4295_v25 = vmul.f32 1.6732632, %v5492_v40  ;;  %6781 = vpow2.f32 %v4119_v61  ;;  %v4121_v52 = vmul.f32 1.442695, %v8759_v41 }
 0x709   : > { %v6770_v9 = vpop.eup %6769  ;;  %v8763_v46 = vadd.f32 %v3904_v62, %v8726_v7  ;;  %v3906_v39 = vpop.f32.mrf.mxu1  ;;  %vm4048_vm10 = vcmp.gt.f32.partialorder %v8759_v41, 0.0 }
 0x70a   : > { %v5494_v6 = vadd.f32 -1.0, %v6770_v9  ;;  %v4296_v35 = vmul.f32 1.6732632, %v5493_v28  ;;  %6783 = vpow2.f32 %v4121_v52  ;;  %v8767_v30 = vadd.f32 %v3906_v39, %v8729_v8 }
 0x70b   : > { %v6772_v5 = vpop.eup %6771  ;;  %v3910_v14 = vpop.f32.mrf.mxu1  ;;  %v4359_v24 = vsel %vm4039_vm0, %v8732_v55, %v4295_v25  ;;  %v4123_v31 = vmul.f32 1.442695, %v8763_v46  ;;  %vm4049_vm9 = vcmp.gt.f32.partialorder %v8763_v46, 0.0 }
 0x70c   : > { %v4297_v63 = vmul.f32 1.6732632, %v5494_v6  ;;  %v5495_v59 = vadd.f32 -1.0, %v6772_v5  ;;  %v4360_v13 = vsel %vm4040_vm2, %v3883_v27, %v4296_v35  ;;  %v8772_v29 = vadd.f32 %v3910_v14, %v8726_v7 }
 0x70d   : > { %v6774_v0 = vpop.eup %6773  ;;  %v4125_v43 = vmul.f32 1.442695, %v8767_v30  ;;  %v3912_v26 = vpop.f32.mrf.mxu1  ;;  %6785 = vpow2.f32 %v4123_v31  ;;  %v4424_v36 = vmul.f32 1.050701, %v4360_v13  ;;  %vm4050_vm11 = vcmp.gt.f32.partialorder %v8767_v30, 0.0 }
 0x70e   : > { %v4361_v38 = vsel %vm4041_vm1, %v3885_v2, %v4297_v63  ;;  %v4298_v17 = vmul.f32 1.6732632, %v5495_v59  ;;  %v5496_v15 = vadd.f32 -1.0, %v6774_v0  ;;  %v4423_v2 = vmul.f32 1.050701, %v4359_v24 }
 0x70f   : > { %v6776_v37 = vpop.eup %6775  ;;  %v4425_v56 = vmul.f32 1.050701, %v4361_v38  ;;  %6787 = vpow2.f32 %v4125_v43  ;;  %v3914_v34 = vpop.f32.mrf.mxu1  ;;  %v4127_v57 = vmul.f32 1.442695, %v8772_v29  ;;  %v8778_v19 = vadd.f32 %v3912_v26, %v8729_v8 }
 0x710   : > { %v4362_v4 = vsel %vm4042_vm3, %v3887_v54, %v4298_v17  ;;  %v5497_v51 = vadd.f32 -1.0, %v6776_v37  ;;  %v8781_v54 = vadd.f32 %v3914_v34, %v8726_v7  ;;  %v4299_v33 = vmul.f32 1.6732632, %v5496_v15 }
 0x711   : > { %v6778_v3 = vpop.eup %6777  ;;  %v4426_v60 = vmul.f32 1.050701, %v4362_v4  ;;  %v3916_v49 = vpop.f32.mrf.mxu1  ;;  %v4487_v11 = vpack.c.bf16 %v4425_v56, %v4423_v2  ;;  %6789 = vpow2.f32 %v4127_v57  ;;  %v4129_v12 = vmul.f32 1.442695, %v8778_v19 }
 0x712   : > { %v4300_v55 = vmul.f32 1.6732632, %v5497_v51  ;;  %v5498_v27 = vadd.f32 -1.0, %v6778_v3  ;;  %v4131_v44 = vmul.f32 1.442695, %v8781_v54  ;;  %v8793_v53 = vadd.f32 %v3916_v49, %v8729_v8 }
 0x713   : > { %v6780_v21 = vpop.eup %6779  ;;  %v4488_v47 = vpack.c.bf16 %v4426_v60, %v4424_v36  ;;  %6791 = vpow2.f32 %v4129_v12  ;;  %v4363_v28 = vsel %vm4043_vm6, %v8739_v1, %v4299_v33  ;;  %vm4051_vm12 = vcmp.gt.f32.partialorder %v8772_v29, 0.0 }
 0x714   : > { %v4301_v50 = vmul.f32 1.6732632, %v5498_v27  ;;  %v5499_v45 = vadd.f32 -1.0, %v6780_v21  ;;  %v4364_v48 = vsel %vm4044_vm4, %v8743_v22, %v4300_v55  ;;  %6793 = vpow2.f32 %v4131_v44 }
 0x715   : > { %4756 = vmatprep.mubr.bf16.mxu0 %v4488_v47  ;;  %v6782_v40 = vpop.eup %6781  ;;  %v4428_v23 = vmul.f32 1.050701, %v4364_v48  ;;  %v4133_v62 = vmul.f32 1.442695, %v8793_v53  ;;  %v4427_v35 = vmul.f32 1.050701, %v4363_v28 }
 0x716   : > { %v4365_v58 = vsel %vm4045_vm5, %v8747_v10, %v4301_v50  ;;  %v4302_v16 = vmul.f32 1.6732632, %v5499_v45  ;;  %4757 = vmatmul.mubr.bf16.vlgmr.msra.gmra.mxu0 %v4487_v11  ;;  %v3920_v10 = vpop.f32.mrf.mxu1  ;;  %v5500_v52 = vadd.f32 -1.0, %v6782_v40  ;;  %vm4052_vm13 = vcmp.gt.f32.partialorder %v8778_v19, 0.0 }
 0x717   : > { %v4429_v9 = vmul.f32 1.050701, %v4365_v58  ;;  %v6784_v6 = vpop.eup %6783  ;;  %v8799_v5 = vadd.f32 %v3920_v10, %v8726_v7  ;;  %6795 = vpow2.f32 %v4133_v62  ;;  %vm4053_vm14 = vcmp.gt.f32.partialorder %v8781_v54, 0.0 }
 0x718   : > { %v4366_v22 = vsel %vm4046_vm7, %v8751_v32, %v4302_v16  ;;  %v3922_v25 = vpop.f32.mrf.mxu1  ;;  %v5501_v59 = vadd.f32 -1.0, %v6784_v6  ;;  %v4303_v13 = vmul.f32 1.6732632, %v5500_v52  ;;  %vm4054_vm15 = vcmp.gt.f32.partialorder %v8793_v53, 0.0 }
 0x719   : > { %v4430_v61 = vmul.f32 1.050701, %v4366_v22  ;;  %v8802_v63 = vadd.f32 %v3922_v25, %v8729_v8  ;;  %v4135_v32 = vmul.f32 1.442695, %v8799_v5  ;;  %v4489_v0 = vpack.c.bf16 %v4429_v9, %v4427_v35 }
 0x71a   : > { %v3924_v39 = vpop.f32.mrf.mxu1  ;;  %v6786_v17 = vpop.eup %6785  ;;  %v4304_v15 = vmul.f32 1.6732632, %v5501_v59  ;;  %v4367_v2 = vsel %vm4047_vm8, %v8755_v42, %v4303_v13  ;;  %vm4055_vm3 = vcmp.gt.f32.partialorder %v8799_v5, 0.0 }
 0x71b   : > { %v4490_v1 = vpack.c.bf16 %v4430_v61, %v4428_v23  ;;  %v4137_v38 = vmul.f32 1.442695, %v8802_v63  ;;  %6797 = vpow2.f32 %v4135_v32  ;;  %v8807_v14 = vadd.f32 %v3924_v39, %v8726_v7 }
 0x71c   : > { %v3926_v37 = vpop.f32.mrf.mxu1  ;;  %v6788_v24 = vpop.eup %6787  ;;  %v5502_v31 = vadd.f32 -1.0, %v6786_v17  ;;  %v4368_v57 = vsel %vm4048_vm10, %v8759_v41, %v4304_v15  ;;  %vm4056_vm0 = vcmp.gt.f32.partialorder %v8802_v63, 0.0 }
 0x71d   : > { %4766 = vmatprep.mubr.bf16.mxu0 %v4490_v1  ;;  %6799 = vpow2.f32 %v4137_v38  ;;  %v8810_v4 = vadd.f32 %v3926_v37, %v8729_v8  ;;  %v5503_v51 = vadd.f32 -1.0, %v6788_v24  ;;  %v4139_v43 = vmul.f32 1.442695, %v8807_v14 }
 0x71e   : > { %4767 = vmatmul.mubr.bf16.gmra.mxu0 %v4489_v0  ;;  %v3930_v26 = vpop.f32.mrf.mxu1  ;;  %v4305_v3 = vmul.f32 1.6732632, %v5502_v31  ;;  %v6790_v36 = vpop.eup %6789  ;;  %v4432_v42 = vmul.f32 1.050701, %v4368_v57  ;;  %vm4057_vm1 = vcmp.gt.f32.partialorder %v8807_v14, 0.0 }
 0x71f   : > { %v4141_v56 = vmul.f32 1.442695, %v8810_v4  ;;  %v8815_v60 = vadd.f32 %v3930_v26, %v8726_v7  ;;  %v4306_v55 = vmul.f32 1.6732632, %v5503_v51  ;;  %6801 = vpow2.f32 %v4139_v43 }
 0x720   : > { %v3932_v27 = vpop.f32.mrf.mxu1  ;;  %v4369_v34 = vsel %vm4049_vm9, %v8763_v46, %v4305_v3  ;;  %v6792_v21 = vpop.eup %6791  ;;  %v5504_v11 = vadd.f32 -1.0, %v6790_v36  ;;  %vm4058_vm2 = vcmp.gt.f32.partialorder %v8810_v4, 0.0 }
 0x721   : > { %6803 = vpow2.f32 %v4141_v56  ;;  %v4370_v33 = vsel %vm4050_vm11, %v8767_v30, %v4306_v55  ;;  %v8826_v50 = vadd.f32 %v3932_v27, %v8729_v8  ;;  %v6794_v49 = vpop.eup %6793  ;;  %v4143_v12 = vmul.f32 1.442695, %v8815_v60 }
 0x722   : > { %v3934_v45 = vpop.f32.mrf.mxu1  ;;  %v4434_v47 = vmul.f32 1.050701, %v4370_v33  ;;  %v4433_v48 = vmul.f32 1.050701, %v4369_v34  ;;  %v5506_v58 = vadd.f32 -1.0, %v6794_v49  ;;  %v5505_v41 = vadd.f32 -1.0, %v6792_v21 }
 0x723   : > { %v8830_v46 = vadd.f32 %v3934_v45, %v8726_v7  ;;  %v4431_v30 = vmul.f32 1.050701, %v4367_v2  ;;  %v4145_v44 = vmul.f32 1.442695, %v8826_v50  ;;  %v4307_v23 = vmul.f32 1.6732632, %v5504_v11 }
 0x724   : > { %v3936_v16 = vpop.f32.mrf.mxu1  ;;  %v6796_v10 = vpop.eup %6795  ;;  %6805 = vpow2.f32 %v4143_v12  ;;  %v4492_v61 = vpack.c.bf16 %v4434_v47, %v4432_v42  ;;  %v4309_v62 = vmul.f32 1.6732632, %v5506_v58  ;;  %v4308_v1 = vmul.f32 1.6732632, %v5505_v41 }
 0x725   : > { %v4147_v40 = vmul.f32 1.442695, %v8830_v46  ;;  %v8837_v28 = vadd.f32 %v3936_v16, %v8729_v8  ;;  %v4491_v6 = vpack.c.bf16 %v4433_v48, %v4431_v30  ;;  %v5507_v25 = vadd.f32 -1.0, %v6796_v10 }
 0x726   : > { %4776 = vmatprep.mubr.bf16.mxu0 %v4492_v61  ;;  %v4371_v13 = vsel %vm4051_vm12, %v8772_v29, %v4307_v23  ;;  %v4373_v31 = vsel %vm4053_vm14, %v8781_v54, %v4309_v62  ;;  %v4372_v26 = vsel %vm4052_vm13, %v8778_v19, %v4308_v1  ;;  %vm4059_vm4 = vcmp.gt.f32.partialorder %v8815_v60, 0.0 }
 0x727   : > { %v3940_v22 = vpop.f32.mrf.mxu1  ;;  %6807 = vpow2.f32 %v4147_v40  ;;  %v4149_v59 = vmul.f32 1.442695, %v8837_v28  ;;  %v4310_v39 = vmul.f32 1.6732632, %v5507_v25  ;;  %4777 = vmatmul.mubr.bf16.gmra.mxu0 %v4491_v6  ;;  %v4437_v34 = vmul.f32 1.050701, %v4373_v31 }
 0x728   : > { %v8840_v9 = vadd.f32 %v3940_v22, %v8726_v7  ;;  %v6798_v52 = vpop.eup %6797  ;;  %6809 = vpow2.f32 %v4145_v44  ;;  %v4435_v57 = vmul.f32 1.050701, %v4371_v13  ;;  %v4436_v33 = vmul.f32 1.050701, %v4372_v26 }
 0x729   : > { %v3942_v35 = vpop.f32.mrf.mxu1  ;;  %6811 = vpow2.f32 %v4149_v59  ;;  %v4374_v15 = vsel %vm4054_vm15, %v8793_v53, %v4310_v39  ;;  %v5508_v3 = vadd.f32 -1.0, %v6798_v52  ;;  %vm4060_vm5 = vcmp.gt.f32.partialorder %v8826_v50, 0.0 }
 0x72a   : > { %v6800_v32 = vpop.eup %6799  ;;  %v4151_v0 = vmul.f32 1.442695, %v8840_v9  ;;  %v8847_v38 = vadd.f32 %v3942_v35, %v8729_v8  ;;  %v4438_v54 = vmul.f32 1.050701, %v4374_v15  ;;  %v4493_v42 = vpack.c.bf16 %v4437_v34, %v4435_v57 }
 0x72b   : > { %v3944_v17 = vpop.f32.mrf.mxu1  ;;  %v5509_v37 = vadd.f32 -1.0, %v6800_v32  ;;  %v4311_v12 = vmul.f32 1.6732632, %v5508_v3  ;;  %vm4061_vm6 = vcmp.gt.f32.partialorder %v8830_v46, 0.0  ;;  %vm4062_vm7 = vcmp.gt.f32.partialorder %v8837_v28, 0.0 }
 0x72c   : > { %v8851_v24 = vadd.f32 %v3944_v17, %v8726_v7  ;;  %v6802_v43 = vpop.eup %6801  ;;  %v4153_v56 = vmul.f32 1.442695, %v8847_v38  ;;  %6813 = vpow2.f32 %v4151_v0  ;;  %v4494_v58 = vpack.c.bf16 %v4438_v54, %v4436_v33 }
 0x72d   : > { %v3946_v51 = vpop.f32.mrf.mxu1  ;;  %v5510_v55 = vadd.f32 -1.0, %v6802_v43  ;;  %v4312_v21 = vmul.f32 1.6732632, %v5509_v37  ;;  %vm4063_vm8 = vcmp.gt.f32.partialorder %v8840_v9, 0.0  ;;  %vm4064_vm10 = vcmp.gt.f32.partialorder %v8847_v38, 0.0 }
 0x72e   : > { %v8868_v29 = vadd.f32 %v3946_v51, %v8729_v8  ;;  %v6804_v36 = vpop.eup %6803  ;;  %v4155_v53 = vmul.f32 1.442695, %v8851_v24  ;;  %6815 = vpow2.f32 %v4153_v56  ;;  %4786 = vmatprep.mubr.bf16.mxu0 %v4494_v58  ;;  %vm4065_vm11 = vcmp.gt.f32.partialorder %v8851_v24, 0.0 }
 0x72f   : > { %v3950_v27 = vpop.f32.mrf.mxu1  ;;  %v5511_v2 = vadd.f32 -1.0, %v6804_v36  ;;  %v4313_v19 = vmul.f32 1.6732632, %v5510_v55  ;;  %v4376_v41 = vsel %vm4056_vm0, %v8802_v63, %v4312_v21  ;;  %4787 = vmatmul.mubr.bf16.gmra.mxu0 %v4493_v42 }
 0x730   : > { %6817 = vpow2.f32 %v4155_v53  ;;  %v4157_v47 = vmul.f32 1.442695, %v8868_v29  ;;  %v8873_v11 = vadd.f32 %v3950_v27, %v8726_v7  ;;  %v4440_v6 = vmul.f32 1.050701, %v4376_v41 }
 0x731   : > { %v3952_v45 = vpop.f32.mrf.mxu1  ;;  %v4314_v49 = vmul.f32 1.6732632, %v5511_v2  ;;  %v6806_v44 = vpop.eup %6805  ;;  %v4377_v40 = vsel %vm4057_vm1, %v8807_v14, %v4313_v19  ;;  %vm4066_vm9 = vcmp.gt.f32.partialorder %v8868_v29, 0.0 }
 0x732   : > { %v8877_v48 = vadd.f32 %v3952_v45, %v8729_v8  ;;  %6819 = vpow2.f32 %v4157_v47  ;;  %v4159_v10 = vmul.f32 1.442695, %v8873_v11  ;;  %v4441_v35 = vmul.f32 1.050701, %v4377_v40 }
 0x733   : > { %v3954_v16 = vpop.f32.mrf.mxu1  ;;  %v4378_v30 = vsel %vm4058_vm2, %v8810_v4, %v4314_v49  ;;  %v4375_v4 = vsel %vm4055_vm3, %v8799_v5, %v4311_v12  ;;  %v5512_v14 = vadd.f32 -1.0, %v6806_v44  ;;  %vm4067_vm12 = vcmp.gt.f32.partialorder %v8873_v11, 0.0 }
 0x734   : > { %v4442_v22 = vmul.f32 1.050701, %v4378_v30  ;;  %v8888_v23 = vadd.f32 %v3954_v16, %v8726_v7  ;;  %v6808_v61 = vpop.eup %6807  ;;  %v4161_v62 = vmul.f32 1.442695, %v8877_v48  ;;  %6821 = vpow2.f32 %v4159_v10 }
 0x735   : > { %v3956_v63 = vpop.f32.mrf.mxu1  ;;  %v6810_v25 = vpop.eup %6809  ;;  %v5514_v59 = vadd.f32 -1.0, %v6808_v61  ;;  %v4439_v0 = vmul.f32 1.050701, %v4375_v4  ;;  %v4315_v3 = vmul.f32 1.6732632, %v5512_v14  ;;  %vm4068_vm13 = vcmp.gt.f32.partialorder %v8877_v48, 0.0 }
 0x736   : > { %v4163_v52 = vmul.f32 1.442695, %v8888_v23  ;;  %v6812_v1 = vpop.eup %6811  ;;  %v8895_v32 = vadd.f32 %v3956_v63, %v8729_v8  ;;  %v4496_v39 = vpack.c.bf16 %v4442_v22, %v4440_v6  ;;  %v5513_v5 = vadd.f32 -1.0, %v6810_v25 }
 0x737   : > { %v5515_v17 = vadd.f32 -1.0, %v6812_v1  ;;  %v4495_v31 = vpack.c.bf16 %v4441_v35, %v4439_v0  ;;  %v4317_v56 = vmul.f32 1.6732632, %v5514_v59  ;;  %v4379_v45 = vsel %vm4059_vm4, %v8815_v60, %v4315_v3 }
 0x738   : > { %6823 = vpow2.f32 %v4163_v52  ;;  %4796 = vmatprep.mubr.bf16.mxu0 %v4496_v39  ;;  %v4165_v15 = vmul.f32 1.442695, %v8895_v32  ;;  %v4316_v27 = vmul.f32 1.6732632, %v5513_v5  ;;  %vm4069_vm14 = vcmp.gt.f32.partialorder %v8888_v23, 0.0 }
 0x739   : > { %v3960_v37 = vpop.f32.mrf.mxu1  ;;  %6825 = vpow2.f32 %v4161_v62  ;;  %v6814_v13 = vpop.eup %6813  ;;  %v4318_v54 = vmul.f32 1.6732632, %v5515_v17  ;;  %4797 = vmatmul.mubr.bf16.gmra.mxu0 %v4495_v31  ;;  %v4381_v49 = vsel %vm4061_vm6, %v8830_v46, %v4317_v56  ;;  %vm4070_vm15 = vcmp.gt.f32.partialorder %v8895_v32, 0.0 }
 0x73a   : > { %v8899_v51 = vadd.f32 %v3960_v37, %v8726_v7  ;;  %6827 = vpow2.f32 %v4165_v15  ;;  %v5516_v21 = vadd.f32 -1.0, %v6814_v13  ;;  %v4380_v30 = vsel %vm4060_vm5, %v8826_v50, %v4316_v27 }
 0x73b   : > { %v3962_v43 = vpop.f32.mrf.mxu1  ;;  %v6816_v26 = vpop.eup %6815  ;;  %v4382_v58 = vsel %vm4062_vm7, %v8837_v28, %v4318_v54  ;;  %v4445_v46 = vmul.f32 1.050701, %v4381_v49  ;;  %v4443_v50 = vmul.f32 1.050701, %v4379_v45  ;;  %v4444_v52 = vmul.f32 1.050701, %v4380_v30 }
 0x73c   : > { %v8902_v36 = vadd.f32 %v3962_v43, %v8729_v8  ;;  %v5517_v34 = vadd.f32 -1.0, %v6816_v26  ;;  %v4167_v2 = vmul.f32 1.442695, %v8899_v51  ;;  %v4319_v40 = vmul.f32 1.6732632, %v5516_v21 }
 0x73d   : > { %v3964_v55 = vpop.f32.mrf.mxu1  ;;  %v6818_v53 = vpop.eup %6817  ;;  %v4446_v28 = vmul.f32 1.050701, %v4382_v58  ;;  %v4497_v0 = vpack.c.bf16 %v4445_v46, %v4443_v50  ;;  %vm4071_vm1 = vcmp.gt.f32.partialorder %v8899_v51, 0.0 }
 0x73e   : > { %v8912_v57 = vadd.f32 %v3964_v55, %v8726_v7  ;;  %v4169_v47 = vmul.f32 1.442695, %v8902_v36  ;;  %v5518_v16 = vadd.f32 -1.0, %v6818_v53  ;;  %6829 = vpow2.f32 %v4167_v2 }
 0x73f   : > { %v3966_v33 = vpop.f32.mrf.mxu1  ;;  %v6820_v19 = vpop.eup %6819  ;;  %v4320_v44 = vmul.f32 1.6732632, %v5517_v34  ;;  %v4498_v13 = vpack.c.bf16 %v4446_v28, %v4444_v52  ;;  %vm4072_vm0 = vcmp.gt.f32.partialorder %v8902_v36, 0.0 }
 0x740   : > { %v8920_v12 = vadd.f32 %v3966_v33, %v8729_v8  ;;  %v5519_v42 = vadd.f32 -1.0, %v6820_v19  ;;  %6831 = vpow2.f32 %v4169_v47  ;;  %v4171_v60 = vmul.f32 1.442695, %v8912_v57 }
 0x741   : > { %v3970_v41 = vpop.f32.mrf.mxu1  ;;  %v6822_v6 = vpop.eup %6821  ;;  %v4321_v62 = vmul.f32 1.6732632, %v5518_v16  ;;  %v4384_v1 = vsel %vm4064_vm10, %v8847_v38, %v4320_v44  ;;  %4806 = vmatprep.mubr.bf16.mxu0 %v4498_v13  ;;  %vm4073_vm2 = vcmp.gt.f32.partialorder %v8912_v57, 0.0 }
 0x742   : > { %v4322_v22 = vmul.f32 1.6732632, %v5519_v42  ;;  %v8928_v10 = vadd.f32 %v3970_v41, %v8726_v7  ;;  %6833 = vpow2.f32 %v4171_v60  ;;  %v4173_v63 = vmul.f32 1.442695, %v8920_v12  ;;  %4807 = vmatmul.mubr.bf16.gmra.mxu0 %v4497_v0 }
 0x743   : > { %v3972_v61 = vpop.f32.mrf.mxu1  ;;  %v4448_v38 = vmul.f32 1.050701, %v4384_v1  ;;  %v4385_v15 = vsel %vm4065_vm11, %v8851_v24, %v4321_v62  ;;  %v5520_v56 = vadd.f32 -1.0, %v6822_v6  ;;  %vm4074_vm3 = vcmp.gt.f32.partialorder %v8920_v12, 0.0 }
 0x744   : > { %v8932_v4 = vadd.f32 %v3972_v61, %v8729_v8  ;;  %v4386_v25 = vsel %vm4066_vm9, %v8868_v29, %v4322_v22  ;;  %6835 = vpow2.f32 %v4173_v63  ;;  %v4175_v59 = vmul.f32 1.442695, %v8928_v10 }
 0x745   : > { %v3974_v35 = vpop.f32.mrf.mxu1  ;;  %v6824_v14 = vpop.eup %6823  ;;  %v4450_v17 = vmul.f32 1.050701, %v4386_v25  ;;  %v4383_v29 = vsel %vm4063_vm8, %v8840_v9, %v4319_v40  ;;  %v4449_v2 = vmul.f32 1.050701, %v4385_v15  ;;  %v4323_v42 = vmul.f32 1.6732632, %v5520_v56 }
 0x746   : > { %v6826_v39 = vpop.eup %6825  ;;  %v4177_v37 = vmul.f32 1.442695, %v8932_v4  ;;  %6837 = vpow2.f32 %v4175_v59  ;;  %v8946_v31 = vadd.f32 %v3974_v35, %v8726_v7  ;;  %v5522_v43 = vadd.f32 -1.0, %v6824_v14 }
 0x747   : > { %v3976_v5 = vpop.f32.mrf.mxu1  ;;  %v6828_v3 = vpop.eup %6827  ;;  %v5521_v54 = vadd.f32 -1.0, %v6826_v39  ;;  %v4500_v34 = vpack.c.bf16 %v4450_v17, %v4448_v38  ;;  %v4447_v21 = vmul.f32 1.050701, %v4383_v29  ;;  %vm4076_vm4 = vcmp.gt.f32.partialorder %v8932_v4, 0.0 }
 0x748   : > { %6839 = vpow2.f32 %v4177_v37  ;;  %v4179_v55 = vmul.f32 1.442695, %v8946_v31  ;;  %v8952_v9 = vadd.f32 %v3976_v5, %v8729_v8  ;;  %v5523_v53 = vadd.f32 -1.0, %v6828_v3 }
 0x749   : > { %v4325_v19 = vmul.f32 1.6732632, %v5522_v43  ;;  %4816 = vmatprep.mubr.bf16.mxu0 %v4500_v34  ;;  %v4324_v41 = vmul.f32 1.6732632, %v5521_v54  ;;  %v4499_v46 = vpack.c.bf16 %v4449_v2, %v4447_v21  ;;  %vm4077_vm5 = vcmp.gt.f32.partialorder %v8946_v31, 0.0 }
 0x74a   : > { %v3980_v26 = vpop.f32.mrf.mxu1  ;;  %6841 = vpow2.f32 %v4179_v55  ;;  %v4181_v33 = vmul.f32 1.442695, %v8952_v9  ;;  %v4326_v45 = vmul.f32 1.6732632, %v5523_v53  ;;  %vm4078_vm6 = vcmp.gt.f32.partialorder %v8952_v9, 0.0 }
 0x74b   : > { %v8956_v24 = vadd.f32 %v3980_v26, %v8726_v7  ;;  %v6830_v16 = vpop.eup %6829  ;;  %v4389_v63 = vsel %vm4069_vm14, %v8888_v23, %v4325_v19  ;;  %v4388_v35 = vsel %vm4068_vm13, %v8877_v48, %v4324_v41  ;;  %4817 = vmatmul.mubr.bf16.gmra.mxu0 %v4499_v46  ;;  %vm4075_vm7 = vcmp.gt.f32.partialorder %v8928_v10, 0.0 }
 0x74c   : > { %v3982_v27 = vpop.f32.mrf.mxu1  ;;  %6843 = vpow2.f32 %v4181_v33  ;;  %v4390_v40 = vsel %vm4070_vm15, %v8895_v32, %v4326_v45  ;;  %v5524_v6 = vadd.f32 -1.0, %v6830_v16  ;;  %v4387_v32 = vsel %vm4067_vm12, %v8873_v11, %v4323_v42 }
 0x74d   : > { %v4183_v49 = vmul.f32 1.442695, %v8956_v24  ;;  %v8961_v47 = vadd.f32 %v3982_v27, %v8729_v8  ;;  %v6832_v44 = vpop.eup %6831  ;;  %v4454_v1 = vmul.f32 1.050701, %v4390_v40  ;;  %v4453_v0 = vmul.f32 1.050701, %v4389_v63 }
 0x74e   : > { %v3984_v58 = vpop.f32.mrf.mxu1  ;;  %v5525_v22 = vadd.f32 -1.0, %v6832_v44  ;;  %v4452_v5 = vmul.f32 1.050701, %v4388_v35  ;;  %v4327_v48 = vmul.f32 1.6732632, %v5524_v6  ;;  %vm4079_vm8 = vcmp.gt.f32.partialorder %v8956_v24, 0.0 }
 0x74f   : > { %v8964_v30 = vadd.f32 %v3984_v58, %v8726_v7  ;;  %6845 = vpow2.f32 %v4183_v49  ;;  %v4185_v61 = vmul.f32 1.442695, %v8961_v47  ;;  %v6834_v28 = vpop.eup %6833  ;;  %v4451_v15 = vmul.f32 1.050701, %v4387_v32 }
 0x750   : > { %v3986_v60 = vpop.f32.mrf.mxu1  ;;  %v5526_v14 = vadd.f32 -1.0, %v6834_v28  ;;  %v4328_v17 = vmul.f32 1.6732632, %v5525_v22  ;;  %v4502_v54 = vpack.c.bf16 %v4454_v1, %v4452_v5  ;;  %v4391_v33 = vsel %vm4071_vm1, %v8899_v51, %v4327_v48 }
 0x751   : > { %v4187_v50 = vmul.f32 1.442695, %v8964_v30  ;;  %v8976_v62 = vadd.f32 %v3986_v60, %v8729_v8  ;;  %6847 = vpow2.f32 %v4185_v61  ;;  %v6836_v52 = vpop.eup %6835  ;;  %v4501_v53 = vpack.c.bf16 %v4453_v0, %v4451_v15 }
 0x752   : > { %v3990_v25 = vpop.f32.mrf.mxu1  ;;  %v5527_v11 = vadd.f32 -1.0, %v6836_v52  ;;  %v4329_v29 = vmul.f32 1.6732632, %v5526_v14  ;;  %v4392_v27 = vsel %vm4072_vm0, %v8902_v36, %v4328_v17  ;;  %4826 = vmatprep.mubr.bf16.mxu0 %v4502_v54  ;;  %v4455_v6 = vmul.f32 1.050701, %v4391_v33 }
 0x753   : > { %6849 = vpow2.f32 %v4187_v50  ;;  %v4189_v23 = vmul.f32 1.442695, %v8976_v62  ;;  %v8986_v59 = vadd.f32 %v3990_v25, %v8726_v7  ;;  %v6838_v37 = vpop.eup %6837  ;;  %v4456_v41 = vmul.f32 1.050701, %v4392_v27  ;;  %4827 = vmatmul.mubr.bf16.gmra.mxu0 %v4501_v53 }
 0x754   : > { %v3992_v39 = vpop.f32.mrf.mxu1  ;;  %v4330_v43 = vmul.f32 1.6732632, %v5527_v11  ;;  %v4393_v19 = vsel %vm4073_vm2, %v8912_v57, %v4329_v29  ;;  %v5528_v45 = vadd.f32 -1.0, %v6838_v37  ;;  %vm4080_vm9 = vcmp.gt.f32.partialorder %v8961_v47, 0.0 }
 0x755   : > { %6851 = vpow2.f32 %v4189_v23  ;;  %v6840_v38 = vpop.eup %6839  ;;  %v8991_v26 = vadd.f32 %v3992_v39, %v8729_v8  ;;  %v4191_v56 = vmul.f32 1.442695, %v8986_v59  ;;  %v4457_v60 = vmul.f32 1.050701, %v4393_v19 }
 0x756   : > { %v3994_v13 = vpop.f32.mrf.mxu1  ;;  %v5529_v3 = vadd.f32 -1.0, %v6840_v38  ;;  %v4394_v34 = vsel %vm4074_vm3, %v8920_v12, %v4330_v43  ;;  %v4331_v61 = vmul.f32 1.6732632, %v5528_v45  ;;  %vm4081_vm10 = vcmp.gt.f32.partialorder %v8964_v30, 0.0 }
 0x757   : > { %v4193_v21 = vmul.f32 1.442695, %v8991_v26  ;;  %v6842_v2 = vpop.eup %6841  ;;  %v9009_v49 = vadd.f32 %v3994_v13, %v8726_v7  ;;  %v4458_v36 = vmul.f32 1.050701, %v4394_v34  ;;  %v4503_v5 = vpack.c.bf16 %v4457_v60, %v4455_v6 }
 0x758   : > { %v3996_v55 = vpop.f32.mrf.mxu1  ;;  %v5530_v58 = vadd.f32 -1.0, %v6842_v2  ;;  %v4332_v44 = vmul.f32 1.6732632, %v5529_v3  ;;  %vm4082_vm11 = vcmp.gt.f32.partialorder %v8976_v62, 0.0  ;;  %vm4083_vm12 = vcmp.gt.f32.partialorder %v8986_v59, 0.0 }
 0x759   : > { %6853 = vpow2.f32 %v4193_v21  ;;  %v9012_v12 = vadd.f32 %v3996_v55, %v8729_v8  ;;  %v6844_v42 = vpop.eup %6843  ;;  %v4195_v51 = vmul.f32 1.442695, %v9009_v49  ;;  %v4504_v32 = vpack.c.bf16 %v4458_v36, %v4456_v41 }
 0x75a   : > { %v4000_v16 = vpop.f32.mrf.mxu1  ;;  %6855 = vpow2.f32 %v4191_v56  ;;  %v4333_v46 = vmul.f32 1.6732632, %v5530_v58  ;;  %v5531_v40 = vadd.f32 -1.0, %v6844_v42  ;;  %v4396_v52 = vsel %vm4076_vm4, %v8932_v4, %v4332_v44 }
 0x75b   : > { %6857 = vpow2.f32 %v4195_v51  ;;  %v4197_v28 = vmul.f32 1.442695, %v9012_v12  ;;  %v9018_v63 = vadd.f32 %v4000_v16, %v8726_v7  ;;  %4836 = vmatprep.mubr.bf16.mxu0 %v4504_v32  ;;  %v4395_v4 = vsel %vm4075_vm7, %v8928_v10, %v4331_v61 }
 0x75c   : > { %v6846_v57 = vpop.eup %6845  ;;  %v4002_v22 = vpop.f32.mrf.mxu1  ;;  %v4334_v50 = vmul.f32 1.6732632, %v5531_v40  ;;  %v4397_v1 = vsel %vm4077_vm5, %v8946_v31, %v4333_v46  ;;  %v4460_v13 = vmul.f32 1.050701, %v4396_v52  ;;  %4837 = vmatmul.mubr.bf16.gmra.mxu0 %v4503_v5  ;;  %v4459_v34 = vmul.f32 1.050701, %v4395_v4 }
 0x75d   : > { %v9021_v25 = vadd.f32 %v4002_v22, %v8729_v8  ;;  %v5532_v23 = vadd.f32 -1.0, %v6846_v57  ;;  %6859 = vpow2.f32 %v4197_v28  ;;  %v4199_v11 = vmul.f32 1.442695, %v9018_v63 }
 0x75e   : > { %v4004_v35 = vpop.f32.mrf.mxu1  ;;  %v6848_v14 = vpop.eup %6847  ;;  %v4398_v0 = vsel %vm4078_vm6, %v8952_v9, %v4334_v50  ;;  %v4461_v38 = vmul.f32 1.050701, %v4397_v1  ;;  %vm4084_vm13 = vcmp.gt.f32.partialorder %v8991_v26, 0.0  ;;  %vm4085_vm14 = vcmp.gt.f32.partialorder %v9009_v49, 0.0 }
 0x75f   : > { %v5533_v17 = vadd.f32 -1.0, %v6848_v14  ;;  %v4462_v48 = vmul.f32 1.050701, %v4398_v0  ;;  %6861 = vpow2.f32 %v4199_v11  ;;  %v4201_v15 = vmul.f32 1.442695, %v9021_v25 }
 0x760   : > { %v6850_v39 = vpop.eup %6849  ;;  %v4006_v37 = vpop.f32.mrf.mxu1  ;;  %v4335_v3 = vmul.f32 1.6732632, %v5532_v23  ;;  %v9037_v9 = vadd.f32 %v4004_v35, %v8726_v7  ;;  %v4505_v36 = vpack.c.bf16 %v4461_v38, %v4459_v34  ;;  %vm4086_vm15 = vcmp.gt.f32.partialorder %v9012_v12, 0.0 }
 0x761   : > { %v5534_v29 = vadd.f32 -1.0, %v6850_v39  ;;  %v9040_v54 = vadd.f32 %v4006_v37, %v8729_v8  ;;  %v4336_v55 = vmul.f32 1.6732632, %v5533_v17  ;;  %6863 = vpow2.f32 %v4201_v15 }
 0x762   : > { %v6852_v31 = vpop.eup %6851  ;;  %v4010_v43 = vpop.f32.mrf.mxu1  ;;  %v4506_v27 = vpack.c.bf16 %v4462_v48, %v4460_v13  ;;  %v4203_v33 = vmul.f32 1.442695, %v9037_v9  ;;  %v4399_v58 = vsel %vm4079_vm8, %v8956_v24, %v4335_v3  ;;  %vm4088_vm0 = vcmp.gt.f32.partialorder %v9021_v25, 0.0 }
 0x763   : > { %v5535_v56 = vadd.f32 -1.0, %v6852_v31  ;;  %v4337_v10 = vmul.f32 1.6732632, %v5534_v29  ;;  %v9043_v2 = vadd.f32 %v4010_v43, %v8726_v7  ;;  %v4205_v16 = vmul.f32 1.442695, %v9040_v54 }
 0x764   : > { %v4012_v53 = vpop.f32.mrf.mxu1  ;;  %4846 = vmatprep.mubr.bf16.mxu0 %v4506_v27  ;;  %v4400_v41 = vsel %vm4080_vm9, %v8961_v47, %v4336_v55  ;;  %6865 = vpow2.f32 %v4203_v33  ;;  %v4463_v22 = vmul.f32 1.050701, %v4399_v58  ;;  %vm4087_vm1 = vcmp.gt.f32.partialorder %v9018_v63, 0.0 }
 0x765   : > { %v4338_v21 = vmul.f32 1.6732632, %v5535_v56  ;;  %v4401_v44 = vsel %vm4081_vm10, %v8964_v30, %v4337_v10  ;;  %6867 = vpow2.f32 %v4205_v16  ;;  %v4207_v46 = vmul.f32 1.442695, %v9043_v2  ;;  %4847 = vmatmul.mubr.bf16.gmra.mxu0 %v4505_v36 }
 0x766   : > { %v4014_v19 = vpop.f32.mrf.mxu1  ;;  %v6854_v45 = vpop.eup %6853  ;;  %v9057_v40 = vadd.f32 %v4012_v53, %v8729_v8  ;;  %v4464_v35 = vmul.f32 1.050701, %v4400_v41  ;;  %v4465_v14 = vmul.f32 1.050701, %v4401_v44  ;;  %vm4089_vm2 = vcmp.gt.f32.partialorder %v9037_v9, 0.0 }
 0x767   : > { %v6856_v42 = vpop.eup %6855  ;;  %v4402_v51 = vsel %vm4082_vm11, %v8976_v62, %v4338_v21  ;;  %v5537_v60 = vadd.f32 -1.0, %v6854_v45  ;;  %v9062_v47 = vadd.f32 %v4014_v19, %v8726_v7  ;;  %6869 = vpow2.f32 %v4207_v46 }
 0x768   : > { %v4016_v57 = vpop.f32.mrf.mxu1  ;;  %v6858_v24 = vpop.eup %6857  ;;  %v4466_v61 = vmul.f32 1.050701, %v4402_v51  ;;  %v5536_v28 = vadd.f32 -1.0, %v6856_v42  ;;  %v4209_v50 = vmul.f32 1.442695, %v9057_v40  ;;  %v4507_v43 = vpack.c.bf16 %v4465_v14, %v4463_v22 }
 0x769   : > { %v9065_v30 = vadd.f32 %v4016_v57, %v8729_v8  ;;  %v5538_v6 = vadd.f32 -1.0, %v6858_v24  ;;  %v4211_v52 = vmul.f32 1.442695, %v9062_v47  ;;  %v4340_v23 = vmul.f32 1.6732632, %v5537_v60 }
 0x76a   : > { %v4020_v62 = vpop.f32.mrf.mxu1  ;;  %v6860_v32 = vpop.eup %6859  ;;  %6871 = vpow2.f32 %v4209_v50  ;;  %v4339_v48 = vmul.f32 1.6732632, %v5536_v28  ;;  %v4508_v31 = vpack.c.bf16 %v4466_v61, %v4464_v35  ;;  %vm4090_vm3 = vcmp.gt.f32.partialorder %v9040_v54, 0.0 }
 0x76b   : > { %v4341_v39 = vmul.f32 1.6732632, %v5538_v6  ;;  %v5539_v0 = vadd.f32 -1.0, %v6860_v32  ;;  %6873 = vpow2.f32 %v4211_v52  ;;  %v4213_v17 = vmul.f32 1.442695, %v9065_v30 }
 0x76c   : > { %v4022_v1 = vpop.f32.mrf.mxu1  ;;  %v9071_v11 = vadd.f32 %v4020_v62, %v8726_v7  ;;  %v6862_v4 = vpop.eup %6861  ;;  %4856 = vmatprep.mubr.bf16.mxu0 %v4508_v31  ;;  %v4404_v10 = vsel %vm4084_vm13, %v8991_v26, %v4340_v23  ;;  %vm4092_vm4 = vcmp.gt.f32.partialorder %v9057_v40, 0.0  ;;  %vm4093_vm5 = vcmp.gt.f32.partialorder %v9062_v47, 0.0 }
 0x76d   : > { %v9074_v37 = vadd.f32 %v4022_v1, %v8729_v8  ;;  %v4342_v29 = vmul.f32 1.6732632, %v5539_v0  ;;  %6875 = vpow2.f32 %v4213_v17  ;;  %v4405_v53 = vsel %vm4085_vm14, %v9009_v49, %v4341_v39  ;;  %4857 = vmatmul.mubr.bf16.gmra.mxu0 %v4507_v43 }
 0x76e   : > { %v4024_v5 = vpop.f32.mrf.mxu1  ;;  %v6864_v15 = vpop.eup %6863  ;;  %v4215_v56 = vmul.f32 1.442695, %v9071_v11  ;;  %v5540_v27 = vadd.f32 -1.0, %v6862_v4  ;;  %v4468_v16 = vmul.f32 1.050701, %v4404_v10  ;;  %vm4094_vm6 = vcmp.gt.f32.partialorder %v9065_v30, 0.0 }
 0x76f   : > { %v9077_v13 = vadd.f32 %v4024_v5, %v8726_v7  ;;  %v4406_v3 = vsel %vm4086_vm15, %v9012_v12, %v4342_v29  ;;  %v4217_v55 = vmul.f32 1.442695, %v9074_v37  ;;  %v5541_v34 = vadd.f32 -1.0, %v6864_v15 }
 0x770   : > { %v4026_v38 = vpop.f32.mrf.mxu1  ;;  %v4403_v12 = vsel %vm4083_vm12, %v8986_v59, %v4339_v48  ;;  %6877 = vpow2.f32 %v4215_v56  ;;  %v4470_v45 = vmul.f32 1.050701, %v4406_v3  ;;  %v4469_v42 = vmul.f32 1.050701, %v4405_v53 }
 0x771   : > { %v4219_v33 = vmul.f32 1.442695, %v9077_v13  ;;  %v9095_v19 = vadd.f32 %v4026_v38, %v8729_v8  ;;  %v4344_v36 = vmul.f32 1.6732632, %v5541_v34  ;;  %6879 = vpow2.f32 %v4217_v55  ;;  %v6866_v58 = vpop.eup %6865 }
 0x772   : > { %v4030_v21 = vpop.f32.mrf.mxu1  ;;  %v6868_v41 = vpop.eup %6867  ;;  %v4343_v44 = vmul.f32 1.6732632, %v5540_v27  ;;  %v5542_v51 = vadd.f32 -1.0, %v6866_v58  ;;  %v4467_v46 = vmul.f32 1.050701, %v4403_v12  ;;  %v4510_v28 = vpack.c.bf16 %v4470_v45, %v4468_v16 }
 0x773   : > { %v9098_v26 = vadd.f32 %v4030_v21, %v8726_v7  ;;  %6881 = vpow2.f32 %v4219_v33  ;;  %v4221_v59 = vmul.f32 1.442695, %v9095_v19  ;;  %v5543_v24 = vadd.f32 -1.0, %v6868_v41 }
 0x774   : > { %v4032_v49 = vpop.f32.mrf.mxu1  ;;  %v4408_v62 = vsel %vm4088_vm0, %v9021_v25, %v4344_v36  ;;  %v4345_v61 = vmul.f32 1.6732632, %v5542_v51  ;;  %v6870_v32 = vpop.eup %6869  ;;  %v4509_v35 = vpack.c.bf16 %v4469_v42, %v4467_v46  ;;  %v4407_v23 = vsel %vm4087_vm1, %v9018_v63, %v4343_v44  ;;  %4866 = vmatprep.mubr.bf16.mxu0 %v4510_v28 }
 0x775   : > { %v4223_v57 = vmul.f32 1.442695, %v9098_v26  ;;  %6883 = vpow2.f32 %v4221_v59  ;;  %v9104_v22 = vadd.f32 %v4032_v49, %v8729_v8  ;;  %v4346_v14 = vmul.f32 1.6732632, %v5543_v24 }
 0x776   : > { %v4034_v60 = vpop.f32.mrf.mxu1  ;;  %v4409_v25 = vsel %vm4089_vm2, %v9037_v9, %v4345_v61  ;;  %v4472_v0 = vmul.f32 1.050701, %v4408_v62  ;;  %4867 = vmatmul.mubr.bf16.gmra.mxu0 %v4509_v35  ;;  %v5544_v29 = vadd.f32 -1.0, %v6870_v32  ;;  %v4471_v56 = vmul.f32 1.050701, %v4407_v23 }
 0x777   : > { %v9110_v6 = vadd.f32 %v4034_v60, %v8726_v7  ;;  %v4225_v52 = vmul.f32 1.442695, %v9104_v22  ;;  %v6872_v1 = vpop.eup %6871  ;;  %6885 = vpow2.f32 %v4223_v57  ;;  %v4410_v17 = vsel %vm4090_vm3, %v9040_v54, %v4346_v14 }
 0x778   : > { %v4036_v50 = vpop.f32.mrf.mxu1  ;;  %v6874_v39 = vpop.eup %6873  ;;  %v5545_v5 = vadd.f32 -1.0, %v6872_v1  ;;  %v4474_v48 = vmul.f32 1.050701, %v4410_v17  ;;  %v4473_v38 = vmul.f32 1.050701, %v4409_v25  ;;  %vm4091_vm7 = vcmp.gt.f32.partialorder %v9043_v2, 0.0 }
 0x779   : > { %v4227_v7 = vmul.f32 1.442695, %v9110_v6  ;;  %v9123_v4 = vadd.f32 %v4036_v50, %v8729_v8  ;;  %v5546_v63 = vadd.f32 -1.0, %v6874_v39  ;;  %6887 = vpow2.f32 %v4225_v52 }
 0x77a   : > { %v6876_v31 = vpop.eup %6875  ;;  %v4348_v9 = vmul.f32 1.6732632, %v5545_v5  ;;  %v4512_v3 = vpack.c.bf16 %v4474_v48, %v4472_v0  ;;  %v4347_v10 = vmul.f32 1.6732632, %v5544_v29  ;;  %v4511_v34 = vpack.c.bf16 %v4473_v38, %v4471_v56 }
 0x77b   : > { %6889 = vpow2.f32 %v4227_v7  ;;  %v4349_v15 = vmul.f32 1.6732632, %v5546_v63  ;;  %v5547_v43 = vadd.f32 -1.0, %v6876_v31  ;;  %v4229_v54 = vmul.f32 1.442695, %v9123_v4 }
 0x77c   : > { %v4412_v8 = vsel %vm4092_vm4, %v9057_v40, %v4348_v9  ;;  %4876 = vmatprep.mubr.bf16.mxu0 %v4512_v3  ;;  %v4411_v42 = vsel %vm4091_vm7, %v9043_v2, %v4347_v10  ;;  %vm4095_vm8 = vcmp.gt.f32.partialorder %v9071_v11, 0.0  ;;  %vm4096_vm9 = vcmp.gt.f32.partialorder %v9074_v37, 0.0 }
 0x77d   : > { %v6878_v55 = vpop.eup %6877  ;;  %v4350_v53 = vmul.f32 1.6732632, %v5547_v43  ;;  %6891 = vpow2.f32 %v4229_v54  ;;  %v4413_v33 = vsel %vm4093_vm5, %v9062_v47, %v4349_v15  ;;  %v4476_v49 = vmul.f32 1.050701, %v4412_v8 }
 0x77e   : > { %v6880_v27 = vpop.eup %6879  ;;  %v5548_v21 = vadd.f32 -1.0, %v6878_v55  ;;  %4877 = vmatmul.mubr.bf16.gmra.mxu0 %v4511_v34  ;;  %v4477_v44 = vmul.f32 1.050701, %v4413_v33  ;;  %vm4097_vm10 = vcmp.gt.f32.partialorder %v9077_v13, 0.0  ;;  %vm4098_vm11 = vcmp.gt.f32.partialorder %v9095_v19, 0.0 }
 0x77f   : > { %v4414_v45 = vsel %vm4094_vm6, %v9065_v30, %v4350_v53  ;;  %v5549_v36 = vadd.f32 -1.0, %v6880_v27  ;;  %v4475_v30 = vmul.f32 1.050701, %v4411_v42  ;;  %vm4101_vm12 = vcmp.gt.f32.partialorder %v9110_v6, 0.0 }
 0x780   : > { %v6882_v12 = vpop.eup %6881  ;;  %v4478_v40 = vmul.f32 1.050701, %v4414_v45  ;;  %v4351_v59 = vmul.f32 1.6732632, %v5548_v21  ;;  %vm4100_vm13 = vcmp.gt.f32.partialorder %v9104_v22, 0.0  ;;  %vm4099_vm14 = vcmp.gt.f32.partialorder %v9098_v26, 0.0 }
 0x781   : > { %v5550_v58 = vadd.f32 -1.0, %v6882_v12  ;;  %v4352_v41 = vmul.f32 1.6732632, %v5549_v36  ;;  %v4513_v28 = vpack.c.bf16 %v4477_v44, %v4475_v30  ;;  %vm4102_vm15 = vcmp.gt.f32.partialorder %v9123_v4, 0.0 }
 0x782   : > { %v6884_v16 = vpop.eup %6883  ;;  %v4514_v60 = vpack.c.bf16 %v4478_v40, %v4476_v49  ;;  %v4415_v2 = vsel %vm4095_vm8, %v9071_v11, %v4351_v59 }
 0x783   : > { %v4353_v51 = vmul.f32 1.6732632, %v5550_v58  ;;  %v5551_v57 = vadd.f32 -1.0, %v6884_v16  ;;  %v4416_v46 = vsel %vm4096_vm9, %v9074_v37, %v4352_v41  ;;  %v4479_v25 = vmul.f32 1.050701, %v4415_v2 }
 0x784   : > { %v6886_v47 = vpop.eup %6885  ;;  %4886 = vmatprep.mubr.bf16.mxu0 %v4514_v60  ;;  %v4480_v14 = vmul.f32 1.050701, %v4416_v46 }
 0x785   : > { %v4417_v24 = vsel %vm4097_vm10, %v9077_v13, %v4353_v51  ;;  %v4354_v62 = vmul.f32 1.6732632, %v5551_v57  ;;  %v5552_v1 = vadd.f32 -1.0, %v6886_v47 }
 0x786   : > { %v6888_v61 = vpop.eup %6887  ;;  %v4481_v50 = vmul.f32 1.050701, %v4417_v24  ;;  %4887 = vmatmul.mubr.bf16.gmra.mxu0 %v4513_v28 }
 0x787   : > { %v4418_v32 = vsel %vm4098_vm11, %v9095_v19, %v4354_v62  ;;  %v5553_v23 = vadd.f32 -1.0, %v6888_v61  ;;  %v4355_v17 = vmul.f32 1.6732632, %v5552_v1 }
 0x788   : > { %v6890_v35 = vpop.eup %6889  ;;  %v4482_v52 = vmul.f32 1.050701, %v4418_v32  ;;  %v4515_v7 = vpack.c.bf16 %v4481_v50, %v4479_v25 }
 0x789   : > { %v5554_v37 = vadd.f32 -1.0, %v6890_v35  ;;  %v4356_v39 = vmul.f32 1.6732632, %v5553_v23  ;;  %v4419_v63 = vsel %vm4099_vm14, %v9098_v26, %v4355_v17 }
 0x78a   : > { %v4516_v13 = vpack.c.bf16 %v4482_v52, %v4480_v14  ;;  %v6892_v11 = vpop.eup %6891  ;;  %v4483_v43 = vmul.f32 1.050701, %v4419_v63 }
 0x78b   : > { %v4357_v0 = vmul.f32 1.6732632, %v5554_v37  ;;  %v5555_v5 = vadd.f32 -1.0, %v6892_v11  ;;  %v4420_v48 = vsel %vm4100_vm13, %v9104_v22, %v4356_v39 }
 0x78c   : > { %4896 = vmatprep.mubr.bf16.mxu1 %v4516_v13  ;;  %v4484_v9 = vmul.f32 1.050701, %v4420_v48 }
 0x78d   : > { %4897 = vmatmul.mubr.bf16.vlgmr.msra.gmra.mxu1 %v4515_v7  ;;  %v4421_v19 = vsel %vm4101_vm12, %v9110_v6, %v4357_v0  ;;  %v4358_v29 = vmul.f32 1.6732632, %v5555_v5  ;;  %v5556_v6 = vld [vmem:[%s9349_s9 + $0x7] ss:$8 sm:$0x3] }
 0x78e   : > { %v4485_v31 = vmul.f32 1.050701, %v4421_v19  ;;  %v9155_v22 = vrot.slane %v5556_v6, %v7553_v18  ;;  %v9158_v26 = vrot.slane %v5556_v6, %v7558_v20 }
 0x78f   : > { %v4422_v38 = vsel %vm4102_vm15, %v9123_v4, %v4358_v29 }
 0x790   : > { %v4486_v15 = vmul.f32 1.050701, %v4422_v38  ;;  %v4517_v56 = vpack.c.bf16 %v4485_v31, %v4483_v43 }
 0x792   : > { %v4518_v3 = vpack.c.bf16 %v4486_v15, %v4484_v9 }
 0x794   : > { %4906 = vmatprep.mubr.bf16.mxu1 %v4518_v3 }
 0x795   : > { %4907 = vmatmul.mubr.bf16.gmra.mxu1 %v4517_v56 }
 0x7d6   : > { %v4758_v54 = vpop.f32.mrf.mxu0 }
 0x7d7   : > { %v4759_v4 = vadd.f32 %v4758_v54, %v9155_v22 }
 0x7d8   : > { %v4760_v55 = vpop.f32.mrf.mxu0 }
 0x7d9   : > { %4917 = vst [vmem:[%s9161_s2] sm:$0xff] %v4759_v4  ;;  %v4761_v10 = vadd.f32 %v4760_v55, %v9158_v26 }
 0x7da   : > { %v4762_v18 = vpop.f32.mrf.mxu0 }
 0x7db   : > { %4918 = vst [vmem:[%s9161_s2 + $0x8] sm:$0xff] %v4761_v10  ;;  %v4763_v20 = vadd.f32 %v4762_v18, %v9155_v22 }
 0x7dc   : > { %v4764_v8 = vpop.f32.mrf.mxu0 }
 0x7dd   : > { %4919 = vst [vmem:[%s9161_s2 + $0x10] sm:$0xff] %v4763_v20  ;;  %v4765_v53 = vadd.f32 %v4764_v8, %v9158_v26 }
 0x7de   : > { %v4768_v27 = vpop.f32.mrf.mxu0 }
 0x7df   : > { %4920 = vst [vmem:[%s9161_s2 + $0x18] sm:$0xff] %v4765_v53  ;;  %v4769_v34 = vadd.f32 %v4768_v27, %v9155_v22 }
 0x7e0   : > { %v4770_v21 = vpop.f32.mrf.mxu0 }
 0x7e1   : > { %4921 = vst [vmem:[%s9161_s2 + $0x20] sm:$0xff] %v4769_v34  ;;  %v4771_v12 = vadd.f32 %v4770_v21, %v9158_v26 }
 0x7e2   : > { %v4772_v33 = vpop.f32.mrf.mxu0 }
 0x7e3   : > { %4922 = vst [vmem:[%s9161_s2 + $0x28] sm:$0xff] %v4771_v12  ;;  %v4773_v45 = vadd.f32 %v4772_v33, %v9155_v22 }
 0x7e4   : > { %v4774_v36 = vpop.f32.mrf.mxu0 }
 0x7e5   : > { %4923 = vst [vmem:[%s9161_s2 + $0x30] sm:$0xff] %v4773_v45  ;;  %v4775_v49 = vadd.f32 %v4774_v36, %v9158_v26 }
 0x7e7   : > { %4924 = vst [vmem:[%s9161_s2 + $0x38] sm:$0xff] %v4775_v49  ;;  %v4778_v40 = vpop.f32.mrf.mxu0 }
 0x7e8   : > { %v4779_v58 = vadd.f32 %v4778_v40, %v9155_v22 }
 0x7e9   : > { %v4780_v16 = vpop.f32.mrf.mxu0 }
 0x7ea   : > { %4925 = vst [vmem:[%s9161_s2 + $0x40] sm:$0xff] %v4779_v58  ;;  %v4781_v42 = vadd.f32 %v4780_v16, %v9158_v26 }
 0x7eb   : > { %v4782_v59 = vpop.f32.mrf.mxu0 }
 0x7ec   : > { %4926 = vst [vmem:[%s9161_s2 + $0x48] sm:$0xff] %v4781_v42  ;;  %v4783_v41 = vadd.f32 %v4782_v59, %v9155_v22 }
 0x7ed   : > { %v4784_v44 = vpop.f32.mrf.mxu0 }
 0x7ee   : > { %4927 = vst [vmem:[%s9161_s2 + $0x50] sm:$0xff] %v4783_v41  ;;  %v4785_v51 = vadd.f32 %v4784_v44, %v9158_v26 }
 0x7ef   : > { %v4788_v57 = vpop.f32.mrf.mxu0 }
 0x7f0   : > { %4928 = vst [vmem:[%s9161_s2 + $0x58] sm:$0xff] %v4785_v51  ;;  %v4789_v60 = vadd.f32 %v4788_v57, %v9155_v22 }
 0x7f1   : > { %v4790_v47 = vpop.f32.mrf.mxu0 }
 0x7f2   : > { %4929 = vst [vmem:[%s9161_s2 + $0x60] sm:$0xff] %v4789_v60  ;;  %v4791_v30 = vadd.f32 %v4790_v47, %v9158_v26 }
 0x7f3   : > { %v4792_v46 = vpop.f32.mrf.mxu0 }
 0x7f4   : > { %4930 = vst [vmem:[%s9161_s2 + $0x68] sm:$0xff] %v4791_v30  ;;  %v4793_v24 = vadd.f32 %v4792_v46, %v9155_v22 }
 0x7f5   : > { %v4794_v62 = vpop.f32.mrf.mxu0 }
 0x7f6   : > { %4931 = vst [vmem:[%s9161_s2 + $0x70] sm:$0xff] %v4793_v24  ;;  %v4795_v2 = vadd.f32 %v4794_v62, %v9158_v26 }
 0x7f8   : > { %4932 = vst [vmem:[%s9161_s2 + $0x78] sm:$0xff] %v4795_v2 }
 0x7f9   : > { %v4798_v61 = vpop.f32.mrf.mxu0 }
 0x7fa   : > { %v4799_v28 = vadd.f32 %v4798_v61, %v9155_v22 }
 0x7fb   : > { %v4800_v50 = vpop.f32.mrf.mxu0 }
 0x7fc   : > { %4933 = vst [vmem:[%s9161_s2 + $0x80] sm:$0xff] %v4799_v28  ;;  %v4801_v32 = vadd.f32 %v4800_v50, %v9158_v26 }
 0x7fd   : > { %v4802_v35 = vpop.f32.mrf.mxu0 }
 0x7fe   : > { %4934 = vst [vmem:[%s9161_s2 + $0x88] sm:$0xff] %v4801_v32  ;;  %v4803_v14 = vadd.f32 %v4802_v35, %v9155_v22 }
 0x7ff   : > { %v4804_v52 = vpop.f32.mrf.mxu0 }
 0x800   : > { %4935 = vst [vmem:[%s9161_s2 + $0x90] sm:$0xff] %v4803_v14  ;;  %v4805_v1 = vadd.f32 %v4804_v52, %v9158_v26 }
 0x802   : > { %4936 = vst [vmem:[%s9161_s2 + $0x98] sm:$0xff] %v4805_v1  ;;  %v4808_v23 = vpop.f32.mrf.mxu0 }
 0x803   : > { %v4809_v25 = vadd.f32 %v4808_v23, %v9155_v22 }
 0x804   : > { %v4810_v37 = vpop.f32.mrf.mxu0 }
 0x805   : > { %4937 = vst [vmem:[%s9161_s2 + $0xa0] sm:$0xff] %v4809_v25  ;;  %v4811_v13 = vadd.f32 %v4810_v37, %v9158_v26 }
 0x806   : > { %v4812_v7 = vpop.f32.mrf.mxu0 }
 0x807   : > { %4938 = vst [vmem:[%s9161_s2 + $0xa8] sm:$0xff] %v4811_v13  ;;  %v4813_v39 = vadd.f32 %v4812_v7, %v9155_v22 }
 0x808   : > { %v4814_v0 = vpop.f32.mrf.mxu0 }
 0x809   : > { %4939 = vst [vmem:[%s9161_s2 + $0xb0] sm:$0xff] %v4813_v39  ;;  %v4815_v11 = vadd.f32 %v4814_v0, %v9158_v26 }
 0x80b   : > { %v4818_v17 = vpop.f32.mrf.mxu0  ;;  %4940 = vst [vmem:[%s9161_s2 + $0xb8] sm:$0xff] %v4815_v11 }
 0x80c   : > { %v4819_v5 = vadd.f32 %v4818_v17, %v9155_v22 }
 0x80d   : > { %v4820_v19 = vpop.f32.mrf.mxu0 }
 0x80e   : > { %4941 = vst [vmem:[%s9161_s2 + $0xc0] sm:$0xff] %v4819_v5  ;;  %v4821_v48 = vadd.f32 %v4820_v19, %v9158_v26 }
 0x80f   : > { %v4822_v29 = vpop.f32.mrf.mxu0 }
 0x810   : > { %4942 = vst [vmem:[%s9161_s2 + $0xc8] sm:$0xff] %v4821_v48  ;;  %v4823_v63 = vadd.f32 %v4822_v29, %v9155_v22 }
 0x811   : > { %v4824_v31 = vpop.f32.mrf.mxu0 }
 0x812   : > { %4943 = vst [vmem:[%s9161_s2 + $0xd0] sm:$0xff] %v4823_v63  ;;  %v4825_v38 = vadd.f32 %v4824_v31, %v9158_v26 }
 0x813   : > { %v4828_v9 = vpop.f32.mrf.mxu0 }
 0x814   : > { %4944 = vst [vmem:[%s9161_s2 + $0xd8] sm:$0xff] %v4825_v38  ;;  %v4829_v15 = vadd.f32 %v4828_v9, %v9155_v22 }
 0x815   : > { %v4830_v43 = vpop.f32.mrf.mxu0 }
 0x816   : > { %4945 = vst [vmem:[%s9161_s2 + $0xe0] sm:$0xff] %v4829_v15  ;;  %v4831_v3 = vadd.f32 %v4830_v43, %v9158_v26 }
 0x817   : > { %v4832_v56 = vpop.f32.mrf.mxu0 }
 0x818   : > { %4946 = vst [vmem:[%s9161_s2 + $0xe8] sm:$0xff] %v4831_v3  ;;  %v4833_v6 = vadd.f32 %v4832_v56, %v9155_v22 }
 0x819   : > { %v4834_v54 = vpop.f32.mrf.mxu0 }
 0x81a   : > { %4947 = vst [vmem:[%s9161_s2 + $0xf0] sm:$0xff] %v4833_v6  ;;  %v4835_v4 = vadd.f32 %v4834_v54, %v9158_v26 }
 0x81c   : > { %v4838_v55 = vpop.f32.mrf.mxu0  ;;  %4948 = vst [vmem:[%s9161_s2 + $0xf8] sm:$0xff] %v4835_v4 }
 0x81d   : > { %v4839_v10 = vadd.f32 %v4838_v55, %v9155_v22 }
 0x81e   : > { %v4840_v18 = vpop.f32.mrf.mxu0 }
 0x81f   : > { %4949 = vst [vmem:[%s9161_s2 + $0x100] sm:$0xff] %v4839_v10  ;;  %v4841_v20 = vadd.f32 %v4840_v18, %v9158_v26 }
 0x820   : > { %v4842_v8 = vpop.f32.mrf.mxu0 }
 0x821   : > { %4950 = vst [vmem:[%s9161_s2 + $0x108] sm:$0xff] %v4841_v20  ;;  %v4843_v53 = vadd.f32 %v4842_v8, %v9155_v22 }
 0x822   : > { %v4844_v27 = vpop.f32.mrf.mxu0 }
 0x823   : > { %4951 = vst [vmem:[%s9161_s2 + $0x110] sm:$0xff] %v4843_v53  ;;  %v4845_v34 = vadd.f32 %v4844_v27, %v9158_v26 }
 0x825   : > { %v4848_v21 = vpop.f32.mrf.mxu0  ;;  %4952 = vst [vmem:[%s9161_s2 + $0x118] sm:$0xff] %v4845_v34 }
 0x826   : > { %v4849_v12 = vadd.f32 %v4848_v21, %v9155_v22 }
 0x827   : > { %v4850_v33 = vpop.f32.mrf.mxu0 }
 0x828   : > { %4953 = vst [vmem:[%s9161_s2 + $0x120] sm:$0xff] %v4849_v12  ;;  %v4851_v45 = vadd.f32 %v4850_v33, %v9158_v26 }
 0x829   : > { %v4852_v36 = vpop.f32.mrf.mxu0 }
 0x82a   : > { %4954 = vst [vmem:[%s9161_s2 + $0x128] sm:$0xff] %v4851_v45  ;;  %v4853_v49 = vadd.f32 %v4852_v36, %v9155_v22 }
 0x82b   : > { %v4854_v40 = vpop.f32.mrf.mxu0 }
 0x82c   : > { %4955 = vst [vmem:[%s9161_s2 + $0x130] sm:$0xff] %v4853_v49  ;;  %v4855_v58 = vadd.f32 %v4854_v40, %v9158_v26 }
 0x82d   : > { %v4858_v16 = vpop.f32.mrf.mxu0 }
 0x82e   : > { %4956 = vst [vmem:[%s9161_s2 + $0x138] sm:$0xff] %v4855_v58  ;;  %v4859_v42 = vadd.f32 %v4858_v16, %v9155_v22 }
 0x82f   : > { %v4860_v59 = vpop.f32.mrf.mxu0 }
 0x830   : > { %4957 = vst [vmem:[%s9161_s2 + $0x140] sm:$0xff] %v4859_v42  ;;  %v4861_v41 = vadd.f32 %v4860_v59, %v9158_v26 }
 0x831   : > { %v4862_v44 = vpop.f32.mrf.mxu0 }
 0x832   : > { %4958 = vst [vmem:[%s9161_s2 + $0x148] sm:$0xff] %v4861_v41  ;;  %v4863_v51 = vadd.f32 %v4862_v44, %v9155_v22 }
 0x833   : > { %v4864_v57 = vpop.f32.mrf.mxu0 }
 0x834   : > { %4959 = vst [vmem:[%s9161_s2 + $0x150] sm:$0xff] %v4863_v51  ;;  %v4865_v60 = vadd.f32 %v4864_v57, %v9158_v26 }
 0x836   : > { %v4868_v47 = vpop.f32.mrf.mxu0  ;;  %4960 = vst [vmem:[%s9161_s2 + $0x158] sm:$0xff] %v4865_v60 }
 0x837   : > { %v4869_v30 = vadd.f32 %v4868_v47, %v9155_v22 }
 0x838   : > { %v4870_v46 = vpop.f32.mrf.mxu0 }
 0x839   : > { %4961 = vst [vmem:[%s9161_s2 + $0x160] sm:$0xff] %v4869_v30  ;;  %v4871_v24 = vadd.f32 %v4870_v46, %v9158_v26 }
 0x83a   : > { %v4872_v62 = vpop.f32.mrf.mxu0 }
 0x83b   : > { %4962 = vst [vmem:[%s9161_s2 + $0x168] sm:$0xff] %v4871_v24  ;;  %v4873_v2 = vadd.f32 %v4872_v62, %v9155_v22 }
 0x83c   : > { %v4874_v61 = vpop.f32.mrf.mxu0 }
 0x83d   : > { %4963 = vst [vmem:[%s9161_s2 + $0x170] sm:$0xff] %v4873_v2  ;;  %v4875_v28 = vadd.f32 %v4874_v61, %v9158_v26 }
 0x83e   : > { %v4878_v50 = vpop.f32.mrf.mxu0 }
 0x83f   : > { %4964 = vst [vmem:[%s9161_s2 + $0x178] sm:$0xff] %v4875_v28  ;;  %v4879_v32 = vadd.f32 %v4878_v50, %v9155_v22 }
 0x840   : > { %v4880_v35 = vpop.f32.mrf.mxu0 }
 0x841   : > { %4965 = vst [vmem:[%s9161_s2 + $0x180] sm:$0xff] %v4879_v32  ;;  %v4881_v14 = vadd.f32 %v4880_v35, %v9158_v26 }
 0x842   : > { %v4882_v52 = vpop.f32.mrf.mxu0 }
 0x843   : > { %4966 = vst [vmem:[%s9161_s2 + $0x188] sm:$0xff] %v4881_v14  ;;  %v4883_v1 = vadd.f32 %v4882_v52, %v9155_v22 }
 0x844   : > { %v4884_v23 = vpop.f32.mrf.mxu0 }
 0x845   : > { %4967 = vst [vmem:[%s9161_s2 + $0x190] sm:$0xff] %v4883_v1  ;;  %v4885_v25 = vadd.f32 %v4884_v23, %v9158_v26 }
 0x846   : > { %v4888_v37 = vpop.f32.mrf.mxu0 }
 0x847   : > { %4968 = vst [vmem:[%s9161_s2 + $0x198] sm:$0xff] %v4885_v25  ;;  %v4889_v13 = vadd.f32 %v4888_v37, %v9155_v22 }
 0x848   : > { %v4890_v7 = vpop.f32.mrf.mxu0 }
 0x849   : > { %4969 = vst [vmem:[%s9161_s2 + $0x1a0] sm:$0xff] %v4889_v13  ;;  %v4891_v39 = vadd.f32 %v4890_v7, %v9158_v26 }
 0x84a   : > { %v4892_v0 = vpop.f32.mrf.mxu0 }
 0x84b   : > { %4970 = vst [vmem:[%s9161_s2 + $0x1a8] sm:$0xff] %v4891_v39  ;;  %v4893_v17 = vadd.f32 %v4892_v0, %v9155_v22 }
 0x84c   : > { %v4894_v19 = vpop.f32.mrf.mxu0 }
 0x84d   : > { %v4898_v11 = vpop.f32.mrf.mxu1  ;;  %4971 = vst [vmem:[%s9161_s2 + $0x1b0] sm:$0xff] %v4893_v17  ;;  %v4895_v29 = vadd.f32 %v4894_v19, %v9158_v26 }
 0x84e   : > { %v4899_v5 = vadd.f32 %v4898_v11, %v9155_v22 }
 0x84f   : > { %v4900_v48 = vpop.f32.mrf.mxu1  ;;  %4972 = vst [vmem:[%s9161_s2 + $0x1b8] sm:$0xff] %v4895_v29 }
 0x850   : > { %4973 = vst [vmem:[%s9161_s2 + $0x1c0] sm:$0xff] %v4899_v5  ;;  %v4901_v63 = vadd.f32 %v4900_v48, %v9158_v26 }
 0x851   : > { %v4902_v31 = vpop.f32.mrf.mxu1 }
 0x852   : > { %4974 = vst [vmem:[%s9161_s2 + $0x1c8] sm:$0xff] %v4901_v63  ;;  %v4903_v38 = vadd.f32 %v4902_v31, %v9155_v22 }
 0x853   : > { %v4904_v9 = vpop.f32.mrf.mxu1 }
 0x854   : > { %4975 = vst [vmem:[%s9161_s2 + $0x1d0] sm:$0xff] %v4903_v38  ;;  %v4905_v15 = vadd.f32 %v4904_v9, %v9158_v26 }
 0x855   : > { %v4908_v43 = vpop.f32.mrf.mxu1 }
 0x856   : > { %4976 = vst [vmem:[%s9161_s2 + $0x1d8] sm:$0xff] %v4905_v15  ;;  %v4909_v3 = vadd.f32 %v4908_v43, %v9155_v22 }
 0x857   : > { %v4910_v56 = vpop.f32.mrf.mxu1 }
 0x858   : > { %4977 = vst [vmem:[%s9161_s2 + $0x1e0] sm:$0xff] %v4909_v3  ;;  %v4911_v6 = vadd.f32 %v4910_v56, %v9158_v26 }
 0x859   : > { %v4912_v54 = vpop.f32.mrf.mxu1 }
 0x85a   : > { %4978 = vst [vmem:[%s9161_s2 + $0x1e8] sm:$0xff] %v4911_v6  ;;  %v4913_v4 = vadd.f32 %v4912_v54, %v9155_v22 }
 0x85b   : > { %v4914_v55 = vpop.f32.mrf.mxu1 }
 0x85c   : > { %4979 = vst [vmem:[%s9161_s2 + $0x1f0] sm:$0xff] %v4913_v4  ;;  %v4915_v10 = vadd.f32 %v4914_v55, %v9158_v26 }
 0x85e   : > { %4980 = vst [vmem:[%s9161_s2 + $0x1f8] sm:$0xff] %v4915_v10 }
 0x85f   : > { %7142 = shalt.err (!%p7139_p6)
}
 0x860   : > { %s7143_s12 = scalar_lea.hbm %s9292_s24, 8192  ;;  %s7147_s22 = scalar_lea.hbm %s9350_s10, 16384 }
 0x861   : > { %p7144_p8 = scmp.ne.s32.totalorder %s9292_s24, %s7143_s12  ;;  %p7148_p11 = scmp.lt.s32.totalorder %s9292_s24, %s9350_s10 }
 0x862   : > { %p7149_p13 = scmp.lt.s32.totalorder %s7147_s22, %s7143_s12 }
 0x863   : > { %p7145_p10 = pnand %p7144_p8, %p9391_p5 }
 0x864   : > { %p7150_p0 = por %p7149_p13, %p7148_p11 }
 0x865   : > { %p7146_p7 = pneg %p7145_p10 }
 0x867   : > { %p7151_p2 = pnand %p7150_p0, %p7146_p7 }
 0x869   : > { %7154 = shalt.err (!%p7151_p2)
}
 0x86a   : > { %s7226_s2 = smov 256   ;;  %s7227_s3 = smov 16  }
 0x86b   : > { %6065 = dma.vmem_to_hbm [thread:$0]  (%p9391_p5), %s9294_s4, 8192, %s9292_s24, %s4982_s19, %s7226_s2, %s7226_s2, %s7227_s3  }
 0x86c PF: > { %s5011_s20 = sand.u32 1, %s7197_s13   ;;  %p9392_p9 = scmp.ne.s32.totalorder %s9379_s25, 0 }
 0x86d   : > { %p9393_p12 = scmp.ge.s32.totalorder %s7209_s16, 2  ;;  %s5012_s27 = scalar_lea.sflag [#allocation4], %s5011_s20 }
 0x86f   : > { %p6097_p1 = pnand %p9393_p12, %p9392_p9 }
 0x871   : > { %p6098_p3 = pneg %p6097_p1 }
 0x873   : > { %7192 = dma.done.wait (%p6098_p3), %s5012_s27, 8192  }
 0x874   : > { %7194 = vsyncadd (%p6098_p3), %s5012_s27, 4294959104  ;;  %p27_p4 = scmp.ge.s32.totalorder %s7420_s26, 4   ;;  %s9394_s13 = smov %s7201_s14 }
 0x875   : > { %s9395_s14 = smov %s7205_s15  ;;  %s9396_s15 = smov %s7431_s28 }
 0x876   : > { %s9397_s16 = smov %s7420_s26  ;;  %29 = sbr.rel (!%p27_p4) target bundleno = 16 (0x10), region = 139 }
 0x87b   :  { %5017 = vsyncpa [#allocation3], 1 }
 0x87c   :  { %5019 = vsyncpa [#allocation3 + $0x1], 1 }
 0x87d   :  { %5020 = vsyncpa [#allocation6], 1 }
 0x87e   :  { %5021 = vsyncpa [#allocation9], 1 }
 0x87f   :  { %5022 = vsyncpa [#allocation12], 1 }
 0x880   :  { %5023 = vsyncpa [#allocation15], 1 }
 0x881   :  { %5024 = vsyncpa [#allocation4], 1 }
 0x882   :  { %5026 = vsyncpa [#allocation4 + $0x1], 1 }

// kernel: tpu_custom_call.1
= control target key start
LH: loop header
LB: loop body
LE: loop exit
PB: predicated region body
PF: predicated region fallthrough
CT: control target
= control target key end

     0   :  { %s9340_s0 = inlined_call_operand.hbm [shape: bf16[512,256], index: 0, kind: input, shape index: {}]   ;;  %s9341_s1 = inlined_call_operand.hbm [shape: bf16[256,256], index: 1, kind: input, shape index: {}]   ;;  %s9342_s2 = inlined_call_operand.hbm [shape: bf16[256,128], index: 2, kind: input, shape index: {}]   ;;  %s9343_s3 = inlined_call_operand.hbm [shape: bf16[128,128], index: 3, kind: input, shape index: {}]   ;;  %s9344_s4 = inlined_call_operand.hbm [shape: bf16[128,128], index: 4, kind: input, shape index: {}]   ;;  %s9345_s5 = inlined_call_operand.hbm [shape: bf16[128,128], index: 5, kind: input, shape index: {}]   ;;  %s9346_s6 = inlined_call_operand.hbm [shape: bf16[128,128], index: 6, kind: input, shape index: {}]   ;;  %s9347_s7 = inlined_call_operand.hbm [shape: bf16[128,256], index: 7, kind: input, shape index: {}]   ;;  %s9348_s8 = inlined_call_operand.hbm [shape: bf16[256,256], index: 8, kind: input, shape index: {}]   ;;  %s9349_s9 = inlined_call_operand.vmem [shape: f32[8,256], index: 9, kind: input, shape index: {}]   ;;  %s9350_s10 = inlined_call_operand.hbm [shape: f32[512,256], index: 10, kind: output, shape index: {}]  }
   0x1   :  { %9359 = sst [smem:[#allocation24_spill]] %s9341_s1 }
   0x2   :  { %9360 = sst [smem:[#allocation25_spill]] %s9342_s2 }
   0x3   :  { %9361 = sst [smem:[#allocation26_spill]] %s9343_s3 }
   0x4   :  { %9362 = sst [smem:[#allocation27_spill]] %s9344_s4 }
   0x5   :  { %9363 = sst [smem:[#allocation28_spill]] %s9345_s5 }
   0x6   :  { %9364 = sst [smem:[#allocation29_spill]] %s9346_s6 }
   0x7   :  { %15 = vsyncpa [#allocation3], 0 }
   0x8   :  { %17 = vsyncpa [#allocation3 + $0x1], 0 }
   0x9   :  { %18 = vsyncpa [#allocation6], 0 }
   0xa   :  { %19 = vsyncpa [#allocation9], 0 }
   0xb   :  { %20 = vsyncpa [#allocation12], 0 }
   0xc   :  { %21 = vsyncpa [#allocation15], 0 }
   0xd   :  { %22 = vsyncpa [#allocation4], 0 }
   0xe   :  { %24 = vsyncpa [#allocation4 + $0x1], 0  ;;  %s7283_s13 = smov 0   ;;  %s7285_s14 = smov 0  }
   0xf   :  { %s7287_s15 = smov 0   ;;  %s7289_s16 = smov 0  }
  0x10 LB: > { %s7211_s17 = smov [#allocation5]   ;;  %s7304_s19 = sadd.s32 4294967295, %s7209_s16   ;;  %s7209_s16 = sphi %s7289_s16, %s9397_s16   ;;  %s7205_s15 = sphi %s7287_s15, %s9396_s15   ;;  %s7201_s14 = sphi %s7285_s14, %s9395_s14   ;;  %s7197_s13 = sphi %s7283_s13, %s9394_s13  }
  0x11   : > { %s288_s18 = sshll.u32 %s7211_s17, 4  ;;  %p5146_p0 = scmp.ge.s32.totalorder %s7209_s16, 1  ;;  %s289_s18 = int_to_ptr.vmem [resolvable:$true] %s288_s18 }
  0x12   : > { %p9355_p1 = scmp.eq.s32.totalorder %s7304_s19, 0  ;;  %p276_p2 = scmp.lt.s32.totalorder %s7209_s16, 3 }
  0x13   : > { %s7212_s22 = smov [#allocation8]   ;;  %s7213_s24 = smov [#allocation11]  }
  0x14   : > { %p7309_p3 = pnand %p5146_p0, %p276_p2  ;;  %s314_s23 = sshll.u32 %s7212_s22, 4  ;;  %s7322_s23 = int_to_ptr.vmem [resolvable:$true] %s314_s23 }
  0x15   : > { %s7324_s25 = sshll.u32 %s7213_s24, 4  ;;  %s6904_s27 = scalar_lea.vmem %s289_s18, 4096  ;;  %s341_s25 = int_to_ptr.vmem [resolvable:$true] %s7324_s25 }
  0x16   : > { %s9365_s20 = scalar_select %p7309_p3, 1, 0 }
  0x17   : > { %p6067_p5 = pneg %p7309_p3  ;;  %p6905_p8 = scmp.ne.s32.totalorder %s289_s18, %s6904_s27 }
  0x18   : > { %p6912_p11 = scmp.lt.s32.totalorder %s289_s18, %s289_s18  ;;  %p6913_p12 = scmp.lt.s32.totalorder %s6904_s27, %s6904_s27 }
  0x19   : > { %p7318_p6 = pnand %p6067_p5, %p9355_p1 }
  0x1a   : > { %p6914_p13 = por %p6913_p12, %p6912_p11 }
  0x1b   : > { %p7328_p7 = pneg %p7318_p6 }
  0x1d   : > { %p6907_p9 = pnand %p6905_p8, %p7328_p7 }
  0x1f   : > { %p6908_p10 = pneg %p6907_p9 }
  0x21   : > { %p6915_p0 = pnand %p6914_p13, %p6908_p10 }
  0x23   : > { %6918 = shalt.err (!%p6915_p0)
}
  0x24   : > { %s9351_s28 = smov 128   ;;  %s9353_s29 = smov 8  }
  0x25   : > { %s9368_s1 = sld [smem:[#allocation24_spill]]  ;;  %s6930_s12 = scalar_lea.vmem %s7322_s23, 1024 }
  0x26   : > { %p6931_p2 = scmp.ne.s32.totalorder %s7322_s23, %s6930_s12  ;;  %p6938_p9 = scmp.lt.s32.totalorder %s7322_s23, %s7322_s23 }
  0x27   : > { %p6939_p10 = scmp.lt.s32.totalorder %s6930_s12, %s6930_s12 }
  0x28   : > { %p6933_p5 = pnand %p6931_p2, %p7328_p7 }
  0x29   : > { %p6940_p11 = por %p6939_p10, %p6938_p9 }
  0x2a   : > { %p6934_p8 = pneg %p6933_p5 }
  0x2b   : > { %6070 = dma.hbm_to_vmem [thread:$0]  (!%p7318_p6), %s9368_s1, 4096, %s289_s18, [#allocation6], %s9351_s28, %s9351_s28, %s9353_s29  }
  0x2c   : > { %p6941_p12 = pnand %p6940_p11, %p6934_p8 }
  0x2e   : > { %6944 = shalt.err (!%p6941_p12)
}
  0x2f   : > { %s7216_s17 = smov 64   ;;  %s7217_s22 = smov 4  }
  0x30   : > { %s9369_s3 = sld [smem:[#allocation26_spill]]  ;;  %s6956_s27 = scalar_lea.vmem %s341_s25, 1024 }
  0x31   : > { %p6957_p13 = scmp.ne.s32.totalorder %s341_s25, %s6956_s27  ;;  %p6964_p5 = scmp.lt.s32.totalorder %s341_s25, %s341_s25 }
  0x32   : > { %p6965_p8 = scmp.lt.s32.totalorder %s6956_s27, %s6956_s27 }
  0x33   : > { %p6959_p0 = pnand %p6957_p13, %p7328_p7 }
  0x34   : > { %p6966_p9 = por %p6965_p8, %p6964_p5 }
  0x35   : > { %p6960_p2 = pneg %p6959_p0 }
  0x36   : > { %6076 = dma.hbm_to_vmem [thread:$0]  (!%p7318_p6), %s9369_s3, 1024, %s7322_s23, [#allocation9], %s7216_s17, %s7216_s17, %s7217_s22  }
  0x37   : > { %p6967_p10 = pnand %p6966_p9, %p6960_p2 }
  0x39   : > { %6970 = shalt.err (!%p6967_p10)
}
  0x3a   : > { %s9370_s5 = sld [smem:[#allocation28_spill]]  ;;  %s7218_s23 = smov [#allocation14]  }
  0x3b   : > { %s366_s12 = sshll.u32 %s7218_s23, 4  ;;  %s7219_s18 = smov [#allocation7]   ;;  %s367_s12 = int_to_ptr.vmem [resolvable:$true] %s366_s12 }
  0x3c   : > { %s301_s24 = sshll.u32 %s7219_s18, 4  ;;  %s6982_s28 = scalar_lea.vmem %s367_s12, 2048  ;;  %s302_s24 = int_to_ptr.vmem [resolvable:$true] %s301_s24 }
  0x3d   : > { %p6983_p11 = scmp.ne.s32.totalorder %s367_s12, %s6982_s28  ;;  %p6990_p0 = scmp.lt.s32.totalorder %s367_s12, %s367_s12 }
  0x3e   : > { %p6991_p2 = scmp.lt.s32.totalorder %s6982_s28, %s6982_s28 }
  0x3f   : > { %p6985_p12 = pnand %p6983_p11, %p7328_p7 }
  0x40   : > { %6082 = dma.hbm_to_vmem [thread:$0]  (!%p7318_p6), %s9370_s5, 1024, %s341_s25, [#allocation12], %s7216_s17, %s7216_s17, %s7217_s22  }
  0x41   : > { %p6986_p13 = pneg %p6985_p12  ;;  %p6992_p5 = por %p6991_p2, %p6990_p0 }
  0x43   : > { %p6993_p8 = pnand %p6992_p5, %p6986_p13 }
  0x45   : > { %6996 = shalt.err (!%p6993_p8)
}
  0x46   : > { %s9371_s27 = smov 128   ;;  %s7008_s11 = scalar_lea.vmem %s302_s24, 2048 }
  0x47   : > { %6088 = dma.hbm_to_vmem [thread:$0]  (!%p7318_p6), %s9347_s7, 2048, %s367_s12, [#allocation15], %s9371_s27, %s9371_s27, %s9353_s29  }
  0x48   : > { %p7009_p9 = scmp.ne.s32.totalorder %s302_s24, %s7008_s11  ;;  %p7016_p12 = scmp.lt.s32.totalorder %s302_s24, %s302_s24 }
  0x49   : > { %p7017_p0 = scmp.lt.s32.totalorder %s7008_s11, %s7008_s11 }
  0x4a   : > { %p7011_p10 = pnand %p7009_p9, %p7328_p7 }
  0x4b   : > { %p7018_p13 = por %p7017_p0, %p7016_p12 }
  0x4c   : > { %p7012_p11 = pneg %p7011_p10 }
  0x4e   : > { %p7019_p2 = pnand %p7018_p13, %p7012_p11 }
  0x50   : > { %7022 = shalt.err (!%p7019_p2)
}
  0x51   : > { %s9372_s2 = sld [smem:[#allocation25_spill]]  ;;  %s7220_s12 = smov [#allocation10]  }
  0x52   : > { %s327_s18 = sshll.u32 %s7220_s12, 4  ;;  %s7221_s25 = smov [#allocation13]   ;;  %s328_s18 = int_to_ptr.vmem [resolvable:$true] %s327_s18 }
  0x53   : > { %s353_s30 = sshll.u32 %s7221_s25, 4  ;;  %s7034_s29 = scalar_lea.vmem %s328_s18, 1024  ;;  %s354_s30 = int_to_ptr.vmem [resolvable:$true] %s353_s30 }
  0x54   : > { %p7035_p5 = scmp.ne.s32.totalorder %s328_s18, %s7034_s29  ;;  %p7042_p10 = scmp.lt.s32.totalorder %s328_s18, %s328_s18 }
  0x55   : > { %p7043_p11 = scmp.lt.s32.totalorder %s7034_s29, %s7034_s29 }
  0x56   : > { %p7037_p8 = pnand %p7035_p5, %p7328_p7 }
  0x57   : > { %6073 = dma.hbm_to_vmem [thread:$0]  (!%p7318_p6), %s9372_s2, 2048, %s302_s24, [#allocation6], %s7216_s17, %s7216_s17, %s7217_s22  }
  0x58   : > { %p7038_p9 = pneg %p7037_p8  ;;  %p7044_p12 = por %p7043_p11, %p7042_p10 }
  0x5a   : > { %p7045_p0 = pnand %p7044_p12, %p7038_p9 }
  0x5c   : > { %7048 = shalt.err (!%p7045_p0)
}
  0x5d   : > { %s9373_s4 = sld [smem:[#allocation27_spill]]  ;;  %s7060_s28 = scalar_lea.vmem %s354_s30, 1024 }
  0x5e   : > { %p7061_p13 = scmp.ne.s32.totalorder %s354_s30, %s7060_s28  ;;  %p7068_p8 = scmp.lt.s32.totalorder %s354_s30, %s354_s30 }
  0x5f   : > { %p7069_p10 = scmp.lt.s32.totalorder %s7060_s28, %s7060_s28 }
  0x60   : > { %p7063_p2 = pnand %p7061_p13, %p7328_p7 }
  0x61   : > { %p7070_p9 = por %p7069_p10, %p7068_p8 }
  0x62   : > { %p7064_p5 = pneg %p7063_p2 }
  0x63   : > { %6079 = dma.hbm_to_vmem [thread:$0]  (!%p7318_p6), %s9373_s4, 1024, %s328_s18, [#allocation9], %s7216_s17, %s7216_s17, %s7217_s22  }
  0x64   : > { %p7071_p11 = pnand %p7070_p9, %p7064_p5 }
  0x66   : > { %7074 = shalt.err (!%p7071_p11)
}
  0x67   : > { %s9374_s6 = sld [smem:[#allocation29_spill]]  ;;  %s7222_s12 = smov [#allocation16]  }
  0x68   : > { %s379_s18 = sshll.u32 %s7222_s12, 4  ;;  %s380_s18 = int_to_ptr.vmem [resolvable:$true] %s379_s18 }
  0x69   : > { %s7086_s25 = scalar_lea.vmem %s380_s18, 4096  ;;  %p7094_p2 = scmp.lt.s32.totalorder %s380_s18, %s380_s18 }
  0x6a   : > { %p7087_p12 = scmp.ne.s32.totalorder %s380_s18, %s7086_s25  ;;  %p7095_p5 = scmp.lt.s32.totalorder %s7086_s25, %s7086_s25 }
  0x6c   : > { %p7089_p0 = pnand %p7087_p12, %p7328_p7  ;;  %p7096_p8 = por %p7095_p5, %p7094_p2 }
  0x6d   : > { %6085 = dma.hbm_to_vmem [thread:$0]  (!%p7318_p6), %s9374_s6, 1024, %s354_s30, [#allocation12], %s7216_s17, %s7216_s17, %s7217_s22  }
  0x6e   : > { %p7090_p13 = pneg %p7089_p0 }
  0x70   : > { %p7097_p10 = pnand %p7096_p8, %p7090_p13 }
  0x72   : > { %7100 = shalt.err (!%p7097_p10)
}
  0x73   : > { %s9375_s24 = smov 8   ;;  %s5145_s21 = sadd.s32 4294967294, %s7209_s16  }
  0x74   : > { %6091 = dma.hbm_to_vmem [thread:$0]  (!%p7318_p6), %s9348_s8, 4096, %s380_s18, [#allocation15], %s9371_s27, %s9371_s27, %s9375_s24  }
  0x75   : > { %s7420_s26 = sadd.s32 1, %s7209_s16   ;;  %s37_s30 = sadd.s32 1, %s7205_s15 }
  0x76   : > { %s34_s22 = ssub.s32 %s7209_s16, %s7420_s26  ;;  %p44_p9 = scmp.ne.s32.totalorder %s7205_s15, %s7201_s14 }
  0x77   : > { %p35_p7 = scmp.eq.s32.totalorder %s34_s22, 0  ;;  %p45_p11 = scmp.eq.s32.totalorder %s7209_s16, 0 }
  0x78   : > { %p50_p12 = scmp.ne.s32.totalorder %s7201_s14, %s7197_s13  ;;  %p263_p13 = scmp.eq.s32.totalorder %s7304_s19, 1 }
  0x79   : > { %s7431_s28 = scalar_select %p35_p7, %s7205_s15, %s37_s30  }
  0x7a   : > { %p7433_p0 = por %p45_p11, %p44_p9  ;;  %p7439_p6 = por %p9355_p1, %p50_p12 }
  0x7b   : > { %p269_p2 = scmp.eq.s32.totalorder %s5145_s21, 1  ;;  %p6108_p5 = scmp.lt.s32.totalorder %s7209_s16, 2 }
  0x7c   : > { %s9377_s23 = scalar_select %p7439_p6, 1, 0 }
  0x7d   : > { %s396_s12 = sand.u32 1, %s7205_s15   ;;  %p7446_p8 = por %p263_p13, %p44_p9 }
  0x7e   : > { %p7450_p10 = por %p269_p2, %p50_p12  ;;  %s5156_s11 = sshll.u32 %s396_s12, 8 }
  0x7f   : > { %s9378_s18 = scalar_select %p7446_p8, 1, 0 }
  0x80   : > { %s9379_s25 = scalar_select %p7450_p10, 1, 0 }
  0x81   : > { %s5596_s17 = sshll.u32 %s7209_s16, 12  ;;  %s400_s21 = scalar_lea.vmem [#allocation2], %s5156_s11 }
  0x82   : > { %s7458_s1 = scalar_lea.hbm %s9340_s0, %s5596_s17  ;;  %s408_s2 = sshll.u32 %s400_s21, 4  ;;  %s7460_s2 = int_to_ptr.vmem [resolvable:$true] %s408_s2 }
  0x83   : > { %p7464_p7 = pnand %p6108_p5, %p7433_p0  ;;  %s7468_s4 = scalar_lea.sflag [#allocation3], %s396_s12 }
  0x84   : > { %s7101_s5 = scalar_lea.hbm %s7458_s1, 4096  ;;  %s7106_s11 = scalar_lea.hbm %s9340_s0, 8192 }
  0x85   : > { %p7102_p9 = scmp.ne.s32.totalorder %s7458_s1, %s7101_s5  ;;  %p7103_p11 = pneg %p7464_p7 }
  0x86   : > { %p7107_p0 = scmp.lt.s32.totalorder %s7458_s1, %s9340_s0  ;;  %p7108_p2 = scmp.lt.s32.totalorder %s7106_s11, %s7101_s5 }
  0x87   : > { %p7104_p12 = pnand %p7103_p11, %p7102_p9 }
  0x88   : > { %p7109_p5 = por %p7108_p2, %p7107_p0 }
  0x89   : > { %p7105_p13 = pneg %p7104_p12 }
  0x8b   : > { %p7110_p4 = pnand %p7109_p5, %p7105_p13 }
  0x8d   : > { %7113 = shalt.err (!%p7110_p4)
}
  0x8e   : > { %s7114_s29 = scalar_lea.vmem %s7460_s2, 4096  ;;  %s7223_s12 = smov [#allocation2]  }
  0x8f   : > { %p7115_p1 = scmp.ne.s32.totalorder %s7460_s2, %s7114_s29  ;;  %s7119_s6 = sshll.u32 %s7223_s12, 4  ;;  %s7120_s6 = int_to_ptr.vmem [resolvable:$false] %s7119_s6 }
  0x90   : > { %s7121_s17 = scalar_lea.vmem %s7120_s6, 8192  ;;  %p7122_p12 = scmp.lt.s32.totalorder %s7460_s2, %s7120_s6 }
  0x91   : > { %p7117_p10 = pnand %p7115_p1, %p7103_p11  ;;  %p7123_p8 = scmp.lt.s32.totalorder %s7121_s17, %s7114_s29 }
  0x93   : > { %p7118_p9 = pneg %p7117_p10  ;;  %p7124_p6 = por %p7123_p8, %p7122_p12 }
  0x95   : > { %p7125_p3 = pnand %p7124_p6, %p7118_p9 }
  0x97   : > { %7128 = shalt.err (!%p7125_p3)
}
  0x98   : > { %6095 = dma.hbm_to_vmem [thread:$0]  (!%p7464_p7), %s7458_s1, 4096, %s7460_s2, %s7468_s4, %s9371_s27, %s9371_s27, %s9375_s24  }
  0x99   : > { %p9381_p1 = scmp.ne.s32.totalorder %s9365_s20, 0 }
  0x9a   : > { %s7495_s5 = sand.u32 (!%p9381_p1), 1, %s7201_s14   ;;  %p9382_p3 = scmp.ne.s32.totalorder (!%p9381_p1), %s9377_s23, 0 }
  0x9b   : > { %420 = sbr.rel (%p9381_p1) target bundleno = 2156 (0x86c), region = 60  ;;  %s5161_s6 = sshll.u32 (!%p9381_p1), %s7495_s5, 8 }
  0x9c   : > { %s423_s22 = scalar_lea.sflag (!%p9381_p1), [#allocation3], %s7495_s5  ;;  %s7499_s11 = scalar_lea.vmem (!%p9381_p1), [#allocation2], %s5161_s6 }
  0xa0   : > { %7172 = dma.done.wait (%p9382_p3), %s423_s22, 4096  }
  0xa1   : > { %7174 = vsyncadd (%p9382_p3), %s423_s22, 4294963200  ;;  %p9383_p4 = scmp.eq.s32.totalorder %s7304_s19, 0 }
  0xa3   : > { %7176 = dma.done.wait (%p9383_p4), [#allocation6], 6144   ;;  %p9384_p6 = pmov %p9383_p4 }
  0xa4   : > { %p9385_p8 = pmov %p9383_p4 }
  0xa5   : > { %7178 = vsyncadd (%p9384_p6), [#allocation6], 4294961152 }
  0xa6   : > { %7180 = dma.done.wait (%p9385_p8), [#allocation9], 2048   ;;  %p9386_p10 = pmov %p9383_p4 }
  0xa7   : > { %p9387_p7 = pmov %p9383_p4 }
  0xa8   : > { %7182 = vsyncadd (%p9386_p10), [#allocation9], 4294965248 }
  0xa9   : > { %7184 = dma.done.wait (%p9387_p7), [#allocation12], 2048   ;;  %p9388_p11 = pmov %p9383_p4 }
  0xaa   : > { %p9389_p13 = pmov %p9383_p4 }
  0xab   : > { %7186 = vsyncadd (%p9388_p11), [#allocation12], 4294965248 }
  0xac   : > { %7188 = dma.done.wait (%p9389_p13), [#allocation15], 6144   ;;  %p9390_p0 = pmov %p9383_p4 }
  0xad   : > { %v6165_v0 = vld [vmem:[#allocation5 + $0x74] ss:$8 sps:$4 sm:$0xff]   ;;  %v6167_v1 = vld [vmem:[#allocation5 + $0x70] ss:$8 sps:$4 sm:$0xff]   ;;  %v6168_v2 = vld [vmem:[#allocation5 + $0x64] ss:$8 sps:$4 sm:$0xff]  }
  0xae   : > { %7190 = vsyncadd (%p9390_p0), [#allocation15], 4294961152  ;;  %894 = vmatprep.subr.bf16.mxu0 %v6165_v0  ;;  %v6170_v3 = vld [vmem:[#allocation5 + $0x60] ss:$8 sps:$4 sm:$0xff]   ;;  %v6171_v4 = vld [vmem:[#allocation5 + $0x54] ss:$8 sps:$4 sm:$0xff]  }
  0xaf   : > { %895 = vmatpush1.bf16.msra.mxu0 %v6167_v1  ;;  %v6173_v5 = vld [vmem:[#allocation5 + $0x50] ss:$8 sps:$4 sm:$0xff]   ;;  %v6174_v6 = vld [vmem:[#allocation5 + $0x44] ss:$8 sps:$4 sm:$0xff]   ;;  %v6176_v7 = vld [vmem:[#allocation5 + $0x40] ss:$8 sps:$4 sm:$0xff]  }
  0xb0   : > { %896 = vmatprep.subr.bf16.mxu0 %v6168_v2  ;;  %v6177_v8 = vld [vmem:[#allocation5 + $0x34] ss:$8 sps:$4 sm:$0xff]   ;;  %v6179_v9 = vld [vmem:[#allocation5 + $0x30] ss:$8 sps:$4 sm:$0xff]   ;;  %v6180_v10 = vld [vmem:[#allocation5 + $0x24] ss:$8 sps:$4 sm:$0xff]  }
  0xb1   : > { %v6182_v11 = vld [vmem:[#allocation5 + $0x20] ss:$8 sps:$4 sm:$0xff]   ;;  %v6183_v12 = vld [vmem:[#allocation5 + $0x14] ss:$8 sps:$4 sm:$0xff]   ;;  %v6215_v13 = vld [vmem:[%s7499_s11 + $0x4] ss:$8 sps:$4 sm:$0xff]  }
  0xb2   : > { %v6185_v14 = vld [vmem:[#allocation5 + $0x10] ss:$8 sps:$4 sm:$0xff]   ;;  %v6186_v15 = vld [vmem:[#allocation5 + $0x4] ss:$8 sps:$4 sm:$0xff]   ;;  %926 = vmatprep.mubr.bf16.mxu0 %v6215_v13  ;;  %v6188_v16 = vld [vmem:[#allocation5] ss:$8 sps:$4 sm:$0xff]  }
  0xb3   : > { %897 = vmatpush1.bf16.msra.mxu0 %v6170_v3  ;;  %v6189_v17 = vld [vmem:[#allocation5 + $0xf4] ss:$8 sps:$4 sm:$0xff]   ;;  %v6191_v18 = vld [vmem:[#allocation5 + $0xf0] ss:$8 sps:$4 sm:$0xff]   ;;  %v6192_v19 = vld [vmem:[#allocation5 + $0xe4] ss:$8 sps:$4 sm:$0xff]  }
  0xb4   : > { %898 = vmatprep.subr.bf16.mxu0 %v6171_v4  ;;  %v6194_v20 = vld [vmem:[#allocation5 + $0xe0] ss:$8 sps:$4 sm:$0xff]   ;;  %v6195_v21 = vld [vmem:[#allocation5 + $0xd4] ss:$8 sps:$4 sm:$0xff]   ;;  %v6197_v22 = vld [vmem:[#allocation5 + $0xd0] ss:$8 sps:$4 sm:$0xff]  }
  0xb5   : > { %v6198_v23 = vld [vmem:[#allocation5 + $0xc4] ss:$8 sps:$4 sm:$0xff]   ;;  %v6200_v24 = vld [vmem:[#allocation5 + $0xc0] ss:$8 sps:$4 sm:$0xff]   ;;  %v6201_v25 = vld [vmem:[#allocation5 + $0xb4] ss:$8 sps:$4 sm:$0xff]  }
  0xb6   : > { %v6203_v26 = vld [vmem:[#allocation5 + $0xb0] ss:$8 sps:$4 sm:$0xff]   ;;  %v6204_v27 = vld [vmem:[#allocation5 + $0xa4] ss:$8 sps:$4 sm:$0xff]   ;;  %v6206_v28 = vld [vmem:[#allocation5 + $0xa0] ss:$8 sps:$4 sm:$0xff]  }
  0xb7   : > { %899 = vmatpush1.bf16.msra.mxu0 %v6173_v5  ;;  %v6207_v29 = vld [vmem:[#allocation5 + $0x94] ss:$8 sps:$4 sm:$0xff]   ;;  %v6209_v30 = vld [vmem:[#allocation5 + $0x90] ss:$8 sps:$4 sm:$0xff]   ;;  %v6210_v31 = vld [vmem:[#allocation5 + $0x84] ss:$8 sps:$4 sm:$0xff]  }
  0xb8   : > { %900 = vmatprep.subr.bf16.mxu0 %v6174_v6  ;;  %v6212_v32 = vld [vmem:[#allocation5 + $0x80] ss:$8 sps:$4 sm:$0xff]   ;;  %v6216_v34 = vld [vmem:[%s7499_s11 + $0x14] ss:$8 sps:$4 sm:$0xff]   ;;  %v6218_v35 = vld [vmem:[%s7499_s11 + $0x10] ss:$8 sps:$4 sm:$0xff]  }
  0xb9   : > { %v6213_v33 = vld [vmem:[%s7499_s11] ss:$8 sps:$4 sm:$0xff]   ;;  %v6219_v36 = vld [vmem:[%s7499_s11 + $0x24] ss:$8 sps:$4 sm:$0xff]   ;;  %v6222_v38 = vld [vmem:[%s7499_s11 + $0x34] ss:$8 sps:$4 sm:$0xff]  }
  0xba   : > { %v6221_v37 = vld [vmem:[%s7499_s11 + $0x20] ss:$8 sps:$4 sm:$0xff]   ;;  %v6224_v39 = vld [vmem:[%s7499_s11 + $0x30] ss:$8 sps:$4 sm:$0xff]   ;;  %v6225_v40 = vld [vmem:[%s7499_s11 + $0x44] ss:$8 sps:$4 sm:$0xff]  }
  0xbb   : > { %901 = vmatpush1.bf16.msra.mxu0 %v6176_v7  ;;  %v6227_v41 = vld [vmem:[%s7499_s11 + $0x40] ss:$8 sps:$4 sm:$0xff]   ;;  %v6228_v42 = vld [vmem:[%s7499_s11 + $0x54] ss:$8 sps:$4 sm:$0xff]   ;;  %v6230_v43 = vld [vmem:[%s7499_s11 + $0x50] ss:$8 sps:$4 sm:$0xff]  }
  0xbc   : > { %902 = vmatprep.subr.bf16.mxu0 %v6177_v8  ;;  %v6231_v44 = vld [vmem:[%s7499_s11 + $0x64] ss:$8 sps:$4 sm:$0xff]   ;;  %v6233_v45 = vld [vmem:[%s7499_s11 + $0x60] ss:$8 sps:$4 sm:$0xff]   ;;  %v6234_v46 = vld [vmem:[%s7499_s11 + $0x74] ss:$8 sps:$4 sm:$0xff]  }
  0xbd   : > { %v6236_v47 = vld [vmem:[%s7499_s11 + $0x70] ss:$8 sps:$4 sm:$0xff]   ;;  %v6237_v48 = vld [vmem:[%s7499_s11 + $0x84] ss:$8 sps:$4 sm:$0xff]   ;;  %v6239_v49 = vld [vmem:[%s7499_s11 + $0x80] ss:$8 sps:$4 sm:$0xff]  }
  0xbe   : > { %v6240_v50 = vld [vmem:[%s7499_s11 + $0x94] ss:$8 sps:$4 sm:$0xff]   ;;  %v6242_v53 = vld [vmem:[%s7499_s11 + $0x90] ss:$8 sps:$4 sm:$0xff]   ;;  %v6243_v54 = vld [vmem:[%s7499_s11 + $0xa4] ss:$8 sps:$4 sm:$0xff]  }
  0xbf   : > { %903 = vmatpush1.bf16.msra.mxu0 %v6179_v9  ;;  %v6261_v51 = vld [vmem:[#allocation7 + $0x78] sm:$0xff]   ;;  %v6263_v55 = vld [vmem:[#allocation7 + $0x70] sm:$0xff]   ;;  %v6265_v57 = vld [vmem:[#allocation7 + $0x68] sm:$0xff]   ;;  %s5170_s1 = sshll.u32 %s7495_s5, 9  ;;  %s5598_s3 = sshll.u32 %s7304_s19, 13 }
  0xc0   : > { %904 = vmatprep.subr.bf16.mxu0 %v6180_v10  ;;  %v6262_v52 = vld [vmem:[#allocation7 + $0x38] sm:$0xff]   ;;  %5599 = vmatprep.subr.bf16.mxu1 %v6261_v51  ;;  %v6264_v56 = vld [vmem:[#allocation7 + $0x30] sm:$0xff]   ;;  %v6266_v58 = vld [vmem:[#allocation7 + $0x28] sm:$0xff]   ;;  %s9161_s2 = scalar_lea.vmem [#allocation17], %s5170_s1  ;;  %s9292_s24 = scalar_lea.hbm %s9350_s10, %s5598_s3 }
  0xc1   : > { %5600 = vmatpush3.bf16.msra.mxu1 %v6262_v52  ;;  %v6245_v59 = vld [vmem:[%s7499_s11 + $0xa0] ss:$8 sps:$4 sm:$0xff]   ;;  %v6246_v60 = vld [vmem:[%s7499_s11 + $0xb4] ss:$8 sps:$4 sm:$0xff]   ;;  %v6248_v1 = vld [vmem:[%s7499_s11 + $0xb0] ss:$8 sps:$4 sm:$0xff]  }
  0xc2   : > { %5601 = vmatprep.subr.bf16.mxu1 %v6263_v55  ;;  %v6267_v61 = vld [vmem:[#allocation7 + $0x60] sm:$0xff]   ;;  %v6269_v63 = vld [vmem:[#allocation7 + $0x58] sm:$0xff]   ;;  %v6271_v3 = vld [vmem:[#allocation7 + $0x50] sm:$0xff]   ;;  %s4996_s4 = sshll.u32 %s9161_s2, 4  ;;  %s4982_s19 = scalar_lea.sflag [#allocation4], %s7495_s5  ;;  %s9294_s4 = int_to_ptr.vmem [resolvable:$true] %s4996_s4 }
  0xc3   : > { %905 = vmatpush1.bf16.msra.mxu0 %v6182_v11  ;;  %v6268_v62 = vld [vmem:[#allocation7 + $0x20] sm:$0xff]   ;;  %v6270_v0 = vld [vmem:[#allocation7 + $0x18] sm:$0xff]   ;;  %v6272_v4 = vld [vmem:[#allocation7 + $0x10] sm:$0xff]   ;;  %s7129_s23 = scalar_lea.vmem %s9294_s4, 8192  ;;  %p9391_p5 = scmp.ne.s32.totalorder %s9378_s18, 0 }
  0xc4   : > { %906 = vmatprep.subr.bf16.mxu0 %v6183_v12  ;;  %v6249_v2 = vld [vmem:[%s7499_s11 + $0xc4] ss:$8 sps:$4 sm:$0xff]   ;;  %v6251_v7 = vld [vmem:[%s7499_s11 + $0xc0] ss:$8 sps:$4 sm:$0xff]   ;;  %v6252_v8 = vld [vmem:[%s7499_s11 + $0xd4] ss:$8 sps:$4 sm:$0xff]   ;;  %p7130_p2 = scmp.ne.s32.totalorder %s9294_s4, %s7129_s23 }
  0xc5   : > { %5602 = vmatpush3.bf16.msra.mxu1 %v6264_v56  ;;  %v6273_v5 = vld [vmem:[#allocation7 + $0x48] sm:$0xff]   ;;  %v6275_v9 = vld [vmem:[#allocation7 + $0x40] sm:$0xff]   ;;  %v6254_v11 = vld [vmem:[%s7499_s11 + $0xd0] ss:$8 sps:$4 sm:$0xff]   ;;  %s7225_s30 = smov [#allocation17]  }
  0xc6   : > { %5603 = vmatprep.subr.bf16.mxu1 %v6265_v57  ;;  %v6274_v6 = vld [vmem:[#allocation7 + $0x8] sm:$0xff]   ;;  %v6276_v10 = vld [vmem:[#allocation7] sm:$0xff]   ;;  %p7131_p9 = pnand %p7130_p2, %p9391_p5  ;;  %s7133_s21 = sshll.u32 %s7225_s30, 4  ;;  %s7134_s21 = int_to_ptr.vmem [resolvable:$false] %s7133_s21 }
  0xc7   : > { %907 = vmatpush1.bf16.msra.mxu0 %v6185_v14  ;;  %v6255_v12 = vld [vmem:[%s7499_s11 + $0xe4] ss:$8 sps:$4 sm:$0xff]   ;;  %v6257_v13 = vld [vmem:[%s7499_s11 + $0xe0] ss:$8 sps:$4 sm:$0xff]   ;;  %v6258_v14 = vld [vmem:[%s7499_s11 + $0xf4] ss:$8 sps:$4 sm:$0xff]   ;;  %p7136_p1 = scmp.lt.s32.totalorder %s9294_s4, %s7134_s21 }
  0xc8   : > { %908 = vmatprep.subr.bf16.mxu0 %v6186_v15  ;;  %v6260_v15 = vld [vmem:[%s7499_s11 + $0xf0] ss:$8 sps:$4 sm:$0xff]   ;;  %p7132_p12 = pneg %p7131_p9  ;;  %s7135_s29 = scalar_lea.vmem %s7134_s21, 16384 }
  0xc9   : > { %5604 = vmatpush3.bf16.msra.mxu1 %v6266_v58  ;;  %p7137_p3 = scmp.lt.s32.totalorder %s7135_s29, %s7129_s23 }
  0xca   : > { %5605 = vmatprep.subr.bf16.mxu1 %v6267_v61 }
  0xcb   : > { %909 = vmatpush1.bf16.msra.mxu0 %v6188_v16  ;;  %v564_v16 = vlaneseq  ;;  %p7138_p4 = por %p7137_p3, %p7136_p1 }
  0xcc   : > { %910 = vmatprep.subr.bf16.mxu0 %v6189_v17 }
  0xcd   : > { %5606 = vmatpush3.bf16.msra.mxu1 %v6268_v62  ;;  %v565_v17 = vshrl.u32 %v564_v16, 7  ;;  %p7139_p6 = pnand %p7138_p4, %p7132_p12 }
  0xce   : > { %5607 = vmatprep.subr.bf16.mxu1 %v6269_v63 }
  0xcf   : > { %911 = vmatpush2.bf16.msra.mxu0 %v6191_v18  ;;  %v7553_v18 = vsub.s32 0, %v565_v17 }
  0xd0   : > { %912 = vmatprep.subr.bf16.mxu0 %v6192_v19  ;;  %v562_v19 = vld [vmem:[%s9349_s9] ss:$8 sm:$0x3] }
  0xd1   : > { %5608 = vmatpush3.bf16.msra.mxu1 %v6270_v0 }
  0xd2   : > { %5609 = vmatprep.subr.bf16.mxu1 %v6271_v3 }
  0xd3   : > { %913 = vmatpush2.bf16.msra.mxu0 %v6194_v20  ;;  %v7558_v20 = vsub.s32 1, %v565_v17 }
  0xd4   : > { %914 = vmatprep.subr.bf16.mxu0 %v6195_v21  ;;  %v7561_v21 = vrot.slane %v562_v19, %v7553_v18 }
  0xd5   : > { %5610 = vmatpush3.bf16.msra.mxu1 %v6272_v4 }
  0xd6   : > { %5611 = vmatprep.subr.bf16.mxu1 %v6273_v5 }
  0xd7   : > { %915 = vmatpush2.bf16.msra.mxu0 %v6197_v22  ;;  %v7564_v22 = vrot.slane %v562_v19, %v7558_v20 }
  0xd8   : > { %916 = vmatprep.subr.bf16.mxu0 %v6198_v23 }
  0xd9   : > { %5612 = vmatpush3.bf16.msra.mxu1 %v6274_v6 }
  0xda   : > { %5613 = vmatprep.subr.bf16.mxu1 %v6275_v9 }
  0xdb   : > { %917 = vmatpush2.bf16.msra.mxu0 %v6200_v24 }
  0xdc   : > { %918 = vmatprep.subr.bf16.mxu0 %v6201_v25 }
  0xdd   : > { %5614 = vmatpush3.bf16.msra.mxu1 %v6276_v10 }
  0xdf   : > { %919 = vmatpush2.bf16.msra.mxu0 %v6203_v26 }
  0xe0   : > { %920 = vmatprep.subr.bf16.mxu0 %v6204_v27 }
  0xe3   : > { %921 = vmatpush2.bf16.msra.mxu0 %v6206_v28 }
  0xe4   : > { %922 = vmatprep.subr.bf16.mxu0 %v6207_v29 }
  0xe7   : > { %923 = vmatpush2.bf16.msra.mxu0 %v6209_v30 }
  0xe8   : > { %924 = vmatprep.subr.bf16.mxu0 %v6210_v31 }
  0xeb   : > { %925 = vmatpush2.bf16.msra.mxu0 %v6212_v32 }
  0xee   : > { %927 = vmatmul.mubr.bf16.vlgmr.msra.gmra.mxu0 %v6213_v33 }
  0xef   : > { %936 = vmatprep.mubr.bf16.mxu0 %v6216_v34 }
  0xf6   : > { %937 = vmatmul.mubr.bf16.gmra.mxu0 %v6218_v35 }
  0xf7   : > { %946 = vmatprep.mubr.bf16.mxu0 %v6219_v36 }
  0xfe   : > { %947 = vmatmul.mubr.bf16.gmra.mxu0 %v6221_v37 }
  0xff   : > { %956 = vmatprep.mubr.bf16.mxu0 %v6222_v38 }
 0x106   : > { %957 = vmatmul.mubr.bf16.gmra.mxu0 %v6224_v39 }
 0x107   : > { %966 = vmatprep.mubr.bf16.mxu0 %v6225_v40 }
 0x10e   : > { %967 = vmatmul.mubr.bf16.gmra.mxu0 %v6227_v41 }
 0x10f   : > { %976 = vmatprep.mubr.bf16.mxu0 %v6228_v42 }
 0x116   : > { %977 = vmatmul.mubr.bf16.gmra.mxu0 %v6230_v43 }
 0x117   : > { %986 = vmatprep.mubr.bf16.mxu0 %v6231_v44 }
 0x11e   : > { %987 = vmatmul.mubr.bf16.gmra.mxu0 %v6233_v45 }
 0x11f   : > { %996 = vmatprep.mubr.bf16.mxu0 %v6234_v46 }
 0x126   : > { %997 = vmatmul.mubr.bf16.gmra.mxu0 %v6236_v47 }
 0x127   : > { %1006 = vmatprep.mubr.bf16.mxu0 %v6237_v48 }
 0x12e   : > { %1007 = vmatmul.mubr.bf16.gmra.mxu0 %v6239_v49 }
 0x12f   : > { %1016 = vmatprep.mubr.bf16.mxu0 %v6240_v50 }
 0x136   : > { %1017 = vmatmul.mubr.bf16.gmra.mxu0 %v6242_v53 }
 0x137   : > { %1026 = vmatprep.mubr.bf16.mxu0 %v6243_v54 }
 0x13e   : > { %1027 = vmatmul.mubr.bf16.gmra.mxu0 %v6245_v59 }
 0x13f   : > { %1036 = vmatprep.mubr.bf16.mxu0 %v6246_v60 }
 0x146   : > { %1037 = vmatmul.mubr.bf16.gmra.mxu0 %v6248_v1 }
 0x147   : > { %1046 = vmatprep.mubr.bf16.mxu0 %v6249_v2 }
 0x14e   : > { %1047 = vmatmul.mubr.bf16.gmra.mxu0 %v6251_v7 }
 0x14f   : > { %1056 = vmatprep.mubr.bf16.mxu0 %v6252_v8  ;;  %v7617_v8 = vld [vmem:[#allocation8 + $0x38] sm:$0xff]  }
 0x150   : > { %5807 = vmatprep.subr.bf16.mxu1 %v7617_v8 }
 0x156   : > { %1057 = vmatmul.mubr.bf16.gmra.mxu0 %v6254_v11 }
 0x157   : > { %1066 = vmatprep.mubr.bf16.mxu0 %v6255_v12 }
 0x15e   : > { %1067 = vmatmul.mubr.bf16.gmra.mxu0 %v6257_v13 }
 0x15f   : > { %1076 = vmatprep.mubr.bf16.mxu0 %v6258_v14 }
 0x166   : > { %1077 = vmatmul.mubr.bf16.gmra.mxu0 %v6260_v15 }
 0x1ae   : > { %v928_v23 = vpop.f32.mrf.mxu0 }
 0x1af   : > { %v7567_v24 = vadd.f32 %v928_v23, %v7561_v21 }
 0x1b0   : > { %v930_v25 = vpop.f32.mrf.mxu0 }
 0x1b1   : > { %v1151_v26 = vmul.f32 1.442695, %v7567_v24  ;;  %v7571_v27 = vadd.f32 %v930_v25, %v7564_v22  ;;  %vm1087_vm0 = vcmp.gt.f32.partialorder %v7567_v24, 0.0 }
 0x1b2   : > { %v932_v28 = vpop.f32.mrf.mxu0 }
 0x1b3   : > { %v1153_v29 = vmul.f32 1.442695, %v7571_v27  ;;  %v7575_v30 = vadd.f32 %v932_v28, %v7561_v21  ;;  %6381 = vpow2.f32 %v1151_v26  ;;  %vm1088_vm1 = vcmp.gt.f32.partialorder %v7571_v27, 0.0 }
 0x1b4   : > { %v934_v31 = vpop.f32.mrf.mxu0 }
 0x1b5   : > { %6383 = vpow2.f32 %v1153_v29  ;;  %v1155_v32 = vmul.f32 1.442695, %v7575_v30  ;;  %v7579_v33 = vadd.f32 %v934_v31, %v7564_v22  ;;  %vm1089_vm2 = vcmp.gt.f32.partialorder %v7575_v30, 0.0 }
 0x1b6   : > { %v938_v34 = vpop.f32.mrf.mxu0 }
 0x1b7   : > { %6385 = vpow2.f32 %v1155_v32  ;;  %v1157_v35 = vmul.f32 1.442695, %v7579_v33  ;;  %v7583_v36 = vadd.f32 %v938_v34, %v7561_v21  ;;  %vm1090_vm3 = vcmp.gt.f32.partialorder %v7579_v33, 0.0 }
 0x1b8   : > { %v940_v37 = vpop.f32.mrf.mxu0 }
 0x1b9   : > { %6387 = vpow2.f32 %v1157_v35  ;;  %v7586_v38 = vadd.f32 %v940_v37, %v7564_v22  ;;  %v1159_v42 = vmul.f32 1.442695, %v7583_v36  ;;  %vm1091_vm6 = vcmp.gt.f32.partialorder %v7583_v36, 0.0 }
 0x1ba   : > { %v942_v39 = vpop.f32.mrf.mxu0 }
 0x1bb   : > { %v1161_v40 = vmul.f32 1.442695, %v7586_v38  ;;  %v7590_v41 = vadd.f32 %v942_v39, %v7561_v21  ;;  %vm1092_vm4 = vcmp.gt.f32.partialorder %v7586_v38, 0.0 }
 0x1bc   : > { %v944_v43 = vpop.f32.mrf.mxu0 }
 0x1bd   : > { %6389 = vpow2.f32 %v1161_v40  ;;  %v1163_v44 = vmul.f32 1.442695, %v7590_v41  ;;  %v7595_v45 = vadd.f32 %v944_v43, %v7564_v22  ;;  %vm1093_vm5 = vcmp.gt.f32.partialorder %v7590_v41, 0.0 }
 0x1be   : > { %v948_v46 = vpop.f32.mrf.mxu0 }
 0x1bf   : > { %6391 = vpow2.f32 %v1163_v44  ;;  %v1165_v47 = vmul.f32 1.442695, %v7595_v45  ;;  %v7599_v48 = vadd.f32 %v948_v46, %v7561_v21  ;;  %vm1094_vm7 = vcmp.gt.f32.partialorder %v7595_v45, 0.0 }
 0x1c0   : > { %6393 = vpow2.f32 %v1159_v42  ;;  %v950_v49 = vpop.f32.mrf.mxu0  ;;  %v6382_v50 = vpop.eup %6381 }
 0x1c1   : > { %v1167_v51 = vmul.f32 1.442695, %v7599_v48  ;;  %v7603_v53 = vadd.f32 %v950_v49, %v7564_v22  ;;  %6395 = vpow2.f32 %v1165_v47  ;;  %v5235_v59 = vadd.f32 -1.0, %v6382_v50 }
 0x1c2   : > { %v6384_v52 = vpop.eup %6383  ;;  %v952_v54 = vpop.f32.mrf.mxu0  ;;  %vm1095_vm8 = vcmp.gt.f32.partialorder %v7599_v48, 0.0 }
 0x1c3   : > { %v7606_v55 = vadd.f32 %v952_v54, %v7561_v21  ;;  %v1169_v57 = vmul.f32 1.442695, %v7603_v53  ;;  %6397 = vpow2.f32 %v1167_v51  ;;  %v5236_v61 = vadd.f32 -1.0, %v6384_v52 }
 0x1c4   : > { %v6386_v56 = vpop.eup %6385  ;;  %v954_v58 = vpop.f32.mrf.mxu0  ;;  %v1343_v6 = vmul.f32 1.6732632, %v5235_v59  ;;  %vm1096_vm9 = vcmp.gt.f32.partialorder %v7603_v53, 0.0 }
 0x1c5   : > { %v1171_v60 = vmul.f32 1.442695, %v7606_v55  ;;  %v5237_v63 = vadd.f32 -1.0, %v6386_v56  ;;  %6399 = vpow2.f32 %v1169_v57  ;;  %v7611_v0 = vadd.f32 %v954_v58, %v7564_v22 }
 0x1c6   : > { %v6388_v62 = vpop.eup %6387  ;;  %v958_v1 = vpop.f32.mrf.mxu0  ;;  %v1344_v7 = vmul.f32 1.6732632, %v5236_v61  ;;  %v1407_v23 = vsel %vm1087_vm0, %v7567_v24, %v1343_v6  ;;  %vm1097_vm10 = vcmp.gt.f32.partialorder %v7606_v55, 0.0 }
 0x1c7   : > { %v5238_v2 = vadd.f32 -1.0, %v6388_v62  ;;  %6401 = vpow2.f32 %v1171_v60  ;;  %v1173_v3 = vmul.f32 1.442695, %v7611_v0  ;;  %v7615_v4 = vadd.f32 %v958_v1, %v7561_v21 }
 0x1c8   : > { %v960_v5 = vpop.f32.mrf.mxu0  ;;  %v1345_v10 = vmul.f32 1.6732632, %v5237_v63  ;;  %v1408_v28 = vsel %vm1088_vm1, %v7571_v27, %v1344_v7  ;;  %v1471_v40 = vmul.f32 1.050701, %v1407_v23  ;;  %vm1098_vm11 = vcmp.gt.f32.partialorder %v7611_v0, 0.0 }
 0x1c9   : > { %v7620_v11 = vadd.f32 %v960_v5, %v7564_v22  ;;  %v1346_v14 = vmul.f32 1.6732632, %v5238_v2  ;;  %6403 = vpow2.f32 %v1173_v3  ;;  %v1175_v16 = vmul.f32 1.442695, %v7615_v4 }
 0x1ca   : > { %v6390_v9 = vpop.eup %6389  ;;  %v962_v12 = vpop.f32.mrf.mxu0  ;;  %v1409_v29 = vsel %vm1089_vm2, %v7575_v30, %v1345_v10  ;;  %v1472_v30 = vmul.f32 1.050701, %v1408_v28  ;;  %vm1099_vm12 = vcmp.gt.f32.partialorder %v7615_v4, 0.0 }
 0x1cb   : > { %v7624_v13 = vadd.f32 %v962_v12, %v7561_v21  ;;  %v5240_v25 = vadd.f32 -1.0, %v6390_v9  ;;  %v1177_v26 = vmul.f32 1.442695, %v7620_v11  ;;  %v1410_v39 = vsel %vm1090_vm3, %v7579_v33, %v1346_v14 }
 0x1cc   : > { %v6392_v15 = vpop.eup %6391  ;;  %v964_v17 = vpop.f32.mrf.mxu0  ;;  %6405 = vpow2.f32 %v1175_v16  ;;  %v1473_v27 = vmul.f32 1.050701, %v1409_v29  ;;  %v1474_v50 = vmul.f32 1.050701, %v1410_v39  ;;  %vm1100_vm13 = vcmp.gt.f32.partialorder %v7620_v11, 0.0 }
 0x1cd   : > { %v6394_v19 = vpop.eup %6393  ;;  %v5241_v31 = vadd.f32 -1.0, %v6392_v15  ;;  %v1179_v32 = vmul.f32 1.442695, %v7624_v13  ;;  %v7637_v34 = vadd.f32 %v964_v17, %v7564_v22  ;;  %v1348_v44 = vmul.f32 1.6732632, %v5240_v25 }
 0x1ce   : > { %v968_v35 = vpop.f32.mrf.mxu0  ;;  %v6396_v24 = vpop.eup %6395  ;;  %v5239_v42 = vadd.f32 -1.0, %v6394_v19  ;;  %6407 = vpow2.f32 %v1177_v26  ;;  %v1536_v58 = vpack.c.bf16 %v1474_v50, %v1472_v30  ;;  %v1535_v62 = vpack.c.bf16 %v1473_v27, %v1471_v40 }
 0x1cf   : > { %v7640_v37 = vadd.f32 %v968_v35, %v7561_v21  ;;  %v1349_v47 = vmul.f32 1.6732632, %v5241_v31  ;;  %6409 = vpow2.f32 %v1179_v32  ;;  %v1181_v49 = vmul.f32 1.442695, %v7637_v34 }
 0x1d0   : > { %v970_v43 = vpop.f32.mrf.mxu0  ;;  %v6398_v46 = vpop.eup %6397  ;;  %v5242_v54 = vadd.f32 -1.0, %v6396_v24  ;;  %v1347_v61 = vmul.f32 1.6732632, %v5239_v42  ;;  %v1412_v1 = vsel %vm1092_vm4, %v7586_v38, %v1348_v44  ;;  %1728 = vmatprep.mubr.bf16.mxu1 %v1536_v58  ;;  %v6278_v38 = vld [vmem:[#allocation8 + $0x30] sm:$0xff]   ;;  %vm1101_vm14 = vcmp.gt.f32.partialorder %v7624_v13, 0.0 }
 0x1d1   : > { %v1183_v33 = vmul.f32 1.442695, %v7640_v37  ;;  %v7646_v56 = vadd.f32 %v970_v43, %v7564_v22  ;;  %v5243_v2 = vadd.f32 -1.0, %v6398_v46  ;;  %6411 = vpow2.f32 %v1181_v49  ;;  %1729 = vmatmul.mubr.bf16.vlgmr.msra.gmra.mxu1 %v1535_v62  ;;  %v6280_v43 = vld [vmem:[#allocation8 + $0x20] sm:$0xff]  }
 0x1d2   : > { %v972_v51 = vpop.f32.mrf.mxu0  ;;  %v6400_v52 = vpop.eup %6399  ;;  %v1413_v6 = vsel %vm1093_vm5, %v7590_v41, %v1349_v47  ;;  %v1350_v9 = vmul.f32 1.6732632, %v5242_v54  ;;  %5808 = vmatpush3.bf16.msra.mxu1 %v7617_v8  ;;  %v1411_v16 = vsel %vm1091_vm6, %v7583_v36, %v1347_v61  ;;  %v1476_v17 = vmul.f32 1.050701, %v1412_v1  ;;  %v6279_v41 = vld [vmem:[#allocation8 + $0x28] sm:$0xff]  }
 0x1d3   : > { %v7649_v57 = vadd.f32 %v972_v51, %v7561_v21  ;;  %v5244_v3 = vadd.f32 -1.0, %v6400_v52  ;;  %6413 = vpow2.f32 %v1183_v33  ;;  %v1185_v7 = vmul.f32 1.442695, %v7646_v56  ;;  %5809 = vmatprep.subr.bf16.mxu1 %v6278_v38 }
 0x1d4   : > { %v974_v59 = vpop.f32.mrf.mxu0  ;;  %v6402_v60 = vpop.eup %6401  ;;  %v1477_v19 = vmul.f32 1.050701, %v1413_v6  ;;  %v1351_v23 = vmul.f32 1.6732632, %v5243_v2  ;;  %v1414_v29 = vsel %vm1094_vm7, %v7595_v45, %v1350_v9  ;;  %v1475_v44 = vmul.f32 1.050701, %v1411_v16 }
 0x1d5   : > { %v1187_v63 = vmul.f32 1.442695, %v7649_v57  ;;  %v5245_v10 = vadd.f32 -1.0, %v6402_v60  ;;  %v7659_v12 = vadd.f32 %v974_v59, %v7564_v22  ;;  %v1352_v25 = vmul.f32 1.6732632, %v5244_v3  ;;  %v6281_v60 = vld [vmem:[#allocation8 + $0x18] sm:$0xff]  }
 0x1d6   : > { %v978_v5 = vpop.f32.mrf.mxu0  ;;  %v6404_v15 = vpop.eup %6403  ;;  %5810 = vmatpush3.bf16.msra.mxu1 %v6278_v38  ;;  %v1478_v42 = vmul.f32 1.050701, %v1414_v29  ;;  %v1415_v47 = vsel %vm1095_vm8, %v7599_v48, %v1351_v23  ;;  %v1537_v51 = vpack.c.bf16 %v1477_v19, %v1475_v44  ;;  %vm1102_vm15 = vcmp.gt.f32.partialorder %v7637_v34, 0.0 }
 0x1d7   : > { %6415 = vpow2.f32 %v1187_v63  ;;  %v7668_v8 = vadd.f32 %v978_v5, %v7561_v21  ;;  %v1353_v31 = vmul.f32 1.6732632, %v5245_v10  ;;  %v5246_v32 = vadd.f32 -1.0, %v6404_v15  ;;  %5811 = vmatprep.subr.bf16.mxu1 %v6279_v41  ;;  %v6282_v15 = vld [vmem:[#allocation8 + $0x10] sm:$0xff]  }
 0x1d8   : > { %v980_v14 = vpop.f32.mrf.mxu0  ;;  %6417 = vpow2.f32 %v1185_v7  ;;  %v1189_v35 = vmul.f32 1.442695, %v7659_v12  ;;  %v1538_v50 = vpack.c.bf16 %v1478_v42, %v1476_v17  ;;  %v1416_v58 = vsel %vm1096_vm9, %v7603_v53, %v1352_v25 }
 0x1d9   : > { %v7665_v26 = vadd.f32 %v980_v14, %v7564_v22  ;;  %v6406_v24 = vpop.eup %6405  ;;  %v1191_v49 = vmul.f32 1.442695, %v7668_v8  ;;  %v1354_v33 = vmul.f32 1.6732632, %v5246_v32  ;;  %v1417_v59 = vsel %vm1097_vm10, %v7606_v55, %v1353_v31 }
 0x1da   : > { %v982_v28 = vpop.f32.mrf.mxu0  ;;  %6419 = vpow2.f32 %v1189_v35  ;;  %5812 = vmatpush3.bf16.msra.mxu1 %v6279_v41  ;;  %1736 = vmatprep.mubr.bf16.mxu1 %v1538_v50  ;;  %v5247_v61 = vadd.f32 -1.0, %v6406_v24  ;;  %v1479_v3 = vmul.f32 1.050701, %v1415_v47  ;;  %v1480_v5 = vmul.f32 1.050701, %v1416_v58 }
 0x1db   : > { %v7672_v36 = vadd.f32 %v982_v28, %v7561_v21  ;;  %v1193_v40 = vmul.f32 1.442695, %v7665_v26  ;;  %v6408_v27 = vpop.eup %6407  ;;  %5813 = vmatprep.subr.bf16.mxu1 %v6280_v43  ;;  %1737 = vmatmul.mubr.bf16.gmra.mxu1 %v1537_v51  ;;  %v1418_v53 = vsel %vm1098_vm11, %v7611_v0, %v1354_v33  ;;  %v1481_v6 = vmul.f32 1.050701, %v1417_v59 }
 0x1dc   : > { %v984_v39 = vpop.f32.mrf.mxu0  ;;  %v6410_v46 = vpop.eup %6409  ;;  %v5248_v62 = vadd.f32 -1.0, %v6408_v27  ;;  %v1482_v38 = vmul.f32 1.050701, %v1418_v53  ;;  %v1355_v17 = vmul.f32 1.6732632, %v5247_v61  ;;  %vm1103_vm0 = vcmp.gt.f32.partialorder %v7640_v37, 0.0 }
 0x1dd   : > { %v1195_v45 = vmul.f32 1.442695, %v7672_v36  ;;  %v7684_v52 = vadd.f32 %v984_v39, %v7564_v22  ;;  %6421 = vpow2.f32 %v1193_v40  ;;  %v5249_v63 = vadd.f32 -1.0, %v6410_v46 }
 0x1de   : > { %v988_v30 = vpop.f32.mrf.mxu0  ;;  %v6412_v2 = vpop.eup %6411  ;;  %5814 = vmatpush3.bf16.msra.mxu1 %v6280_v43  ;;  %v1356_v0 = vmul.f32 1.6732632, %v5248_v62  ;;  %v1540_v29 = vpack.c.bf16 %v1482_v38, %v1480_v5  ;;  %v1539_v39 = vpack.c.bf16 %v1481_v6, %v1479_v3  ;;  %v1419_v43 = vsel %vm1099_vm12, %v7615_v4, %v1355_v17 }
 0x1df   : > { %v7689_v48 = vadd.f32 %v988_v30, %v7561_v21  ;;  %6423 = vpow2.f32 %v1195_v45  ;;  %v1197_v7 = vmul.f32 1.442695, %v7684_v52  ;;  %5815 = vmatprep.subr.bf16.mxu1 %v6281_v60  ;;  %v1357_v41 = vmul.f32 1.6732632, %v5249_v63 }
 0x1e0   : > { %v990_v54 = vpop.f32.mrf.mxu0  ;;  %6425 = vpow2.f32 %v1191_v49  ;;  %v6414_v55 = vpop.eup %6413  ;;  %v5250_v25 = vadd.f32 -1.0, %v6412_v2  ;;  %1744 = vmatprep.mubr.bf16.mxu1 %v1540_v29  ;;  %vm1104_vm1 = vcmp.gt.f32.partialorder %v7646_v56, 0.0  ;;  %v1420_v49 = vsel %vm1100_vm13, %v7620_v11, %v1356_v0 }
 0x1e1   : > { %v7697_v9 = vadd.f32 %v990_v54, %v7564_v22  ;;  %v1199_v14 = vmul.f32 1.442695, %v7689_v48  ;;  %v5251_v28 = vadd.f32 -1.0, %v6414_v55  ;;  %6427 = vpow2.f32 %v1197_v7 }
 0x1e2   : > { %v992_v1 = vpop.f32.mrf.mxu0  ;;  %5816 = vmatpush3.bf16.msra.mxu1 %v6281_v60  ;;  %v1421_v27 = vsel %vm1101_vm14, %v7624_v13, %v1357_v41  ;;  %v1358_v47 = vmul.f32 1.6732632, %v5250_v25  ;;  %v1483_v54 = vmul.f32 1.050701, %v1419_v43  ;;  %vm1105_vm2 = vcmp.gt.f32.partialorder %v7649_v57, 0.0 }
 0x1e3   : > { %v7702_v19 = vadd.f32 %v992_v1, %v7561_v21  ;;  %v1201_v35 = vmul.f32 1.442695, %v7697_v9  ;;  %6429 = vpow2.f32 %v1199_v14  ;;  %5817 = vmatprep.subr.bf16.mxu1 %v6282_v15  ;;  %1745 = vmatmul.mubr.bf16.gmra.mxu1 %v1539_v39  ;;  %v1359_v30 = vmul.f32 1.6732632, %v5251_v28 }
 0x1e4   : > { %v994_v10 = vpop.f32.mrf.mxu0  ;;  %v6416_v16 = vpop.eup %6415  ;;  %vm1106_vm3 = vcmp.gt.f32.partialorder %v7659_v12, 0.0  ;;  %v1485_v59 = vmul.f32 1.050701, %v1421_v27  ;;  %v1422_v60 = vsel %vm1102_vm15, %v7637_v34, %v1358_v47  ;;  %v1484_v63 = vmul.f32 1.050701, %v1420_v49 }
 0x1e5   : > { %v7705_v31 = vadd.f32 %v994_v10, %v7564_v22  ;;  %v6418_v32 = vpop.eup %6417  ;;  %v1203_v24 = vmul.f32 1.442695, %v7702_v19  ;;  %v5253_v42 = vadd.f32 -1.0, %v6416_v16  ;;  %v1423_v1 = vsel %vm1103_vm0, %v7640_v37, %v1359_v30 }
 0x1e6   : > { %v998_v23 = vpop.f32.mrf.mxu0  ;;  %v5252_v46 = vadd.f32 -1.0, %v6418_v32  ;;  %5818 = vmatpush3.bf16.msra.mxu1 %v6282_v15  ;;  %v1486_v3 = vmul.f32 1.050701, %v1422_v60  ;;  %vm1108_vm4 = vcmp.gt.f32.partialorder %v7665_v26, 0.0  ;;  %v1541_v16 = vpack.c.bf16 %v1485_v59, %v1483_v54 }
 0x1e7   : > { %v1205_v44 = vmul.f32 1.442695, %v7705_v31  ;;  %6431 = vpow2.f32 %v1203_v24  ;;  %v6420_v51 = vpop.eup %6419  ;;  %v1361_v33 = vmul.f32 1.6732632, %v5253_v42  ;;  %v7730_v11 = vadd.f32 %v998_v23, %v7561_v21 }
 0x1e8   : > { %v1000_v40 = vpop.f32.mrf.mxu0  ;;  %6433 = vpow2.f32 %v1201_v35  ;;  %v1360_v2 = vmul.f32 1.6732632, %v5252_v46  ;;  %v5254_v55 = vadd.f32 -1.0, %v6420_v51  ;;  %v1542_v37 = vpack.c.bf16 %v1486_v3, %v1484_v63 }
 0x1e9   : > { %v7722_v4 = vadd.f32 %v1000_v40, %v7564_v22  ;;  %6435 = vpow2.f32 %v1205_v44  ;;  %v1425_v34 = vsel %vm1105_vm2, %v7649_v57, %v1361_v33  ;;  %v1207_v15 = vmul.f32 1.442695, %v7730_v11 }
 0x1ea   : > { %v1002_v45 = vpop.f32.mrf.mxu0  ;;  %v6422_v58 = vpop.eup %6421  ;;  %v1487_v0 = vmul.f32 1.050701, %v1423_v1  ;;  %vm1107_vm5 = vcmp.gt.f32.partialorder %v7668_v8, 0.0  ;;  %vm1109_vm6 = vcmp.gt.f32.partialorder %v7672_v36, 0.0  ;;  %1752 = vmatprep.mubr.bf16.mxu1 %v1542_v37  ;;  %v1424_v57 = vsel %vm1104_vm1, %v7646_v56, %v1360_v2 }
 0x1eb   : > { %v7725_v13 = vadd.f32 %v1002_v45, %v7561_v21  ;;  %v1209_v5 = vmul.f32 1.442695, %v7722_v4  ;;  %v5256_v14 = vadd.f32 -1.0, %v6422_v58  ;;  %1753 = vmatmul.mubr.bf16.gmra.mxu1 %v1541_v16  ;;  %v1362_v28 = vmul.f32 1.6732632, %v5254_v55 }
 0x1ec   : > { %v1004_v50 = vpop.f32.mrf.mxu0  ;;  %v6424_v62 = vpop.eup %6423  ;;  %v1489_v35 = vmul.f32 1.050701, %v1425_v34  ;;  %vm1110_vm7 = vcmp.gt.f32.partialorder %v7684_v52, 0.0  ;;  %v1488_v45 = vmul.f32 1.050701, %v1424_v57  ;;  %vm1111_vm8 = vcmp.gt.f32.partialorder %v7689_v48, 0.0 }
 0x1ed   : > { %v6426_v53 = vpop.eup %6425  ;;  %v1211_v6 = vmul.f32 1.442695, %v7725_v13  ;;  %v7741_v7 = vadd.f32 %v1004_v50, %v7564_v22  ;;  %v5257_v38 = vadd.f32 -1.0, %v6424_v62  ;;  %v1364_v39 = vmul.f32 1.6732632, %v5256_v14 }
 0x1ee   : > { %v1008_v61 = vpop.f32.mrf.mxu0  ;;  %v5255_v41 = vadd.f32 -1.0, %v6426_v53  ;;  %v6428_v32 = vpop.eup %6427  ;;  %v1426_v27 = vsel %vm1106_vm3, %v7659_v12, %v1362_v28  ;;  %v1543_v62 = vpack.c.bf16 %v1489_v35, %v1487_v0  ;;  %vm1112_vm9 = vcmp.gt.f32.partialorder %v7697_v9, 0.0 }
 0x1ef   : > { %6437 = vpow2.f32 %v1211_v6  ;;  %v1213_v25 = vmul.f32 1.442695, %v7741_v7  ;;  %v7759_v24 = vadd.f32 %v1008_v61, %v7561_v21  ;;  %v1365_v43 = vmul.f32 1.6732632, %v5257_v38 }
 0x1f0   : > { %v1010_v10 = vpop.f32.mrf.mxu0  ;;  %6439 = vpow2.f32 %v1209_v5  ;;  %v6430_v42 = vpop.eup %6429  ;;  %v1363_v30 = vmul.f32 1.6732632, %v5255_v41  ;;  %v1490_v46 = vmul.f32 1.050701, %v1426_v27  ;;  %v5258_v49 = vadd.f32 -1.0, %v6428_v32 }
 0x1f1   : > { %v7751_v23 = vadd.f32 %v1010_v10, %v7564_v22  ;;  %6441 = vpow2.f32 %v1207_v15  ;;  %v1428_v58 = vsel %vm1108_vm4, %v7665_v26, %v1364_v39  ;;  %v5259_v59 = vadd.f32 -1.0, %v6430_v42 }
 0x1f2   : > { %v1012_v17 = vpop.f32.mrf.mxu0  ;;  %6443 = vpow2.f32 %v1213_v25  ;;  %v1215_v12 = vmul.f32 1.442695, %v7759_v24  ;;  %v1544_v60 = vpack.c.bf16 %v1490_v46, %v1488_v45  ;;  %v1429_v61 = vsel %vm1109_vm6, %v7672_v36, %v1365_v43 }
 0x1f3   : > { %v7762_v40 = vadd.f32 %v1012_v17, %v7561_v21  ;;  %v1217_v56 = vmul.f32 1.442695, %v7751_v23  ;;  %v1427_v53 = vsel %vm1107_vm5, %v7668_v8, %v1363_v30  ;;  %v1366_v5 = vmul.f32 1.6732632, %v5258_v49 }
 0x1f4   : > { %v1014_v29 = vpop.f32.mrf.mxu0  ;;  %v6432_v47 = vpop.eup %6431  ;;  %1760 = vmatprep.mubr.bf16.mxu1 %v1544_v60  ;;  %v1492_v10 = vmul.f32 1.050701, %v1428_v58  ;;  %v1493_v34 = vmul.f32 1.050701, %v1429_v61  ;;  %v1367_v14 = vmul.f32 1.6732632, %v5259_v59 }
 0x1f5   : > { %v1219_v50 = vmul.f32 1.442695, %v7762_v40  ;;  %v7770_v51 = vadd.f32 %v1014_v29, %v7564_v22  ;;  %v6434_v33 = vpop.eup %6433  ;;  %6445 = vpow2.f32 %v1217_v56  ;;  %v5261_v3 = vadd.f32 -1.0, %v6432_v47  ;;  %1761 = vmatmul.mubr.bf16.gmra.mxu1 %v1543_v62 }
 0x1f6   : > { %v1018_v44 = vpop.f32.mrf.mxu0  ;;  %v6436_v2 = vpop.eup %6435  ;;  %v5260_v36 = vadd.f32 -1.0, %v6434_v33  ;;  %v1430_v15 = vsel %vm1110_vm7, %v7684_v52, %v1366_v5  ;;  %v1491_v25 = vmul.f32 1.050701, %v1427_v53  ;;  %vm1113_vm10 = vcmp.gt.f32.partialorder %v7702_v19, 0.0 }
 0x1f7   : > { %v7780_v63 = vadd.f32 %v1018_v44, %v7561_v21  ;;  %6447 = vpow2.f32 %v1219_v50  ;;  %v1221_v55 = vmul.f32 1.442695, %v7770_v51  ;;  %v5262_v37 = vadd.f32 -1.0, %v6436_v2 }
 0x1f8   : > { %v1020_v54 = vpop.f32.mrf.mxu0  ;;  %6449 = vpow2.f32 %v1215_v12  ;;  %v1369_v0 = vmul.f32 1.6732632, %v5261_v3  ;;  %v1494_v57 = vmul.f32 1.050701, %v1430_v15  ;;  %v1368_v28 = vmul.f32 1.6732632, %v5260_v36 }
 0x1f9   : > { %v7784_v26 = vadd.f32 %v1020_v54, %v7564_v22  ;;  %v1223_v38 = vmul.f32 1.442695, %v7780_v63  ;;  %6451 = vpow2.f32 %v1221_v55  ;;  %v1431_v42 = vsel %vm1111_vm8, %v7689_v48, %v1367_v14 }
 0x1fa   : > { %v1022_v1 = vpop.f32.mrf.mxu0  ;;  %v1546_v35 = vpack.c.bf16 %v1494_v57, %v1492_v10  ;;  %v1545_v56 = vpack.c.bf16 %v1493_v34, %v1491_v25  ;;  %v1433_v45 = vsel %vm1113_vm10, %v7702_v19, %v1369_v0  ;;  %vm1114_vm11 = vcmp.gt.f32.partialorder %v7705_v31, 0.0 }
 0x1fb   : > { %v7795_v16 = vadd.f32 %v1022_v1, %v7561_v21  ;;  %v1225_v41 = vmul.f32 1.442695, %v7784_v26  ;;  %6453 = vpow2.f32 %v1223_v38  ;;  %v1370_v30 = vmul.f32 1.6732632, %v5262_v37 }
 0x1fc   : > { %v1024_v6 = vpop.f32.mrf.mxu0  ;;  %v6438_v17 = vpop.eup %6437  ;;  %1768 = vmatprep.mubr.bf16.mxu1 %v1546_v35  ;;  %v1432_v46 = vsel %vm1112_vm9, %v7697_v9, %v1368_v28  ;;  %v1495_v54 = vmul.f32 1.050701, %v1431_v42  ;;  %vm1115_vm12 = vcmp.gt.f32.partialorder %v7730_v11, 0.0  ;;  %vm1116_vm13 = vcmp.gt.f32.partialorder %v7722_v4, 0.0 }
 0x1fd   : > { %v6440_v32 = vpop.eup %6439  ;;  %v1227_v52 = vmul.f32 1.442695, %v7795_v16  ;;  %v7802_v39 = vadd.f32 %v1024_v6, %v7564_v22  ;;  %v5265_v43 = vadd.f32 -1.0, %v6438_v17  ;;  %6455 = vpow2.f32 %v1225_v41  ;;  %1769 = vmatmul.mubr.bf16.gmra.mxu1 %v1545_v56 }
 0x1fe   : > { %v1028_v8 = vpop.f32.mrf.mxu0  ;;  %v6442_v44 = vpop.eup %6441  ;;  %v5264_v47 = vadd.f32 -1.0, %v6440_v32  ;;  %vm1117_vm14 = vcmp.gt.f32.partialorder %v7725_v13, 0.0  ;;  %v1497_v33 = vmul.f32 1.050701, %v1433_v45  ;;  %v1434_v59 = vsel %vm1114_vm11, %v7705_v31, %v1370_v30 }
 0x1ff   : > { %6457 = vpow2.f32 %v1227_v52  ;;  %v6444_v50 = vpop.eup %6443  ;;  %v1229_v19 = vmul.f32 1.442695, %v7802_v39  ;;  %v5263_v58 = vadd.f32 -1.0, %v6442_v44  ;;  %v1373_v9 = vmul.f32 1.6732632, %v5265_v43 }
 0x200   : > { %v1030_v29 = vpop.f32.mrf.mxu0  ;;  %v1496_v61 = vmul.f32 1.050701, %v1432_v46  ;;  %v7823_v62 = vadd.f32 %v1028_v8, %v7561_v21  ;;  %v1498_v1 = vmul.f32 1.050701, %v1434_v59  ;;  %v1372_v53 = vmul.f32 1.6732632, %v5264_v47 }
 0x201   : > { %v7813_v48 = vadd.f32 %v1030_v29, %v7564_v22  ;;  %vm1118_vm15 = vcmp.gt.f32.partialorder %v7741_v7, 0.0  ;;  %v5266_v36 = vadd.f32 -1.0, %v6444_v50  ;;  %vm1120_vm0 = vcmp.gt.f32.partialorder %v7751_v23, 0.0 }
 0x202   : > { %v1032_v27 = vpop.f32.mrf.mxu0  ;;  %v6446_v60 = vpop.eup %6445  ;;  %6459 = vpow2.f32 %v1229_v19  ;;  %v1548_v31 = vpack.c.bf16 %v1498_v1, %v1496_v61  ;;  %v1371_v34 = vmul.f32 1.6732632, %v5263_v58  ;;  %v1437_v14 = vsel %vm1117_vm14, %v7725_v13, %v1373_v9 }
 0x203   : > { %v7826_v2 = vadd.f32 %v1032_v27, %v7561_v21  ;;  %v1233_v55 = vmul.f32 1.442695, %v7813_v48  ;;  %v5268_v37 = vadd.f32 -1.0, %v6446_v60  ;;  %v1547_v38 = vpack.c.bf16 %v1497_v33, %v1495_v54 }
 0x204   : > { %v1034_v49 = vpop.f32.mrf.mxu0  ;;  %v6448_v3 = vpop.eup %6447  ;;  %v1231_v17 = vmul.f32 1.442695, %v7823_v62  ;;  %1776 = vmatprep.mubr.bf16.mxu1 %v1548_v31  ;;  %v1436_v57 = vsel %vm1116_vm13, %v7722_v4, %v1372_v53  ;;  %vm1121_vm1 = vcmp.gt.f32.partialorder %v7762_v40, 0.0  ;;  %v1374_v13 = vmul.f32 1.6732632, %v5266_v36 }
 0x205   : > { %v7832_v6 = vadd.f32 %v1034_v49, %v7564_v22  ;;  %v6450_v10 = vpop.eup %6449  ;;  %v5269_v8 = vadd.f32 -1.0, %v6448_v3  ;;  %v1235_v0 = vmul.f32 1.442695, %v7826_v2  ;;  %6461 = vpow2.f32 %v1233_v55  ;;  %1777 = vmatmul.mubr.bf16.gmra.mxu1 %v1547_v38 }
 0x206   : > { %v1038_v12 = vpop.f32.mrf.mxu0  ;;  %v6452_v28 = vpop.eup %6451  ;;  %vm1119_vm2 = vcmp.gt.f32.partialorder %v7759_v24, 0.0  ;;  %v5267_v29 = vadd.f32 -1.0, %v6450_v10  ;;  %v1435_v4 = vsel %vm1115_vm12, %v7730_v11, %v1371_v34  ;;  %v1501_v52 = vmul.f32 1.050701, %v1437_v14 }
 0x207   : > { %v7840_v41 = vadd.f32 %v1038_v12, %v7561_v21  ;;  %6463 = vpow2.f32 %v1235_v0  ;;  %v1237_v32 = vmul.f32 1.442695, %v7832_v6  ;;  %v1376_v42 = vmul.f32 1.6732632, %v5268_v37 }
 0x208   : > { %v1040_v5 = vpop.f32.mrf.mxu0  ;;  %v6454_v27 = vpop.eup %6453  ;;  %v1377_v44 = vmul.f32 1.6732632, %v5269_v8  ;;  %6465 = vpow2.f32 %v1231_v17  ;;  %v1438_v45 = vsel %vm1118_vm15, %v7741_v7, %v1374_v13  ;;  %v1500_v47 = vmul.f32 1.050701, %v1436_v57 }
 0x209   : > { %v7849_v35 = vadd.f32 %v1040_v5, %v7564_v22  ;;  %v1239_v43 = vmul.f32 1.442695, %v7840_v41  ;;  %vm1122_vm3 = vcmp.gt.f32.partialorder %v7770_v51, 0.0  ;;  %v5270_v11 = vadd.f32 -1.0, %v6452_v28 }
 0x20a   : > { %v1042_v15 = vpop.f32.mrf.mxu0  ;;  %v6456_v46 = vpop.eup %6455  ;;  %v1502_v49 = vmul.f32 1.050701, %v1438_v45  ;;  %v1499_v19 = vmul.f32 1.050701, %v1435_v4  ;;  %v1375_v33 = vmul.f32 1.6732632, %v5267_v29  ;;  %6467 = vpow2.f32 %v1237_v32 }
 0x20b   : > { %v7859_v30 = vadd.f32 %v1042_v15, %v7561_v21  ;;  %v1241_v58 = vmul.f32 1.442695, %v7849_v35  ;;  %v1440_v7 = vsel %vm1120_vm0, %v7751_v23, %v1376_v42  ;;  %v5271_v9 = vadd.f32 -1.0, %v6454_v27 }
 0x20c   : > { %v1044_v25 = vpop.f32.mrf.mxu0  ;;  %v6458_v54 = vpop.eup %6457  ;;  %6469 = vpow2.f32 %v1239_v43  ;;  %v1550_v59 = vpack.c.bf16 %v1502_v49, %v1500_v47  ;;  %v1441_v60 = vsel %vm1121_vm1, %v7762_v40, %v1377_v44  ;;  %v1549_v61 = vpack.c.bf16 %v1501_v52, %v1499_v19 }
 0x20d   : > { %v1243_v1 = vmul.f32 1.442695, %v7859_v30  ;;  %v7871_v3 = vadd.f32 %v1044_v25, %v7564_v22  ;;  %v5272_v53 = vadd.f32 -1.0, %v6456_v46  ;;  %v5273_v36 = vadd.f32 -1.0, %v6458_v54 }
 0x20e   : > { %v1048_v56 = vpop.f32.mrf.mxu0  ;;  %1784 = vmatprep.mubr.bf16.mxu1 %v1550_v59  ;;  %v1378_v23 = vmul.f32 1.6732632, %v5270_v11  ;;  %vm1123_vm4 = vcmp.gt.f32.partialorder %v7780_v63, 0.0  ;;  %vm1124_vm5 = vcmp.gt.f32.partialorder %v7784_v26, 0.0  ;;  %6471 = vpow2.f32 %v1241_v58 }
 0x20f   : > { %1785 = vmatmul.mubr.bf16.gmra.mxu1 %v1549_v61  ;;  %v7879_v40 = vadd.f32 %v1048_v56, %v7561_v21  ;;  %v6460_v31 = vpop.eup %6459  ;;  %v1439_v10 = vsel %vm1119_vm2, %v7759_v24, %v1375_v33  ;;  %v1504_v34 = vmul.f32 1.050701, %v1440_v7  ;;  %v1505_v14 = vmul.f32 1.050701, %v1441_v60 }
 0x210   : > { %v1050_v50 = vpop.f32.mrf.mxu0  ;;  %v1379_v37 = vmul.f32 1.6732632, %v5271_v9  ;;  %6473 = vpow2.f32 %v1243_v1  ;;  %v1245_v15 = vmul.f32 1.442695, %v7871_v3  ;;  %v1442_v17 = vsel %vm1122_vm3, %v7770_v51, %v1378_v23 }
 0x211   : > { %v7874_v55 = vadd.f32 %v1050_v50, %v7564_v22  ;;  %v1380_v0 = vmul.f32 1.6732632, %v5272_v53  ;;  %v1381_v57 = vmul.f32 1.6732632, %v5273_v36  ;;  %v1506_v13 = vmul.f32 1.050701, %v1442_v17 }
 0x212   : > { %v1052_v12 = vpop.f32.mrf.mxu0  ;;  %v6462_v28 = vpop.eup %6461  ;;  %v1503_v29 = vmul.f32 1.050701, %v1439_v10  ;;  %v5274_v32 = vadd.f32 -1.0, %v6460_v31  ;;  %v1247_v4 = vmul.f32 1.442695, %v7879_v40  ;;  %vm1125_vm6 = vcmp.gt.f32.partialorder %v7795_v16, 0.0 }
 0x213   : > { %v1249_v8 = vmul.f32 1.442695, %v7874_v55  ;;  %v7890_v25 = vadd.f32 %v1052_v12, %v7561_v21  ;;  %vm1126_vm7 = vcmp.gt.f32.partialorder %v7802_v39, 0.0  ;;  %v1552_v51 = vpack.c.bf16 %v1506_v13, %v1504_v34 }
 0x214   : > { %v1054_v5 = vpop.f32.mrf.mxu0  ;;  %v6464_v42 = vpop.eup %6463  ;;  %v1443_v56 = vsel %vm1123_vm4, %v7780_v63, %v1379_v37  ;;  %v1551_v27 = vpack.c.bf16 %v1505_v14, %v1503_v29  ;;  %v1444_v46 = vsel %vm1124_vm5, %v7784_v26, %v1380_v0  ;;  %v1445_v47 = vsel %vm1125_vm6, %v7795_v16, %v1381_v57 }
 0x215   : > { %v7894_v52 = vadd.f32 %v1054_v5, %v7564_v22  ;;  %6475 = vpow2.f32 %v1249_v8  ;;  %v1251_v44 = vmul.f32 1.442695, %v7890_v25  ;;  %v6466_v45 = vpop.eup %6465  ;;  %v5276_v11 = vadd.f32 -1.0, %v6462_v28  ;;  %1792 = vmatprep.mubr.bf16.mxu1 %v1552_v51 }
 0x216   : > { %v1058_v38 = vpop.f32.mrf.mxu0  ;;  %6477 = vpow2.f32 %v1245_v15  ;;  %v5277_v54 = vadd.f32 -1.0, %v6464_v42  ;;  %v1382_v19 = vmul.f32 1.6732632, %v5274_v32  ;;  %v1507_v58 = vmul.f32 1.050701, %v1443_v56 }
 0x217   : > { %v1253_v49 = vmul.f32 1.442695, %v7894_v52  ;;  %6479 = vpow2.f32 %v1247_v4  ;;  %1793 = vmatmul.mubr.bf16.gmra.mxu1 %v1551_v27  ;;  %v6468_v33 = vpop.eup %6467  ;;  %vm1127_vm8 = vcmp.gt.f32.partialorder %v7823_v62, 0.0  ;;  %v1508_v9 = vmul.f32 1.050701, %v1444_v46 }
 0x218   : > { %v1060_v24 = vpop.f32.mrf.mxu0  ;;  %6481 = vpow2.f32 %v1251_v44  ;;  %v1509_v59 = vmul.f32 1.050701, %v1445_v47  ;;  %v5275_v12 = vadd.f32 -1.0, %v6466_v45  ;;  %v1384_v60 = vmul.f32 1.6732632, %v5276_v11 }
 0x219   : > { %v7908_v63 = vadd.f32 %v1060_v24, %v7564_v22  ;;  %v6470_v7 = vpop.eup %6469  ;;  %6483 = vpow2.f32 %v1253_v49  ;;  %v7915_v61 = vadd.f32 %v1058_v38, %v7561_v21  ;;  %v1446_v53 = vsel %vm1126_vm7, %v7802_v39, %v1382_v19 }
 0x21a   : > { %v1062_v43 = vpop.f32.mrf.mxu0  ;;  %vm1128_vm9 = vcmp.gt.f32.partialorder %v7813_v48, 0.0  ;;  %v1385_v23 = vmul.f32 1.6732632, %v5277_v54  ;;  %v5278_v5 = vadd.f32 -1.0, %v6468_v33  ;;  %v1510_v31 = vmul.f32 1.050701, %v1446_v53 }
 0x21b   : > { %v7912_v26 = vadd.f32 %v1062_v43, %v7561_v21  ;;  %v1257_v1 = vmul.f32 1.442695, %v7908_v63  ;;  %v6472_v10 = vpop.eup %6471  ;;  %v5279_v34 = vadd.f32 -1.0, %v6470_v7  ;;  %v1383_v15 = vmul.f32 1.6732632, %v5275_v12 }
 0x21c   : > { %v1064_v50 = vpop.f32.mrf.mxu0  ;;  %vm1129_vm10 = vcmp.gt.f32.partialorder %v7826_v2, 0.0  ;;  %vm1130_vm11 = vcmp.gt.f32.partialorder %v7832_v6, 0.0  ;;  %v1554_v39 = vpack.c.bf16 %v1510_v31, %v1508_v9  ;;  %v1448_v17 = vsel %vm1128_vm9, %v7813_v48, %v1384_v60 }
 0x21d   : > { %6485 = vpow2.f32 %v1257_v1  ;;  %v1259_v14 = vmul.f32 1.442695, %v7912_v26  ;;  %v7924_v37 = vadd.f32 %v1064_v50, %v7564_v22  ;;  %v6474_v8 = vpop.eup %6473  ;;  %vm1131_vm12 = vcmp.gt.f32.partialorder %v7840_v41, 0.0 }
 0x21e   : > { %v1068_v16 = vpop.f32.mrf.mxu0  ;;  %v1255_v0 = vmul.f32 1.442695, %v7915_v61  ;;  %v1553_v57 = vpack.c.bf16 %v1509_v59, %v1507_v58  ;;  %v1449_v24 = vsel %vm1129_vm10, %v7826_v2, %v1385_v23  ;;  %vm1132_vm13 = vcmp.gt.f32.partialorder %v7849_v35, 0.0  ;;  %1800 = vmatprep.mubr.bf16.mxu1 %v1554_v39 }
 0x21f   : > { %v5280_v28 = vadd.f32 -1.0, %v6472_v10  ;;  %v1261_v29 = vmul.f32 1.442695, %v7924_v37  ;;  %v1387_v32 = vmul.f32 1.6732632, %v5279_v34  ;;  %vm1133_vm14 = vcmp.gt.f32.partialorder %v7859_v30, 0.0 }
 0x220   : > { %v1070_v36 = vpop.f32.mrf.mxu0  ;;  %1801 = vmatmul.mubr.bf16.gmra.mxu1 %v1553_v57  ;;  %6487 = vpow2.f32 %v1259_v14  ;;  %v1386_v4 = vmul.f32 1.6732632, %v5278_v5  ;;  %v1447_v2 = vsel %vm1127_vm8, %v7823_v62, %v1383_v15  ;;  %v1512_v43 = vmul.f32 1.050701, %v1448_v17 }
 0x221   : > { %v7936_v48 = vadd.f32 %v1070_v36, %v7564_v22  ;;  %v5281_v56 = vadd.f32 -1.0, %v6474_v8  ;;  %6489 = vpow2.f32 %v1261_v29  ;;  %v1513_v44 = vmul.f32 1.050701, %v1449_v24 }
 0x222   : > { %v1072_v38 = vpop.f32.mrf.mxu0  ;;  %v6476_v51 = vpop.eup %6475  ;;  %6491 = vpow2.f32 %v1255_v0  ;;  %v1450_v46 = vsel %vm1130_vm11, %v7832_v6, %v1386_v4  ;;  %v1388_v11 = vmul.f32 1.6732632, %v5280_v28  ;;  %v7946_v49 = vadd.f32 %v1068_v16, %v7561_v21 }
 0x223   : > { %v6478_v27 = vpop.eup %6477  ;;  %v1265_v45 = vmul.f32 1.442695, %v7936_v48  ;;  %v1514_v50 = vmul.f32 1.050701, %v1450_v46  ;;  %v7949_v62 = vadd.f32 %v1072_v38, %v7561_v21  ;;  %v1511_v19 = vmul.f32 1.050701, %v1447_v2 }
 0x224   : > { %v1074_v13 = vpop.f32.mrf.mxu0  ;;  %v6480_v54 = vpop.eup %6479  ;;  %v1451_v33 = vsel %vm1131_vm12, %v7840_v41, %v1387_v32  ;;  %v5284_v58 = vadd.f32 -1.0, %v6476_v51  ;;  %v1389_v9 = vmul.f32 1.6732632, %v5281_v56  ;;  %v5282_v59 = vadd.f32 -1.0, %v6478_v27 }
 0x225   : > { %v7955_v7 = vadd.f32 %v1074_v13, %v7564_v22  ;;  %v6482_v6 = vpop.eup %6481  ;;  %6493 = vpow2.f32 %v1265_v45  ;;  %v1556_v16 = vpack.c.bf16 %v1514_v50, %v1512_v43  ;;  %vm1134_vm15 = vcmp.gt.f32.partialorder %v7871_v3, 0.0 }
 0x226   : > { %v1078_v42 = vpop.f32.mrf.mxu0  ;;  %v6484_v12 = vpop.eup %6483  ;;  %vm1136_vm0 = vcmp.gt.f32.partialorder %v7874_v55, 0.0  ;;  %v1555_v60 = vpack.c.bf16 %v1513_v44, %v1511_v19  ;;  %v1267_v1 = vmul.f32 1.442695, %v7949_v62  ;;  %v1515_v36 = vmul.f32 1.050701, %v1451_v33 }
 0x227   : > { %v1452_v41 = vsel %vm1132_vm13, %v7849_v35, %v1388_v11  ;;  %vm1137_vm1 = vcmp.gt.f32.partialorder %v7890_v25, 0.0  ;;  %vm1138_vm2 = vcmp.gt.f32.partialorder %v7894_v52, 0.0  ;;  %v1263_v23 = vmul.f32 1.442695, %v7946_v49  ;;  %1808 = vmatprep.mubr.bf16.mxu1 %v1556_v16 }
 0x228   : > { %v1080_v47 = vpop.f32.mrf.mxu0  ;;  %v1269_v5 = vmul.f32 1.442695, %v7955_v7  ;;  %v1392_v31 = vmul.f32 1.6732632, %v5284_v58  ;;  %v5285_v10 = vadd.f32 -1.0, %v6482_v6  ;;  %1809 = vmatmul.mubr.bf16.gmra.mxu1 %v1555_v60  ;;  %6495 = vpow2.f32 %v1267_v1 }
 0x229   : > { %v7968_v34 = vadd.f32 %v1080_v47, %v7564_v22  ;;  %v1453_v35 = vsel %vm1133_vm14, %v7859_v30, %v1389_v9  ;;  %vm1135_vm3 = vcmp.gt.f32.partialorder %v7879_v40, 0.0  ;;  %v5286_v38 = vadd.f32 -1.0, %v6484_v12 }
 0x22a   : > { %v1082_v53 = vpop.f32.mrf.mxu0  ;;  %v6486_v14 = vpop.eup %6485  ;;  %vm1140_vm4 = vcmp.gt.f32.partialorder %v7908_v63, 0.0  ;;  %6497 = vpow2.f32 %v1269_v5  ;;  %v1390_v15 = vmul.f32 1.6732632, %v5282_v59  ;;  %v1516_v39 = vmul.f32 1.050701, %v1452_v41 }
 0x22b   : > { %v5283_v8 = vadd.f32 -1.0, %v6480_v54  ;;  %v5288_v17 = vadd.f32 -1.0, %v6486_v14  ;;  %vm1142_vm5 = vcmp.gt.f32.partialorder %v7924_v37, 0.0  ;;  %6499 = vpow2.f32 %v1263_v23 }
 0x22c   : > { %v1084_v0 = vpop.f32.mrf.mxu0  ;;  %v7977_v57 = vadd.f32 %v1078_v42, %v7561_v21  ;;  %v1273_v13 = vmul.f32 1.442695, %v7968_v34  ;;  %v1454_v30 = vsel %vm1134_vm15, %v7871_v3, %v1390_v15  ;;  %v1517_v24 = vmul.f32 1.050701, %v1453_v35  ;;  %v6283_v35 = vld [vmem:[#allocation8 + $0x8] sm:$0xff]  }
 0x22d   : > { %v1456_v28 = vsel %vm1136_vm0, %v7874_v55, %v1392_v31  ;;  %v1393_v29 = vmul.f32 1.6732632, %v5285_v10  ;;  %v7987_v32 = vadd.f32 %v1082_v53, %v7561_v21  ;;  %v6488_v4 = vpop.eup %6487  ;;  %v1518_v51 = vmul.f32 1.050701, %v1454_v30  ;;  %5819 = vmatprep.subr.bf16.mxu1 %v6283_v35 }
 0x22e   : > { %6501 = vpow2.f32 %v1273_v13  ;;  %v7990_v42 = vadd.f32 %v1084_v0, %v7564_v22  ;;  %v1394_v2 = vmul.f32 1.6732632, %v5286_v38  ;;  %v6490_v43 = vpop.eup %6489  ;;  %v1391_v56 = vmul.f32 1.6732632, %v5283_v8  ;;  %5820 = vmatpush3.bf16.msra.mxu1 %v6283_v35 }
 0x22f   : > { %v1396_v27 = vmul.f32 1.6732632, %v5288_v17  ;;  %v1275_v3 = vmul.f32 1.442695, %v7987_v32  ;;  %v6492_v44 = vpop.eup %6491  ;;  %v1520_v45 = vmul.f32 1.050701, %v1456_v28  ;;  %v1558_v47 = vpack.c.bf16 %v1518_v51, %v1516_v39 }
 0x230   : > { %v5290_v46 = vadd.f32 -1.0, %v6490_v43  ;;  %v1271_v55 = vmul.f32 1.442695, %v7977_v57  ;;  %v1457_v21 = vsel %vm1137_vm1, %v7890_v25, %v1393_v29  ;;  %v1557_v11 = vpack.c.bf16 %v1517_v24, %v1515_v36 }
 0x231   : > { %v1277_v22 = vmul.f32 1.442695, %v7990_v42  ;;  %v1458_v50 = vsel %vm1138_vm2, %v7894_v52, %v1394_v2  ;;  %v5289_v54 = vadd.f32 -1.0, %v6488_v4  ;;  %1816 = vmatprep.mubr.bf16.mxu1 %v1558_v47  ;;  %6503 = vpow2.f32 %v1275_v3 }
 0x232   : > { %v1522_v19 = vmul.f32 1.050701, %v1458_v50  ;;  %v1398_v33 = vmul.f32 1.6732632, %v5290_v46  ;;  %v6494_v58 = vpop.eup %6493  ;;  %v1455_v6 = vsel %vm1135_vm3, %v7879_v40, %v1391_v56  ;;  %v5287_v9 = vadd.f32 -1.0, %v6492_v44  ;;  %1817 = vmatmul.mubr.bf16.gmra.mxu1 %v1557_v11  ;;  %v6284_v44 = vld [vmem:[#allocation8] sm:$0xff]  }
 0x233   : > { %v1460_v25 = vsel %vm1140_vm4, %v7908_v63, %v1396_v27  ;;  %6505 = vpow2.f32 %v1277_v22  ;;  %v5292_v59 = vadd.f32 -1.0, %v6494_v58  ;;  %v1521_v12 = vmul.f32 1.050701, %v1457_v21  ;;  %5821 = vmatprep.subr.bf16.mxu1 %v6284_v44 }
 0x234   : > { %6507 = vpow2.f32 %v1271_v55  ;;  %v1560_v52 = vpack.c.bf16 %v1522_v19, %v1520_v45  ;;  %v1462_v16 = vsel %vm1142_vm5, %v7924_v37, %v1398_v33  ;;  %v1524_v53 = vmul.f32 1.050701, %v1460_v25  ;;  %5822 = vmatpush3.bf16.msra.mxu1 %v6284_v44 }
 0x235   : > { %v1526_v60 = vmul.f32 1.050701, %v1462_v16  ;;  %v6496_v1 = vpop.eup %6495  ;;  %v1397_v36 = vmul.f32 1.6732632, %v5289_v54  ;;  %v1519_v41 = vmul.f32 1.050701, %v1455_v6 }
 0x236   : > { %1824 = vmatprep.mubr.bf16.mxu1 %v1560_v52  ;;  %v1400_v23 = vmul.f32 1.6732632, %v5292_v59  ;;  %v1395_v5 = vmul.f32 1.6732632, %v5287_v9  ;;  %vm1141_vm6 = vcmp.gt.f32.partialorder %v7912_v26, 0.0  ;;  %vm1144_vm7 = vcmp.gt.f32.partialorder %v7936_v48, 0.0 }
 0x237   : > { %v6498_v40 = vpop.eup %6497  ;;  %v1562_v31 = vpack.c.bf16 %v1526_v60, %v1524_v53  ;;  %v1559_v14 = vpack.c.bf16 %v1521_v12, %v1519_v41  ;;  %v1461_v38 = vsel %vm1141_vm6, %v7912_v26, %v1397_v36  ;;  %v5293_v37 = vadd.f32 -1.0, %v6496_v1  ;;  %v8033_v52 = vld [vmem:[%s9349_s9 + $0x1] ss:$0 sm:$0xff] }
 0x238   : > { %v5294_v63 = vadd.f32 -1.0, %v6498_v40  ;;  %v6500_v10 = vpop.eup %6499  ;;  %vm1139_vm8 = vcmp.gt.f32.partialorder %v7915_v61, 0.0  ;;  %v1464_v8 = vsel %vm1144_vm7, %v7936_v48, %v1400_v23  ;;  %vm1146_vm9 = vcmp.gt.f32.partialorder %v7955_v7, 0.0 }
 0x239   : > { %v1459_v17 = vsel %vm1139_vm8, %v7915_v61, %v1395_v5  ;;  %v5291_v0 = vadd.f32 -1.0, %v6500_v10  ;;  %v1525_v30 = vmul.f32 1.050701, %v1461_v38  ;;  %v1528_v28 = vmul.f32 1.050701, %v1464_v8 }
 0x23a   : > { %v1402_v15 = vmul.f32 1.6732632, %v5294_v63  ;;  %1825 = vmatmul.mubr.bf16.gmra.mxu1 %v1559_v14  ;;  %v1401_v29 = vmul.f32 1.6732632, %v5293_v37  ;;  %v1523_v51 = vmul.f32 1.050701, %v1459_v17 }
 0x23b   : > { %v6502_v39 = vpop.eup %6501  ;;  %1832 = vmatprep.mubr.bf16.mxu1 %v1562_v31  ;;  %v1399_v43 = vmul.f32 1.6732632, %v5291_v0  ;;  %vm1145_vm10 = vcmp.gt.f32.partialorder %v7949_v62, 0.0  ;;  %vm1148_vm11 = vcmp.gt.f32.partialorder %v7968_v34, 0.0  ;;  %vm1143_vm12 = vcmp.gt.f32.partialorder %v7946_v49, 0.0 }
 0x23c   : > { %v5296_v13 = vadd.f32 -1.0, %v6502_v39  ;;  %v1466_v26 = vsel %vm1146_vm9, %v7955_v7, %v1402_v15  ;;  %v1561_v3 = vpack.c.bf16 %v1525_v30, %v1523_v51  ;;  %v1465_v45 = vsel %vm1145_vm10, %v7949_v62, %v1401_v29  ;;  %v6285_v30 = vld [vmem:[#allocation10 + $0x38] sm:$0xff]  }
 0x23d   : > { %v1530_v24 = vmul.f32 1.050701, %v1466_v26  ;;  %v1463_v47 = vsel %vm1143_vm12, %v7946_v49, %v1399_v43  ;;  %vm1150_vm13 = vcmp.gt.f32.partialorder %v7990_v42, 0.0  ;;  %v1529_v11 = vmul.f32 1.050701, %v1465_v45  ;;  %5855 = vmatprep.subr.bf16.mxu0 %v6285_v30 }
 0x23e   : > { %v6504_v4 = vpop.eup %6503  ;;  %v1404_v2 = vmul.f32 1.6732632, %v5296_v13  ;;  %v1527_v19 = vmul.f32 1.050701, %v1463_v47  ;;  %vm1149_vm14 = vcmp.gt.f32.partialorder %v7987_v32, 0.0  ;;  %vm1147_vm15 = vcmp.gt.f32.partialorder %v7977_v57, 0.0  ;;  %5856 = vmatpush3.bf16.msra.mxu0 %v6285_v30 }
 0x23f   : > { %v1564_v56 = vpack.c.bf16 %v1530_v24, %v1528_v28  ;;  %v5297_v7 = vadd.f32 -1.0, %v6504_v4 }
 0x240   : > { %v6506_v48 = vpop.eup %6505  ;;  %v1468_v46 = vsel %vm1148_vm11, %v7968_v34, %v1404_v2  ;;  %v1563_v34 = vpack.c.bf16 %v1529_v11, %v1527_v19 }
 0x241   : > { %v6508_v27 = vpop.eup %6507  ;;  %v5298_v61 = vadd.f32 -1.0, %v6506_v48  ;;  %v1532_v22 = vmul.f32 1.050701, %v1468_v46  ;;  %v1405_v50 = vmul.f32 1.6732632, %v5297_v7 }
 0x242   : > { %1833 = vmatmul.mubr.bf16.gmra.mxu1 %v1561_v3  ;;  %v5295_v21 = vadd.f32 -1.0, %v6508_v27 }
 0x243   : > { %v1406_v55 = vmul.f32 1.6732632, %v5298_v61  ;;  %1840 = vmatprep.mubr.bf16.mxu1 %v1564_v56  ;;  %v1469_v6 = vsel %vm1149_vm14, %v7987_v32, %v1405_v50 }
 0x244   : > { %v1403_v33 = vmul.f32 1.6732632, %v5295_v21  ;;  %v1533_v9 = vmul.f32 1.050701, %v1469_v6  ;;  %v6287_v6 = vld [vmem:[#allocation10 + $0x28] sm:$0xff]  }
 0x245   : > { %v1470_v62 = vsel %vm1150_vm13, %v7990_v42, %v1406_v55 }
 0x246   : > { %v1534_v54 = vmul.f32 1.050701, %v1470_v62  ;;  %v1467_v49 = vsel %vm1147_vm15, %v7977_v57, %v1403_v33 }
 0x247   : > { %v1531_v25 = vmul.f32 1.050701, %v1467_v49 }
 0x248   : > { %v1566_v58 = vpack.c.bf16 %v1534_v54, %v1532_v22 }
 0x249   : > { %v1565_v42 = vpack.c.bf16 %v1533_v9, %v1531_v25 }
 0x24a   : > { %1841 = vmatmul.mubr.bf16.gmra.mxu1 %v1563_v34  ;;  %v6286_v34 = vld [vmem:[#allocation10 + $0x30] sm:$0xff]  }
 0x24b   : > { %1848 = vmatprep.mubr.bf16.mxu1 %v1566_v58  ;;  %5857 = vmatprep.subr.bf16.mxu0 %v6286_v34 }
 0x24c   : > { %5858 = vmatpush3.bf16.msra.mxu0 %v6286_v34 }
 0x24d   : > { %5859 = vmatprep.subr.bf16.mxu0 %v6287_v6 }
 0x250   : > { %5860 = vmatpush3.bf16.msra.mxu0 %v6287_v6 }
 0x252   : > { %1849 = vmatmul.mubr.bf16.gmra.mxu1 %v1565_v42 }
 0x291   : > { %v5615_v59 = vpop.f32.mrf.mxu1 }
 0x293   : > { %v5616_v16 = vpop.f32.mrf.mxu1 }
 0x294   : > { %v5617_v12 = vadd.f32 %v5616_v16, %v5615_v59 }
 0x295   : > { %v5618_v60 = vpop.f32.mrf.mxu1 }
 0x296   : > { %v1731_v32 = vadd.f32 %v5617_v12, %v8033_v52 }
 0x297   : > { %v5619_v1 = vpop.f32.mrf.mxu1 }
 0x298   : > { %v1889_v53 = vmul.f32 1.442695, %v1731_v32  ;;  %v5620_v36 = vadd.f32 %v5619_v1, %v5618_v60  ;;  %vm1857_vm0 = vcmp.gt.f32.partialorder %v1731_v32, 0.0  ;;  %v6288_v1 = vld [vmem:[#allocation10 + $0x20] sm:$0xff]  }
 0x299   : > { %5861 = vmatprep.subr.bf16.mxu0 %v6288_v1 }
 0x29a   : > { %6509 = vpow2.f32 %v1889_v53  ;;  %v1734_v57 = vadd.f32 %v5620_v36, %v8033_v52  ;;  %5862 = vmatpush3.bf16.msra.mxu0 %v6288_v1 }
 0x29b   : > { %v5621_v41 = vpop.f32.mrf.mxu1 }
 0x29c   : > { %v1891_v40 = vmul.f32 1.442695, %v1734_v57  ;;  %vm1858_vm1 = vcmp.gt.f32.partialorder %v1734_v57, 0.0 }
 0x29d   : > { %v5622_v23 = vpop.f32.mrf.mxu1 }
 0x29e   : > { %6511 = vpow2.f32 %v1891_v40  ;;  %v5623_v5 = vadd.f32 %v5622_v23, %v5621_v41 }
 0x29f   : > { %v5624_v63 = vpop.f32.mrf.mxu1 }
 0x2a0   : > { %v1739_v31 = vadd.f32 %v5623_v5, %v8033_v52 }
 0x2a1   : > { %v5625_v10 = vpop.f32.mrf.mxu1 }
 0x2a2   : > { %v1893_v14 = vmul.f32 1.442695, %v1739_v31  ;;  %v5626_v35 = vadd.f32 %v5625_v10, %v5624_v63  ;;  %vm1859_vm2 = vcmp.gt.f32.partialorder %v1739_v31, 0.0 }
 0x2a3   : > { %v5627_v38 = vpop.f32.mrf.mxu1 }
 0x2a4   : > { %6513 = vpow2.f32 %v1893_v14  ;;  %v8039_v37 = vadd.f32 %v5626_v35, %v8033_v52 }
 0x2a5   : > { %v5628_v15 = vpop.f32.mrf.mxu1 }
 0x2a6   : > { %v1895_v8 = vmul.f32 1.442695, %v8039_v37  ;;  %v5629_v17 = vadd.f32 %v5628_v15, %v5627_v38  ;;  %vm1860_vm3 = vcmp.gt.f32.partialorder %v8039_v37, 0.0  ;;  %v6289_v38 = vld [vmem:[#allocation10 + $0x18] sm:$0xff]  }
 0x2a7   : > { %v6510_v39 = vpop.eup %6509  ;;  %v5630_v13 = vpop.f32.mrf.mxu1  ;;  %5863 = vmatprep.subr.bf16.mxu0 %v6289_v38 }
 0x2a8   : > { %v5315_v0 = vadd.f32 -1.0, %v6510_v39  ;;  %6515 = vpow2.f32 %v1895_v8  ;;  %v8043_v26 = vadd.f32 %v5629_v17, %v8033_v52  ;;  %5864 = vmatpush3.bf16.msra.mxu0 %v6289_v38 }
 0x2a9   : > { %v5631_v24 = vpop.f32.mrf.mxu1 }
 0x2aa   : > { %v1985_v28 = vmul.f32 1.6732632, %v5315_v0  ;;  %v1897_v4 = vmul.f32 1.442695, %v8043_v26  ;;  %v5632_v51 = vadd.f32 %v5631_v24, %v5630_v13  ;;  %vm1861_vm4 = vcmp.gt.f32.partialorder %v8043_v26, 0.0  ;;  %v6290_v24 = vld [vmem:[#allocation10 + $0x10] sm:$0xff]  }
 0x2ab   : > { %v6512_v29 = vpop.eup %6511  ;;  %v5633_v43 = vpop.f32.mrf.mxu1  ;;  %5865 = vmatprep.subr.bf16.mxu0 %v6290_v24 }
 0x2ac   : > { %v5316_v2 = vadd.f32 -1.0, %v6512_v29  ;;  %6517 = vpow2.f32 %v1897_v4  ;;  %v8047_v48 = vadd.f32 %v5632_v51, %v8033_v52  ;;  %v2017_v27 = vsel %vm1857_vm0, %v1731_v32, %v1985_v28  ;;  %5866 = vmatpush3.bf16.msra.mxu0 %v6290_v24 }
 0x2ad   : > { %v5634_v3 = vpop.f32.mrf.mxu1  ;;  %v2049_v7 = vmul.f32 1.050701, %v2017_v27 }
 0x2ae   : > { %v1986_v56 = vmul.f32 1.6732632, %v5316_v2  ;;  %v1899_v61 = vmul.f32 1.442695, %v8047_v48  ;;  %v5635_v45 = vadd.f32 %v5634_v3, %v5633_v43  ;;  %vm1862_vm5 = vcmp.gt.f32.partialorder %v8047_v48, 0.0 }
 0x2af   : > { %v5636_v47 = vpop.f32.mrf.mxu1 }
 0x2b0   : > { %v2018_v44 = vsel %vm1858_vm1, %v1734_v57, %v1986_v56  ;;  %6519 = vpow2.f32 %v1899_v61  ;;  %v8051_v11 = vadd.f32 %v5635_v45, %v8033_v52 }
 0x2b1   : > { %v2050_v46 = vmul.f32 1.050701, %v2018_v44  ;;  %v6514_v55 = vpop.eup %6513  ;;  %v5637_v22 = vpop.f32.mrf.mxu1 }
 0x2b2   : > { %v5317_v21 = vadd.f32 -1.0, %v6514_v55  ;;  %v1901_v54 = vmul.f32 1.442695, %v8051_v11  ;;  %v5638_v19 = vadd.f32 %v5637_v22, %v5636_v47  ;;  %vm1863_vm6 = vcmp.gt.f32.partialorder %v8051_v11, 0.0 }
 0x2b3   : > { %v2081_v62 = vpack.c.bf16 %v2050_v46, %v2049_v7 }
 0x2b4   : > { %v1987_v50 = vmul.f32 1.6732632, %v5317_v21  ;;  %6521 = vpow2.f32 %v1901_v54  ;;  %v8055_v9 = vadd.f32 %v5638_v19, %v8033_v52 }
 0x2b5   : > { %5823 = vmatprep.mubr.bf16.mxu1 %v2081_v62  ;;  %v6516_v33 = vpop.eup %6515  ;;  %v5639_v58 = vpop.f32.mrf.mxu1 }
 0x2b6   : > { %v5318_v49 = vadd.f32 -1.0, %v6516_v33  ;;  %v2019_v42 = vsel %vm1859_vm2, %v1739_v31, %v1987_v50  ;;  %v1903_v16 = vmul.f32 1.442695, %v8055_v9  ;;  %vm1864_vm7 = vcmp.gt.f32.partialorder %v8055_v9, 0.0 }
 0x2b7   : > { %v5640_v25 = vpop.f32.mrf.mxu1  ;;  %v2051_v40 = vmul.f32 1.050701, %v2019_v42 }
 0x2b8   : > { %v1988_v59 = vmul.f32 1.6732632, %v5318_v49  ;;  %v5641_v12 = vadd.f32 %v5640_v25, %v5639_v58  ;;  %6523 = vpow2.f32 %v1903_v16 }
 0x2b9   : > { %v6518_v60 = vpop.eup %6517  ;;  %v5642_v32 = vpop.f32.mrf.mxu1 }
 0x2ba   : > { %v2020_v53 = vsel %vm1860_vm3, %v8039_v37, %v1988_v59  ;;  %v5319_v36 = vadd.f32 -1.0, %v6518_v60  ;;  %v8061_v57 = vadd.f32 %v5641_v12, %v8033_v52 }
 0x2bb   : > { %v2052_v41 = vmul.f32 1.050701, %v2020_v53  ;;  %v5643_v23 = vpop.f32.mrf.mxu1 }
 0x2bc   : > { %v1905_v5 = vmul.f32 1.442695, %v8061_v57  ;;  %v5644_v63 = vadd.f32 %v5643_v23, %v5642_v32  ;;  %v1989_v31 = vmul.f32 1.6732632, %v5319_v36  ;;  %vm1865_vm8 = vcmp.gt.f32.partialorder %v8061_v57, 0.0 }
 0x2bd   : > { %v6520_v10 = vpop.eup %6519  ;;  %v2082_v14 = vpack.c.bf16 %v2052_v41, %v2051_v40  ;;  %v5645_v35 = vpop.f32.mrf.mxu1 }
 0x2be   : > { %6525 = vpow2.f32 %v1905_v5  ;;  %v8065_v37 = vadd.f32 %v5644_v63, %v8033_v52  ;;  %v5320_v15 = vadd.f32 -1.0, %v6520_v10  ;;  %v2021_v13 = vsel %vm1861_vm4, %v8043_v26, %v1989_v31 }
 0x2bf   : > { %v5646_v39 = vpop.f32.mrf.mxu1  ;;  %5824 = vmatmul.mubr.bf16.vlgmr.msra.gmra.mxu1 %v2082_v14  ;;  %v2053_v2 = vmul.f32 1.050701, %v2021_v13 }
 0x2c0   : > { %v1907_v8 = vmul.f32 1.442695, %v8065_v37  ;;  %v5647_v17 = vadd.f32 %v5646_v39, %v5645_v35  ;;  %v1990_v0 = vmul.f32 1.6732632, %v5320_v15  ;;  %vm1866_vm9 = vcmp.gt.f32.partialorder %v8065_v37, 0.0 }
 0x2c1   : > { %v5648_v30 = vpop.f32.mrf.mxu1  ;;  %v6522_v4 = vpop.eup %6521 }
 0x2c2   : > { %6527 = vpow2.f32 %v1907_v8  ;;  %v8072_v28 = vadd.f32 %v5647_v17, %v8033_v52  ;;  %v2022_v29 = vsel %vm1862_vm5, %v8047_v48, %v1990_v0  ;;  %v5321_v56 = vadd.f32 -1.0, %v6522_v4 }
 0x2c3   : > { %v5649_v51 = vpop.f32.mrf.mxu1  ;;  %v2054_v43 = vmul.f32 1.050701, %v2022_v29 }
 0x2c4   : > { %v1909_v27 = vmul.f32 1.442695, %v8072_v28  ;;  %v5650_v26 = vadd.f32 %v5649_v51, %v5648_v30  ;;  %v1991_v45 = vmul.f32 1.6732632, %v5321_v56  ;;  %vm1867_vm10 = vcmp.gt.f32.partialorder %v8072_v28, 0.0 }
 0x2c5   : > { %v5651_v61 = vpop.f32.mrf.mxu1  ;;  %v2083_v3 = vpack.c.bf16 %v2054_v43, %v2053_v2  ;;  %v6524_v7 = vpop.eup %6523 }
 0x2c6   : > { %6529 = vpow2.f32 %v1909_v27  ;;  %v8077_v44 = vadd.f32 %v5650_v26, %v8033_v52  ;;  %v5322_v47 = vadd.f32 -1.0, %v6524_v7  ;;  %v2023_v50 = vsel %vm1863_vm6, %v8051_v11, %v1991_v45 }
 0x2c7   : > { %v5652_v46 = vpop.f32.mrf.mxu1  ;;  %5827 = vmatprep.mubr.bf16.mxu1 %v2083_v3  ;;  %v2055_v49 = vmul.f32 1.050701, %v2023_v50 }
 0x2c8   : > { %v1911_v48 = vmul.f32 1.442695, %v8077_v44  ;;  %v5653_v55 = vadd.f32 %v5652_v46, %v5651_v61  ;;  %v1992_v22 = vmul.f32 1.6732632, %v5322_v47  ;;  %vm1868_vm11 = vcmp.gt.f32.partialorder %v8077_v44, 0.0 }
 0x2c9   : > { %v5654_v21 = vpop.f32.mrf.mxu1 }
 0x2ca   : > { %6531 = vpow2.f32 %v1911_v48  ;;  %v8082_v62 = vadd.f32 %v5653_v55, %v8033_v52  ;;  %v2024_v6 = vsel %vm1864_vm7, %v8055_v9, %v1992_v22 }
 0x2cb   : > { %v6526_v54 = vpop.eup %6525  ;;  %v5655_v19 = vpop.f32.mrf.mxu1  ;;  %v2056_v59 = vmul.f32 1.050701, %v2024_v6 }
 0x2cc   : > { %v5323_v33 = vadd.f32 -1.0, %v6526_v54  ;;  %v1913_v58 = vmul.f32 1.442695, %v8082_v62  ;;  %v5656_v34 = vadd.f32 %v5655_v19, %v5654_v21  ;;  %vm1869_vm12 = vcmp.gt.f32.partialorder %v8082_v62, 0.0 }
 0x2cd   : > { %v2084_v32 = vpack.c.bf16 %v2056_v59, %v2055_v49 }
 0x2ce   : > { %6533 = vpow2.f32 %v1913_v58  ;;  %v8089_v25 = vadd.f32 %v5656_v34, %v8033_v52  ;;  %v1993_v16 = vmul.f32 1.6732632, %v5323_v33 }
 0x2cf   : > { %v5657_v42 = vpop.f32.mrf.mxu1  ;;  %v6528_v12 = vpop.eup %6527  ;;  %5828 = vmatmul.mubr.bf16.gmra.mxu1 %v2084_v32 }
 0x2d0   : > { %v1915_v11 = vmul.f32 1.442695, %v8089_v25  ;;  %v5324_v1 = vadd.f32 -1.0, %v6528_v12  ;;  %v2025_v40 = vsel %vm1865_vm8, %v8061_v57, %v1993_v16  ;;  %vm1870_vm13 = vcmp.gt.f32.partialorder %v8089_v25, 0.0 }
 0x2d1   : > { %v5658_v60 = vpop.f32.mrf.mxu1  ;;  %v2057_v35 = vmul.f32 1.050701, %v2025_v40 }
 0x2d2   : > { %v5659_v53 = vadd.f32 %v5658_v60, %v5657_v42  ;;  %6535 = vpow2.f32 %v1915_v11  ;;  %v1994_v9 = vmul.f32 1.6732632, %v5324_v1 }
 0x2d3   : > { %v5660_v36 = vpop.f32.mrf.mxu1  ;;  %v6530_v41 = vpop.eup %6529 }
 0x2d4   : > { %v8096_v23 = vadd.f32 %v5659_v53, %v8033_v52  ;;  %v5325_v5 = vadd.f32 -1.0, %v6530_v41  ;;  %v2026_v31 = vsel %vm1866_vm9, %v8065_v37, %v1994_v9 }
 0x2d5   : > { %v5661_v63 = vpop.f32.mrf.mxu1  ;;  %v2058_v38 = vmul.f32 1.050701, %v2026_v31 }
 0x2d6   : > { %v1917_v10 = vmul.f32 1.442695, %v8096_v23  ;;  %v5662_v14 = vadd.f32 %v5661_v63, %v5660_v36  ;;  %v1995_v39 = vmul.f32 1.6732632, %v5325_v5  ;;  %vm1871_vm14 = vcmp.gt.f32.partialorder %v8096_v23, 0.0 }
 0x2d7   : > { %v5663_v15 = vpop.f32.mrf.mxu1  ;;  %v6532_v8 = vpop.eup %6531  ;;  %v2085_v17 = vpack.c.bf16 %v2058_v38, %v2057_v35 }
 0x2d8   : > { %6537 = vpow2.f32 %v1917_v10  ;;  %v8101_v57 = vadd.f32 %v5662_v14, %v8033_v52  ;;  %v5326_v13 = vadd.f32 -1.0, %v6532_v8  ;;  %v2027_v4 = vsel %vm1867_vm10, %v8072_v28, %v1995_v39 }
 0x2d9   : > { %v5664_v0 = vpop.f32.mrf.mxu1  ;;  %5831 = vmatprep.mubr.bf16.mxu1 %v2085_v17  ;;  %v2059_v3 = vmul.f32 1.050701, %v2027_v4 }
 0x2da   : > { %v1919_v30 = vmul.f32 1.442695, %v8101_v57  ;;  %v5665_v37 = vadd.f32 %v5664_v0, %v5663_v15  ;;  %v1996_v29 = vmul.f32 1.6732632, %v5326_v13  ;;  %vm1872_vm15 = vcmp.gt.f32.partialorder %v8101_v57, 0.0 }
 0x2db   : > { %v5666_v24 = vpop.f32.mrf.mxu1  ;;  %v6534_v51 = vpop.eup %6533 }
 0x2dc   : > { %6539 = vpow2.f32 %v1919_v30  ;;  %v8108_v2 = vadd.f32 %v5665_v37, %v8033_v52  ;;  %v5327_v43 = vadd.f32 -1.0, %v6534_v51  ;;  %v2028_v27 = vsel %vm1868_vm11, %v8077_v44, %v1996_v29 }
 0x2dd   : > { %v5667_v56 = vpop.f32.mrf.mxu1  ;;  %v2060_v45 = vmul.f32 1.050701, %v2028_v27 }
 0x2de   : > { %v1921_v26 = vmul.f32 1.442695, %v8108_v2  ;;  %v5668_v61 = vadd.f32 %v5667_v56, %v5666_v24  ;;  %v1997_v7 = vmul.f32 1.6732632, %v5327_v43  ;;  %vm1873_vm0 = vcmp.gt.f32.partialorder %v8108_v2, 0.0 }
 0x2df   : > { %v6536_v46 = vpop.eup %6535  ;;  %v2086_v55 = vpack.c.bf16 %v2060_v45, %v2059_v3 }
 0x2e0   : > { %6541 = vpow2.f32 %v1921_v26  ;;  %v8113_v28 = vadd.f32 %v5668_v61, %v8033_v52  ;;  %v5669_v48 = vpop.f32.mrf.mxu1  ;;  %v5328_v47 = vadd.f32 -1.0, %v6536_v46  ;;  %v2029_v54 = vsel %vm1869_vm12, %v8082_v62, %v1997_v7 }
 0x2e1   : > { %5832 = vmatmul.mubr.bf16.gmra.mxu1 %v2086_v55  ;;  %v2061_v42 = vmul.f32 1.050701, %v2029_v54 }
 0x2e2   : > { %v1923_v21 = vmul.f32 1.442695, %v8113_v28  ;;  %v5670_v22 = vpop.f32.mrf.mxu1  ;;  %v1998_v50 = vmul.f32 1.6732632, %v5328_v47  ;;  %vm1874_vm1 = vcmp.gt.f32.partialorder %v8113_v28, 0.0 }
 0x2e3   : > { %v5671_v44 = vadd.f32 %v5670_v22, %v5669_v48 }
 0x2e4   : > { %6543 = vpow2.f32 %v1923_v21  ;;  %v5672_v19 = vpop.f32.mrf.mxu1  ;;  %v2030_v34 = vsel %vm1870_vm13, %v8089_v25, %v1998_v50 }
 0x2e5   : > { %v6538_v33 = vpop.eup %6537  ;;  %v8120_v58 = vadd.f32 %v5671_v44, %v8033_v52  ;;  %v2062_v59 = vmul.f32 1.050701, %v2030_v34 }
 0x2e6   : > { %v5329_v6 = vadd.f32 -1.0, %v6538_v33  ;;  %v5673_v49 = vpop.f32.mrf.mxu1 }
 0x2e7   : > { %v1925_v16 = vmul.f32 1.442695, %v8120_v58  ;;  %v5674_v12 = vadd.f32 %v5673_v49, %v5672_v19  ;;  %v2087_v60 = vpack.c.bf16 %v2062_v59, %v2061_v42  ;;  %vm1875_vm2 = vcmp.gt.f32.partialorder %v8120_v58, 0.0 }
 0x2e8   : > { %v5675_v11 = vpop.f32.mrf.mxu1  ;;  %v1999_v62 = vmul.f32 1.6732632, %v5329_v6 }
 0x2e9   : > { %v6540_v32 = vpop.eup %6539  ;;  %6545 = vpow2.f32 %v1925_v16  ;;  %v8125_v1 = vadd.f32 %v5674_v12, %v8033_v52  ;;  %5835 = vmatprep.mubr.bf16.mxu1 %v2087_v60 }
 0x2ea   : > { %v5676_v53 = vpop.f32.mrf.mxu1  ;;  %v5330_v36 = vadd.f32 -1.0, %v6540_v32  ;;  %v2031_v5 = vsel %vm1871_vm14, %v8096_v23, %v1999_v62 }
 0x2eb   : > { %v1927_v25 = vmul.f32 1.442695, %v8125_v1  ;;  %v5677_v9 = vadd.f32 %v5676_v53, %v5675_v11  ;;  %v2063_v39 = vmul.f32 1.050701, %v2031_v5  ;;  %vm1876_vm3 = vcmp.gt.f32.partialorder %v8125_v1, 0.0 }
 0x2ec   : > { %v5678_v40 = vpop.f32.mrf.mxu1  ;;  %v2000_v41 = vmul.f32 1.6732632, %v5330_v36 }
 0x2ed   : > { %v6542_v63 = vpop.eup %6541  ;;  %6547 = vpow2.f32 %v1927_v25  ;;  %v8132_v31 = vadd.f32 %v5677_v9, %v8033_v52 }
 0x2ee   : > { %v5331_v10 = vadd.f32 -1.0, %v6542_v63  ;;  %v5679_v14 = vpop.f32.mrf.mxu1  ;;  %v2032_v35 = vsel %vm1872_vm15, %v8101_v57, %v2000_v41 }
 0x2ef   : > { %v1929_v38 = vmul.f32 1.442695, %v8132_v31  ;;  %v5680_v15 = vadd.f32 %v5679_v14, %v5678_v40  ;;  %v2064_v8 = vmul.f32 1.050701, %v2032_v35  ;;  %vm1877_vm4 = vcmp.gt.f32.partialorder %v8132_v31, 0.0 }
 0x2f0   : > { %v2001_v17 = vmul.f32 1.6732632, %v5331_v10 }
 0x2f1   : > { %v6544_v0 = vpop.eup %6543  ;;  %6549 = vpow2.f32 %v1929_v38  ;;  %v8137_v23 = vadd.f32 %v5680_v15, %v8033_v52  ;;  %v2088_v13 = vpack.c.bf16 %v2064_v8, %v2063_v39 }
 0x2f2   : > { %v5681_v30 = vpop.f32.mrf.mxu1  ;;  %v5332_v37 = vadd.f32 -1.0, %v6544_v0  ;;  %v2033_v4 = vsel %vm1873_vm0, %v8108_v2, %v2001_v17 }
 0x2f3   : > { %v1931_v24 = vmul.f32 1.442695, %v8137_v23  ;;  %5836 = vmatmul.mubr.bf16.gmra.mxu1 %v2088_v13  ;;  %v2065_v3 = vmul.f32 1.050701, %v2033_v4  ;;  %vm1878_vm5 = vcmp.gt.f32.partialorder %v8137_v23, 0.0 }
 0x2f4   : > { %v5682_v57 = vpop.f32.mrf.mxu1  ;;  %v2002_v29 = vmul.f32 1.6732632, %v5332_v37 }
 0x2f5   : > { %6551 = vpow2.f32 %v1931_v24  ;;  %v5683_v51 = vadd.f32 %v5682_v57, %v5681_v30 }
 0x2f6   : > { %v6546_v43 = vpop.eup %6545  ;;  %v5684_v56 = vpop.f32.mrf.mxu1  ;;  %v2034_v27 = vsel %vm1874_vm1, %v8113_v28, %v2002_v29 }
 0x2f7   : > { %v5333_v26 = vadd.f32 -1.0, %v6546_v43  ;;  %v8145_v61 = vadd.f32 %v5683_v51, %v8033_v52  ;;  %v2066_v45 = vmul.f32 1.050701, %v2034_v27 }
 0x2f8   : > { %v5685_v7 = vpop.f32.mrf.mxu1 }
 0x2f9   : > { %v1933_v46 = vmul.f32 1.442695, %v8145_v61  ;;  %v5686_v48 = vadd.f32 %v5685_v7, %v5684_v56  ;;  %v2089_v55 = vpack.c.bf16 %v2066_v45, %v2065_v3  ;;  %v2003_v21 = vmul.f32 1.6732632, %v5333_v26 }
 0x2fa   : > { %v6548_v2 = vpop.eup %6547  ;;  %v5687_v47 = vpop.f32.mrf.mxu1  ;;  %vm1879_vm6 = vcmp.gt.f32.partialorder %v8145_v61, 0.0 }
 0x2fb   : > { %6553 = vpow2.f32 %v1933_v46  ;;  %v8149_v22 = vadd.f32 %v5686_v48, %v8033_v52  ;;  %5839 = vmatprep.mubr.bf16.mxu1 %v2089_v55  ;;  %v5334_v28 = vadd.f32 -1.0, %v6548_v2  ;;  %v2035_v33 = vsel %vm1875_vm2, %v8120_v58, %v2003_v21 }
 0x2fc   : > { %v5688_v44 = vpop.f32.mrf.mxu1  ;;  %v2067_v12 = vmul.f32 1.050701, %v2035_v33 }
 0x2fd   : > { %v1935_v50 = vmul.f32 1.442695, %v8149_v22  ;;  %v5689_v54 = vadd.f32 %v5688_v44, %v5687_v47  ;;  %v2004_v19 = vmul.f32 1.6732632, %v5334_v28  ;;  %vm1880_vm7 = vcmp.gt.f32.partialorder %v8149_v22, 0.0 }
 0x2fe   : > { %v6550_v34 = vpop.eup %6549  ;;  %v5690_v6 = vpop.f32.mrf.mxu1 }
 0x2ff   : > { %v5335_v49 = vadd.f32 -1.0, %v6550_v34  ;;  %6555 = vpow2.f32 %v1935_v50  ;;  %v8156_v42 = vadd.f32 %v5689_v54, %v8033_v52  ;;  %v2036_v59 = vsel %vm1876_vm3, %v8125_v1, %v2004_v19 }
 0x300   : > { %v5691_v16 = vpop.f32.mrf.mxu1  ;;  %v2068_v11 = vmul.f32 1.050701, %v2036_v59 }
 0x301   : > { %v1937_v60 = vmul.f32 1.442695, %v8156_v42  ;;  %v5692_v62 = vadd.f32 %v5691_v16, %v5690_v6  ;;  %v2005_v32 = vmul.f32 1.6732632, %v5335_v49  ;;  %vm1881_vm8 = vcmp.gt.f32.partialorder %v8156_v42, 0.0 }
 0x302   : > { %v6552_v53 = vpop.eup %6551  ;;  %v5693_v58 = vpop.f32.mrf.mxu1  ;;  %v2090_v36 = vpack.c.bf16 %v2068_v11, %v2067_v12 }
 0x303   : > { %6557 = vpow2.f32 %v1937_v60  ;;  %v8161_v25 = vadd.f32 %v5692_v62, %v8033_v52  ;;  %v5336_v9 = vadd.f32 -1.0, %v6552_v53  ;;  %v2037_v63 = vsel %vm1877_vm4, %v8132_v31, %v2005_v32 }
 0x304   : > { %v5694_v40 = vpop.f32.mrf.mxu1  ;;  %5840 = vmatmul.mubr.bf16.gmra.mxu1 %v2090_v36  ;;  %v2069_v39 = vmul.f32 1.050701, %v2037_v63 }
 0x305   : > { %v1939_v1 = vmul.f32 1.442695, %v8161_v25  ;;  %v5695_v41 = vadd.f32 %v5694_v40, %v5693_v58  ;;  %v2006_v5 = vmul.f32 1.6732632, %v5336_v9  ;;  %vm1882_vm9 = vcmp.gt.f32.partialorder %v8161_v25, 0.0  ;;  %v6291_v58 = vld [vmem:[#allocation10 + $0x8] sm:$0xff]  }
 0x306   : > { %v5696_v10 = vpop.f32.mrf.mxu1  ;;  %5867 = vmatprep.subr.bf16.mxu0 %v6291_v58 }
 0x307   : > { %6559 = vpow2.f32 %v1939_v1  ;;  %v8168_v14 = vadd.f32 %v5695_v41, %v8033_v52  ;;  %v2038_v35 = vsel %vm1878_vm5, %v8137_v23, %v2006_v5  ;;  %5868 = vmatpush3.bf16.msra.mxu0 %v6291_v58 }
 0x308   : > { %v6554_v38 = vpop.eup %6553  ;;  %v5697_v15 = vpop.f32.mrf.mxu1  ;;  %v2070_v8 = vmul.f32 1.050701, %v2038_v35 }
 0x309   : > { %v5337_v17 = vadd.f32 -1.0, %v6554_v38  ;;  %v1941_v0 = vmul.f32 1.442695, %v8168_v14  ;;  %v5698_v13 = vadd.f32 %v5697_v15, %v5696_v10  ;;  %vm1883_vm10 = vcmp.gt.f32.partialorder %v8168_v14, 0.0 }
 0x30a   : > { %v5699_v30 = vpop.f32.mrf.mxu1  ;;  %v2091_v37 = vpack.c.bf16 %v2070_v8, %v2069_v39 }
 0x30b   : > { %6561 = vpow2.f32 %v1941_v0  ;;  %v8173_v31 = vadd.f32 %v5698_v13, %v8033_v52  ;;  %v2007_v24 = vmul.f32 1.6732632, %v5337_v17  ;;  %v6292_v0 = vld [vmem:[#allocation10] sm:$0xff]  }
 0x30c   : > { %v6556_v57 = vpop.eup %6555  ;;  %v5700_v29 = vpop.f32.mrf.mxu1  ;;  %5843 = vmatprep.mubr.bf16.mxu1 %v2091_v37  ;;  %5869 = vmatprep.subr.bf16.mxu0 %v6292_v0 }
 0x30d   : > { %v1943_v23 = vmul.f32 1.442695, %v8173_v31  ;;  %v5701_v4 = vadd.f32 %v5700_v29, %v5699_v30  ;;  %v5338_v51 = vadd.f32 -1.0, %v6556_v57  ;;  %v2039_v26 = vsel %vm1879_vm6, %v8145_v61, %v2007_v24  ;;  %5870 = vmatpush3.bf16.msra.mxu0 %v6292_v0 }
 0x30e   : > { %v5702_v43 = vpop.f32.mrf.mxu1  ;;  %v2071_v47 = vmul.f32 1.050701, %v2039_v26  ;;  %vm1884_vm11 = vcmp.gt.f32.partialorder %v8173_v31, 0.0 }
 0x30f   : > { %6563 = vpow2.f32 %v1943_v23  ;;  %v8178_v56 = vadd.f32 %v5701_v4, %v8033_v52  ;;  %v2008_v27 = vmul.f32 1.6732632, %v5338_v51 }
 0x310   : > { %v6558_v3 = vpop.eup %6557  ;;  %v5703_v45 = vpop.f32.mrf.mxu1 }
 0x311   : > { %v5339_v7 = vadd.f32 -1.0, %v6558_v3  ;;  %v1945_v46 = vmul.f32 1.442695, %v8178_v56  ;;  %v5704_v48 = vadd.f32 %v5703_v45, %v5702_v43  ;;  %v2040_v2 = vsel %vm1880_vm7, %v8149_v22, %v2008_v27 }
 0x312   : > { %v5705_v55 = vpop.f32.mrf.mxu1  ;;  %v2072_v28 = vmul.f32 1.050701, %v2040_v2  ;;  %vm1885_vm12 = vcmp.gt.f32.partialorder %v8178_v56, 0.0 }
 0x313   : > { %6565 = vpow2.f32 %v1945_v46  ;;  %v1846_v21 = vadd.f32 %v5704_v48, %v8033_v52  ;;  %v2009_v44 = vmul.f32 1.6732632, %v5339_v7  ;;  %v8200_v46 = vld [vmem:[%s9349_s9 + $0x2] ss:$0 sm:$0xff] }
 0x314   : > { %v6560_v50 = vpop.eup %6559  ;;  %v5706_v54 = vpop.f32.mrf.mxu1  ;;  %v2092_v33 = vpack.c.bf16 %v2072_v28, %v2071_v47 }
 0x315   : > { %v1947_v61 = vmul.f32 1.442695, %v1846_v21  ;;  %v5707_v19 = vadd.f32 %v5706_v54, %v5705_v55  ;;  %v5340_v6 = vadd.f32 -1.0, %v6560_v50  ;;  %v2041_v22 = vsel %vm1881_vm8, %v8156_v42, %v2009_v44 }
 0x316   : > { %v5708_v34 = vpop.f32.mrf.mxu1  ;;  %5844 = vmatmul.mubr.bf16.gmra.mxu1 %v2092_v33  ;;  %v2073_v53 = vmul.f32 1.050701, %v2041_v22  ;;  %vm1886_vm13 = vcmp.gt.f32.partialorder %v1846_v21, 0.0 }
 0x317   : > { %6567 = vpow2.f32 %v1947_v61  ;;  %v1851_v49 = vadd.f32 %v5707_v19, %v8033_v52  ;;  %v2010_v12 = vmul.f32 1.6732632, %v5340_v6 }
 0x318   : > { %v6562_v59 = vpop.eup %6561  ;;  %v5709_v16 = vpop.f32.mrf.mxu1 }
 0x319   : > { %v5341_v11 = vadd.f32 -1.0, %v6562_v59  ;;  %v1949_v60 = vmul.f32 1.442695, %v1851_v49  ;;  %v5710_v62 = vadd.f32 %v5709_v16, %v5708_v34  ;;  %v2042_v32 = vsel %vm1882_vm9, %v8161_v25, %v2010_v12 }
 0x31a   : > { %v2074_v9 = vmul.f32 1.050701, %v2042_v32  ;;  %vm1887_vm14 = vcmp.gt.f32.partialorder %v1851_v49, 0.0 }
 0x31b   : > { %6569 = vpow2.f32 %v1949_v60  ;;  %v1854_v36 = vadd.f32 %v5710_v62, %v8033_v52  ;;  %v2011_v40 = vmul.f32 1.6732632, %v5341_v11 }
 0x31c   : > { %v6564_v1 = vpop.eup %6563  ;;  %v2093_v41 = vpack.c.bf16 %v2074_v9, %v2073_v53 }
 0x31d   : > { %v1951_v42 = vmul.f32 1.442695, %v1854_v36  ;;  %v5342_v5 = vadd.f32 -1.0, %v6564_v1  ;;  %v2043_v25 = vsel %vm1883_vm10, %v8168_v14, %v2011_v40  ;;  %vm1888_vm15 = vcmp.gt.f32.partialorder %v1854_v36, 0.0 }
 0x31e   : > { %5847 = vmatprep.mubr.bf16.mxu1 %v2093_v41  ;;  %v2075_v38 = vmul.f32 1.050701, %v2043_v25  ;;  %v6294_v25 = vld [vmem:[#allocation11 + $0x30] sm:$0xff]  }
 0x31f   : > { %6571 = vpow2.f32 %v1951_v42  ;;  %v2012_v63 = vmul.f32 1.6732632, %v5342_v5 }
 0x320   : > { %v6566_v10 = vpop.eup %6565 }
 0x321   : > { %v5343_v35 = vadd.f32 -1.0, %v6566_v10  ;;  %v2044_v52 = vsel %vm1884_vm11, %v8173_v31, %v2012_v63  ;;  %v6293_v63 = vld [vmem:[#allocation11 + $0x38] sm:$0xff]  }
 0x322   : > { %v2076_v15 = vmul.f32 1.050701, %v2044_v52  ;;  %5903 = vmatprep.subr.bf16.mxu1 %v6293_v63 }
 0x323   : > { %v2013_v39 = vmul.f32 1.6732632, %v5343_v35  ;;  %5904 = vmatpush3.bf16.msra.mxu1 %v6293_v63 }
 0x324   : > { %v6568_v8 = vpop.eup %6567  ;;  %v2094_v17 = vpack.c.bf16 %v2076_v15, %v2075_v38  ;;  %5905 = vmatprep.subr.bf16.mxu1 %v6294_v25 }
 0x325   : > { %v5344_v13 = vadd.f32 -1.0, %v6568_v8  ;;  %v2045_v14 = vsel %vm1885_vm12, %v8178_v56, %v2013_v39 }
 0x326   : > { %5848 = vmatmul.mubr.bf16.gmra.mxu1 %v2094_v17  ;;  %v2077_v31 = vmul.f32 1.050701, %v2045_v14 }
 0x327   : > { %v2014_v30 = vmul.f32 1.6732632, %v5344_v13  ;;  %v6295_v13 = vld [vmem:[#allocation11 + $0x28] sm:$0xff]   ;;  %5906 = vmatpush3.bf16.msra.mxu1 %v6294_v25 }
 0x328   : > { %v6570_v37 = vpop.eup %6569  ;;  %5907 = vmatprep.subr.bf16.mxu1 %v6295_v13 }
 0x329   : > { %v5345_v24 = vadd.f32 -1.0, %v6570_v37  ;;  %v2046_v57 = vsel %vm1886_vm13, %v1846_v21, %v2014_v30 }
 0x32a   : > { %v2078_v29 = vmul.f32 1.050701, %v2046_v57 }
 0x32b   : > { %v2015_v23 = vmul.f32 1.6732632, %v5345_v24  ;;  %5908 = vmatpush3.bf16.msra.mxu1 %v6295_v13 }
 0x32c   : > { %v6572_v4 = vpop.eup %6571  ;;  %v2095_v51 = vpack.c.bf16 %v2078_v29, %v2077_v31  ;;  %v6296_v31 = vld [vmem:[#allocation11 + $0x20] sm:$0xff]  }
 0x32d   : > { %v5346_v43 = vadd.f32 -1.0, %v6572_v4  ;;  %v2047_v26 = vsel %vm1887_vm14, %v1851_v49, %v2015_v23  ;;  %5909 = vmatprep.subr.bf16.mxu1 %v6296_v31 }
 0x32e   : > { %5851 = vmatprep.mubr.bf16.mxu1 %v2095_v51  ;;  %v2079_v45 = vmul.f32 1.050701, %v2047_v26  ;;  %v6297_v26 = vld [vmem:[#allocation11 + $0x18] sm:$0xff]  }
 0x32f   : > { %v2016_v27 = vmul.f32 1.6732632, %v5346_v43  ;;  %5910 = vmatpush3.bf16.msra.mxu1 %v6296_v31 }
 0x330   : > { %5911 = vmatprep.subr.bf16.mxu1 %v6297_v26 }
 0x331   : > { %v2048_v3 = vsel %vm1888_vm15, %v1854_v36, %v2016_v27 }
 0x332   : > { %v2080_v7 = vmul.f32 1.050701, %v2048_v3 }
 0x333   : > { %5912 = vmatpush3.bf16.msra.mxu1 %v6297_v26 }
 0x334   : > { %v2096_v56 = vpack.c.bf16 %v2080_v7, %v2079_v45 }
 0x336   : > { %5852 = vmatmul.mubr.bf16.gmra.mxu1 %v2096_v56 }
 0x37f   : > { %v5825_v48 = vpop.f32.mrf.mxu1 }
 0x380   : > { %v2205_v55 = vadd.f32 %v5825_v48, %v8200_v46 }
 0x381   : > { %v2196_v2 = vpop.f32.mrf.mxu1 }
 0x382   : > { %v2359_v47 = vmul.f32 1.442695, %v2205_v55  ;;  %v2197_v21 = vadd.f32 %v2196_v2, %v8200_v46  ;;  %vm2325_vm0 = vcmp.gt.f32.partialorder %v2205_v55, 0.0 }
 0x383   : > { %v5826_v28 = vpop.f32.mrf.mxu1 }
 0x384   : > { %6573 = vpow2.f32 %v2359_v47  ;;  %v2355_v44 = vmul.f32 1.442695, %v2197_v21  ;;  %v2208_v50 = vadd.f32 %v5826_v28, %v8200_v46  ;;  %vm2323_vm1 = vcmp.gt.f32.partialorder %v2197_v21, 0.0  ;;  %v6298_v28 = vld [vmem:[#allocation11 + $0x10] sm:$0xff]  }
 0x385   : > { %v2199_v54 = vpop.f32.mrf.mxu1  ;;  %5913 = vmatprep.subr.bf16.mxu1 %v6298_v28 }
 0x386   : > { %6575 = vpow2.f32 %v2355_v44  ;;  %v2361_v61 = vmul.f32 1.442695, %v2208_v50  ;;  %v2200_v19 = vadd.f32 %v2199_v54, %v8200_v46  ;;  %vm2326_vm2 = vcmp.gt.f32.partialorder %v2208_v50, 0.0  ;;  %5914 = vmatpush3.bf16.msra.mxu1 %v6298_v28 }
 0x388   : > { %6577 = vpow2.f32 %v2361_v61  ;;  %v2357_v33 = vmul.f32 1.442695, %v2200_v19  ;;  %vm2324_vm3 = vcmp.gt.f32.partialorder %v2200_v19, 0.0 }
 0x38a   : > { %6579 = vpow2.f32 %v2357_v33 }
 0x38f   : > { %v5829_v6 = vpop.f32.mrf.mxu1 }
 0x390   : > { %v8207_v59 = vadd.f32 %v5829_v6, %v8200_v46 }
 0x391   : > { %v6574_v34 = vpop.eup %6573  ;;  %v2212_v12 = vpop.f32.mrf.mxu1 }
 0x392   : > { %v5357_v22 = vadd.f32 -1.0, %v6574_v34  ;;  %v2367_v60 = vmul.f32 1.442695, %v8207_v59  ;;  %v8211_v62 = vadd.f32 %v2212_v12, %v8200_v46  ;;  %vm2329_vm4 = vcmp.gt.f32.partialorder %v8207_v59, 0.0 }
 0x393   : > { %v6576_v49 = vpop.eup %6575  ;;  %v5830_v58 = vpop.f32.mrf.mxu1 }
 0x394   : > { %v5355_v16 = vadd.f32 -1.0, %v6576_v49  ;;  %v2453_v9 = vmul.f32 1.6732632, %v5357_v22  ;;  %6581 = vpow2.f32 %v2367_v60  ;;  %v2363_v40 = vmul.f32 1.442695, %v8211_v62  ;;  %v6299_v49 = vld [vmem:[#allocation11 + $0x8] sm:$0xff]  }
 0x395   : > { %v6578_v11 = vpop.eup %6577  ;;  %v8215_v41 = vadd.f32 %v5830_v58, %v8200_v46  ;;  %v2215_v5 = vpop.f32.mrf.mxu1  ;;  %vm2327_vm5 = vcmp.gt.f32.partialorder %v8211_v62, 0.0  ;;  %5915 = vmatprep.subr.bf16.mxu1 %v6299_v49 }
 0x396   : > { %v2451_v32 = vmul.f32 1.6732632, %v5355_v16  ;;  %v5358_v53 = vadd.f32 -1.0, %v6578_v11  ;;  %6583 = vpow2.f32 %v2363_v40  ;;  %v8218_v10 = vadd.f32 %v2215_v5, %v8200_v46  ;;  %5916 = vmatpush3.bf16.msra.mxu1 %v6299_v49 }
 0x397   : > { %v6580_v36 = vpop.eup %6579  ;;  %v2369_v38 = vmul.f32 1.442695, %v8215_v41  ;;  %v2485_v39 = vsel %vm2325_vm0, %v2205_v55, %v2453_v9  ;;  %vm2330_vm6 = vcmp.gt.f32.partialorder %v8215_v41, 0.0 }
 0x398   : > { %v2454_v1 = vmul.f32 1.6732632, %v5358_v53  ;;  %v5356_v42 = vadd.f32 -1.0, %v6580_v36  ;;  %v2483_v35 = vsel %vm2323_vm1, %v2197_v21, %v2451_v32  ;;  %v2365_v8 = vmul.f32 1.442695, %v8218_v10 }
 0x399   : > { %6585 = vpow2.f32 %v2369_v38  ;;  %v2515_v30 = vmul.f32 1.050701, %v2483_v35  ;;  %v2517_v37 = vmul.f32 1.050701, %v2485_v39  ;;  %vm2328_vm7 = vcmp.gt.f32.partialorder %v8218_v10, 0.0 }
 0x39a   : > { %v2486_v52 = vsel %vm2326_vm2, %v2208_v50, %v2454_v1  ;;  %v2452_v15 = vmul.f32 1.6732632, %v5356_v42  ;;  %6587 = vpow2.f32 %v2365_v8 }
 0x39b   : > { %v2518_v17 = vmul.f32 1.050701, %v2486_v52 }
 0x39c   : > { %v2484_v0 = vsel %vm2324_vm3, %v2200_v19, %v2452_v15 }
 0x39d   : > { %v2516_v14 = vmul.f32 1.050701, %v2484_v0  ;;  %v2548_v57 = vpack.c.bf16 %v2518_v17, %v2517_v37 }
 0x39f   : > { %v2547_v24 = vpack.c.bf16 %v2516_v14, %v2515_v30 }
 0x3a1   : > { %v5833_v29 = vpop.f32.mrf.mxu1  ;;  %5871 = vmatprep.mubr.bf16.mxu0 %v2547_v24  ;;  %v6582_v51 = vpop.eup %6581 }
 0x3a2   : > { %v8224_v23 = vadd.f32 %v5833_v29, %v8200_v46  ;;  %5872 = vmatmul.mubr.bf16.vlgmr.msra.gmra.mxu0 %v2548_v57  ;;  %v5361_v7 = vadd.f32 -1.0, %v6582_v51 }
 0x3a3   : > { %v2228_v4 = vpop.f32.mrf.mxu1  ;;  %v6584_v45 = vpop.eup %6583 }
 0x3a4   : > { %v2375_v43 = vmul.f32 1.442695, %v8224_v23  ;;  %v8228_v27 = vadd.f32 %v2228_v4, %v8200_v46  ;;  %v5359_v55 = vadd.f32 -1.0, %v6584_v45  ;;  %v2457_v61 = vmul.f32 1.6732632, %v5361_v7 }
 0x3a5   : > { %v5834_v3 = vpop.f32.mrf.mxu1  ;;  %vm2333_vm10 = vcmp.gt.f32.partialorder %v8224_v23, 0.0 }
 0x3a6   : > { %6589 = vpow2.f32 %v2375_v43  ;;  %v2371_v56 = vmul.f32 1.442695, %v8228_v27  ;;  %v8232_v48 = vadd.f32 %v5834_v3, %v8200_v46  ;;  %v6586_v44 = vpop.eup %6585  ;;  %v2455_v50 = vmul.f32 1.6732632, %v5359_v55 }
 0x3a7   : > { %v2231_v2 = vpop.f32.mrf.mxu1  ;;  %v6588_v54 = vpop.eup %6587  ;;  %v5362_v19 = vadd.f32 -1.0, %v6586_v44  ;;  %v2489_v12 = vsel %vm2329_vm4, %v8207_v59, %v2457_v61  ;;  %vm2331_vm9 = vcmp.gt.f32.partialorder %v8228_v27, 0.0 }
 0x3a8   : > { %6591 = vpow2.f32 %v2371_v56  ;;  %v2377_v47 = vmul.f32 1.442695, %v8232_v48  ;;  %v8236_v21 = vadd.f32 %v2231_v2, %v8200_v46  ;;  %v5360_v33 = vadd.f32 -1.0, %v6588_v54 }
 0x3a9   : > { %v2458_v6 = vmul.f32 1.6732632, %v5362_v19  ;;  %v2487_v22 = vsel %vm2327_vm5, %v8211_v62, %v2455_v50  ;;  %v2521_v36 = vmul.f32 1.050701, %v2489_v12  ;;  %vm2334_vm8 = vcmp.gt.f32.partialorder %v8232_v48, 0.0 }
 0x3aa   : > { %6593 = vpow2.f32 %v2377_v47  ;;  %v2373_v34 = vmul.f32 1.442695, %v8236_v21  ;;  %v2456_v16 = vmul.f32 1.6732632, %v5360_v33  ;;  %v2519_v53 = vmul.f32 1.050701, %v2487_v22 }
 0x3ab   : > { %v2490_v11 = vsel %vm2330_vm6, %v8215_v41, %v2458_v6  ;;  %vm2332_vm11 = vcmp.gt.f32.partialorder %v8236_v21, 0.0 }
 0x3ac   : > { %6595 = vpow2.f32 %v2373_v34  ;;  %v2522_v60 = vmul.f32 1.050701, %v2490_v11  ;;  %v2488_v32 = vsel %vm2328_vm7, %v8218_v10, %v2456_v16 }
 0x3ad   : > { %v2520_v58 = vmul.f32 1.050701, %v2488_v32 }
 0x3ae   : > { %v2550_v42 = vpack.c.bf16 %v2522_v60, %v2521_v36 }
 0x3af   : > { %v2549_v62 = vpack.c.bf16 %v2520_v58, %v2519_v53 }
 0x3b1   : > { %5875 = vmatprep.mubr.bf16.mxu0 %v2549_v62 }
 0x3b2   : > { %5876 = vmatmul.mubr.bf16.gmra.mxu0 %v2550_v42 }
 0x3b3   : > { %v5837_v9 = vpop.f32.mrf.mxu1  ;;  %v6590_v40 = vpop.eup %6589 }
 0x3b4   : > { %v8248_v1 = vadd.f32 %v5837_v9, %v8200_v46  ;;  %v5365_v25 = vadd.f32 -1.0, %v6590_v40 }
 0x3b5   : > { %v2244_v59 = vpop.f32.mrf.mxu1  ;;  %v6592_v41 = vpop.eup %6591 }
 0x3b6   : > { %v2383_v5 = vmul.f32 1.442695, %v8248_v1  ;;  %v8252_v63 = vadd.f32 %v2244_v59, %v8200_v46  ;;  %v5363_v10 = vadd.f32 -1.0, %v6592_v41  ;;  %v2461_v30 = vmul.f32 1.6732632, %v5365_v25 }
 0x3b7   : > { %v5838_v35 = vpop.f32.mrf.mxu1  ;;  %v6594_v52 = vpop.eup %6593  ;;  %vm2337_vm14 = vcmp.gt.f32.partialorder %v8248_v1, 0.0 }
 0x3b8   : > { %6597 = vpow2.f32 %v2383_v5  ;;  %v2379_v38 = vmul.f32 1.442695, %v8252_v63  ;;  %v2256_v15 = vadd.f32 %v5838_v35, %v8200_v46  ;;  %v5366_v39 = vadd.f32 -1.0, %v6594_v52 }
 0x3b9   : > { %v2247_v8 = vpop.f32.mrf.mxu1  ;;  %v2459_v17 = vmul.f32 1.6732632, %v5363_v10  ;;  %v6596_v13 = vpop.eup %6595  ;;  %v2493_v51 = vsel %vm2333_vm10, %v8224_v23, %v2461_v30  ;;  %vm2335_vm13 = vcmp.gt.f32.partialorder %v8252_v63, 0.0 }
 0x3ba   : > { %6599 = vpow2.f32 %v2379_v38  ;;  %v2385_v0 = vmul.f32 1.442695, %v2256_v15  ;;  %v2462_v14 = vmul.f32 1.6732632, %v5366_v39  ;;  %v2248_v37 = vadd.f32 %v2247_v8, %v8200_v46 }
 0x3bb   : > { %v5364_v24 = vadd.f32 -1.0, %v6596_v13  ;;  %v2491_v29 = vsel %vm2331_vm9, %v8228_v27, %v2459_v17  ;;  %v2525_v7 = vmul.f32 1.050701, %v2493_v51  ;;  %vm2338_vm12 = vcmp.gt.f32.partialorder %v2256_v15, 0.0 }
 0x3bc   : > { %6601 = vpow2.f32 %v2385_v0  ;;  %v2494_v57 = vsel %vm2334_vm8, %v8232_v48, %v2462_v14  ;;  %v2381_v31 = vmul.f32 1.442695, %v2248_v37  ;;  %v2523_v3 = vmul.f32 1.050701, %v2491_v29 }
 0x3bd   : > { %v2460_v4 = vmul.f32 1.6732632, %v5364_v24  ;;  %v2526_v43 = vmul.f32 1.050701, %v2494_v57  ;;  %vm2336_vm15 = vcmp.gt.f32.partialorder %v2248_v37, 0.0 }
 0x3be   : > { %6603 = vpow2.f32 %v2381_v31 }
 0x3bf   : > { %v2492_v26 = vsel %vm2332_vm11, %v8236_v21, %v2460_v4  ;;  %v2552_v48 = vpack.c.bf16 %v2526_v43, %v2525_v7 }
 0x3c0   : > { %v2524_v45 = vmul.f32 1.050701, %v2492_v26 }
 0x3c2   : > { %v2551_v56 = vpack.c.bf16 %v2524_v45, %v2523_v3 }
 0x3c4   : > { %v5841_v55 = vpop.f32.mrf.mxu1  ;;  %5879 = vmatprep.mubr.bf16.mxu0 %v2551_v56 }
 0x3c5   : > { %v6598_v2 = vpop.eup %6597  ;;  %v8266_v47 = vadd.f32 %v5841_v55, %v8200_v46  ;;  %5880 = vmatmul.mubr.bf16.gmra.mxu0 %v2552_v48 }
 0x3c6   : > { %v2260_v27 = vpop.f32.mrf.mxu1  ;;  %v5369_v21 = vadd.f32 -1.0, %v6598_v2 }
 0x3c7   : > { %v6600_v23 = vpop.eup %6599  ;;  %v2391_v28 = vmul.f32 1.442695, %v8266_v47  ;;  %v8270_v44 = vadd.f32 %v2260_v27, %v8200_v46  ;;  %vm2341_vm2 = vcmp.gt.f32.partialorder %v8266_v47, 0.0 }
 0x3c8   : > { %v5367_v50 = vadd.f32 -1.0, %v6600_v23  ;;  %v5842_v54 = vpop.f32.mrf.mxu1  ;;  %v2465_v12 = vmul.f32 1.6732632, %v5369_v21 }
 0x3c9   : > { %v6602_v61 = vpop.eup %6601  ;;  %v2387_v19 = vmul.f32 1.442695, %v8270_v44  ;;  %v2272_v33 = vadd.f32 %v5842_v54, %v8200_v46  ;;  %6605 = vpow2.f32 %v2391_v28  ;;  %vm2339_vm1 = vcmp.gt.f32.partialorder %v8270_v44, 0.0  ;;  %v6300_v54 = vld [vmem:[#allocation11] sm:$0xff]  }
 0x3ca   : > { %v5370_v34 = vadd.f32 -1.0, %v6602_v61  ;;  %v2263_v6 = vpop.f32.mrf.mxu1  ;;  %v2463_v49 = vmul.f32 1.6732632, %v5367_v50  ;;  %v2497_v62 = vsel %vm2337_vm14, %v8248_v1, %v2465_v12  ;;  %5917 = vmatprep.subr.bf16.mxu1 %v6300_v54 }
 0x3cb   : > { %6607 = vpow2.f32 %v2387_v19  ;;  %v2393_v22 = vmul.f32 1.442695, %v2272_v33  ;;  %v6604_v16 = vpop.eup %6603  ;;  %v2264_v60 = vadd.f32 %v2263_v6, %v8200_v46  ;;  %v2529_v5 = vmul.f32 1.050701, %v2497_v62  ;;  %5918 = vmatpush3.bf16.msra.mxu1 %v6300_v54 }
 0x3cc   : > { %v2466_v11 = vmul.f32 1.6732632, %v5370_v34  ;;  %v5368_v32 = vadd.f32 -1.0, %v6604_v16  ;;  %v2495_v36 = vsel %vm2335_vm13, %v8252_v63, %v2463_v49  ;;  %vm2342_vm0 = vcmp.gt.f32.partialorder %v2272_v33, 0.0 }
 0x3cd   : > { %6609 = vpow2.f32 %v2393_v22  ;;  %v2389_v58 = vmul.f32 1.442695, %v2264_v60  ;;  %v2527_v59 = vmul.f32 1.050701, %v2495_v36  ;;  %vm2340_vm3 = vcmp.gt.f32.partialorder %v2264_v60, 0.0 }
 0x3ce   : > { %v2498_v53 = vsel %vm2338_vm12, %v2256_v15, %v2466_v11  ;;  %v2464_v9 = vmul.f32 1.6732632, %v5368_v32 }
 0x3cf   : > { %6611 = vpow2.f32 %v2389_v58  ;;  %v2530_v40 = vmul.f32 1.050701, %v2498_v53 }
 0x3d0   : > { %v2496_v42 = vsel %vm2336_vm15, %v2248_v37, %v2464_v9 }
 0x3d1   : > { %v2528_v41 = vmul.f32 1.050701, %v2496_v42  ;;  %v2554_v10 = vpack.c.bf16 %v2530_v40, %v2529_v5 }
 0x3d3   : > { %v2553_v25 = vpack.c.bf16 %v2528_v41, %v2527_v59 }
 0x3d5   : > { %5883 = vmatprep.mubr.bf16.mxu0 %v2553_v25 }
 0x3d6   : > { %v6606_v35 = vpop.eup %6605  ;;  %v5845_v52 = vpop.f32.mrf.mxu1  ;;  %5884 = vmatmul.mubr.bf16.gmra.mxu0 %v2554_v10 }
 0x3d7   : > { %v8280_v15 = vadd.f32 %v5845_v52, %v8200_v46  ;;  %v5373_v8 = vadd.f32 -1.0, %v6606_v35 }
 0x3d8   : > { %v6608_v38 = vpop.eup %6607  ;;  %v2276_v39 = vpop.f32.mrf.mxu1 }
 0x3d9   : > { %v5371_v63 = vadd.f32 -1.0, %v6608_v38  ;;  %v2399_v17 = vmul.f32 1.442695, %v8280_v15  ;;  %v8284_v0 = vadd.f32 %v2276_v39, %v8200_v46  ;;  %v2469_v4 = vmul.f32 1.6732632, %v5373_v8 }
 0x3da   : > { %v6610_v1 = vpop.eup %6609  ;;  %v5846_v30 = vpop.f32.mrf.mxu1  ;;  %vm2345_vm4 = vcmp.gt.f32.partialorder %v8280_v15, 0.0 }
 0x3db   : > { %v5374_v13 = vadd.f32 -1.0, %v6610_v1  ;;  %6613 = vpow2.f32 %v2399_v17  ;;  %v2395_v14 = vmul.f32 1.442695, %v8284_v0  ;;  %v2467_v24 = vmul.f32 1.6732632, %v5371_v63 }
 0x3dc   : > { %v6612_v37 = vpop.eup %6611  ;;  %v8288_v31 = vadd.f32 %v5846_v30, %v8200_v46  ;;  %v2279_v29 = vpop.f32.mrf.mxu1  ;;  %v2501_v55 = vsel %vm2341_vm2, %v8266_v47, %v2469_v4  ;;  %vm2343_vm5 = vcmp.gt.f32.partialorder %v8284_v0, 0.0 }
 0x3dd   : > { %v2470_v57 = vmul.f32 1.6732632, %v5374_v13  ;;  %v5372_v51 = vadd.f32 -1.0, %v6612_v37  ;;  %6615 = vpow2.f32 %v2395_v14  ;;  %v2280_v43 = vadd.f32 %v2279_v29, %v8200_v46 }
 0x3de   : > { %v2401_v26 = vmul.f32 1.442695, %v8288_v31  ;;  %v2499_v7 = vsel %vm2339_vm1, %v8270_v44, %v2467_v24  ;;  %v2533_v28 = vmul.f32 1.050701, %v2501_v55  ;;  %vm2346_vm6 = vcmp.gt.f32.partialorder %v8288_v31, 0.0 }
 0x3df   : > { %v2502_v3 = vsel %vm2342_vm0, %v2272_v33, %v2470_v57  ;;  %v2397_v45 = vmul.f32 1.442695, %v2280_v43  ;;  %v2468_v56 = vmul.f32 1.6732632, %v5372_v51  ;;  %v2531_v27 = vmul.f32 1.050701, %v2499_v7 }
 0x3e0   : > { %6617 = vpow2.f32 %v2401_v26  ;;  %v2534_v48 = vmul.f32 1.050701, %v2502_v3  ;;  %vm2344_vm7 = vcmp.gt.f32.partialorder %v2280_v43, 0.0 }
 0x3e1   : > { %6619 = vpow2.f32 %v2397_v45  ;;  %v2500_v2 = vsel %vm2340_vm3, %v2264_v60, %v2468_v56 }
 0x3e2   : > { %v2532_v23 = vmul.f32 1.050701, %v2500_v2  ;;  %v2556_v19 = vpack.c.bf16 %v2534_v48, %v2533_v28 }
 0x3e4   : > { %v2555_v50 = vpack.c.bf16 %v2532_v23, %v2531_v27 }
 0x3e6   : > { %v5849_v21 = vpop.f32.mrf.mxu1  ;;  %5887 = vmatprep.mubr.bf16.mxu0 %v2555_v50 }
 0x3e7   : > { %v8297_v61 = vadd.f32 %v5849_v21, %v8200_v46  ;;  %5888 = vmatmul.mubr.bf16.gmra.mxu0 %v2556_v19 }
 0x3e8   : > { %v2292_v33 = vpop.f32.mrf.mxu1  ;;  %v6614_v44 = vpop.eup %6613 }
 0x3e9   : > { %v2407_v47 = vmul.f32 1.442695, %v8297_v61  ;;  %v8301_v34 = vadd.f32 %v2292_v33, %v8200_v46  ;;  %v5377_v22 = vadd.f32 -1.0, %v6614_v44  ;;  %vm2349_vm10 = vcmp.gt.f32.partialorder %v8297_v61, 0.0 }
 0x3ea   : > { %v5850_v6 = vpop.f32.mrf.mxu1  ;;  %v6616_v49 = vpop.eup %6615 }
 0x3eb   : > { %6621 = vpow2.f32 %v2407_v47  ;;  %v2403_v16 = vmul.f32 1.442695, %v8301_v34  ;;  %v2304_v12 = vadd.f32 %v5850_v6, %v8200_v46  ;;  %v5375_v11 = vadd.f32 -1.0, %v6616_v49 }
 0x3ec   : > { %v2295_v60 = vpop.f32.mrf.mxu1  ;;  %v2473_v62 = vmul.f32 1.6732632, %v5377_v22  ;;  %vm2347_vm9 = vcmp.gt.f32.partialorder %v8301_v34, 0.0 }
 0x3ed   : > { %6623 = vpow2.f32 %v2403_v16  ;;  %v2409_v32 = vmul.f32 1.442695, %v2304_v12  ;;  %v8306_v53 = vadd.f32 %v2295_v60, %v8200_v46  ;;  %v6618_v58 = vpop.eup %6617  ;;  %v2471_v36 = vmul.f32 1.6732632, %v5375_v11 }
 0x3ee   : > { %v6620_v9 = vpop.eup %6619  ;;  %v5378_v40 = vadd.f32 -1.0, %v6618_v58  ;;  %v2505_v10 = vsel %vm2345_vm4, %v8280_v15, %v2473_v62  ;;  %vm2350_vm8 = vcmp.gt.f32.partialorder %v2304_v12, 0.0 }
 0x3ef   : > { %6625 = vpow2.f32 %v2409_v32  ;;  %v5376_v42 = vadd.f32 -1.0, %v6620_v9  ;;  %v2405_v59 = vmul.f32 1.442695, %v8306_v53  ;;  %v2503_v5 = vsel %vm2343_vm5, %v8284_v0, %v2471_v36 }
 0x3f0   : > { %v2474_v41 = vmul.f32 1.6732632, %v5378_v40  ;;  %v2535_v63 = vmul.f32 1.050701, %v2503_v5  ;;  %v2537_v1 = vmul.f32 1.050701, %v2505_v10 }
 0x3f1   : > { %6627 = vpow2.f32 %v2405_v59  ;;  %v2472_v25 = vmul.f32 1.6732632, %v5376_v42  ;;  %vm2348_vm11 = vcmp.gt.f32.partialorder %v8306_v53, 0.0 }
 0x3f2   : > { %v2506_v35 = vsel %vm2346_vm6, %v8288_v31, %v2474_v41 }
 0x3f3   : > { %v2538_v52 = vmul.f32 1.050701, %v2506_v35  ;;  %v2504_v38 = vsel %vm2344_vm7, %v2280_v43, %v2472_v25 }
 0x3f4   : > { %v2536_v39 = vmul.f32 1.050701, %v2504_v38 }
 0x3f5   : > { %v2558_v14 = vpack.c.bf16 %v2538_v52, %v2537_v1  ;;  %v6302_v1 = vld [vmem:[#allocation13 + $0x30] sm:$0xff]  }
 0x3f6   : > { %v5853_v8 = vpop.f32.mrf.mxu1  ;;  %v2557_v13 = vpack.c.bf16 %v2536_v39, %v2535_v63  ;;  %v6301_v39 = vld [vmem:[#allocation13 + $0x38] sm:$0xff]  }
 0x3f7   : > { %v8316_v17 = vadd.f32 %v5853_v8, %v8200_v46  ;;  %5951 = vmatprep.subr.bf16.mxu0 %v6301_v39 }
 0x3f8   : > { %v6622_v0 = vpop.eup %6621  ;;  %v2308_v30 = vpop.f32.mrf.mxu1  ;;  %5891 = vmatprep.mubr.bf16.mxu0 %v2557_v13  ;;  %5952 = vmatpush3.bf16.msra.mxu0 %v6301_v39 }
 0x3f9   : > { %v2415_v37 = vmul.f32 1.442695, %v8316_v17  ;;  %v2309_v15 = vadd.f32 %v2308_v30, %v8200_v46  ;;  %5892 = vmatmul.mubr.bf16.gmra.mxu0 %v2558_v14  ;;  %v5381_v31 = vadd.f32 -1.0, %v6622_v0  ;;  %vm2353_vm13 = vcmp.gt.f32.partialorder %v8316_v17, 0.0  ;;  %5953 = vmatprep.subr.bf16.mxu0 %v6302_v1  ;;  %v6303_v30 = vld [vmem:[#allocation13 + $0x28] sm:$0xff]  }
 0x3fa   : > { %v6624_v24 = vpop.eup %6623  ;;  %v5854_v57 = vpop.f32.mrf.mxu1 }
 0x3fb   : > { %v5379_v29 = vadd.f32 -1.0, %v6624_v24  ;;  %6629 = vpow2.f32 %v2415_v37  ;;  %v2411_v51 = vmul.f32 1.442695, %v2309_v15  ;;  %v2320_v43 = vadd.f32 %v5854_v57, %v8200_v46 }
 0x3fc   : > { %v6626_v4 = vpop.eup %6625  ;;  %v2311_v26 = vpop.f32.mrf.mxu1  ;;  %v2477_v48 = vmul.f32 1.6732632, %v5381_v31  ;;  %vm2351_vm12 = vcmp.gt.f32.partialorder %v2309_v15, 0.0  ;;  %5954 = vmatpush3.bf16.msra.mxu0 %v6302_v1  ;;  %v6304_v31 = vld [vmem:[#allocation13 + $0x20] sm:$0xff]   ;;  %v6305_v1 = vld [vmem:[#allocation13 + $0x18] sm:$0xff]  }
 0x3fd   : > { %v5382_v3 = vadd.f32 -1.0, %v6626_v4  ;;  %v2312_v45 = vadd.f32 %v2311_v26, %v8200_v46  ;;  %v2475_v7 = vmul.f32 1.6732632, %v5379_v29  ;;  %6631 = vpow2.f32 %v2411_v51  ;;  %5955 = vmatprep.subr.bf16.mxu0 %v6303_v30 }
 0x3fe   : > { %v2417_v56 = vmul.f32 1.442695, %v2320_v43  ;;  %v6628_v55 = vpop.eup %6627  ;;  %v2509_v46 = vsel %vm2349_vm10, %v8297_v61, %v2477_v48  ;;  %vm2354_vm14 = vcmp.gt.f32.partialorder %v2320_v43, 0.0 }
 0x3ff   : > { %v2478_v2 = vmul.f32 1.6732632, %v5382_v3  ;;  %v2413_v27 = vmul.f32 1.442695, %v2312_v45  ;;  %v5380_v23 = vadd.f32 -1.0, %v6628_v55  ;;  %v2507_v21 = vsel %vm2347_vm9, %v8301_v34, %v2475_v7 }
 0x400   : > { %6633 = vpow2.f32 %v2417_v56  ;;  %v2539_v33 = vmul.f32 1.050701, %v2507_v21  ;;  %v2541_v47 = vmul.f32 1.050701, %v2509_v46  ;;  %vm2352_vm15 = vcmp.gt.f32.partialorder %v2312_v45, 0.0  ;;  %5956 = vmatpush3.bf16.msra.mxu0 %v6303_v30 }
 0x401   : > { %v2510_v28 = vsel %vm2350_vm8, %v2304_v12, %v2478_v2  ;;  %6635 = vpow2.f32 %v2413_v27  ;;  %v2476_v50 = vmul.f32 1.6732632, %v5380_v23  ;;  %5957 = vmatprep.subr.bf16.mxu0 %v6304_v31 }
 0x402   : > { %v2542_v54 = vmul.f32 1.050701, %v2510_v28 }
 0x403   : > { %v2508_v19 = vsel %vm2348_vm11, %v8306_v53, %v2476_v50 }
 0x404   : > { %v2540_v44 = vmul.f32 1.050701, %v2508_v19  ;;  %v2560_v22 = vpack.c.bf16 %v2542_v54, %v2541_v47  ;;  %5958 = vmatpush3.bf16.msra.mxu0 %v6304_v31 }
 0x405   : > { %5959 = vmatprep.subr.bf16.mxu0 %v6305_v1 }
 0x406   : > { %v2559_v6 = vpack.c.bf16 %v2540_v44, %v2539_v33 }
 0x408   : > { %v6630_v49 = vpop.eup %6629  ;;  %5895 = vmatprep.mubr.bf16.mxu0 %v2559_v6  ;;  %5960 = vmatpush3.bf16.msra.mxu0 %v6305_v1 }
 0x409   : > { %v5385_v16 = vadd.f32 -1.0, %v6630_v49  ;;  %5896 = vmatmul.mubr.bf16.gmra.mxu0 %v2560_v22 }
 0x40a   : > { %v6632_v12 = vpop.eup %6631 }
 0x40b   : > { %v5383_v11 = vadd.f32 -1.0, %v6632_v12  ;;  %v2481_v32 = vmul.f32 1.6732632, %v5385_v16 }
 0x40d   : > { %v6634_v34 = vpop.eup %6633  ;;  %v2479_v61 = vmul.f32 1.6732632, %v5383_v11  ;;  %v2513_v40 = vsel %vm2353_vm13, %v8316_v17, %v2481_v32  ;;  %v8333_v17 = vld [vmem:[%s9349_s9 + $0x3] ss:$0 sm:$0xff] }
 0x40e   : > { %v6636_v60 = vpop.eup %6635  ;;  %v5386_v58 = vadd.f32 -1.0, %v6634_v34  ;;  %v2545_v10 = vmul.f32 1.050701, %v2513_v40 }
 0x40f   : > { %v5384_v36 = vadd.f32 -1.0, %v6636_v60  ;;  %v2511_v53 = vsel %vm2351_vm12, %v2309_v15, %v2479_v61 }
 0x410   : > { %v2482_v9 = vmul.f32 1.6732632, %v5386_v58  ;;  %v2543_v5 = vmul.f32 1.050701, %v2511_v53 }
 0x411   : > { %v2480_v62 = vmul.f32 1.6732632, %v5384_v36 }
 0x412   : > { %v2514_v42 = vsel %vm2354_vm14, %v2320_v43, %v2482_v9 }
 0x413   : > { %v2546_v59 = vmul.f32 1.050701, %v2514_v42  ;;  %v2512_v41 = vsel %vm2352_vm15, %v2312_v45, %v2480_v62 }
 0x414   : > { %v2544_v25 = vmul.f32 1.050701, %v2512_v41 }
 0x415   : > { %v2562_v52 = vpack.c.bf16 %v2546_v59, %v2545_v10 }
 0x416   : > { %v2561_v35 = vpack.c.bf16 %v2544_v25, %v2543_v5 }
 0x418   : > { %5899 = vmatprep.mubr.bf16.mxu0 %v2561_v35 }
 0x419   : > { %5900 = vmatmul.mubr.bf16.gmra.mxu0 %v2562_v52 }
 0x462   : > { %v5873_v38 = vpop.f32.mrf.mxu0 }
 0x463   : > { %v2671_v15 = vadd.f32 %v5873_v38, %v8333_v17 }
 0x464   : > { %v2662_v63 = vpop.f32.mrf.mxu0 }
 0x465   : > { %v2663_v14 = vadd.f32 %v2662_v63, %v8333_v17 }
 0x466   : > { %v5874_v8 = vpop.f32.mrf.mxu0 }
 0x467   : > { %v2674_v13 = vadd.f32 %v5874_v8, %v8333_v17 }
 0x468   : > { %v2665_v0 = vpop.f32.mrf.mxu0 }
 0x469   : > { %v2666_v37 = vadd.f32 %v2665_v0, %v8333_v17  ;;  %v2790_v57 = vpack.c.bf16 %v2674_v13, %v2671_v15  ;;  %v6306_v0 = vld [vmem:[#allocation13 + $0x10] sm:$0xff]   ;;  %v6307_v15 = vld [vmem:[#allocation13 + $0x8] sm:$0xff]  }
 0x46a   : > { %5961 = vmatprep.subr.bf16.mxu0 %v6306_v0 }
 0x46b   : > { %v2789_v24 = vpack.c.bf16 %v2666_v37, %v2663_v14  ;;  %5962 = vmatpush3.bf16.msra.mxu0 %v6306_v0 }
 0x46c   : > { %5963 = vmatprep.subr.bf16.mxu0 %v6307_v15 }
 0x46d   : > { %5919 = vmatprep.mubr.bf16.mxu1 %v2789_v24 }
 0x46e   : > { %5920 = vmatmul.mubr.bf16.vlgmr.msra.gmra.mxu1 %v2790_v57 }
 0x46f   : > { %5964 = vmatpush3.bf16.msra.mxu0 %v6307_v15  ;;  %v6314_v15 = vld [vmem:[#allocation14 + $0x64] ss:$8 sps:$4 sm:$0xff]  }
 0x472   : > { %v5877_v29 = vpop.f32.mrf.mxu0 }
 0x473   : > { %v2687_v7 = vadd.f32 %v5877_v29, %v8333_v17 }
 0x474   : > { %v2678_v4 = vpop.f32.mrf.mxu0 }
 0x475   : > { %v2679_v3 = vadd.f32 %v2678_v4, %v8333_v17 }
 0x476   : > { %v5878_v51 = vpop.f32.mrf.mxu0 }
 0x477   : > { %v2690_v43 = vadd.f32 %v5878_v51, %v8333_v17  ;;  %v6308_v51 = vld [vmem:[#allocation13] sm:$0xff]  }
 0x478   : > { %v2681_v26 = vpop.f32.mrf.mxu0  ;;  %5965 = vmatprep.subr.bf16.mxu0 %v6308_v51 }
 0x479   : > { %v2682_v45 = vadd.f32 %v2681_v26, %v8333_v17  ;;  %v2792_v55 = vpack.c.bf16 %v2690_v43, %v2687_v7  ;;  %5966 = vmatpush3.bf16.msra.mxu0 %v6308_v51 }
 0x47b   : > { %v2791_v56 = vpack.c.bf16 %v2682_v45, %v2679_v3 }
 0x47d   : > { %5923 = vmatprep.mubr.bf16.mxu1 %v2791_v56 }
 0x47e   : > { %5924 = vmatmul.mubr.bf16.gmra.mxu1 %v2792_v55 }
 0x485   : > { %v5881_v48 = vpop.f32.mrf.mxu0 }
 0x486   : > { %v2703_v46 = vadd.f32 %v5881_v48, %v8333_v17 }
 0x487   : > { %v2694_v2 = vpop.f32.mrf.mxu0 }
 0x488   : > { %v2695_v21 = vadd.f32 %v2694_v2, %v8333_v17 }
 0x489   : > { %v5882_v27 = vpop.f32.mrf.mxu0 }
 0x48a   : > { %v2706_v23 = vadd.f32 %v5882_v27, %v8333_v17 }
 0x48b   : > { %v2697_v28 = vpop.f32.mrf.mxu0 }
 0x48c   : > { %v2698_v50 = vadd.f32 %v2697_v28, %v8333_v17  ;;  %v2794_v19 = vpack.c.bf16 %v2706_v23, %v2703_v46  ;;  %v8370_v23 = vld [vmem:[%s9349_s9 + $0x4] ss:$0 sm:$0xff] }
 0x48e   : > { %v2793_v54 = vpack.c.bf16 %v2698_v50, %v2695_v21 }
 0x490   : > { %5927 = vmatprep.mubr.bf16.mxu1 %v2793_v54 }
 0x491   : > { %5928 = vmatmul.mubr.bf16.gmra.mxu1 %v2794_v19 }
 0x496   : > { %v5885_v33 = vpop.f32.mrf.mxu0 }
 0x497   : > { %v2719_v12 = vadd.f32 %v5885_v33, %v8333_v17 }
 0x498   : > { %v2710_v44 = vpop.f32.mrf.mxu0 }
 0x499   : > { %v2711_v22 = vadd.f32 %v2710_v44, %v8333_v17 }
 0x49a   : > { %v5886_v47 = vpop.f32.mrf.mxu0 }
 0x49b   : > { %v2722_v6 = vadd.f32 %v5886_v47, %v8333_v17 }
 0x49c   : > { %v2713_v49 = vpop.f32.mrf.mxu0 }
 0x49d   : > { %v2714_v16 = vadd.f32 %v2713_v49, %v8333_v17  ;;  %v2796_v34 = vpack.c.bf16 %v2722_v6, %v2719_v12 }
 0x49f   : > { %v2795_v11 = vpack.c.bf16 %v2714_v16, %v2711_v22 }
 0x4a1   : > { %5931 = vmatprep.mubr.bf16.mxu1 %v2795_v11 }
 0x4a2   : > { %5932 = vmatmul.mubr.bf16.gmra.mxu1 %v2796_v34 }
 0x4a7   : > { %v5889_v60 = vpop.f32.mrf.mxu0 }
 0x4a8   : > { %v2735_v62 = vadd.f32 %v5889_v60, %v8333_v17 }
 0x4a9   : > { %v2726_v32 = vpop.f32.mrf.mxu0 }
 0x4aa   : > { %v2727_v9 = vadd.f32 %v2726_v32, %v8333_v17 }
 0x4ab   : > { %v5890_v61 = vpop.f32.mrf.mxu0 }
 0x4ac   : > { %v2738_v58 = vadd.f32 %v5890_v61, %v8333_v17 }
 0x4ad   : > { %v2729_v36 = vpop.f32.mrf.mxu0 }
 0x4ae   : > { %v2730_v53 = vadd.f32 %v2729_v36, %v8333_v17  ;;  %v2798_v42 = vpack.c.bf16 %v2738_v58, %v2735_v62 }
 0x4b0   : > { %v2797_v40 = vpack.c.bf16 %v2730_v53, %v2727_v9 }
 0x4b2   : > { %5935 = vmatprep.mubr.bf16.mxu1 %v2797_v40 }
 0x4b3   : > { %5936 = vmatmul.mubr.bf16.gmra.mxu1 %v2798_v42 }
 0x4b9   : > { %v5893_v59 = vpop.f32.mrf.mxu0 }
 0x4ba   : > { %v2751_v38 = vadd.f32 %v5893_v59, %v8333_v17 }
 0x4bb   : > { %v2742_v41 = vpop.f32.mrf.mxu0 }
 0x4bc   : > { %v2743_v35 = vadd.f32 %v2742_v41, %v8333_v17 }
 0x4bd   : > { %v5894_v5 = vpop.f32.mrf.mxu0 }
 0x4be   : > { %v2754_v25 = vadd.f32 %v5894_v5, %v8333_v17 }
 0x4bf   : > { %v2745_v10 = vpop.f32.mrf.mxu0 }
 0x4c0   : > { %v2746_v52 = vadd.f32 %v2745_v10, %v8333_v17  ;;  %v2800_v39 = vpack.c.bf16 %v2754_v25, %v2751_v38  ;;  %v6311_v38 = vld [vmem:[#allocation14 + $0x74] ss:$8 sps:$4 sm:$0xff]  }
 0x4c1   : > { %3846 = vmatprep.subr.bf16.mxu1 %v6311_v38 }
 0x4c2   : > { %v2799_v63 = vpack.c.bf16 %v2746_v52, %v2743_v35  ;;  %v6309_v52 = vld [vmem:[#allocation14 + $0x70] ss:$8 sps:$4 sm:$0xff]  }
 0x4c3   : > { %3847 = vmatpush1.bf16.msra.mxu1 %v6309_v52 }
 0x4c4   : > { %5939 = vmatprep.mubr.bf16.mxu1 %v2799_v63  ;;  %3848 = vmatprep.subr.bf16.mxu1 %v6314_v15 }
 0x4c5   : > { %5940 = vmatmul.mubr.bf16.gmra.mxu1 %v2800_v39 }
 0x4c9   : > { %v5897_v8 = vpop.f32.mrf.mxu0 }
 0x4ca   : > { %v2767_v31 = vadd.f32 %v5897_v8, %v8333_v17 }
 0x4cb   : > { %v2758_v13 = vpop.f32.mrf.mxu0 }
 0x4cc   : > { %v2759_v24 = vadd.f32 %v2758_v13, %v8333_v17 }
 0x4cd   : > { %v5898_v30 = vpop.f32.mrf.mxu0 }
 0x4ce   : > { %v2770_v14 = vadd.f32 %v5898_v30, %v8333_v17 }
 0x4cf   : > { %v2761_v37 = vpop.f32.mrf.mxu0 }
 0x4d0   : > { %v2762_v57 = vadd.f32 %v2761_v37, %v8333_v17  ;;  %v2802_v4 = vpack.c.bf16 %v2770_v14, %v2767_v31  ;;  %v6312_v37 = vld [vmem:[#allocation14 + $0x60] ss:$8 sps:$4 sm:$0xff]   ;;  %v6317_v31 = vld [vmem:[#allocation14 + $0x54] ss:$8 sps:$4 sm:$0xff]  }
 0x4d1   : > { %3849 = vmatpush1.bf16.msra.mxu1 %v6312_v37 }
 0x4d2   : > { %v2801_v29 = vpack.c.bf16 %v2762_v57, %v2759_v24  ;;  %3850 = vmatprep.subr.bf16.mxu1 %v6317_v31 }
 0x4d4   : > { %5943 = vmatprep.mubr.bf16.mxu1 %v2801_v29 }
 0x4d5   : > { %5944 = vmatmul.mubr.bf16.gmra.mxu1 %v2802_v4 }
 0x4d9   : > { %v5901_v43 = vpop.f32.mrf.mxu0 }
 0x4da   : > { %v2783_v48 = vadd.f32 %v5901_v43, %v8333_v17  ;;  %v6315_v43 = vld [vmem:[#allocation14 + $0x50] ss:$8 sps:$4 sm:$0xff]  }
 0x4db   : > { %v2774_v26 = vpop.f32.mrf.mxu0  ;;  %3851 = vmatpush1.bf16.msra.mxu1 %v6315_v43 }
 0x4dc   : > { %v2775_v56 = vadd.f32 %v2774_v26, %v8333_v17  ;;  %v6320_v26 = vld [vmem:[#allocation14 + $0x44] ss:$8 sps:$4 sm:$0xff]  }
 0x4dd   : > { %v5902_v3 = vpop.f32.mrf.mxu0  ;;  %3852 = vmatprep.subr.bf16.mxu1 %v6320_v26 }
 0x4de   : > { %v2786_v45 = vadd.f32 %v5902_v3, %v8333_v17 }
 0x4df   : > { %v2777_v7 = vpop.f32.mrf.mxu0 }
 0x4e0   : > { %v2778_v55 = vadd.f32 %v2777_v7, %v8333_v17  ;;  %v2804_v27 = vpack.c.bf16 %v2786_v45, %v2783_v48 }
 0x4e2   : > { %v2803_v2 = vpack.c.bf16 %v2778_v55, %v2775_v56  ;;  %v6318_v55 = vld [vmem:[#allocation14 + $0x40] ss:$8 sps:$4 sm:$0xff]  }
 0x4e3   : > { %3853 = vmatpush1.bf16.msra.mxu1 %v6318_v55 }
 0x4e4   : > { %5947 = vmatprep.mubr.bf16.mxu1 %v2803_v2 }
 0x4e5   : > { %5948 = vmatmul.mubr.bf16.gmra.mxu1 %v2804_v27 }
 0x52e   : > { %v5921_v28 = vpop.f32.mrf.mxu1 }
 0x52f   : > { %v2913_v21 = vadd.f32 %v5921_v28, %v8370_v23 }
 0x530   : > { %v2904_v50 = vpop.f32.mrf.mxu1 }
 0x531   : > { %v3067_v46 = vmul.f32 1.442695, %v2913_v21  ;;  %v2905_v54 = vadd.f32 %v2904_v50, %v8370_v23  ;;  %vm3033_vm0 = vcmp.gt.f32.partialorder %v2913_v21, 0.0 }
 0x532   : > { %v5922_v19 = vpop.f32.mrf.mxu1 }
 0x533   : > { %6637 = vpow2.f32 %v3067_v46  ;;  %v3063_v33 = vmul.f32 1.442695, %v2905_v54  ;;  %v2916_v17 = vadd.f32 %v5922_v19, %v8370_v23  ;;  %vm3031_vm1 = vcmp.gt.f32.partialorder %v2905_v54, 0.0 }
 0x534   : > { %v2907_v44 = vpop.f32.mrf.mxu1 }
 0x535   : > { %6639 = vpow2.f32 %v3063_v33  ;;  %v3069_v47 = vmul.f32 1.442695, %v2916_v17  ;;  %v2908_v6 = vadd.f32 %v2907_v44, %v8370_v23  ;;  %vm3034_vm2 = vcmp.gt.f32.partialorder %v2916_v17, 0.0 }
 0x537   : > { %6641 = vpow2.f32 %v3069_v47  ;;  %v3065_v49 = vmul.f32 1.442695, %v2908_v6  ;;  %vm3032_vm3 = vcmp.gt.f32.partialorder %v2908_v6, 0.0 }
 0x539   : > { %6643 = vpow2.f32 %v3065_v49 }
 0x53e   : > { %v5925_v16 = vpop.f32.mrf.mxu1 }
 0x53f   : > { %v8377_v34 = vadd.f32 %v5925_v16, %v8370_v23 }
 0x540   : > { %v6638_v22 = vpop.eup %6637  ;;  %v2920_v32 = vpop.f32.mrf.mxu1 }
 0x541   : > { %v5405_v11 = vadd.f32 -1.0, %v6638_v22  ;;  %v3075_v58 = vmul.f32 1.442695, %v8377_v34  ;;  %v8381_v36 = vadd.f32 %v2920_v32, %v8370_v23  ;;  %vm3037_vm4 = vcmp.gt.f32.partialorder %v8377_v34, 0.0 }
 0x542   : > { %v6640_v12 = vpop.eup %6639  ;;  %v5926_v62 = vpop.f32.mrf.mxu1 }
 0x543   : > { %v5403_v60 = vadd.f32 -1.0, %v6640_v12  ;;  %v3161_v42 = vmul.f32 1.6732632, %v5405_v11  ;;  %6645 = vpow2.f32 %v3075_v58  ;;  %v3071_v59 = vmul.f32 1.442695, %v8381_v36 }
 0x544   : > { %v6642_v61 = vpop.eup %6641  ;;  %v8385_v25 = vadd.f32 %v5926_v62, %v8370_v23  ;;  %v2923_v10 = vpop.f32.mrf.mxu1  ;;  %vm3035_vm5 = vcmp.gt.f32.partialorder %v8381_v36, 0.0 }
 0x545   : > { %v3159_v9 = vmul.f32 1.6732632, %v5403_v60  ;;  %v5406_v53 = vadd.f32 -1.0, %v6642_v61  ;;  %6647 = vpow2.f32 %v3071_v59  ;;  %v8388_v35 = vadd.f32 %v2923_v10, %v8370_v23 }
 0x546   : > { %v6644_v40 = vpop.eup %6643  ;;  %v3077_v8 = vmul.f32 1.442695, %v8385_v25  ;;  %v3193_v13 = vsel %vm3033_vm0, %v2913_v21, %v3161_v42  ;;  %vm3038_vm6 = vcmp.gt.f32.partialorder %v8385_v25, 0.0 }
 0x547   : > { %v3162_v41 = vmul.f32 1.6732632, %v5406_v53  ;;  %v5404_v5 = vadd.f32 -1.0, %v6644_v40  ;;  %v3191_v63 = vsel %vm3031_vm1, %v2905_v54, %v3159_v9  ;;  %v3073_v0 = vmul.f32 1.442695, %v8388_v35 }
 0x548   : > { %6649 = vpow2.f32 %v3077_v8  ;;  %v3223_v24 = vmul.f32 1.050701, %v3191_v63  ;;  %v3225_v29 = vmul.f32 1.050701, %v3193_v13  ;;  %vm3036_vm7 = vcmp.gt.f32.partialorder %v8388_v35, 0.0 }
 0x549   : > { %v3194_v39 = vsel %vm3034_vm2, %v2916_v17, %v3162_v41  ;;  %v3160_v1 = vmul.f32 1.6732632, %v5404_v5  ;;  %6651 = vpow2.f32 %v3073_v0 }
 0x54a   : > { %v3226_v30 = vmul.f32 1.050701, %v3194_v39 }
 0x54b   : > { %v3192_v14 = vsel %vm3032_vm3, %v2908_v6, %v3160_v1 }
 0x54c   : > { %v3224_v57 = vmul.f32 1.050701, %v3192_v14  ;;  %v3256_v51 = vpack.c.bf16 %v3226_v30, %v3225_v29 }
 0x54e   : > { %v3255_v4 = vpack.c.bf16 %v3224_v57, %v3223_v24 }
 0x550   : > { %5967 = vmatprep.mubr.bf16.mxu0 %v3255_v4  ;;  %v6646_v7 = vpop.eup %6645 }
 0x551   : > { %v5929_v3 = vpop.f32.mrf.mxu1  ;;  %5968 = vmatmul.mubr.bf16.vlgmr.msra.gmra.mxu0 %v3256_v51  ;;  %v5409_v28 = vadd.f32 -1.0, %v6646_v7 }
 0x552   : > { %v8393_v45 = vadd.f32 %v5929_v3, %v8370_v23  ;;  %v6648_v27 = vpop.eup %6647 }
 0x553   : > { %v2936_v56 = vpop.f32.mrf.mxu1  ;;  %v5407_v50 = vadd.f32 -1.0, %v6648_v27  ;;  %v3165_v6 = vmul.f32 1.6732632, %v5409_v28 }
 0x554   : > { %v3083_v48 = vmul.f32 1.442695, %v8393_v45  ;;  %v8397_v2 = vadd.f32 %v2936_v56, %v8370_v23  ;;  %vm3041_vm8 = vcmp.gt.f32.partialorder %v8393_v45, 0.0 }
 0x555   : > { %v5930_v21 = vpop.f32.mrf.mxu1  ;;  %v6650_v33 = vpop.eup %6649  ;;  %v3163_v17 = vmul.f32 1.6732632, %v5407_v50  ;;  %v3197_v61 = vsel %vm3037_vm4, %v8377_v34, %v3165_v6 }
 0x556   : > { %6653 = vpow2.f32 %v3083_v48  ;;  %v3079_v46 = vmul.f32 1.442695, %v8397_v2  ;;  %v8401_v54 = vadd.f32 %v5930_v21, %v8370_v23  ;;  %v6652_v47 = vpop.eup %6651  ;;  %v5410_v49 = vadd.f32 -1.0, %v6650_v33 }
 0x557   : > { %v2939_v19 = vpop.f32.mrf.mxu1  ;;  %v5408_v22 = vadd.f32 -1.0, %v6652_v47  ;;  %v3195_v60 = vsel %vm3035_vm5, %v8381_v36, %v3163_v17  ;;  %v3229_v42 = vmul.f32 1.050701, %v3197_v61  ;;  %vm3039_vm9 = vcmp.gt.f32.partialorder %v8397_v2, 0.0 }
 0x558   : > { %v8404_v44 = vadd.f32 %v2939_v19, %v8370_v23  ;;  %6655 = vpow2.f32 %v3079_v46  ;;  %v3085_v16 = vmul.f32 1.442695, %v8401_v54  ;;  %v3166_v12 = vmul.f32 1.6732632, %v5410_v49 }
 0x559   : > { %v3164_v32 = vmul.f32 1.6732632, %v5408_v22  ;;  %v3227_v62 = vmul.f32 1.050701, %v3195_v60  ;;  %vm3042_vm10 = vcmp.gt.f32.partialorder %v8401_v54, 0.0 }
 0x55a   : > { %v3081_v11 = vmul.f32 1.442695, %v8404_v44  ;;  %6657 = vpow2.f32 %v3085_v16  ;;  %v3198_v58 = vsel %vm3038_vm6, %v8385_v25, %v3166_v12  ;;  %vm3040_vm11 = vcmp.gt.f32.partialorder %v8404_v44, 0.0 }
 0x55b   : > { %v3230_v9 = vmul.f32 1.050701, %v3198_v58  ;;  %v3196_v53 = vsel %vm3036_vm7, %v8388_v35, %v3164_v32 }
 0x55c   : > { %6659 = vpow2.f32 %v3081_v11  ;;  %v3228_v40 = vmul.f32 1.050701, %v3196_v53 }
 0x55d   : > { %v3258_v36 = vpack.c.bf16 %v3230_v9, %v3229_v42 }
 0x55e   : > { %v3257_v59 = vpack.c.bf16 %v3228_v40, %v3227_v62 }
 0x560   : > { %5971 = vmatprep.mubr.bf16.mxu0 %v3257_v59 }
 0x561   : > { %5972 = vmatmul.mubr.bf16.gmra.mxu0 %v3258_v36 }
 0x562   : > { %v5933_v41 = vpop.f32.mrf.mxu1 }
 0x563   : > { %v6654_v5 = vpop.eup %6653  ;;  %v8417_v10 = vadd.f32 %v5933_v41, %v8370_v23 }
 0x564   : > { %v2952_v34 = vpop.f32.mrf.mxu1  ;;  %v5413_v35 = vadd.f32 -1.0, %v6654_v5 }
 0x565   : > { %v3091_v25 = vmul.f32 1.442695, %v8417_v10  ;;  %v8421_v52 = vadd.f32 %v2952_v34, %v8370_v23  ;;  %v6656_v38 = vpop.eup %6655  ;;  %vm3045_vm12 = vcmp.gt.f32.partialorder %v8417_v10, 0.0 }
 0x566   : > { %v5934_v63 = vpop.f32.mrf.mxu1  ;;  %v5411_v39 = vadd.f32 -1.0, %v6656_v38  ;;  %v3169_v15 = vmul.f32 1.6732632, %v5413_v35 }
 0x567   : > { %6661 = vpow2.f32 %v3091_v25  ;;  %v3087_v1 = vmul.f32 1.442695, %v8421_v52  ;;  %v8425_v8 = vadd.f32 %v5934_v63, %v8370_v23  ;;  %v6658_v0 = vpop.eup %6657  ;;  %vm3043_vm13 = vcmp.gt.f32.partialorder %v8421_v52, 0.0 }
 0x568   : > { %v2955_v13 = vpop.f32.mrf.mxu1  ;;  %v3167_v30 = vmul.f32 1.6732632, %v5411_v39  ;;  %v5414_v24 = vadd.f32 -1.0, %v6658_v0  ;;  %v3201_v26 = vsel %vm3041_vm8, %v8393_v45, %v3169_v15 }
 0x569   : > { %6663 = vpow2.f32 %v3087_v1  ;;  %v8428_v14 = vadd.f32 %v2955_v13, %v8370_v23  ;;  %v6660_v37 = vpop.eup %6659  ;;  %v3093_v57 = vmul.f32 1.442695, %v8425_v8  ;;  %v3233_v27 = vmul.f32 1.050701, %v3201_v26 }
 0x56a   : > { %v5412_v31 = vadd.f32 -1.0, %v6660_v37  ;;  %v3170_v4 = vmul.f32 1.6732632, %v5414_v24  ;;  %v3199_v51 = vsel %vm3039_vm9, %v8397_v2, %v3167_v30  ;;  %vm3046_vm14 = vcmp.gt.f32.partialorder %v8425_v8, 0.0 }
 0x56b   : > { %v3089_v29 = vmul.f32 1.442695, %v8428_v14  ;;  %6665 = vpow2.f32 %v3093_v57  ;;  %v3231_v55 = vmul.f32 1.050701, %v3199_v51  ;;  %vm3044_vm15 = vcmp.gt.f32.partialorder %v8428_v14, 0.0 }
 0x56c   : > { %v3168_v43 = vmul.f32 1.6732632, %v5412_v31  ;;  %v3202_v3 = vsel %vm3042_vm10, %v8401_v54, %v3170_v4 }
 0x56d   : > { %6667 = vpow2.f32 %v3089_v29  ;;  %v3234_v7 = vmul.f32 1.050701, %v3202_v3 }
 0x56e   : > { %v3200_v56 = vsel %vm3040_vm11, %v8404_v44, %v3168_v43 }
 0x56f   : > { %v3232_v48 = vmul.f32 1.050701, %v3200_v56  ;;  %v3260_v21 = vpack.c.bf16 %v3234_v7, %v3233_v27 }
 0x571   : > { %v3259_v28 = vpack.c.bf16 %v3232_v48, %v3231_v55 }
 0x573   : > { %v5937_v2 = vpop.f32.mrf.mxu1  ;;  %5975 = vmatprep.mubr.bf16.mxu0 %v3259_v28 }
 0x574   : > { %v6662_v50 = vpop.eup %6661  ;;  %v8441_v46 = vadd.f32 %v5937_v2, %v8370_v23  ;;  %5976 = vmatmul.mubr.bf16.gmra.mxu0 %v3260_v21 }
 0x575   : > { %v5417_v19 = vadd.f32 -1.0, %v6662_v50  ;;  %v2968_v54 = vpop.f32.mrf.mxu1 }
 0x576   : > { %v6664_v45 = vpop.eup %6663  ;;  %v3099_v17 = vmul.f32 1.442695, %v8441_v46  ;;  %v8445_v44 = vadd.f32 %v2968_v54, %v8370_v23  ;;  %vm3049_vm2 = vcmp.gt.f32.partialorder %v8441_v46, 0.0 }
 0x577   : > { %v5415_v33 = vadd.f32 -1.0, %v6664_v45  ;;  %v5938_v47 = vpop.f32.mrf.mxu1  ;;  %v3173_v12 = vmul.f32 1.6732632, %v5417_v19 }
 0x578   : > { %v6666_v6 = vpop.eup %6665  ;;  %6669 = vpow2.f32 %v3099_v17  ;;  %v2980_v22 = vadd.f32 %v5938_v47, %v8370_v23  ;;  %v3095_v60 = vmul.f32 1.442695, %v8445_v44  ;;  %vm3047_vm1 = vcmp.gt.f32.partialorder %v8445_v44, 0.0 }
 0x579   : > { %v3171_v49 = vmul.f32 1.6732632, %v5415_v33  ;;  %v5418_v11 = vadd.f32 -1.0, %v6666_v6  ;;  %v2971_v32 = vpop.f32.mrf.mxu1  ;;  %v3205_v42 = vsel %vm3045_vm12, %v8417_v10, %v3173_v12 }
 0x57a   : > { %v6668_v16 = vpop.eup %6667  ;;  %v3101_v58 = vmul.f32 1.442695, %v2980_v22  ;;  %6671 = vpow2.f32 %v3095_v60  ;;  %v2972_v53 = vadd.f32 %v2971_v32, %v8370_v23  ;;  %v3237_v38 = vmul.f32 1.050701, %v3205_v42 }
 0x57b   : > { %v5416_v61 = vadd.f32 -1.0, %v6668_v16  ;;  %v3174_v9 = vmul.f32 1.6732632, %v5418_v11  ;;  %v3203_v62 = vsel %vm3043_vm13, %v8421_v52, %v3171_v49  ;;  %vm3050_vm0 = vcmp.gt.f32.partialorder %v2980_v22, 0.0 }
 0x57c   : > { %6673 = vpow2.f32 %v3101_v58  ;;  %v3097_v41 = vmul.f32 1.442695, %v2972_v53  ;;  %v3235_v34 = vmul.f32 1.050701, %v3203_v62  ;;  %vm3048_vm3 = vcmp.gt.f32.partialorder %v2972_v53, 0.0 }
 0x57d   : > { %v3172_v40 = vmul.f32 1.6732632, %v5416_v61  ;;  %v3206_v59 = vsel %vm3046_vm14, %v8425_v8, %v3174_v9 }
 0x57e   : > { %v3238_v36 = vmul.f32 1.050701, %v3206_v59  ;;  %6675 = vpow2.f32 %v3097_v41 }
 0x57f   : > { %v3204_v5 = vsel %vm3044_vm15, %v8428_v14, %v3172_v40 }
 0x580   : > { %v3236_v25 = vmul.f32 1.050701, %v3204_v5  ;;  %v3262_v52 = vpack.c.bf16 %v3238_v36, %v3237_v38 }
 0x582   : > { %v3261_v35 = vpack.c.bf16 %v3236_v25, %v3235_v34 }
 0x584   : > { %5979 = vmatprep.mubr.bf16.mxu0 %v3261_v35 }
 0x585   : > { %v5941_v63 = vpop.f32.mrf.mxu1  ;;  %5980 = vmatmul.mubr.bf16.gmra.mxu0 %v3262_v52  ;;  %v6670_v39 = vpop.eup %6669 }
 0x586   : > { %v8459_v10 = vadd.f32 %v5941_v63, %v8370_v23  ;;  %v5421_v30 = vadd.f32 -1.0, %v6670_v39 }
 0x587   : > { %v2984_v1 = vpop.f32.mrf.mxu1  ;;  %v6672_v0 = vpop.eup %6671 }
 0x588   : > { %v3107_v8 = vmul.f32 1.442695, %v8459_v10  ;;  %v8463_v13 = vadd.f32 %v2984_v1, %v8370_v23  ;;  %v5419_v15 = vadd.f32 -1.0, %v6672_v0  ;;  %v3177_v26 = vmul.f32 1.6732632, %v5421_v30 }
 0x589   : > { %v5942_v14 = vpop.f32.mrf.mxu1  ;;  %v6674_v37 = vpop.eup %6673  ;;  %vm3053_vm4 = vcmp.gt.f32.partialorder %v8459_v10, 0.0 }
 0x58a   : > { %6677 = vpow2.f32 %v3107_v8  ;;  %v3103_v24 = vmul.f32 1.442695, %v8463_v13  ;;  %v5422_v57 = vadd.f32 -1.0, %v6674_v37  ;;  %v8467_v31 = vadd.f32 %v5942_v14, %v8370_v23 }
 0x58b   : > { %v2987_v29 = vpop.f32.mrf.mxu1  ;;  %v3175_v4 = vmul.f32 1.6732632, %v5419_v15  ;;  %v6676_v43 = vpop.eup %6675  ;;  %v3209_v21 = vsel %vm3049_vm2, %v8441_v46, %v3177_v26  ;;  %vm3051_vm5 = vcmp.gt.f32.partialorder %v8463_v13, 0.0 }
 0x58c   : > { %6679 = vpow2.f32 %v3103_v24  ;;  %v8470_v51 = vadd.f32 %v2987_v29, %v8370_v23  ;;  %v3178_v3 = vmul.f32 1.6732632, %v5422_v57  ;;  %v3109_v7 = vmul.f32 1.442695, %v8467_v31 }
 0x58d   : > { %v5420_v56 = vadd.f32 -1.0, %v6676_v43  ;;  %v3207_v27 = vsel %vm3047_vm1, %v8445_v44, %v3175_v4  ;;  %v3241_v54 = vmul.f32 1.050701, %v3209_v21  ;;  %vm3054_vm6 = vcmp.gt.f32.partialorder %v8467_v31, 0.0  ;;  %v6321_v43 = vld [vmem:[#allocation14 + $0x30] ss:$8 sps:$4 sm:$0xff]  }
 0x58e   : > { %v3105_v55 = vmul.f32 1.442695, %v8470_v51  ;;  %v3210_v48 = vsel %vm3050_vm0, %v2980_v22, %v3178_v3  ;;  %6681 = vpow2.f32 %v3109_v7  ;;  %v3239_v45 = vmul.f32 1.050701, %v3207_v27  ;;  %v6323_v7 = vld [vmem:[#allocation14 + $0x34] ss:$8 sps:$4 sm:$0xff]  }
 0x58f   : > { %v3176_v28 = vmul.f32 1.6732632, %v5420_v56  ;;  %v3242_v50 = vmul.f32 1.050701, %v3210_v48  ;;  %vm3052_vm7 = vcmp.gt.f32.partialorder %v8470_v51, 0.0  ;;  %3854 = vmatprep.subr.bf16.mxu1 %v6323_v7 }
 0x590   : > { %6683 = vpow2.f32 %v3105_v55  ;;  %3855 = vmatpush1.bf16.msra.mxu1 %v6321_v43 }
 0x591   : > { %v3208_v2 = vsel %vm3048_vm3, %v2972_v53, %v3176_v28  ;;  %v3264_v47 = vpack.c.bf16 %v3242_v50, %v3241_v54 }
 0x592   : > { %v3240_v19 = vmul.f32 1.050701, %v3208_v2 }
 0x594   : > { %v3263_v17 = vpack.c.bf16 %v3240_v19, %v3239_v45  ;;  %v6326_v19 = vld [vmem:[#allocation14 + $0x24] ss:$8 sps:$4 sm:$0xff]  }
 0x595   : > { %v5945_v33 = vpop.f32.mrf.mxu1  ;;  %3856 = vmatprep.subr.bf16.mxu1 %v6326_v19 }
 0x596   : > { %v8479_v6 = vadd.f32 %v5945_v33, %v8370_v23  ;;  %5983 = vmatprep.mubr.bf16.mxu0 %v3263_v17  ;;  %v6324_v33 = vld [vmem:[#allocation14 + $0x20] ss:$8 sps:$4 sm:$0xff]  }
 0x597   : > { %v6678_v49 = vpop.eup %6677  ;;  %v3000_v22 = vpop.f32.mrf.mxu1  ;;  %5984 = vmatmul.mubr.bf16.gmra.mxu0 %v3264_v47  ;;  %3857 = vmatpush1.bf16.msra.mxu1 %v6324_v33 }
 0x598   : > { %v3115_v44 = vmul.f32 1.442695, %v8479_v6  ;;  %v8483_v16 = vadd.f32 %v3000_v22, %v8370_v23  ;;  %v5425_v12 = vadd.f32 -1.0, %v6678_v49  ;;  %vm3057_vm9 = vcmp.gt.f32.partialorder %v8479_v6, 0.0 }
 0x599   : > { %v6680_v46 = vpop.eup %6679  ;;  %v5946_v11 = vpop.f32.mrf.mxu1 }
 0x59a   : > { %v5423_v60 = vadd.f32 -1.0, %v6680_v46  ;;  %6685 = vpow2.f32 %v3115_v44  ;;  %v3111_v32 = vmul.f32 1.442695, %v8483_v16  ;;  %v8487_v61 = vadd.f32 %v5946_v11, %v8370_v23  ;;  %v6329_v44 = vld [vmem:[#allocation14 + $0x14] ss:$8 sps:$4 sm:$0xff]  }
 0x59b   : > { %v3003_v58 = vpop.f32.mrf.mxu1  ;;  %v6682_v9 = vpop.eup %6681  ;;  %v3181_v42 = vmul.f32 1.6732632, %v5425_v12  ;;  %vm3055_vm8 = vcmp.gt.f32.partialorder %v8483_v16, 0.0  ;;  %v6327_v11 = vld [vmem:[#allocation14 + $0x10] ss:$8 sps:$4 sm:$0xff]   ;;  %3858 = vmatprep.subr.bf16.mxu1 %v6329_v44 }
 0x59c   : > { %v3179_v53 = vmul.f32 1.6732632, %v5423_v60  ;;  %v8490_v62 = vadd.f32 %v3003_v58, %v8370_v23  ;;  %v5426_v59 = vadd.f32 -1.0, %v6682_v9  ;;  %6687 = vpow2.f32 %v3111_v32  ;;  %3859 = vmatpush1.bf16.msra.mxu1 %v6327_v11 }
 0x59d   : > { %v6684_v40 = vpop.eup %6683  ;;  %v3117_v36 = vmul.f32 1.442695, %v8487_v61  ;;  %v3213_v35 = vsel %vm3053_vm4, %v8459_v10, %v3181_v42  ;;  %vm3058_vm10 = vcmp.gt.f32.partialorder %v8487_v61, 0.0  ;;  %v6330_v42 = vld [vmem:[#allocation14] ss:$8 sps:$4 sm:$0xff]  }
 0x59e   : > { %v5424_v41 = vadd.f32 -1.0, %v6684_v40  ;;  %v3182_v5 = vmul.f32 1.6732632, %v5426_v59  ;;  %v3113_v34 = vmul.f32 1.442695, %v8490_v62  ;;  %v3211_v25 = vsel %vm3051_vm5, %v8463_v13, %v3179_v53 }
 0x59f   : > { %6689 = vpow2.f32 %v3117_v36  ;;  %v3243_v1 = vmul.f32 1.050701, %v3211_v25  ;;  %v3245_v0 = vmul.f32 1.050701, %v3213_v35  ;;  %vm3056_vm11 = vcmp.gt.f32.partialorder %v8490_v62, 0.0 }
 0x5a0   : > { %v3180_v38 = vmul.f32 1.6732632, %v5424_v41  ;;  %v3214_v52 = vsel %vm3054_vm6, %v8467_v31, %v3182_v5  ;;  %6691 = vpow2.f32 %v3113_v34  ;;  %v6332_v53 = vld [vmem:[#allocation14 + $0x4] ss:$8 sps:$4 sm:$0xff]   ;;  %v7224_v36 = vmov 0  }
 0x5a1   : > { %v3246_v63 = vmul.f32 1.050701, %v3214_v52  ;;  %3860 = vmatprep.subr.bf16.mxu1 %v6332_v53  ;;  %3878 = vmatprep.mubr.bf16.mxu1 %v7224_v36 }
 0x5a2   : > { %v3212_v39 = vsel %vm3052_vm7, %v8470_v51, %v3180_v38  ;;  %3861 = vmatpush1.bf16.msra.mxu1 %v6330_v42 }
 0x5a3   : > { %v3244_v8 = vmul.f32 1.050701, %v3212_v39  ;;  %v3266_v37 = vpack.c.bf16 %v3246_v63, %v3245_v0 }
 0x5a5   : > { %v5949_v30 = vpop.f32.mrf.mxu1  ;;  %v3265_v14 = vpack.c.bf16 %v3244_v8, %v3243_v1 }
 0x5a6   : > { %v8503_v13 = vadd.f32 %v5949_v30, %v8370_v23 }
 0x5a7   : > { %v3016_v15 = vpop.f32.mrf.mxu1  ;;  %v6686_v24 = vpop.eup %6685  ;;  %5987 = vmatprep.mubr.bf16.mxu0 %v3265_v14 }
 0x5a8   : > { %v3123_v10 = vmul.f32 1.442695, %v8503_v13  ;;  %v8507_v57 = vadd.f32 %v3016_v15, %v8370_v23  ;;  %5988 = vmatmul.mubr.bf16.gmra.mxu0 %v3266_v37  ;;  %v5429_v29 = vadd.f32 -1.0, %v6686_v24  ;;  %vm3061_vm14 = vcmp.gt.f32.partialorder %v8503_v13, 0.0 }
 0x5a9   : > { %v5950_v31 = vpop.f32.mrf.mxu1  ;;  %v6688_v26 = vpop.eup %6687 }
 0x5aa   : > { %6693 = vpow2.f32 %v3123_v10  ;;  %v3119_v4 = vmul.f32 1.442695, %v8507_v57  ;;  %v8511_v51 = vadd.f32 %v5950_v31, %v8370_v23  ;;  %v5427_v56 = vadd.f32 -1.0, %v6688_v26  ;;  %v8538_v10 = vld [vmem:[%s9349_s9 + $0x5] ss:$0 sm:$0xff] }
 0x5ab   : > { %v3019_v3 = vpop.f32.mrf.mxu1  ;;  %v3185_v28 = vmul.f32 1.6732632, %v5429_v29  ;;  %vm3059_vm13 = vcmp.gt.f32.partialorder %v8507_v57, 0.0 }
 0x5ac   : > { %6695 = vpow2.f32 %v3119_v4  ;;  %v3125_v55 = vmul.f32 1.442695, %v8511_v51  ;;  %v8515_v48 = vadd.f32 %v3019_v3, %v8370_v23  ;;  %v6690_v27 = vpop.eup %6689  ;;  %v3183_v21 = vmul.f32 1.6732632, %v5427_v56 }
 0x5ad   : > { %v6692_v50 = vpop.eup %6691  ;;  %v5430_v2 = vadd.f32 -1.0, %v6690_v27  ;;  %v3217_v49 = vsel %vm3057_vm9, %v8479_v6, %v3185_v28  ;;  %vm3062_vm12 = vcmp.gt.f32.partialorder %v8511_v51, 0.0 }
 0x5ae   : > { %6697 = vpow2.f32 %v3125_v55  ;;  %v3121_v45 = vmul.f32 1.442695, %v8515_v48  ;;  %v5428_v54 = vadd.f32 -1.0, %v6692_v50  ;;  %v3215_v23 = vsel %vm3055_vm8, %v8483_v16, %v3183_v21 }
 0x5af   : > { %v3186_v17 = vmul.f32 1.6732632, %v5430_v2  ;;  %v3247_v60 = vmul.f32 1.050701, %v3215_v23  ;;  %v3249_v58 = vmul.f32 1.050701, %v3217_v49 }
 0x5b0   : > { %6699 = vpow2.f32 %v3121_v45  ;;  %v3184_v47 = vmul.f32 1.6732632, %v5428_v54  ;;  %vm3060_vm15 = vcmp.gt.f32.partialorder %v8515_v48, 0.0 }
 0x5b1   : > { %v3218_v22 = vsel %vm3058_vm10, %v8487_v61, %v3186_v17 }
 0x5b2   : > { %v3250_v46 = vmul.f32 1.050701, %v3218_v22  ;;  %v3216_v12 = vsel %vm3056_vm11, %v8490_v62, %v3184_v47 }
 0x5b3   : > { %v3248_v32 = vmul.f32 1.050701, %v3216_v12 }
 0x5b4   : > { %v3268_v40 = vpack.c.bf16 %v3250_v46, %v3249_v58 }
 0x5b5   : > { %v3267_v9 = vpack.c.bf16 %v3248_v32, %v3247_v60 }
 0x5b7   : > { %v6694_v16 = vpop.eup %6693  ;;  %5991 = vmatprep.mubr.bf16.mxu0 %v3267_v9 }
 0x5b8   : > { %v5433_v61 = vadd.f32 -1.0, %v6694_v16  ;;  %5992 = vmatmul.mubr.bf16.gmra.mxu0 %v3268_v40 }
 0x5b9   : > { %v6696_v6 = vpop.eup %6695 }
 0x5ba   : > { %v5431_v59 = vadd.f32 -1.0, %v6696_v6  ;;  %v3189_v25 = vmul.f32 1.6732632, %v5433_v61 }
 0x5bb   : > { %v6698_v41 = vpop.eup %6697 }
 0x5bc   : > { %v5434_v62 = vadd.f32 -1.0, %v6698_v41  ;;  %v3187_v5 = vmul.f32 1.6732632, %v5431_v59  ;;  %v3221_v1 = vsel %vm3061_vm14, %v8503_v13, %v3189_v25 }
 0x5bd   : > { %v6700_v34 = vpop.eup %6699  ;;  %v3253_v37 = vmul.f32 1.050701, %v3221_v1 }
 0x5be   : > { %v3190_v38 = vmul.f32 1.6732632, %v5434_v62  ;;  %v5432_v35 = vadd.f32 -1.0, %v6700_v34  ;;  %v3219_v63 = vsel %vm3059_vm13, %v8507_v57, %v3187_v5  ;;  %v6333_v62 = vld [vmem:[#allocation16 + $0x70] ss:$8 sps:$4 sm:$0xff]  }
 0x5bf   : > { %v3251_v30 = vmul.f32 1.050701, %v3219_v63  ;;  %v6335_v5 = vld [vmem:[#allocation16 + $0x74] ss:$8 sps:$4 sm:$0xff]   ;;  %v6336_v63 = vld [vmem:[#allocation16 + $0x60] ss:$8 sps:$4 sm:$0xff]  }
 0x5c0   : > { %v3222_v52 = vsel %vm3062_vm12, %v8511_v51, %v3190_v38  ;;  %v3188_v39 = vmul.f32 1.6732632, %v5432_v35  ;;  %v6338_v38 = vld [vmem:[#allocation16 + $0x64] ss:$8 sps:$4 sm:$0xff]   ;;  %4724 = vmatprep.subr.bf16.mxu0 %v6335_v5  ;;  %5999 = vmatprep.subr.bf16.mxu1 %v6335_v5 }
 0x5c1   : > { %v3254_v8 = vmul.f32 1.050701, %v3222_v52  ;;  %4725 = vmatpush1.bf16.msra.mxu0 %v6333_v62 }
 0x5c2   : > { %v3220_v0 = vsel %vm3060_vm15, %v8515_v48, %v3188_v39  ;;  %4726 = vmatprep.subr.bf16.mxu0 %v6338_v38 }
 0x5c3   : > { %v3252_v14 = vmul.f32 1.050701, %v3220_v0  ;;  %v3270_v24 = vpack.c.bf16 %v3254_v8, %v3253_v37  ;;  %v6341_v0 = vld [vmem:[#allocation16 + $0x54] ss:$8 sps:$4 sm:$0xff]  }
 0x5c5   : > { %v3269_v15 = vpack.c.bf16 %v3252_v14, %v3251_v30  ;;  %4727 = vmatpush1.bf16.msra.mxu0 %v6336_v63 }
 0x5c6   : > { %4728 = vmatprep.subr.bf16.mxu0 %v6341_v0 }
 0x5c7   : > { %5995 = vmatprep.mubr.bf16.mxu0 %v3269_v15 }
 0x5c8   : > { %5996 = vmatmul.mubr.bf16.gmra.mxu0 %v3270_v24 }
 0x611   : > { %v5969_v57 = vpop.f32.mrf.mxu0 }
 0x612   : > { %v3379_v13 = vadd.f32 %v5969_v57, %v8538_v10 }
 0x613   : > { %v3370_v31 = vpop.f32.mrf.mxu0 }
 0x614   : > { %v3371_v29 = vadd.f32 %v3370_v31, %v8538_v10  ;;  %v3533_v26 = vmul.f32 1.442695, %v3379_v13  ;;  %vm3499_vm3 = vcmp.gt.f32.partialorder %v3379_v13, 0.0 }
 0x615   : > { %v5970_v4 = vpop.f32.mrf.mxu0 }
 0x616   : > { %v3529_v51 = vmul.f32 1.442695, %v3371_v29  ;;  %v3382_v43 = vadd.f32 %v5970_v4, %v8538_v10  ;;  %vm3497_vm0 = vcmp.gt.f32.partialorder %v3371_v29, 0.0  ;;  %v6339_v4 = vld [vmem:[#allocation16 + $0x50] ss:$8 sps:$4 sm:$0xff]  }
 0x617   : > { %v3373_v3 = vpop.f32.mrf.mxu0  ;;  %4729 = vmatpush1.bf16.msra.mxu0 %v6339_v4 }
 0x618   : > { %6701 = vpow2.f32 %v3529_v51  ;;  %v3535_v7 = vmul.f32 1.442695, %v3382_v43  ;;  %v3374_v56 = vadd.f32 %v3373_v3, %v8538_v10  ;;  %vm3500_vm2 = vcmp.gt.f32.partialorder %v3382_v43, 0.0 }
 0x61a   : > { %6703 = vpow2.f32 %v3535_v7  ;;  %v3531_v55 = vmul.f32 1.442695, %v3374_v56  ;;  %vm3498_vm1 = vcmp.gt.f32.partialorder %v3374_v56, 0.0 }
 0x61b   : > { %6705 = vpow2.f32 %v3533_v26  ;;  %v6344_v26 = vld [vmem:[#allocation16 + $0x44] ss:$8 sps:$4 sm:$0xff]  }
 0x61c   : > { %6707 = vpow2.f32 %v3531_v55  ;;  %4730 = vmatprep.subr.bf16.mxu0 %v6344_v26 }
 0x621   : > { %v5973_v48 = vpop.f32.mrf.mxu0 }
 0x622   : > { %v8545_v28 = vadd.f32 %v5973_v48, %v8538_v10 }
 0x623   : > { %v3386_v50 = vpop.f32.mrf.mxu0 }
 0x624   : > { %v8548_v45 = vadd.f32 %v3386_v50, %v8538_v10  ;;  %v3541_v23 = vmul.f32 1.442695, %v8545_v28  ;;  %vm3503_vm7 = vcmp.gt.f32.partialorder %v8545_v28, 0.0 }
 0x625   : > { %v6702_v27 = vpop.eup %6701  ;;  %v5974_v33 = vpop.f32.mrf.mxu0 }
 0x626   : > { %v5443_v21 = vadd.f32 -1.0, %v6702_v27  ;;  %v3537_v47 = vmul.f32 1.442695, %v8548_v45  ;;  %v8553_v44 = vadd.f32 %v5974_v33, %v8538_v10  ;;  %vm3501_vm4 = vcmp.gt.f32.partialorder %v8548_v45, 0.0 }
 0x627   : > { %v6704_v2 = vpop.eup %6703  ;;  %v3389_v46 = vpop.f32.mrf.mxu0 }
 0x628   : > { %v6706_v19 = vpop.eup %6705  ;;  %v3625_v54 = vmul.f32 1.6732632, %v5443_v21  ;;  %v5446_v49 = vadd.f32 -1.0, %v6704_v2  ;;  %6709 = vpow2.f32 %v3537_v47  ;;  %v8556_v12 = vadd.f32 %v3389_v46, %v8538_v10  ;;  %v6342_v2 = vld [vmem:[#allocation16 + $0x40] ss:$8 sps:$4 sm:$0xff]  }
 0x629   : > { %v6708_v17 = vpop.eup %6707  ;;  %v5445_v11 = vadd.f32 -1.0, %v6706_v19  ;;  %v3543_v58 = vmul.f32 1.442695, %v8553_v44  ;;  %6711 = vpow2.f32 %v3541_v23  ;;  %v6347_v19 = vld [vmem:[#allocation16 + $0x34] ss:$8 sps:$4 sm:$0xff]   ;;  %4731 = vmatpush1.bf16.msra.mxu0 %v6342_v2  ;;  %vm3504_vm6 = vcmp.gt.f32.partialorder %v8553_v44, 0.0 }
 0x62a   : > { %v5444_v22 = vadd.f32 -1.0, %v6708_v17  ;;  %v3657_v60 = vsel %vm3497_vm0, %v3371_v29, %v3625_v54  ;;  %v3539_v16 = vmul.f32 1.442695, %v8556_v12  ;;  %v3628_v9 = vmul.f32 1.6732632, %v5446_v49  ;;  %4732 = vmatprep.subr.bf16.mxu0 %v6347_v19 }
 0x62b   : > { %6713 = vpow2.f32 %v3543_v58  ;;  %v3689_v40 = vmul.f32 1.050701, %v3657_v60  ;;  %v3627_v6 = vmul.f32 1.6732632, %v5445_v11  ;;  %vm3502_vm5 = vcmp.gt.f32.partialorder %v8556_v12, 0.0 }
 0x62c   : > { %v3626_v32 = vmul.f32 1.6732632, %v5444_v22  ;;  %6715 = vpow2.f32 %v3539_v16  ;;  %v3660_v59 = vsel %vm3500_vm2, %v3382_v43, %v3628_v9  ;;  %v6345_v47 = vld [vmem:[#allocation16 + $0x30] ss:$8 sps:$4 sm:$0xff]   ;;  %v6350_v22 = vld [vmem:[#allocation16 + $0x24] ss:$8 sps:$4 sm:$0xff]  }
 0x62d   : > { %v3659_v41 = vsel %vm3499_vm3, %v3379_v13, %v3627_v6  ;;  %v3692_v34 = vmul.f32 1.050701, %v3660_v59  ;;  %4733 = vmatpush1.bf16.msra.mxu0 %v6345_v47  ;;  %v6348_v58 = vld [vmem:[#allocation16 + $0x20] ss:$8 sps:$4 sm:$0xff]  }
 0x62e   : > { %v3658_v53 = vsel %vm3498_vm1, %v3374_v56, %v3626_v32  ;;  %v3691_v35 = vmul.f32 1.050701, %v3659_v41  ;;  %4734 = vmatprep.subr.bf16.mxu0 %v6350_v22 }
 0x62f   : > { %v3690_v42 = vmul.f32 1.050701, %v3658_v53 }
 0x630   : > { %v3722_v30 = vpack.c.bf16 %v3692_v34, %v3691_v35 }
 0x631   : > { %v3721_v61 = vpack.c.bf16 %v3690_v42, %v3689_v40  ;;  %4735 = vmatpush1.bf16.msra.mxu0 %v6348_v58 }
 0x633   : > { %3879 = vmatmul.mubr.bf16.vlgmr.msra.gmra.mxu1 %v3721_v61 }
 0x634   : > { %3888 = vmatprep.mubr.bf16.mxu1 %v7224_v36  ;;  %v5977_v25 = vpop.f32.mrf.mxu0  ;;  %6015 = vmatpush1.bf16.msra.mxu1 %v6333_v62  ;;  %v6351_v62 = vld [vmem:[#allocation16 + $0x10] ss:$8 sps:$4 sm:$0xff]  }
 0x635   : > { %v6710_v39 = vpop.eup %6709  ;;  %v8562_v1 = vadd.f32 %v5977_v25, %v8538_v10  ;;  %6000 = vmatprep.subr.bf16.mxu1 %v6338_v38  ;;  %v6356_v38 = vld [vmem:[#allocation16 + $0x4] ss:$8 sps:$4 sm:$0xff]  }
 0x636   : > { %v3402_v52 = vpop.f32.mrf.mxu0  ;;  %v5447_v14 = vadd.f32 -1.0, %v6710_v39  ;;  %v6712_v15 = vpop.eup %6711 }
 0x637   : > { %v8565_v8 = vadd.f32 %v3402_v52, %v8538_v10  ;;  %v3549_v43 = vmul.f32 1.442695, %v8562_v1  ;;  %v5449_v48 = vadd.f32 -1.0, %v6712_v15  ;;  %vm3507_vm11 = vcmp.gt.f32.partialorder %v8562_v1, 0.0 }
 0x638   : > { %v5978_v37 = vpop.f32.mrf.mxu0  ;;  %v6714_v13 = vpop.eup %6713  ;;  %v3629_v31 = vmul.f32 1.6732632, %v5447_v14  ;;  %6016 = vmatpush1.bf16.msra.mxu1 %v6336_v63 }
 0x639   : > { %v3545_v24 = vmul.f32 1.442695, %v8565_v8  ;;  %v8569_v57 = vadd.f32 %v5978_v37, %v8538_v10  ;;  %v6716_v51 = vpop.eup %6715  ;;  %v5450_v3 = vadd.f32 -1.0, %v6714_v13  ;;  %6001 = vmatprep.subr.bf16.mxu1 %v6341_v0  ;;  %v6354_v37 = vld [vmem:[#allocation16] ss:$8 sps:$4 sm:$0xff]   ;;  %vm3505_vm8 = vcmp.gt.f32.partialorder %v8565_v8, 0.0 }
 0x63a   : > { %v3405_v29 = vpop.f32.mrf.mxu0  ;;  %v5448_v7 = vadd.f32 -1.0, %v6716_v51  ;;  %v3661_v27 = vsel %vm3501_vm4, %v8548_v45, %v3629_v31  ;;  %v3631_v45 = vmul.f32 1.6732632, %v5449_v48 }
 0x63b   : > { %3889 = vmatmul.mubr.bf16.gmra.mxu1 %v3722_v30  ;;  %6717 = vpow2.f32 %v3545_v24  ;;  %v3551_v56 = vmul.f32 1.442695, %v8569_v57  ;;  %v8575_v55 = vadd.f32 %v3405_v29, %v8538_v10  ;;  %v3632_v54 = vmul.f32 1.6732632, %v5450_v3 }
 0x63c   : > { %3898 = vmatprep.mubr.bf16.mxu1 %v7224_v36  ;;  %v3630_v21 = vmul.f32 1.6732632, %v5448_v7  ;;  %6017 = vmatpush1.bf16.msra.mxu1 %v6339_v4  ;;  %v3693_v17 = vmul.f32 1.050701, %v3661_v27  ;;  %vm3508_vm10 = vcmp.gt.f32.partialorder %v8569_v57, 0.0 }
 0x63d   : > { %6719 = vpow2.f32 %v3551_v56  ;;  %v3547_v50 = vmul.f32 1.442695, %v8575_v55  ;;  %6002 = vmatprep.subr.bf16.mxu1 %v6344_v26  ;;  %v3664_v46 = vsel %vm3504_vm6, %v8553_v44, %v3632_v54  ;;  %v6353_v44 = vld [vmem:[#allocation16 + $0x14] ss:$8 sps:$4 sm:$0xff]   ;;  %vm3506_vm9 = vcmp.gt.f32.partialorder %v8575_v55, 0.0 }
 0x63e   : > { %6721 = vpow2.f32 %v3549_v43  ;;  %v3662_v33 = vsel %vm3502_vm5, %v8556_v12, %v3630_v21  ;;  %v3663_v12 = vsel %vm3503_vm7, %v8545_v28, %v3631_v45  ;;  %v3696_v16 = vmul.f32 1.050701, %v3664_v46  ;;  %4736 = vmatprep.subr.bf16.mxu0 %v6353_v44 }
 0x63f   : > { %6723 = vpow2.f32 %v3547_v50  ;;  %v3694_v23 = vmul.f32 1.050701, %v3662_v33  ;;  %v3695_v42 = vmul.f32 1.050701, %v3663_v12  ;;  %4737 = vmatpush1.bf16.msra.mxu0 %v6351_v62 }
 0x640   : > { %6018 = vmatpush1.bf16.msra.mxu1 %v6342_v2  ;;  %4738 = vmatprep.subr.bf16.mxu0 %v6356_v38 }
 0x641   : > { %v3723_v49 = vpack.c.bf16 %v3694_v23, %v3693_v17  ;;  %6003 = vmatprep.subr.bf16.mxu1 %v6347_v19  ;;  %v3724_v34 = vpack.c.bf16 %v3696_v16, %v3695_v42 }
 0x643   : > { %3899 = vmatmul.mubr.bf16.gmra.mxu1 %v3723_v49  ;;  %4739 = vmatpush1.bf16.msra.mxu0 %v6354_v37 }
 0x644   : > { %3908 = vmatprep.mubr.bf16.mxu1 %v7224_v36  ;;  %6019 = vmatpush1.bf16.msra.mxu1 %v6345_v47 }
 0x645   : > { %v5981_v11 = vpop.f32.mrf.mxu0  ;;  %6004 = vmatprep.subr.bf16.mxu1 %v6350_v22 }
 0x646   : > { %v8587_v60 = vadd.f32 %v5981_v11, %v8538_v10 }
 0x647   : > { %v3418_v32 = vpop.f32.mrf.mxu0 }
 0x648   : > { %v8591_v9 = vadd.f32 %v3418_v32, %v8538_v10  ;;  %v6718_v53 = vpop.eup %6717  ;;  %v3557_v28 = vmul.f32 1.442695, %v8587_v60  ;;  %6020 = vmatpush1.bf16.msra.mxu1 %v6348_v58  ;;  %vm3511_vm15 = vcmp.gt.f32.partialorder %v8587_v60, 0.0 }
 0x649   : > { %v5982_v40 = vpop.f32.mrf.mxu0  ;;  %v5451_v6 = vadd.f32 -1.0, %v6718_v53  ;;  %6005 = vmatprep.subr.bf16.mxu1 %v6353_v44 }
 0x64a   : > { %v3553_v61 = vmul.f32 1.442695, %v8591_v9  ;;  %v8596_v59 = vadd.f32 %v5982_v40, %v8538_v10  ;;  %v6720_v5 = vpop.eup %6719  ;;  %vm3509_vm12 = vcmp.gt.f32.partialorder %v8591_v9, 0.0 }
 0x64b   : > { %v3421_v41 = vpop.f32.mrf.mxu0  ;;  %v6722_v35 = vpop.eup %6721  ;;  %v3633_v52 = vmul.f32 1.6732632, %v5451_v6  ;;  %3909 = vmatmul.mubr.bf16.gmra.mxu1 %v3724_v34  ;;  %v5454_v30 = vadd.f32 -1.0, %v6720_v5 }
 0x64c   : > { %v8599_v25 = vadd.f32 %v3421_v41, %v8538_v10  ;;  %6725 = vpow2.f32 %v3553_v61  ;;  %v6724_v63 = vpop.eup %6723  ;;  %v3559_v39 = vmul.f32 1.442695, %v8596_v59  ;;  %3918 = vmatprep.mubr.bf16.mxu1 %v7224_v36  ;;  %v5453_v15 = vadd.f32 -1.0, %v6722_v35  ;;  %6021 = vmatpush1.bf16.msra.mxu1 %v6351_v62 }
 0x64d   : > { %v5452_v14 = vadd.f32 -1.0, %v6724_v63  ;;  %6727 = vpow2.f32 %v3557_v28  ;;  %v3665_v24 = vsel %vm3505_vm8, %v8565_v8, %v3633_v52  ;;  %6006 = vmatprep.subr.bf16.mxu1 %v6356_v38  ;;  %v3636_v31 = vmul.f32 1.6732632, %v5454_v30 }
 0x64e   : > { %v3555_v0 = vmul.f32 1.442695, %v8599_v25  ;;  %6729 = vpow2.f32 %v3559_v39  ;;  %v3697_v4 = vmul.f32 1.050701, %v3665_v24  ;;  %v3635_v43 = vmul.f32 1.6732632, %v5453_v15 }
 0x64f   : > { %v3634_v13 = vmul.f32 1.6732632, %v5452_v14  ;;  %v3668_v3 = vsel %vm3508_vm10, %v8569_v57, %v3636_v31  ;;  %vm3510_vm13 = vcmp.gt.f32.partialorder %v8599_v25, 0.0  ;;  %vm3512_vm14 = vcmp.gt.f32.partialorder %v8596_v59, 0.0 }
 0x650   : > { %6731 = vpow2.f32 %v3555_v0  ;;  %6022 = vmatpush1.bf16.msra.mxu1 %v6354_v37  ;;  %v3667_v7 = vsel %vm3507_vm11, %v8562_v1, %v3635_v43 }
 0x651   : > { %v3666_v29 = vsel %vm3506_vm9, %v8575_v55, %v3634_v13  ;;  %v3700_v55 = vmul.f32 1.050701, %v3668_v3  ;;  %v3699_v57 = vmul.f32 1.050701, %v3667_v7 }
 0x652   : > { %v3698_v51 = vmul.f32 1.050701, %v3666_v29 }
 0x653   : > { %v3726_v23 = vpack.c.bf16 %v3700_v55, %v3699_v57 }
 0x654   : > { %v3725_v26 = vpack.c.bf16 %v3698_v51, %v3697_v4 }
 0x656   : > { %3919 = vmatmul.mubr.bf16.gmra.mxu1 %v3725_v26 }
 0x657   : > { %v5985_v8 = vpop.f32.mrf.mxu0  ;;  %3928 = vmatprep.mubr.bf16.mxu1 %v7224_v36 }
 0x658   : > { %v8614_v48 = vadd.f32 %v5985_v8, %v8538_v10 }
 0x659   : > { %v6726_v56 = vpop.eup %6725  ;;  %v3434_v27 = vpop.f32.mrf.mxu0 }
 0x65a   : > { %v5455_v21 = vadd.f32 -1.0, %v6726_v56  ;;  %v8617_v50 = vadd.f32 %v3434_v27, %v8538_v10  ;;  %v6728_v2 = vpop.eup %6727  ;;  %v3565_v1 = vmul.f32 1.442695, %v8614_v48  ;;  %vm3515_vm3 = vcmp.gt.f32.partialorder %v8614_v48, 0.0 }
 0x65b   : > { %v5986_v19 = vpop.f32.mrf.mxu0  ;;  %v6730_v54 = vpop.eup %6729  ;;  %v5457_v12 = vadd.f32 -1.0, %v6728_v2 }
 0x65c   : > { %v3637_v33 = vmul.f32 1.6732632, %v5455_v21  ;;  %v3561_v45 = vmul.f32 1.442695, %v8617_v50  ;;  %v8622_v47 = vadd.f32 %v5986_v19, %v8538_v10  ;;  %v5458_v22 = vadd.f32 -1.0, %v6730_v54 }
 0x65d   : > { %v6732_v17 = vpop.eup %6731  ;;  %v3437_v49 = vpop.f32.mrf.mxu0  ;;  %v3639_v28 = vmul.f32 1.6732632, %v5457_v12  ;;  %vm3513_vm0 = vcmp.gt.f32.partialorder %v8617_v50, 0.0 }
 0x65e   : > { %v5456_v46 = vadd.f32 -1.0, %v6732_v17  ;;  %v3438_v11 = vadd.f32 %v3437_v49, %v8538_v10  ;;  %6733 = vpow2.f32 %v3561_v45  ;;  %3929 = vmatmul.mubr.bf16.gmra.mxu1 %v3726_v23  ;;  %v3669_v32 = vsel %vm3509_vm12, %v8591_v9, %v3637_v33 }
 0x65f   : > { %v3567_v16 = vmul.f32 1.442695, %v8622_v47  ;;  %3938 = vmatprep.mubr.bf16.mxu1 %v7224_v36  ;;  %6735 = vpow2.f32 %v3565_v1  ;;  %v3640_v53 = vmul.f32 1.6732632, %v5458_v22  ;;  %v3701_v42 = vmul.f32 1.050701, %v3669_v32 }
 0x660   : > { %v3638_v58 = vmul.f32 1.6732632, %v5456_v46  ;;  %v3563_v44 = vmul.f32 1.442695, %v3438_v11  ;;  %v3671_v62 = vsel %vm3511_vm15, %v8587_v60, %v3639_v28  ;;  %vm3514_vm1 = vcmp.gt.f32.partialorder %v3438_v11, 0.0 }
 0x661   : > { %6737 = vpow2.f32 %v3567_v16  ;;  %v3672_v61 = vsel %vm3512_vm14, %v8596_v59, %v3640_v53  ;;  %v3703_v35 = vmul.f32 1.050701, %v3671_v62  ;;  %vm3516_vm2 = vcmp.gt.f32.partialorder %v8622_v47, 0.0  ;;  %v6359_v22 = vld [vmem:[#allocation16 + $0xf4] ss:$8 sps:$4 sm:$0xff]  }
 0x662   : > { %v3670_v40 = vsel %vm3510_vm13, %v8599_v25, %v3638_v58  ;;  %6739 = vpow2.f32 %v3563_v44  ;;  %v3704_v5 = vmul.f32 1.050701, %v3672_v61  ;;  %4740 = vmatprep.subr.bf16.mxu0 %v6359_v22  ;;  %6007 = vmatprep.subr.bf16.mxu1 %v6359_v22  ;;  %v6362_v28 = vld [vmem:[#allocation16 + $0xe4] ss:$8 sps:$4 sm:$0xff]  }
 0x663   : > { %v3702_v6 = vmul.f32 1.050701, %v3670_v40  ;;  %v6374_v22 = vld [vmem:[#allocation16 + $0xa4] ss:$8 sps:$4 sm:$0xff]  }
 0x664   : > { %v3728_v39 = vpack.c.bf16 %v3704_v5, %v3703_v35 }
 0x665   : > { %v3727_v9 = vpack.c.bf16 %v3702_v6, %v3701_v42 }
 0x667   : > { %3939 = vmatmul.mubr.bf16.gmra.mxu1 %v3727_v9 }
 0x668   : > { %v5989_v41 = vpop.f32.mrf.mxu0  ;;  %3948 = vmatprep.mubr.bf16.mxu1 %v7224_v36 }
 0x669   : > { %v8637_v34 = vadd.f32 %v5989_v41, %v8538_v10  ;;  %v6360_v41 = vld [vmem:[#allocation16 + $0xe0] ss:$8 sps:$4 sm:$0xff]  }
 0x66a   : > { %v3450_v25 = vpop.f32.mrf.mxu0 }
 0x66b   : > { %v8640_v38 = vadd.f32 %v3450_v25, %v8538_v10  ;;  %v6734_v63 = vpop.eup %6733  ;;  %v3573_v30 = vmul.f32 1.442695, %v8637_v34  ;;  %vm3519_vm7 = vcmp.gt.f32.partialorder %v8637_v34, 0.0 }
 0x66c   : > { %v5990_v52 = vpop.f32.mrf.mxu0  ;;  %v5459_v0 = vadd.f32 -1.0, %v6734_v63  ;;  %v6736_v37 = vpop.eup %6735 }
 0x66d   : > { %v3569_v59 = vmul.f32 1.442695, %v8640_v38  ;;  %v8645_v60 = vadd.f32 %v5990_v52, %v8538_v10  ;;  %v5461_v26 = vadd.f32 -1.0, %v6736_v37  ;;  %vm3517_vm4 = vcmp.gt.f32.partialorder %v8640_v38, 0.0  ;;  %v6365_v52 = vld [vmem:[#allocation16 + $0xd4] ss:$8 sps:$4 sm:$0xff]  }
 0x66e   : > { %v3453_v14 = vpop.f32.mrf.mxu0  ;;  %v6738_v24 = vpop.eup %6737  ;;  %v3641_v13 = vmul.f32 1.6732632, %v5459_v0 }
 0x66f   : > { %6741 = vpow2.f32 %v3569_v59  ;;  %v8648_v15 = vadd.f32 %v3453_v14, %v8538_v10  ;;  %3949 = vmatmul.mubr.bf16.gmra.mxu1 %v3728_v39  ;;  %v6740_v31 = vpop.eup %6739  ;;  %v3575_v29 = vmul.f32 1.442695, %v8645_v60  ;;  %v5462_v51 = vadd.f32 -1.0, %v6738_v24  ;;  %v6363_v39 = vld [vmem:[#allocation16 + $0xd0] ss:$8 sps:$4 sm:$0xff]  }
 0x670   : > { %3958 = vmatprep.mubr.bf16.mxu1 %v7224_v36  ;;  %v5460_v43 = vadd.f32 -1.0, %v6740_v31  ;;  %6743 = vpow2.f32 %v3573_v30  ;;  %v3673_v3 = vsel %vm3513_vm0, %v8617_v50, %v3641_v13  ;;  %v3643_v21 = vmul.f32 1.6732632, %v5461_v26  ;;  %v6368_v24 = vld [vmem:[#allocation16 + $0xc4] ss:$8 sps:$4 sm:$0xff]  }
 0x671   : > { %v3571_v4 = vmul.f32 1.442695, %v8648_v15  ;;  %6745 = vpow2.f32 %v3575_v29  ;;  %v3644_v7 = vmul.f32 1.6732632, %v5462_v51  ;;  %v3705_v55 = vmul.f32 1.050701, %v3673_v3 }
 0x672   : > { %v3642_v8 = vmul.f32 1.6732632, %v5460_v43  ;;  %v3675_v50 = vsel %vm3515_vm3, %v8614_v48, %v3643_v21  ;;  %vm3518_vm5 = vcmp.gt.f32.partialorder %v8648_v15, 0.0  ;;  %vm3520_vm6 = vcmp.gt.f32.partialorder %v8645_v60, 0.0  ;;  %v6366_v29 = vld [vmem:[#allocation16 + $0xc0] ss:$8 sps:$4 sm:$0xff]  }
 0x673   : > { %6747 = vpow2.f32 %v3571_v4  ;;  %v3676_v19 = vsel %vm3516_vm2, %v8622_v47, %v3644_v7  ;;  %v3707_v48 = vmul.f32 1.050701, %v3675_v50  ;;  %v6371_v7 = vld [vmem:[#allocation16 + $0xb4] ss:$8 sps:$4 sm:$0xff]  }
 0x674   : > { %v3674_v56 = vsel %vm3514_vm1, %v3438_v11, %v3642_v8  ;;  %v3708_v1 = vmul.f32 1.050701, %v3676_v19  ;;  %v6357_v11 = vld [vmem:[#allocation16 + $0xf0] ss:$8 sps:$4 sm:$0xff]  }
 0x675   : > { %v3706_v27 = vmul.f32 1.050701, %v3674_v56  ;;  %4741 = vmatpush2.bf16.msra.mxu0 %v6357_v11  ;;  %6023 = vmatpush2.bf16.msra.mxu1 %v6357_v11 }
 0x676   : > { %v3730_v42 = vpack.c.bf16 %v3708_v1, %v3707_v48  ;;  %4742 = vmatprep.subr.bf16.mxu0 %v6362_v28  ;;  %6008 = vmatprep.subr.bf16.mxu1 %v6362_v28  ;;  %v6380_v28 = vld [vmem:[#allocation16 + $0x84] ss:$8 sps:$4 sm:$0xff]  }
 0x677   : > { %v3729_v2 = vpack.c.bf16 %v3706_v27, %v3705_v55  ;;  %v6369_v27 = vld [vmem:[#allocation16 + $0xb0] ss:$8 sps:$4 sm:$0xff]  }
 0x678   : > { %v5993_v57 = vpop.f32.mrf.mxu0 }
 0x679   : > { %3959 = vmatmul.mubr.bf16.gmra.mxu1 %v3729_v2  ;;  %v8660_v17 = vadd.f32 %v5993_v57, %v8538_v10  ;;  %4743 = vmatpush2.bf16.msra.mxu0 %v6360_v41 }
 0x67a   : > { %v3466_v54 = vpop.f32.mrf.mxu0  ;;  %3968 = vmatprep.mubr.bf16.mxu1 %v7224_v36  ;;  %6024 = vmatpush2.bf16.msra.mxu1 %v6360_v41 }
 0x67b   : > { %v8663_v23 = vadd.f32 %v3466_v54, %v8538_v10  ;;  %v3581_v44 = vmul.f32 1.442695, %v8660_v17  ;;  %4744 = vmatprep.subr.bf16.mxu0 %v6365_v52  ;;  %6009 = vmatprep.subr.bf16.mxu1 %v6365_v52  ;;  %vm3523_vm11 = vcmp.gt.f32.partialorder %v8660_v17, 0.0 }
 0x67c   : > { %v6742_v33 = vpop.eup %6741  ;;  %v5994_v49 = vpop.f32.mrf.mxu0 }
 0x67d   : > { %v5463_v45 = vadd.f32 -1.0, %v6742_v33  ;;  %v3577_v47 = vmul.f32 1.442695, %v8663_v23  ;;  %v8668_v46 = vadd.f32 %v5994_v49, %v8538_v10  ;;  %v6744_v12 = vpop.eup %6743  ;;  %4745 = vmatpush2.bf16.msra.mxu0 %v6363_v39  ;;  %v6372_v49 = vld [vmem:[#allocation16 + $0xa0] ss:$8 sps:$4 sm:$0xff]   ;;  %vm3521_vm8 = vcmp.gt.f32.partialorder %v8663_v23, 0.0 }
 0x67e   : > { %v3469_v32 = vpop.f32.mrf.mxu0  ;;  %v6746_v58 = vpop.eup %6745  ;;  %v5465_v5 = vadd.f32 -1.0, %v6744_v12  ;;  %6025 = vmatpush2.bf16.msra.mxu1 %v6363_v39  ;;  %4746 = vmatprep.subr.bf16.mxu0 %v6368_v24 }
 0x67f   : > { %v3645_v16 = vmul.f32 1.6732632, %v5463_v45  ;;  %6749 = vpow2.f32 %v3577_v47  ;;  %v3583_v53 = vmul.f32 1.442695, %v8668_v46  ;;  %v8673_v6 = vadd.f32 %v3469_v32, %v8538_v10  ;;  %6010 = vmatprep.subr.bf16.mxu1 %v6368_v24  ;;  %v6377_v32 = vld [vmem:[#allocation16 + $0x94] ss:$8 sps:$4 sm:$0xff]  }
 0x680   : > { %v6748_v40 = vpop.eup %6747  ;;  %v5466_v9 = vadd.f32 -1.0, %v6746_v58  ;;  %v6375_v58 = vld [vmem:[#allocation16 + $0x90] ss:$8 sps:$4 sm:$0xff]   ;;  %vm3524_vm10 = vcmp.gt.f32.partialorder %v8668_v46, 0.0 }
 0x681   : > { %v5464_v61 = vadd.f32 -1.0, %v6748_v40  ;;  %6751 = vpow2.f32 %v3583_v53  ;;  %v3579_v62 = vmul.f32 1.442695, %v8673_v6  ;;  %3969 = vmatmul.mubr.bf16.gmra.mxu1 %v3730_v42  ;;  %v3677_v25 = vsel %vm3517_vm4, %v8640_v38, %v3645_v16  ;;  %4747 = vmatpush2.bf16.msra.mxu0 %v6366_v29 }
 0x682   : > { %6753 = vpow2.f32 %v3581_v44  ;;  %3978 = vmatprep.mubr.bf16.mxu1 %v7224_v36  ;;  %v3648_v63 = vmul.f32 1.6732632, %v5466_v9  ;;  %v3709_v0 = vmul.f32 1.050701, %v3677_v25  ;;  %v3647_v38 = vmul.f32 1.6732632, %v5465_v5  ;;  %6026 = vmatpush2.bf16.msra.mxu1 %v6366_v29 }
 0x683   : > { %v3646_v35 = vmul.f32 1.6732632, %v5464_v61  ;;  %6755 = vpow2.f32 %v3579_v62  ;;  %4748 = vmatprep.subr.bf16.mxu0 %v6371_v7  ;;  %6011 = vmatprep.subr.bf16.mxu1 %v6371_v7  ;;  %vm3522_vm9 = vcmp.gt.f32.partialorder %v8673_v6, 0.0  ;;  %v6378_v9 = vld [vmem:[#allocation16 + $0x80] ss:$8 sps:$4 sm:$0xff]  }
 0x684   : > { %v3680_v13 = vsel %vm3520_vm6, %v8645_v60, %v3648_v63  ;;  %v3679_v4 = vsel %vm3519_vm7, %v8637_v34, %v3647_v38 }
 0x685   : > { %v3678_v59 = vsel %vm3518_vm5, %v8648_v15, %v3646_v35  ;;  %v3712_v26 = vmul.f32 1.050701, %v3680_v13  ;;  %v3711_v34 = vmul.f32 1.050701, %v3679_v4  ;;  %4749 = vmatpush2.bf16.msra.mxu0 %v6369_v27 }
 0x686   : > { %v3710_v30 = vmul.f32 1.050701, %v3678_v59  ;;  %6027 = vmatpush2.bf16.msra.mxu1 %v6369_v27  ;;  %4750 = vmatprep.subr.bf16.mxu0 %v6374_v22 }
 0x687   : > { %v3732_v54 = vpack.c.bf16 %v3712_v26, %v3711_v34  ;;  %6012 = vmatprep.subr.bf16.mxu1 %v6374_v22 }
 0x688   : > { %v5997_v14 = vpop.f32.mrf.mxu0  ;;  %v3731_v37 = vpack.c.bf16 %v3710_v30, %v3709_v0 }
 0x689   : > { %v8690_v60 = vadd.f32 %v5997_v14, %v8538_v10  ;;  %4751 = vmatpush2.bf16.msra.mxu0 %v6372_v49 }
 0x68a   : > { %v3482_v31 = vpop.f32.mrf.mxu0  ;;  %3979 = vmatmul.mubr.bf16.gmra.mxu1 %v3731_v37  ;;  %4752 = vmatprep.subr.bf16.mxu0 %v6377_v32 }
 0x68b   : > { %v8685_v15 = vadd.f32 %v3482_v31, %v8538_v10  ;;  %3988 = vmatprep.mubr.bf16.mxu1 %v7224_v36  ;;  %v3589_v50 = vmul.f32 1.442695, %v8690_v60  ;;  %6028 = vmatpush2.bf16.msra.mxu1 %v6372_v49  ;;  %vm3527_vm15 = vcmp.gt.f32.partialorder %v8690_v60, 0.0 }
 0x68c   : > { %v5998_v51 = vpop.f32.mrf.mxu0  ;;  %v6750_v43 = vpop.eup %6749  ;;  %6013 = vmatprep.subr.bf16.mxu1 %v6377_v32 }
 0x68d   : > { %v3585_v3 = vmul.f32 1.442695, %v8685_v15  ;;  %v8694_v8 = vadd.f32 %v5998_v51, %v8538_v10  ;;  %v5467_v56 = vadd.f32 -1.0, %v6750_v43  ;;  %4753 = vmatpush2.bf16.msra.mxu0 %v6375_v58  ;;  %vm3525_vm12 = vcmp.gt.f32.partialorder %v8685_v15, 0.0 }
 0x68e   : > { %v3485_v55 = vpop.f32.mrf.mxu0  ;;  %v6752_v57 = vpop.eup %6751  ;;  %4754 = vmatprep.subr.bf16.mxu0 %v6380_v28 }
 0x68f   : > { %6757 = vpow2.f32 %v3585_v3  ;;  %v3591_v21 = vmul.f32 1.442695, %v8694_v8  ;;  %v8698_v2 = vadd.f32 %v3485_v55, %v8538_v10  ;;  %v6754_v19 = vpop.eup %6753  ;;  %v3649_v33 = vmul.f32 1.6732632, %v5467_v56  ;;  %6029 = vmatpush2.bf16.msra.mxu1 %v6375_v58 }
 0x690   : > { %v6756_v45 = vpop.eup %6755  ;;  %v5470_v47 = vadd.f32 -1.0, %v6752_v57  ;;  %v5469_v10 = vadd.f32 -1.0, %v6754_v19  ;;  %6014 = vmatprep.subr.bf16.mxu1 %v6380_v28  ;;  %vm3528_vm14 = vcmp.gt.f32.partialorder %v8694_v8, 0.0  ;;  %v5475_v3 = vld [vmem:[%s9349_s9 + $0x6] ss:$8 sm:$0x3] }
 0x691   : > { %v3587_v1 = vmul.f32 1.442695, %v8698_v2  ;;  %6759 = vpow2.f32 %v3591_v21  ;;  %v5468_v11 = vadd.f32 -1.0, %v6756_v45  ;;  %v3681_v12 = vsel %vm3521_vm8, %v8663_v23, %v3649_v33  ;;  %4755 = vmatpush2.bf16.msra.mxu0 %v6378_v9 }
 0x692   : > { %3989 = vmatmul.mubr.bf16.gmra.mxu1 %v3732_v54  ;;  %v3652_v16 = vmul.f32 1.6732632, %v5470_v47  ;;  %v3713_v53 = vmul.f32 1.050701, %v3681_v12  ;;  %v3651_v42 = vmul.f32 1.6732632, %v5469_v10  ;;  %v8726_v7 = vrot.slane %v5475_v3, %v7553_v18 }
 0x693   : > { %6761 = vpow2.f32 %v3587_v1  ;;  %3998 = vmatprep.mubr.bf16.mxu1 %v7224_v36  ;;  %v3650_v48 = vmul.f32 1.6732632, %v5468_v11  ;;  %6030 = vmatpush2.bf16.msra.mxu1 %v6378_v9  ;;  %vm3526_vm13 = vcmp.gt.f32.partialorder %v8698_v2, 0.0 }
 0x694   : > { %6763 = vpow2.f32 %v3589_v50  ;;  %v3684_v61 = vsel %vm3524_vm10, %v8668_v46, %v3652_v16 }
 0x695   : > { %v3682_v44 = vsel %vm3522_vm9, %v8673_v6, %v3650_v48  ;;  %v3683_v6 = vsel %vm3523_vm11, %v8660_v17, %v3651_v42  ;;  %v3716_v5 = vmul.f32 1.050701, %v3684_v61 }
 0x696   : > { %v3714_v40 = vmul.f32 1.050701, %v3682_v44  ;;  %v3715_v63 = vmul.f32 1.050701, %v3683_v6 }
 0x698   : > { %v3733_v23 = vpack.c.bf16 %v3714_v40, %v3713_v53  ;;  %v3734_v39 = vpack.c.bf16 %v3716_v5, %v3715_v63 }
 0x69a   : > { %3999 = vmatmul.mubr.bf16.gmra.mxu1 %v3733_v23 }
 0x69b   : > { %4008 = vmatprep.mubr.bf16.mxu1 %v7224_v36 }
 0x69c   : > { %v6758_v41 = vpop.eup %6757 }
 0x69d   : > { %v5471_v62 = vadd.f32 -1.0, %v6758_v41 }
 0x69e   : > { %v6760_v25 = vpop.eup %6759 }
 0x69f   : > { %v3653_v35 = vmul.f32 1.6732632, %v5471_v62  ;;  %v5474_v30 = vadd.f32 -1.0, %v6760_v25 }
 0x6a0   : > { %v6762_v52 = vpop.eup %6761 }
 0x6a1   : > { %v5472_v59 = vadd.f32 -1.0, %v6762_v52  ;;  %v6764_v46 = vpop.eup %6763  ;;  %v3685_v0 = vsel %vm3525_vm12, %v8685_v15, %v3653_v35  ;;  %v3656_v13 = vmul.f32 1.6732632, %v5474_v30 }
 0x6a2   : > { %4009 = vmatmul.mubr.bf16.gmra.mxu1 %v3734_v39  ;;  %v5473_v17 = vadd.f32 -1.0, %v6764_v46  ;;  %v3717_v37 = vmul.f32 1.050701, %v3685_v0 }
 0x6a3   : > { %v3654_v38 = vmul.f32 1.6732632, %v5472_v59  ;;  %4018 = vmatprep.mubr.bf16.mxu1 %v7224_v36  ;;  %v3688_v4 = vsel %vm3528_vm14, %v8694_v8, %v3656_v13  ;;  %v8729_v8 = vrot.slane %v5475_v3, %v7558_v20 }
 0x6a4   : > { %v3655_v29 = vmul.f32 1.6732632, %v5473_v17  ;;  %v3720_v51 = vmul.f32 1.050701, %v3688_v4 }
 0x6a5   : > { %v3686_v14 = vsel %vm3526_vm13, %v8698_v2, %v3654_v38 }
 0x6a6   : > { %v3718_v24 = vmul.f32 1.050701, %v3686_v14  ;;  %v3687_v15 = vsel %vm3527_vm15, %v8690_v60, %v3655_v29 }
 0x6a7   : > { %v3719_v43 = vmul.f32 1.050701, %v3687_v15 }
 0x6a8   : > { %v3735_v31 = vpack.c.bf16 %v3718_v24, %v3717_v37 }
 0x6a9   : > { %v3736_v26 = vpack.c.bf16 %v3720_v51, %v3719_v43 }
 0x6aa   : > { %4019 = vmatmul.mubr.bf16.gmra.mxu1 %v3735_v31 }
 0x6ab   : > { %4028 = vmatprep.mubr.bf16.mxu1 %v7224_v36 }
 0x6b2   : > { %4029 = vmatmul.mubr.bf16.gmra.mxu1 %v3736_v26 }
 0x6f3   : > { %v3880_v56 = vpop.f32.mrf.mxu1 }
 0x6f4   : > { %v8732_v55 = vadd.f32 %v3880_v56, %v8726_v7 }
 0x6f5   : > { %v3882_v60 = vpop.f32.mrf.mxu1 }
 0x6f6   : > { %v4103_v36 = vmul.f32 1.442695, %v8732_v55  ;;  %v3883_v27 = vadd.f32 %v3882_v60, %v8729_v8  ;;  %vm4039_vm0 = vcmp.gt.f32.partialorder %v8732_v55, 0.0 }
 0x6f7   : > { %v3884_v34 = vpop.f32.mrf.mxu1 }
 0x6f8   : > { %6765 = vpow2.f32 %v4103_v36  ;;  %v4105_v21 = vmul.f32 1.442695, %v3883_v27  ;;  %v3885_v2 = vadd.f32 %v3884_v34, %v8726_v7  ;;  %vm4040_vm2 = vcmp.gt.f32.partialorder %v3883_v27, 0.0 }
 0x6f9   : > { %v3886_v57 = vpop.f32.mrf.mxu1 }
 0x6fa   : > { %6767 = vpow2.f32 %v4105_v21  ;;  %v4107_v19 = vmul.f32 1.442695, %v3885_v2  ;;  %v3887_v54 = vadd.f32 %v3886_v57, %v8729_v8  ;;  %vm4041_vm1 = vcmp.gt.f32.partialorder %v3885_v2, 0.0 }
 0x6fb   : > { %v3890_v33 = vpop.f32.mrf.mxu1 }
 0x6fc   : > { %6769 = vpow2.f32 %v4107_v19  ;;  %v4109_v50 = vmul.f32 1.442695, %v3887_v54  ;;  %v8739_v1 = vadd.f32 %v3890_v33, %v8726_v7  ;;  %vm4042_vm3 = vcmp.gt.f32.partialorder %v3887_v54, 0.0 }
 0x6fd   : > { %v3892_v45 = vpop.f32.mrf.mxu1 }
 0x6fe   : > { %6771 = vpow2.f32 %v4109_v50  ;;  %v4111_v49 = vmul.f32 1.442695, %v8739_v1  ;;  %v8743_v22 = vadd.f32 %v3892_v45, %v8729_v8  ;;  %vm4043_vm6 = vcmp.gt.f32.partialorder %v8739_v1, 0.0 }
 0x6ff   : > { %v3894_v47 = vpop.f32.mrf.mxu1 }
 0x700   : > { %6773 = vpow2.f32 %v4111_v49  ;;  %v4113_v11 = vmul.f32 1.442695, %v8743_v22  ;;  %v8747_v10 = vadd.f32 %v3894_v47, %v8726_v7  ;;  %vm4044_vm4 = vcmp.gt.f32.partialorder %v8743_v22, 0.0 }
 0x701   : > { %v3896_v12 = vpop.f32.mrf.mxu1 }
 0x702   : > { %6775 = vpow2.f32 %v4113_v11  ;;  %v4115_v48 = vmul.f32 1.442695, %v8747_v10  ;;  %v8751_v32 = vadd.f32 %v3896_v12, %v8729_v8  ;;  %vm4045_vm5 = vcmp.gt.f32.partialorder %v8747_v10, 0.0 }
 0x703   : > { %v3900_v44 = vpop.f32.mrf.mxu1 }
 0x704   : > { %6777 = vpow2.f32 %v4115_v48  ;;  %v4117_v58 = vmul.f32 1.442695, %v8751_v32  ;;  %v8755_v42 = vadd.f32 %v3900_v44, %v8726_v7  ;;  %vm4046_vm7 = vcmp.gt.f32.partialorder %v8751_v32, 0.0 }
 0x705   : > { %v6766_v16 = vpop.eup %6765  ;;  %v3902_v23 = vpop.f32.mrf.mxu1 }
 0x706   : > { %6779 = vpow2.f32 %v4117_v58  ;;  %v5492_v40 = vadd.f32 -1.0, %v6766_v16  ;;  %v4119_v61 = vmul.f32 1.442695, %v8755_v42  ;;  %v8759_v41 = vadd.f32 %v3902_v23, %v8729_v8 }
 0x707   : > { %v6768_v53 = vpop.eup %6767  ;;  %v3904_v62 = vpop.f32.mrf.mxu1  ;;  %vm4047_vm8 = vcmp.gt.f32.partialorder %v8755_v42, 0.0 }
 0x708   : > { %v5493_v28 = vadd.f32 -1.0, %v6768_v53  ;;  %v4295_v25 = vmul.f32 1.6732632, %v5492_v40  ;;  %6781 = vpow2.f32 %v4119_v61  ;;  %v4121_v52 = vmul.f32 1.442695, %v8759_v41 }
 0x709   : > { %v6770_v9 = vpop.eup %6769  ;;  %v8763_v46 = vadd.f32 %v3904_v62, %v8726_v7  ;;  %v3906_v39 = vpop.f32.mrf.mxu1  ;;  %vm4048_vm10 = vcmp.gt.f32.partialorder %v8759_v41, 0.0 }
 0x70a   : > { %v5494_v6 = vadd.f32 -1.0, %v6770_v9  ;;  %v4296_v35 = vmul.f32 1.6732632, %v5493_v28  ;;  %6783 = vpow2.f32 %v4121_v52  ;;  %v8767_v30 = vadd.f32 %v3906_v39, %v8729_v8 }
 0x70b   : > { %v6772_v5 = vpop.eup %6771  ;;  %v3910_v14 = vpop.f32.mrf.mxu1  ;;  %v4359_v24 = vsel %vm4039_vm0, %v8732_v55, %v4295_v25  ;;  %v4123_v31 = vmul.f32 1.442695, %v8763_v46  ;;  %vm4049_vm9 = vcmp.gt.f32.partialorder %v8763_v46, 0.0 }
 0x70c   : > { %v4297_v63 = vmul.f32 1.6732632, %v5494_v6  ;;  %v5495_v59 = vadd.f32 -1.0, %v6772_v5  ;;  %v4360_v13 = vsel %vm4040_vm2, %v3883_v27, %v4296_v35  ;;  %v8772_v29 = vadd.f32 %v3910_v14, %v8726_v7 }
 0x70d   : > { %v6774_v0 = vpop.eup %6773  ;;  %v4125_v43 = vmul.f32 1.442695, %v8767_v30  ;;  %v3912_v26 = vpop.f32.mrf.mxu1  ;;  %6785 = vpow2.f32 %v4123_v31  ;;  %v4424_v36 = vmul.f32 1.050701, %v4360_v13  ;;  %vm4050_vm11 = vcmp.gt.f32.partialorder %v8767_v30, 0.0 }
 0x70e   : > { %v4361_v38 = vsel %vm4041_vm1, %v3885_v2, %v4297_v63  ;;  %v4298_v17 = vmul.f32 1.6732632, %v5495_v59  ;;  %v5496_v15 = vadd.f32 -1.0, %v6774_v0  ;;  %v4423_v2 = vmul.f32 1.050701, %v4359_v24 }
 0x70f   : > { %v6776_v37 = vpop.eup %6775  ;;  %v4425_v56 = vmul.f32 1.050701, %v4361_v38  ;;  %6787 = vpow2.f32 %v4125_v43  ;;  %v3914_v34 = vpop.f32.mrf.mxu1  ;;  %v4127_v57 = vmul.f32 1.442695, %v8772_v29  ;;  %v8778_v19 = vadd.f32 %v3912_v26, %v8729_v8 }
 0x710   : > { %v4362_v4 = vsel %vm4042_vm3, %v3887_v54, %v4298_v17  ;;  %v5497_v51 = vadd.f32 -1.0, %v6776_v37  ;;  %v8781_v54 = vadd.f32 %v3914_v34, %v8726_v7  ;;  %v4299_v33 = vmul.f32 1.6732632, %v5496_v15 }
 0x711   : > { %v6778_v3 = vpop.eup %6777  ;;  %v4426_v60 = vmul.f32 1.050701, %v4362_v4  ;;  %v3916_v49 = vpop.f32.mrf.mxu1  ;;  %v4487_v11 = vpack.c.bf16 %v4425_v56, %v4423_v2  ;;  %6789 = vpow2.f32 %v4127_v57  ;;  %v4129_v12 = vmul.f32 1.442695, %v8778_v19 }
 0x712   : > { %v4300_v55 = vmul.f32 1.6732632, %v5497_v51  ;;  %v5498_v27 = vadd.f32 -1.0, %v6778_v3  ;;  %v4131_v44 = vmul.f32 1.442695, %v8781_v54  ;;  %v8793_v53 = vadd.f32 %v3916_v49, %v8729_v8 }
 0x713   : > { %v6780_v21 = vpop.eup %6779  ;;  %v4488_v47 = vpack.c.bf16 %v4426_v60, %v4424_v36  ;;  %6791 = vpow2.f32 %v4129_v12  ;;  %v4363_v28 = vsel %vm4043_vm6, %v8739_v1, %v4299_v33  ;;  %vm4051_vm12 = vcmp.gt.f32.partialorder %v8772_v29, 0.0 }
 0x714   : > { %v4301_v50 = vmul.f32 1.6732632, %v5498_v27  ;;  %v5499_v45 = vadd.f32 -1.0, %v6780_v21  ;;  %v4364_v48 = vsel %vm4044_vm4, %v8743_v22, %v4300_v55  ;;  %6793 = vpow2.f32 %v4131_v44 }
 0x715   : > { %4756 = vmatprep.mubr.bf16.mxu0 %v4488_v47  ;;  %v6782_v40 = vpop.eup %6781  ;;  %v4428_v23 = vmul.f32 1.050701, %v4364_v48  ;;  %v4133_v62 = vmul.f32 1.442695, %v8793_v53  ;;  %v4427_v35 = vmul.f32 1.050701, %v4363_v28 }
 0x716   : > { %v4365_v58 = vsel %vm4045_vm5, %v8747_v10, %v4301_v50  ;;  %v4302_v16 = vmul.f32 1.6732632, %v5499_v45  ;;  %4757 = vmatmul.mubr.bf16.vlgmr.msra.gmra.mxu0 %v4487_v11  ;;  %v3920_v10 = vpop.f32.mrf.mxu1  ;;  %v5500_v52 = vadd.f32 -1.0, %v6782_v40  ;;  %vm4052_vm13 = vcmp.gt.f32.partialorder %v8778_v19, 0.0 }
 0x717   : > { %v4429_v9 = vmul.f32 1.050701, %v4365_v58  ;;  %v6784_v6 = vpop.eup %6783  ;;  %v8799_v5 = vadd.f32 %v3920_v10, %v8726_v7  ;;  %6795 = vpow2.f32 %v4133_v62  ;;  %vm4053_vm14 = vcmp.gt.f32.partialorder %v8781_v54, 0.0 }
 0x718   : > { %v4366_v22 = vsel %vm4046_vm7, %v8751_v32, %v4302_v16  ;;  %v3922_v25 = vpop.f32.mrf.mxu1  ;;  %v5501_v59 = vadd.f32 -1.0, %v6784_v6  ;;  %v4303_v13 = vmul.f32 1.6732632, %v5500_v52  ;;  %vm4054_vm15 = vcmp.gt.f32.partialorder %v8793_v53, 0.0 }
 0x719   : > { %v4430_v61 = vmul.f32 1.050701, %v4366_v22  ;;  %v8802_v63 = vadd.f32 %v3922_v25, %v8729_v8  ;;  %v4135_v32 = vmul.f32 1.442695, %v8799_v5  ;;  %v4489_v0 = vpack.c.bf16 %v4429_v9, %v4427_v35 }
 0x71a   : > { %v3924_v39 = vpop.f32.mrf.mxu1  ;;  %v6786_v17 = vpop.eup %6785  ;;  %v4304_v15 = vmul.f32 1.6732632, %v5501_v59  ;;  %v4367_v2 = vsel %vm4047_vm8, %v8755_v42, %v4303_v13  ;;  %vm4055_vm3 = vcmp.gt.f32.partialorder %v8799_v5, 0.0 }
 0x71b   : > { %v4490_v1 = vpack.c.bf16 %v4430_v61, %v4428_v23  ;;  %v4137_v38 = vmul.f32 1.442695, %v8802_v63  ;;  %6797 = vpow2.f32 %v4135_v32  ;;  %v8807_v14 = vadd.f32 %v3924_v39, %v8726_v7 }
 0x71c   : > { %v3926_v37 = vpop.f32.mrf.mxu1  ;;  %v6788_v24 = vpop.eup %6787  ;;  %v5502_v31 = vadd.f32 -1.0, %v6786_v17  ;;  %v4368_v57 = vsel %vm4048_vm10, %v8759_v41, %v4304_v15  ;;  %vm4056_vm0 = vcmp.gt.f32.partialorder %v8802_v63, 0.0 }
 0x71d   : > { %4766 = vmatprep.mubr.bf16.mxu0 %v4490_v1  ;;  %6799 = vpow2.f32 %v4137_v38  ;;  %v8810_v4 = vadd.f32 %v3926_v37, %v8729_v8  ;;  %v5503_v51 = vadd.f32 -1.0, %v6788_v24  ;;  %v4139_v43 = vmul.f32 1.442695, %v8807_v14 }
 0x71e   : > { %4767 = vmatmul.mubr.bf16.gmra.mxu0 %v4489_v0  ;;  %v3930_v26 = vpop.f32.mrf.mxu1  ;;  %v4305_v3 = vmul.f32 1.6732632, %v5502_v31  ;;  %v6790_v36 = vpop.eup %6789  ;;  %v4432_v42 = vmul.f32 1.050701, %v4368_v57  ;;  %vm4057_vm1 = vcmp.gt.f32.partialorder %v8807_v14, 0.0 }
 0x71f   : > { %v4141_v56 = vmul.f32 1.442695, %v8810_v4  ;;  %v8815_v60 = vadd.f32 %v3930_v26, %v8726_v7  ;;  %v4306_v55 = vmul.f32 1.6732632, %v5503_v51  ;;  %6801 = vpow2.f32 %v4139_v43 }
 0x720   : > { %v3932_v27 = vpop.f32.mrf.mxu1  ;;  %v4369_v34 = vsel %vm4049_vm9, %v8763_v46, %v4305_v3  ;;  %v6792_v21 = vpop.eup %6791  ;;  %v5504_v11 = vadd.f32 -1.0, %v6790_v36  ;;  %vm4058_vm2 = vcmp.gt.f32.partialorder %v8810_v4, 0.0 }
 0x721   : > { %6803 = vpow2.f32 %v4141_v56  ;;  %v4370_v33 = vsel %vm4050_vm11, %v8767_v30, %v4306_v55  ;;  %v8826_v50 = vadd.f32 %v3932_v27, %v8729_v8  ;;  %v6794_v49 = vpop.eup %6793  ;;  %v4143_v12 = vmul.f32 1.442695, %v8815_v60 }
 0x722   : > { %v3934_v45 = vpop.f32.mrf.mxu1  ;;  %v4434_v47 = vmul.f32 1.050701, %v4370_v33  ;;  %v4433_v48 = vmul.f32 1.050701, %v4369_v34  ;;  %v5506_v58 = vadd.f32 -1.0, %v6794_v49  ;;  %v5505_v41 = vadd.f32 -1.0, %v6792_v21 }
 0x723   : > { %v8830_v46 = vadd.f32 %v3934_v45, %v8726_v7  ;;  %v4431_v30 = vmul.f32 1.050701, %v4367_v2  ;;  %v4145_v44 = vmul.f32 1.442695, %v8826_v50  ;;  %v4307_v23 = vmul.f32 1.6732632, %v5504_v11 }
 0x724   : > { %v3936_v16 = vpop.f32.mrf.mxu1  ;;  %v6796_v10 = vpop.eup %6795  ;;  %6805 = vpow2.f32 %v4143_v12  ;;  %v4492_v61 = vpack.c.bf16 %v4434_v47, %v4432_v42  ;;  %v4309_v62 = vmul.f32 1.6732632, %v5506_v58  ;;  %v4308_v1 = vmul.f32 1.6732632, %v5505_v41 }
 0x725   : > { %v4147_v40 = vmul.f32 1.442695, %v8830_v46  ;;  %v8837_v28 = vadd.f32 %v3936_v16, %v8729_v8  ;;  %v4491_v6 = vpack.c.bf16 %v4433_v48, %v4431_v30  ;;  %v5507_v25 = vadd.f32 -1.0, %v6796_v10 }
 0x726   : > { %4776 = vmatprep.mubr.bf16.mxu0 %v4492_v61  ;;  %v4371_v13 = vsel %vm4051_vm12, %v8772_v29, %v4307_v23  ;;  %v4373_v31 = vsel %vm4053_vm14, %v8781_v54, %v4309_v62  ;;  %v4372_v26 = vsel %vm4052_vm13, %v8778_v19, %v4308_v1  ;;  %vm4059_vm4 = vcmp.gt.f32.partialorder %v8815_v60, 0.0 }
 0x727   : > { %v3940_v22 = vpop.f32.mrf.mxu1  ;;  %6807 = vpow2.f32 %v4147_v40  ;;  %v4149_v59 = vmul.f32 1.442695, %v8837_v28  ;;  %v4310_v39 = vmul.f32 1.6732632, %v5507_v25  ;;  %4777 = vmatmul.mubr.bf16.gmra.mxu0 %v4491_v6  ;;  %v4437_v34 = vmul.f32 1.050701, %v4373_v31 }
 0x728   : > { %v8840_v9 = vadd.f32 %v3940_v22, %v8726_v7  ;;  %v6798_v52 = vpop.eup %6797  ;;  %6809 = vpow2.f32 %v4145_v44  ;;  %v4435_v57 = vmul.f32 1.050701, %v4371_v13  ;;  %v4436_v33 = vmul.f32 1.050701, %v4372_v26 }
 0x729   : > { %v3942_v35 = vpop.f32.mrf.mxu1  ;;  %6811 = vpow2.f32 %v4149_v59  ;;  %v4374_v15 = vsel %vm4054_vm15, %v8793_v53, %v4310_v39  ;;  %v5508_v3 = vadd.f32 -1.0, %v6798_v52  ;;  %vm4060_vm5 = vcmp.gt.f32.partialorder %v8826_v50, 0.0 }
 0x72a   : > { %v6800_v32 = vpop.eup %6799  ;;  %v4151_v0 = vmul.f32 1.442695, %v8840_v9  ;;  %v8847_v38 = vadd.f32 %v3942_v35, %v8729_v8  ;;  %v4438_v54 = vmul.f32 1.050701, %v4374_v15  ;;  %v4493_v42 = vpack.c.bf16 %v4437_v34, %v4435_v57 }
 0x72b   : > { %v3944_v17 = vpop.f32.mrf.mxu1  ;;  %v5509_v37 = vadd.f32 -1.0, %v6800_v32  ;;  %v4311_v12 = vmul.f32 1.6732632, %v5508_v3  ;;  %vm4061_vm6 = vcmp.gt.f32.partialorder %v8830_v46, 0.0  ;;  %vm4062_vm7 = vcmp.gt.f32.partialorder %v8837_v28, 0.0 }
 0x72c   : > { %v8851_v24 = vadd.f32 %v3944_v17, %v8726_v7  ;;  %v6802_v43 = vpop.eup %6801  ;;  %v4153_v56 = vmul.f32 1.442695, %v8847_v38  ;;  %6813 = vpow2.f32 %v4151_v0  ;;  %v4494_v58 = vpack.c.bf16 %v4438_v54, %v4436_v33 }
 0x72d   : > { %v3946_v51 = vpop.f32.mrf.mxu1  ;;  %v5510_v55 = vadd.f32 -1.0, %v6802_v43  ;;  %v4312_v21 = vmul.f32 1.6732632, %v5509_v37  ;;  %vm4063_vm8 = vcmp.gt.f32.partialorder %v8840_v9, 0.0  ;;  %vm4064_vm10 = vcmp.gt.f32.partialorder %v8847_v38, 0.0 }
 0x72e   : > { %v8868_v29 = vadd.f32 %v3946_v51, %v8729_v8  ;;  %v6804_v36 = vpop.eup %6803  ;;  %v4155_v53 = vmul.f32 1.442695, %v8851_v24  ;;  %6815 = vpow2.f32 %v4153_v56  ;;  %4786 = vmatprep.mubr.bf16.mxu0 %v4494_v58  ;;  %vm4065_vm11 = vcmp.gt.f32.partialorder %v8851_v24, 0.0 }
 0x72f   : > { %v3950_v27 = vpop.f32.mrf.mxu1  ;;  %v5511_v2 = vadd.f32 -1.0, %v6804_v36  ;;  %v4313_v19 = vmul.f32 1.6732632, %v5510_v55  ;;  %v4376_v41 = vsel %vm4056_vm0, %v8802_v63, %v4312_v21  ;;  %4787 = vmatmul.mubr.bf16.gmra.mxu0 %v4493_v42 }
 0x730   : > { %6817 = vpow2.f32 %v4155_v53  ;;  %v4157_v47 = vmul.f32 1.442695, %v8868_v29  ;;  %v8873_v11 = vadd.f32 %v3950_v27, %v8726_v7  ;;  %v4440_v6 = vmul.f32 1.050701, %v4376_v41 }
 0x731   : > { %v3952_v45 = vpop.f32.mrf.mxu1  ;;  %v4314_v49 = vmul.f32 1.6732632, %v5511_v2  ;;  %v6806_v44 = vpop.eup %6805  ;;  %v4377_v40 = vsel %vm4057_vm1, %v8807_v14, %v4313_v19  ;;  %vm4066_vm9 = vcmp.gt.f32.partialorder %v8868_v29, 0.0 }
 0x732   : > { %v8877_v48 = vadd.f32 %v3952_v45, %v8729_v8  ;;  %6819 = vpow2.f32 %v4157_v47  ;;  %v4159_v10 = vmul.f32 1.442695, %v8873_v11  ;;  %v4441_v35 = vmul.f32 1.050701, %v4377_v40 }
 0x733   : > { %v3954_v16 = vpop.f32.mrf.mxu1  ;;  %v4378_v30 = vsel %vm4058_vm2, %v8810_v4, %v4314_v49  ;;  %v4375_v4 = vsel %vm4055_vm3, %v8799_v5, %v4311_v12  ;;  %v5512_v14 = vadd.f32 -1.0, %v6806_v44  ;;  %vm4067_vm12 = vcmp.gt.f32.partialorder %v8873_v11, 0.0 }
 0x734   : > { %v4442_v22 = vmul.f32 1.050701, %v4378_v30  ;;  %v8888_v23 = vadd.f32 %v3954_v16, %v8726_v7  ;;  %v6808_v61 = vpop.eup %6807  ;;  %v4161_v62 = vmul.f32 1.442695, %v8877_v48  ;;  %6821 = vpow2.f32 %v4159_v10 }
 0x735   : > { %v3956_v63 = vpop.f32.mrf.mxu1  ;;  %v6810_v25 = vpop.eup %6809  ;;  %v5514_v59 = vadd.f32 -1.0, %v6808_v61  ;;  %v4439_v0 = vmul.f32 1.050701, %v4375_v4  ;;  %v4315_v3 = vmul.f32 1.6732632, %v5512_v14  ;;  %vm4068_vm13 = vcmp.gt.f32.partialorder %v8877_v48, 0.0 }
 0x736   : > { %v4163_v52 = vmul.f32 1.442695, %v8888_v23  ;;  %v6812_v1 = vpop.eup %6811  ;;  %v8895_v32 = vadd.f32 %v3956_v63, %v8729_v8  ;;  %v4496_v39 = vpack.c.bf16 %v4442_v22, %v4440_v6  ;;  %v5513_v5 = vadd.f32 -1.0, %v6810_v25 }
 0x737   : > { %v5515_v17 = vadd.f32 -1.0, %v6812_v1  ;;  %v4495_v31 = vpack.c.bf16 %v4441_v35, %v4439_v0  ;;  %v4317_v56 = vmul.f32 1.6732632, %v5514_v59  ;;  %v4379_v45 = vsel %vm4059_vm4, %v8815_v60, %v4315_v3 }
 0x738   : > { %6823 = vpow2.f32 %v4163_v52  ;;  %4796 = vmatprep.mubr.bf16.mxu0 %v4496_v39  ;;  %v4165_v15 = vmul.f32 1.442695, %v8895_v32  ;;  %v4316_v27 = vmul.f32 1.6732632, %v5513_v5  ;;  %vm4069_vm14 = vcmp.gt.f32.partialorder %v8888_v23, 0.0 }
 0x739   : > { %v3960_v37 = vpop.f32.mrf.mxu1  ;;  %6825 = vpow2.f32 %v4161_v62  ;;  %v6814_v13 = vpop.eup %6813  ;;  %v4318_v54 = vmul.f32 1.6732632, %v5515_v17  ;;  %4797 = vmatmul.mubr.bf16.gmra.mxu0 %v4495_v31  ;;  %v4381_v49 = vsel %vm4061_vm6, %v8830_v46, %v4317_v56  ;;  %vm4070_vm15 = vcmp.gt.f32.partialorder %v8895_v32, 0.0 }
 0x73a   : > { %v8899_v51 = vadd.f32 %v3960_v37, %v8726_v7  ;;  %6827 = vpow2.f32 %v4165_v15  ;;  %v5516_v21 = vadd.f32 -1.0, %v6814_v13  ;;  %v4380_v30 = vsel %vm4060_vm5, %v8826_v50, %v4316_v27 }
 0x73b   : > { %v3962_v43 = vpop.f32.mrf.mxu1  ;;  %v6816_v26 = vpop.eup %6815  ;;  %v4382_v58 = vsel %vm4062_vm7, %v8837_v28, %v4318_v54  ;;  %v4445_v46 = vmul.f32 1.050701, %v4381_v49  ;;  %v4443_v50 = vmul.f32 1.050701, %v4379_v45  ;;  %v4444_v52 = vmul.f32 1.050701, %v4380_v30 }
 0x73c   : > { %v8902_v36 = vadd.f32 %v3962_v43, %v8729_v8  ;;  %v5517_v34 = vadd.f32 -1.0, %v6816_v26  ;;  %v4167_v2 = vmul.f32 1.442695, %v8899_v51  ;;  %v4319_v40 = vmul.f32 1.6732632, %v5516_v21 }
 0x73d   : > { %v3964_v55 = vpop.f32.mrf.mxu1  ;;  %v6818_v53 = vpop.eup %6817  ;;  %v4446_v28 = vmul.f32 1.050701, %v4382_v58  ;;  %v4497_v0 = vpack.c.bf16 %v4445_v46, %v4443_v50  ;;  %vm4071_vm1 = vcmp.gt.f32.partialorder %v8899_v51, 0.0 }
 0x73e   : > { %v8912_v57 = vadd.f32 %v3964_v55, %v8726_v7  ;;  %v4169_v47 = vmul.f32 1.442695, %v8902_v36  ;;  %v5518_v16 = vadd.f32 -1.0, %v6818_v53  ;;  %6829 = vpow2.f32 %v4167_v2 }
 0x73f   : > { %v3966_v33 = vpop.f32.mrf.mxu1  ;;  %v6820_v19 = vpop.eup %6819  ;;  %v4320_v44 = vmul.f32 1.6732632, %v5517_v34  ;;  %v4498_v13 = vpack.c.bf16 %v4446_v28, %v4444_v52  ;;  %vm4072_vm0 = vcmp.gt.f32.partialorder %v8902_v36, 0.0 }
 0x740   : > { %v8920_v12 = vadd.f32 %v3966_v33, %v8729_v8  ;;  %v5519_v42 = vadd.f32 -1.0, %v6820_v19  ;;  %6831 = vpow2.f32 %v4169_v47  ;;  %v4171_v60 = vmul.f32 1.442695, %v8912_v57 }
 0x741   : > { %v3970_v41 = vpop.f32.mrf.mxu1  ;;  %v6822_v6 = vpop.eup %6821  ;;  %v4321_v62 = vmul.f32 1.6732632, %v5518_v16  ;;  %v4384_v1 = vsel %vm4064_vm10, %v8847_v38, %v4320_v44  ;;  %4806 = vmatprep.mubr.bf16.mxu0 %v4498_v13  ;;  %vm4073_vm2 = vcmp.gt.f32.partialorder %v8912_v57, 0.0 }
 0x742   : > { %v4322_v22 = vmul.f32 1.6732632, %v5519_v42  ;;  %v8928_v10 = vadd.f32 %v3970_v41, %v8726_v7  ;;  %6833 = vpow2.f32 %v4171_v60  ;;  %v4173_v63 = vmul.f32 1.442695, %v8920_v12  ;;  %4807 = vmatmul.mubr.bf16.gmra.mxu0 %v4497_v0 }
 0x743   : > { %v3972_v61 = vpop.f32.mrf.mxu1  ;;  %v4448_v38 = vmul.f32 1.050701, %v4384_v1  ;;  %v4385_v15 = vsel %vm4065_vm11, %v8851_v24, %v4321_v62  ;;  %v5520_v56 = vadd.f32 -1.0, %v6822_v6  ;;  %vm4074_vm3 = vcmp.gt.f32.partialorder %v8920_v12, 0.0 }
 0x744   : > { %v8932_v4 = vadd.f32 %v3972_v61, %v8729_v8  ;;  %v4386_v25 = vsel %vm4066_vm9, %v8868_v29, %v4322_v22  ;;  %6835 = vpow2.f32 %v4173_v63  ;;  %v4175_v59 = vmul.f32 1.442695, %v8928_v10 }
 0x745   : > { %v3974_v35 = vpop.f32.mrf.mxu1  ;;  %v6824_v14 = vpop.eup %6823  ;;  %v4450_v17 = vmul.f32 1.050701, %v4386_v25  ;;  %v4383_v29 = vsel %vm4063_vm8, %v8840_v9, %v4319_v40  ;;  %v4449_v2 = vmul.f32 1.050701, %v4385_v15  ;;  %v4323_v42 = vmul.f32 1.6732632, %v5520_v56 }
 0x746   : > { %v6826_v39 = vpop.eup %6825  ;;  %v4177_v37 = vmul.f32 1.442695, %v8932_v4  ;;  %6837 = vpow2.f32 %v4175_v59  ;;  %v8946_v31 = vadd.f32 %v3974_v35, %v8726_v7  ;;  %v5522_v43 = vadd.f32 -1.0, %v6824_v14 }
 0x747   : > { %v3976_v5 = vpop.f32.mrf.mxu1  ;;  %v6828_v3 = vpop.eup %6827  ;;  %v5521_v54 = vadd.f32 -1.0, %v6826_v39  ;;  %v4500_v34 = vpack.c.bf16 %v4450_v17, %v4448_v38  ;;  %v4447_v21 = vmul.f32 1.050701, %v4383_v29  ;;  %vm4076_vm4 = vcmp.gt.f32.partialorder %v8932_v4, 0.0 }
 0x748   : > { %6839 = vpow2.f32 %v4177_v37  ;;  %v4179_v55 = vmul.f32 1.442695, %v8946_v31  ;;  %v8952_v9 = vadd.f32 %v3976_v5, %v8729_v8  ;;  %v5523_v53 = vadd.f32 -1.0, %v6828_v3 }
 0x749   : > { %v4325_v19 = vmul.f32 1.6732632, %v5522_v43  ;;  %4816 = vmatprep.mubr.bf16.mxu0 %v4500_v34  ;;  %v4324_v41 = vmul.f32 1.6732632, %v5521_v54  ;;  %v4499_v46 = vpack.c.bf16 %v4449_v2, %v4447_v21  ;;  %vm4077_vm5 = vcmp.gt.f32.partialorder %v8946_v31, 0.0 }
 0x74a   : > { %v3980_v26 = vpop.f32.mrf.mxu1  ;;  %6841 = vpow2.f32 %v4179_v55  ;;  %v4181_v33 = vmul.f32 1.442695, %v8952_v9  ;;  %v4326_v45 = vmul.f32 1.6732632, %v5523_v53  ;;  %vm4078_vm6 = vcmp.gt.f32.partialorder %v8952_v9, 0.0 }
 0x74b   : > { %v8956_v24 = vadd.f32 %v3980_v26, %v8726_v7  ;;  %v6830_v16 = vpop.eup %6829  ;;  %v4389_v63 = vsel %vm4069_vm14, %v8888_v23, %v4325_v19  ;;  %v4388_v35 = vsel %vm4068_vm13, %v8877_v48, %v4324_v41  ;;  %4817 = vmatmul.mubr.bf16.gmra.mxu0 %v4499_v46  ;;  %vm4075_vm7 = vcmp.gt.f32.partialorder %v8928_v10, 0.0 }
 0x74c   : > { %v3982_v27 = vpop.f32.mrf.mxu1  ;;  %6843 = vpow2.f32 %v4181_v33  ;;  %v4390_v40 = vsel %vm4070_vm15, %v8895_v32, %v4326_v45  ;;  %v5524_v6 = vadd.f32 -1.0, %v6830_v16  ;;  %v4387_v32 = vsel %vm4067_vm12, %v8873_v11, %v4323_v42 }
 0x74d   : > { %v4183_v49 = vmul.f32 1.442695, %v8956_v24  ;;  %v8961_v47 = vadd.f32 %v3982_v27, %v8729_v8  ;;  %v6832_v44 = vpop.eup %6831  ;;  %v4454_v1 = vmul.f32 1.050701, %v4390_v40  ;;  %v4453_v0 = vmul.f32 1.050701, %v4389_v63 }
 0x74e   : > { %v3984_v58 = vpop.f32.mrf.mxu1  ;;  %v5525_v22 = vadd.f32 -1.0, %v6832_v44  ;;  %v4452_v5 = vmul.f32 1.050701, %v4388_v35  ;;  %v4327_v48 = vmul.f32 1.6732632, %v5524_v6  ;;  %vm4079_vm8 = vcmp.gt.f32.partialorder %v8956_v24, 0.0 }
 0x74f   : > { %v8964_v30 = vadd.f32 %v3984_v58, %v8726_v7  ;;  %6845 = vpow2.f32 %v4183_v49  ;;  %v4185_v61 = vmul.f32 1.442695, %v8961_v47  ;;  %v6834_v28 = vpop.eup %6833  ;;  %v4451_v15 = vmul.f32 1.050701, %v4387_v32 }
 0x750   : > { %v3986_v60 = vpop.f32.mrf.mxu1  ;;  %v5526_v14 = vadd.f32 -1.0, %v6834_v28  ;;  %v4328_v17 = vmul.f32 1.6732632, %v5525_v22  ;;  %v4502_v54 = vpack.c.bf16 %v4454_v1, %v4452_v5  ;;  %v4391_v33 = vsel %vm4071_vm1, %v8899_v51, %v4327_v48 }
 0x751   : > { %v4187_v50 = vmul.f32 1.442695, %v8964_v30  ;;  %v8976_v62 = vadd.f32 %v3986_v60, %v8729_v8  ;;  %6847 = vpow2.f32 %v4185_v61  ;;  %v6836_v52 = vpop.eup %6835  ;;  %v4501_v53 = vpack.c.bf16 %v4453_v0, %v4451_v15 }
 0x752   : > { %v3990_v25 = vpop.f32.mrf.mxu1  ;;  %v5527_v11 = vadd.f32 -1.0, %v6836_v52  ;;  %v4329_v29 = vmul.f32 1.6732632, %v5526_v14  ;;  %v4392_v27 = vsel %vm4072_vm0, %v8902_v36, %v4328_v17  ;;  %4826 = vmatprep.mubr.bf16.mxu0 %v4502_v54  ;;  %v4455_v6 = vmul.f32 1.050701, %v4391_v33 }
 0x753   : > { %6849 = vpow2.f32 %v4187_v50  ;;  %v4189_v23 = vmul.f32 1.442695, %v8976_v62  ;;  %v8986_v59 = vadd.f32 %v3990_v25, %v8726_v7  ;;  %v6838_v37 = vpop.eup %6837  ;;  %v4456_v41 = vmul.f32 1.050701, %v4392_v27  ;;  %4827 = vmatmul.mubr.bf16.gmra.mxu0 %v4501_v53 }
 0x754   : > { %v3992_v39 = vpop.f32.mrf.mxu1  ;;  %v4330_v43 = vmul.f32 1.6732632, %v5527_v11  ;;  %v4393_v19 = vsel %vm4073_vm2, %v8912_v57, %v4329_v29  ;;  %v5528_v45 = vadd.f32 -1.0, %v6838_v37  ;;  %vm4080_vm9 = vcmp.gt.f32.partialorder %v8961_v47, 0.0 }
 0x755   : > { %6851 = vpow2.f32 %v4189_v23  ;;  %v6840_v38 = vpop.eup %6839  ;;  %v8991_v26 = vadd.f32 %v3992_v39, %v8729_v8  ;;  %v4191_v56 = vmul.f32 1.442695, %v8986_v59  ;;  %v4457_v60 = vmul.f32 1.050701, %v4393_v19 }
 0x756   : > { %v3994_v13 = vpop.f32.mrf.mxu1  ;;  %v5529_v3 = vadd.f32 -1.0, %v6840_v38  ;;  %v4394_v34 = vsel %vm4074_vm3, %v8920_v12, %v4330_v43  ;;  %v4331_v61 = vmul.f32 1.6732632, %v5528_v45  ;;  %vm4081_vm10 = vcmp.gt.f32.partialorder %v8964_v30, 0.0 }
 0x757   : > { %v4193_v21 = vmul.f32 1.442695, %v8991_v26  ;;  %v6842_v2 = vpop.eup %6841  ;;  %v9009_v49 = vadd.f32 %v3994_v13, %v8726_v7  ;;  %v4458_v36 = vmul.f32 1.050701, %v4394_v34  ;;  %v4503_v5 = vpack.c.bf16 %v4457_v60, %v4455_v6 }
 0x758   : > { %v3996_v55 = vpop.f32.mrf.mxu1  ;;  %v5530_v58 = vadd.f32 -1.0, %v6842_v2  ;;  %v4332_v44 = vmul.f32 1.6732632, %v5529_v3  ;;  %vm4082_vm11 = vcmp.gt.f32.partialorder %v8976_v62, 0.0  ;;  %vm4083_vm12 = vcmp.gt.f32.partialorder %v8986_v59, 0.0 }
 0x759   : > { %6853 = vpow2.f32 %v4193_v21  ;;  %v9012_v12 = vadd.f32 %v3996_v55, %v8729_v8  ;;  %v6844_v42 = vpop.eup %6843  ;;  %v4195_v51 = vmul.f32 1.442695, %v9009_v49  ;;  %v4504_v32 = vpack.c.bf16 %v4458_v36, %v4456_v41 }
 0x75a   : > { %v4000_v16 = vpop.f32.mrf.mxu1  ;;  %6855 = vpow2.f32 %v4191_v56  ;;  %v4333_v46 = vmul.f32 1.6732632, %v5530_v58  ;;  %v5531_v40 = vadd.f32 -1.0, %v6844_v42  ;;  %v4396_v52 = vsel %vm4076_vm4, %v8932_v4, %v4332_v44 }
 0x75b   : > { %6857 = vpow2.f32 %v4195_v51  ;;  %v4197_v28 = vmul.f32 1.442695, %v9012_v12  ;;  %v9018_v63 = vadd.f32 %v4000_v16, %v8726_v7  ;;  %4836 = vmatprep.mubr.bf16.mxu0 %v4504_v32  ;;  %v4395_v4 = vsel %vm4075_vm7, %v8928_v10, %v4331_v61 }
 0x75c   : > { %v6846_v57 = vpop.eup %6845  ;;  %v4002_v22 = vpop.f32.mrf.mxu1  ;;  %v4334_v50 = vmul.f32 1.6732632, %v5531_v40  ;;  %v4397_v1 = vsel %vm4077_vm5, %v8946_v31, %v4333_v46  ;;  %v4460_v13 = vmul.f32 1.050701, %v4396_v52  ;;  %4837 = vmatmul.mubr.bf16.gmra.mxu0 %v4503_v5  ;;  %v4459_v34 = vmul.f32 1.050701, %v4395_v4 }
 0x75d   : > { %v9021_v25 = vadd.f32 %v4002_v22, %v8729_v8  ;;  %v5532_v23 = vadd.f32 -1.0, %v6846_v57  ;;  %6859 = vpow2.f32 %v4197_v28  ;;  %v4199_v11 = vmul.f32 1.442695, %v9018_v63 }
 0x75e   : > { %v4004_v35 = vpop.f32.mrf.mxu1  ;;  %v6848_v14 = vpop.eup %6847  ;;  %v4398_v0 = vsel %vm4078_vm6, %v8952_v9, %v4334_v50  ;;  %v4461_v38 = vmul.f32 1.050701, %v4397_v1  ;;  %vm4084_vm13 = vcmp.gt.f32.partialorder %v8991_v26, 0.0  ;;  %vm4085_vm14 = vcmp.gt.f32.partialorder %v9009_v49, 0.0 }
 0x75f   : > { %v5533_v17 = vadd.f32 -1.0, %v6848_v14  ;;  %v4462_v48 = vmul.f32 1.050701, %v4398_v0  ;;  %6861 = vpow2.f32 %v4199_v11  ;;  %v4201_v15 = vmul.f32 1.442695, %v9021_v25 }
 0x760   : > { %v6850_v39 = vpop.eup %6849  ;;  %v4006_v37 = vpop.f32.mrf.mxu1  ;;  %v4335_v3 = vmul.f32 1.6732632, %v5532_v23  ;;  %v9037_v9 = vadd.f32 %v4004_v35, %v8726_v7  ;;  %v4505_v36 = vpack.c.bf16 %v4461_v38, %v4459_v34  ;;  %vm4086_vm15 = vcmp.gt.f32.partialorder %v9012_v12, 0.0 }
 0x761   : > { %v5534_v29 = vadd.f32 -1.0, %v6850_v39  ;;  %v9040_v54 = vadd.f32 %v4006_v37, %v8729_v8  ;;  %v4336_v55 = vmul.f32 1.6732632, %v5533_v17  ;;  %6863 = vpow2.f32 %v4201_v15 }
 0x762   : > { %v6852_v31 = vpop.eup %6851  ;;  %v4010_v43 = vpop.f32.mrf.mxu1  ;;  %v4506_v27 = vpack.c.bf16 %v4462_v48, %v4460_v13  ;;  %v4203_v33 = vmul.f32 1.442695, %v9037_v9  ;;  %v4399_v58 = vsel %vm4079_vm8, %v8956_v24, %v4335_v3  ;;  %vm4088_vm0 = vcmp.gt.f32.partialorder %v9021_v25, 0.0 }
 0x763   : > { %v5535_v56 = vadd.f32 -1.0, %v6852_v31  ;;  %v4337_v10 = vmul.f32 1.6732632, %v5534_v29  ;;  %v9043_v2 = vadd.f32 %v4010_v43, %v8726_v7  ;;  %v4205_v16 = vmul.f32 1.442695, %v9040_v54 }
 0x764   : > { %v4012_v53 = vpop.f32.mrf.mxu1  ;;  %4846 = vmatprep.mubr.bf16.mxu0 %v4506_v27  ;;  %v4400_v41 = vsel %vm4080_vm9, %v8961_v47, %v4336_v55  ;;  %6865 = vpow2.f32 %v4203_v33  ;;  %v4463_v22 = vmul.f32 1.050701, %v4399_v58  ;;  %vm4087_vm1 = vcmp.gt.f32.partialorder %v9018_v63, 0.0 }
 0x765   : > { %v4338_v21 = vmul.f32 1.6732632, %v5535_v56  ;;  %v4401_v44 = vsel %vm4081_vm10, %v8964_v30, %v4337_v10  ;;  %6867 = vpow2.f32 %v4205_v16  ;;  %v4207_v46 = vmul.f32 1.442695, %v9043_v2  ;;  %4847 = vmatmul.mubr.bf16.gmra.mxu0 %v4505_v36 }
 0x766   : > { %v4014_v19 = vpop.f32.mrf.mxu1  ;;  %v6854_v45 = vpop.eup %6853  ;;  %v9057_v40 = vadd.f32 %v4012_v53, %v8729_v8  ;;  %v4464_v35 = vmul.f32 1.050701, %v4400_v41  ;;  %v4465_v14 = vmul.f32 1.050701, %v4401_v44  ;;  %vm4089_vm2 = vcmp.gt.f32.partialorder %v9037_v9, 0.0 }
 0x767   : > { %v6856_v42 = vpop.eup %6855  ;;  %v4402_v51 = vsel %vm4082_vm11, %v8976_v62, %v4338_v21  ;;  %v5537_v60 = vadd.f32 -1.0, %v6854_v45  ;;  %v9062_v47 = vadd.f32 %v4014_v19, %v8726_v7  ;;  %6869 = vpow2.f32 %v4207_v46 }
 0x768   : > { %v4016_v57 = vpop.f32.mrf.mxu1  ;;  %v6858_v24 = vpop.eup %6857  ;;  %v4466_v61 = vmul.f32 1.050701, %v4402_v51  ;;  %v5536_v28 = vadd.f32 -1.0, %v6856_v42  ;;  %v4209_v50 = vmul.f32 1.442695, %v9057_v40  ;;  %v4507_v43 = vpack.c.bf16 %v4465_v14, %v4463_v22 }
 0x769   : > { %v9065_v30 = vadd.f32 %v4016_v57, %v8729_v8  ;;  %v5538_v6 = vadd.f32 -1.0, %v6858_v24  ;;  %v4211_v52 = vmul.f32 1.442695, %v9062_v47  ;;  %v4340_v23 = vmul.f32 1.6732632, %v5537_v60 }
 0x76a   : > { %v4020_v62 = vpop.f32.mrf.mxu1  ;;  %v6860_v32 = vpop.eup %6859  ;;  %6871 = vpow2.f32 %v4209_v50  ;;  %v4339_v48 = vmul.f32 1.6732632, %v5536_v28  ;;  %v4508_v31 = vpack.c.bf16 %v4466_v61, %v4464_v35  ;;  %vm4090_vm3 = vcmp.gt.f32.partialorder %v9040_v54, 0.0 }
 0x76b   : > { %v4341_v39 = vmul.f32 1.6732632, %v5538_v6  ;;  %v5539_v0 = vadd.f32 -1.0, %v6860_v32  ;;  %6873 = vpow2.f32 %v4211_v52  ;;  %v4213_v17 = vmul.f32 1.442695, %v9065_v30 }
 0x76c   : > { %v4022_v1 = vpop.f32.mrf.mxu1  ;;  %v9071_v11 = vadd.f32 %v4020_v62, %v8726_v7  ;;  %v6862_v4 = vpop.eup %6861  ;;  %4856 = vmatprep.mubr.bf16.mxu0 %v4508_v31  ;;  %v4404_v10 = vsel %vm4084_vm13, %v8991_v26, %v4340_v23  ;;  %vm4092_vm4 = vcmp.gt.f32.partialorder %v9057_v40, 0.0  ;;  %vm4093_vm5 = vcmp.gt.f32.partialorder %v9062_v47, 0.0 }
 0x76d   : > { %v9074_v37 = vadd.f32 %v4022_v1, %v8729_v8  ;;  %v4342_v29 = vmul.f32 1.6732632, %v5539_v0  ;;  %6875 = vpow2.f32 %v4213_v17  ;;  %v4405_v53 = vsel %vm4085_vm14, %v9009_v49, %v4341_v39  ;;  %4857 = vmatmul.mubr.bf16.gmra.mxu0 %v4507_v43 }
 0x76e   : > { %v4024_v5 = vpop.f32.mrf.mxu1  ;;  %v6864_v15 = vpop.eup %6863  ;;  %v4215_v56 = vmul.f32 1.442695, %v9071_v11  ;;  %v5540_v27 = vadd.f32 -1.0, %v6862_v4  ;;  %v4468_v16 = vmul.f32 1.050701, %v4404_v10  ;;  %vm4094_vm6 = vcmp.gt.f32.partialorder %v9065_v30, 0.0 }
 0x76f   : > { %v9077_v13 = vadd.f32 %v4024_v5, %v8726_v7  ;;  %v4406_v3 = vsel %vm4086_vm15, %v9012_v12, %v4342_v29  ;;  %v4217_v55 = vmul.f32 1.442695, %v9074_v37  ;;  %v5541_v34 = vadd.f32 -1.0, %v6864_v15 }
 0x770   : > { %v4026_v38 = vpop.f32.mrf.mxu1  ;;  %v4403_v12 = vsel %vm4083_vm12, %v8986_v59, %v4339_v48  ;;  %6877 = vpow2.f32 %v4215_v56  ;;  %v4470_v45 = vmul.f32 1.050701, %v4406_v3  ;;  %v4469_v42 = vmul.f32 1.050701, %v4405_v53 }
 0x771   : > { %v4219_v33 = vmul.f32 1.442695, %v9077_v13  ;;  %v9095_v19 = vadd.f32 %v4026_v38, %v8729_v8  ;;  %v4344_v36 = vmul.f32 1.6732632, %v5541_v34  ;;  %6879 = vpow2.f32 %v4217_v55  ;;  %v6866_v58 = vpop.eup %6865 }
 0x772   : > { %v4030_v21 = vpop.f32.mrf.mxu1  ;;  %v6868_v41 = vpop.eup %6867  ;;  %v4343_v44 = vmul.f32 1.6732632, %v5540_v27  ;;  %v5542_v51 = vadd.f32 -1.0, %v6866_v58  ;;  %v4467_v46 = vmul.f32 1.050701, %v4403_v12  ;;  %v4510_v28 = vpack.c.bf16 %v4470_v45, %v4468_v16 }
 0x773   : > { %v9098_v26 = vadd.f32 %v4030_v21, %v8726_v7  ;;  %6881 = vpow2.f32 %v4219_v33  ;;  %v4221_v59 = vmul.f32 1.442695, %v9095_v19  ;;  %v5543_v24 = vadd.f32 -1.0, %v6868_v41 }
 0x774   : > { %v4032_v49 = vpop.f32.mrf.mxu1  ;;  %v4408_v62 = vsel %vm4088_vm0, %v9021_v25, %v4344_v36  ;;  %v4345_v61 = vmul.f32 1.6732632, %v5542_v51  ;;  %v6870_v32 = vpop.eup %6869  ;;  %v4509_v35 = vpack.c.bf16 %v4469_v42, %v4467_v46  ;;  %v4407_v23 = vsel %vm4087_vm1, %v9018_v63, %v4343_v44  ;;  %4866 = vmatprep.mubr.bf16.mxu0 %v4510_v28 }
 0x775   : > { %v4223_v57 = vmul.f32 1.442695, %v9098_v26  ;;  %6883 = vpow2.f32 %v4221_v59  ;;  %v9104_v22 = vadd.f32 %v4032_v49, %v8729_v8  ;;  %v4346_v14 = vmul.f32 1.6732632, %v5543_v24 }
 0x776   : > { %v4034_v60 = vpop.f32.mrf.mxu1  ;;  %v4409_v25 = vsel %vm4089_vm2, %v9037_v9, %v4345_v61  ;;  %v4472_v0 = vmul.f32 1.050701, %v4408_v62  ;;  %4867 = vmatmul.mubr.bf16.gmra.mxu0 %v4509_v35  ;;  %v5544_v29 = vadd.f32 -1.0, %v6870_v32  ;;  %v4471_v56 = vmul.f32 1.050701, %v4407_v23 }
 0x777   : > { %v9110_v6 = vadd.f32 %v4034_v60, %v8726_v7  ;;  %v4225_v52 = vmul.f32 1.442695, %v9104_v22  ;;  %v6872_v1 = vpop.eup %6871  ;;  %6885 = vpow2.f32 %v4223_v57  ;;  %v4410_v17 = vsel %vm4090_vm3, %v9040_v54, %v4346_v14 }
 0x778   : > { %v4036_v50 = vpop.f32.mrf.mxu1  ;;  %v6874_v39 = vpop.eup %6873  ;;  %v5545_v5 = vadd.f32 -1.0, %v6872_v1  ;;  %v4474_v48 = vmul.f32 1.050701, %v4410_v17  ;;  %v4473_v38 = vmul.f32 1.050701, %v4409_v25  ;;  %vm4091_vm7 = vcmp.gt.f32.partialorder %v9043_v2, 0.0 }
 0x779   : > { %v4227_v7 = vmul.f32 1.442695, %v9110_v6  ;;  %v9123_v4 = vadd.f32 %v4036_v50, %v8729_v8  ;;  %v5546_v63 = vadd.f32 -1.0, %v6874_v39  ;;  %6887 = vpow2.f32 %v4225_v52 }
 0x77a   : > { %v6876_v31 = vpop.eup %6875  ;;  %v4348_v9 = vmul.f32 1.6732632, %v5545_v5  ;;  %v4512_v3 = vpack.c.bf16 %v4474_v48, %v4472_v0  ;;  %v4347_v10 = vmul.f32 1.6732632, %v5544_v29  ;;  %v4511_v34 = vpack.c.bf16 %v4473_v38, %v4471_v56 }
 0x77b   : > { %6889 = vpow2.f32 %v4227_v7  ;;  %v4349_v15 = vmul.f32 1.6732632, %v5546_v63  ;;  %v5547_v43 = vadd.f32 -1.0, %v6876_v31  ;;  %v4229_v54 = vmul.f32 1.442695, %v9123_v4 }
 0x77c   : > { %v4412_v8 = vsel %vm4092_vm4, %v9057_v40, %v4348_v9  ;;  %4876 = vmatprep.mubr.bf16.mxu0 %v4512_v3  ;;  %v4411_v42 = vsel %vm4091_vm7, %v9043_v2, %v4347_v10  ;;  %vm4095_vm8 = vcmp.gt.f32.partialorder %v9071_v11, 0.0  ;;  %vm4096_vm9 = vcmp.gt.f32.partialorder %v9074_v37, 0.0 }
 0x77d   : > { %v6878_v55 = vpop.eup %6877  ;;  %v4350_v53 = vmul.f32 1.6732632, %v5547_v43  ;;  %6891 = vpow2.f32 %v4229_v54  ;;  %v4413_v33 = vsel %vm4093_vm5, %v9062_v47, %v4349_v15  ;;  %v4476_v49 = vmul.f32 1.050701, %v4412_v8 }
 0x77e   : > { %v6880_v27 = vpop.eup %6879  ;;  %v5548_v21 = vadd.f32 -1.0, %v6878_v55  ;;  %4877 = vmatmul.mubr.bf16.gmra.mxu0 %v4511_v34  ;;  %v4477_v44 = vmul.f32 1.050701, %v4413_v33  ;;  %vm4097_vm10 = vcmp.gt.f32.partialorder %v9077_v13, 0.0  ;;  %vm4098_vm11 = vcmp.gt.f32.partialorder %v9095_v19, 0.0 }
 0x77f   : > { %v4414_v45 = vsel %vm4094_vm6, %v9065_v30, %v4350_v53  ;;  %v5549_v36 = vadd.f32 -1.0, %v6880_v27  ;;  %v4475_v30 = vmul.f32 1.050701, %v4411_v42  ;;  %vm4101_vm12 = vcmp.gt.f32.partialorder %v9110_v6, 0.0 }
 0x780   : > { %v6882_v12 = vpop.eup %6881  ;;  %v4478_v40 = vmul.f32 1.050701, %v4414_v45  ;;  %v4351_v59 = vmul.f32 1.6732632, %v5548_v21  ;;  %vm4100_vm13 = vcmp.gt.f32.partialorder %v9104_v22, 0.0  ;;  %vm4099_vm14 = vcmp.gt.f32.partialorder %v9098_v26, 0.0 }
 0x781   : > { %v5550_v58 = vadd.f32 -1.0, %v6882_v12  ;;  %v4352_v41 = vmul.f32 1.6732632, %v5549_v36  ;;  %v4513_v28 = vpack.c.bf16 %v4477_v44, %v4475_v30  ;;  %vm4102_vm15 = vcmp.gt.f32.partialorder %v9123_v4, 0.0 }
 0x782   : > { %v6884_v16 = vpop.eup %6883  ;;  %v4514_v60 = vpack.c.bf16 %v4478_v40, %v4476_v49  ;;  %v4415_v2 = vsel %vm4095_vm8, %v9071_v11, %v4351_v59 }
 0x783   : > { %v4353_v51 = vmul.f32 1.6732632, %v5550_v58  ;;  %v5551_v57 = vadd.f32 -1.0, %v6884_v16  ;;  %v4416_v46 = vsel %vm4096_vm9, %v9074_v37, %v4352_v41  ;;  %v4479_v25 = vmul.f32 1.050701, %v4415_v2 }
 0x784   : > { %v6886_v47 = vpop.eup %6885  ;;  %4886 = vmatprep.mubr.bf16.mxu0 %v4514_v60  ;;  %v4480_v14 = vmul.f32 1.050701, %v4416_v46 }
 0x785   : > { %v4417_v24 = vsel %vm4097_vm10, %v9077_v13, %v4353_v51  ;;  %v4354_v62 = vmul.f32 1.6732632, %v5551_v57  ;;  %v5552_v1 = vadd.f32 -1.0, %v6886_v47 }
 0x786   : > { %v6888_v61 = vpop.eup %6887  ;;  %v4481_v50 = vmul.f32 1.050701, %v4417_v24  ;;  %4887 = vmatmul.mubr.bf16.gmra.mxu0 %v4513_v28 }
 0x787   : > { %v4418_v32 = vsel %vm4098_vm11, %v9095_v19, %v4354_v62  ;;  %v5553_v23 = vadd.f32 -1.0, %v6888_v61  ;;  %v4355_v17 = vmul.f32 1.6732632, %v5552_v1 }
 0x788   : > { %v6890_v35 = vpop.eup %6889  ;;  %v4482_v52 = vmul.f32 1.050701, %v4418_v32  ;;  %v4515_v7 = vpack.c.bf16 %v4481_v50, %v4479_v25 }
 0x789   : > { %v5554_v37 = vadd.f32 -1.0, %v6890_v35  ;;  %v4356_v39 = vmul.f32 1.6732632, %v5553_v23  ;;  %v4419_v63 = vsel %vm4099_vm14, %v9098_v26, %v4355_v17 }
 0x78a   : > { %v4516_v13 = vpack.c.bf16 %v4482_v52, %v4480_v14  ;;  %v6892_v11 = vpop.eup %6891  ;;  %v4483_v43 = vmul.f32 1.050701, %v4419_v63 }
 0x78b   : > { %v4357_v0 = vmul.f32 1.6732632, %v5554_v37  ;;  %v5555_v5 = vadd.f32 -1.0, %v6892_v11  ;;  %v4420_v48 = vsel %vm4100_vm13, %v9104_v22, %v4356_v39 }
 0x78c   : > { %4896 = vmatprep.mubr.bf16.mxu1 %v4516_v13  ;;  %v4484_v9 = vmul.f32 1.050701, %v4420_v48 }
 0x78d   : > { %4897 = vmatmul.mubr.bf16.vlgmr.msra.gmra.mxu1 %v4515_v7  ;;  %v4421_v19 = vsel %vm4101_vm12, %v9110_v6, %v4357_v0  ;;  %v4358_v29 = vmul.f32 1.6732632, %v5555_v5  ;;  %v5556_v6 = vld [vmem:[%s9349_s9 + $0x7] ss:$8 sm:$0x3] }
 0x78e   : > { %v4485_v31 = vmul.f32 1.050701, %v4421_v19  ;;  %v9155_v22 = vrot.slane %v5556_v6, %v7553_v18  ;;  %v9158_v26 = vrot.slane %v5556_v6, %v7558_v20 }
 0x78f   : > { %v4422_v38 = vsel %vm4102_vm15, %v9123_v4, %v4358_v29 }
 0x790   : > { %v4486_v15 = vmul.f32 1.050701, %v4422_v38  ;;  %v4517_v56 = vpack.c.bf16 %v4485_v31, %v4483_v43 }
 0x792   : > { %v4518_v3 = vpack.c.bf16 %v4486_v15, %v4484_v9 }
 0x794   : > { %4906 = vmatprep.mubr.bf16.mxu1 %v4518_v3 }
 0x795   : > { %4907 = vmatmul.mubr.bf16.gmra.mxu1 %v4517_v56 }
 0x7d6   : > { %v4758_v54 = vpop.f32.mrf.mxu0 }
 0x7d7   : > { %v4759_v4 = vadd.f32 %v4758_v54, %v9155_v22 }
 0x7d8   : > { %v4760_v55 = vpop.f32.mrf.mxu0 }
 0x7d9   : > { %4917 = vst [vmem:[%s9161_s2] sm:$0xff] %v4759_v4  ;;  %v4761_v10 = vadd.f32 %v4760_v55, %v9158_v26 }
 0x7da   : > { %v4762_v18 = vpop.f32.mrf.mxu0 }
 0x7db   : > { %4918 = vst [vmem:[%s9161_s2 + $0x8] sm:$0xff] %v4761_v10  ;;  %v4763_v20 = vadd.f32 %v4762_v18, %v9155_v22 }
 0x7dc   : > { %v4764_v8 = vpop.f32.mrf.mxu0 }
 0x7dd   : > { %4919 = vst [vmem:[%s9161_s2 + $0x10] sm:$0xff] %v4763_v20  ;;  %v4765_v53 = vadd.f32 %v4764_v8, %v9158_v26 }
 0x7de   : > { %v4768_v27 = vpop.f32.mrf.mxu0 }
 0x7df   : > { %4920 = vst [vmem:[%s9161_s2 + $0x18] sm:$0xff] %v4765_v53  ;;  %v4769_v34 = vadd.f32 %v4768_v27, %v9155_v22 }
 0x7e0   : > { %v4770_v21 = vpop.f32.mrf.mxu0 }
 0x7e1   : > { %4921 = vst [vmem:[%s9161_s2 + $0x20] sm:$0xff] %v4769_v34  ;;  %v4771_v12 = vadd.f32 %v4770_v21, %v9158_v26 }
 0x7e2   : > { %v4772_v33 = vpop.f32.mrf.mxu0 }
 0x7e3   : > { %4922 = vst [vmem:[%s9161_s2 + $0x28] sm:$0xff] %v4771_v12  ;;  %v4773_v45 = vadd.f32 %v4772_v33, %v9155_v22 }
 0x7e4   : > { %v4774_v36 = vpop.f32.mrf.mxu0 }
 0x7e5   : > { %4923 = vst [vmem:[%s9161_s2 + $0x30] sm:$0xff] %v4773_v45  ;;  %v4775_v49 = vadd.f32 %v4774_v36, %v9158_v26 }
 0x7e7   : > { %4924 = vst [vmem:[%s9161_s2 + $0x38] sm:$0xff] %v4775_v49  ;;  %v4778_v40 = vpop.f32.mrf.mxu0 }
 0x7e8   : > { %v4779_v58 = vadd.f32 %v4778_v40, %v9155_v22 }
 0x7e9   : > { %v4780_v16 = vpop.f32.mrf.mxu0 }
 0x7ea   : > { %4925 = vst [vmem:[%s9161_s2 + $0x40] sm:$0xff] %v4779_v58  ;;  %v4781_v42 = vadd.f32 %v4780_v16, %v9158_v26 }
 0x7eb   : > { %v4782_v59 = vpop.f32.mrf.mxu0 }
 0x7ec   : > { %4926 = vst [vmem:[%s9161_s2 + $0x48] sm:$0xff] %v4781_v42  ;;  %v4783_v41 = vadd.f32 %v4782_v59, %v9155_v22 }
 0x7ed   : > { %v4784_v44 = vpop.f32.mrf.mxu0 }
 0x7ee   : > { %4927 = vst [vmem:[%s9161_s2 + $0x50] sm:$0xff] %v4783_v41  ;;  %v4785_v51 = vadd.f32 %v4784_v44, %v9158_v26 }
 0x7ef   : > { %v4788_v57 = vpop.f32.mrf.mxu0 }
 0x7f0   : > { %4928 = vst [vmem:[%s9161_s2 + $0x58] sm:$0xff] %v4785_v51  ;;  %v4789_v60 = vadd.f32 %v4788_v57, %v9155_v22 }
 0x7f1   : > { %v4790_v47 = vpop.f32.mrf.mxu0 }
 0x7f2   : > { %4929 = vst [vmem:[%s9161_s2 + $0x60] sm:$0xff] %v4789_v60  ;;  %v4791_v30 = vadd.f32 %v4790_v47, %v9158_v26 }
 0x7f3   : > { %v4792_v46 = vpop.f32.mrf.mxu0 }
 0x7f4   : > { %4930 = vst [vmem:[%s9161_s2 + $0x68] sm:$0xff] %v4791_v30  ;;  %v4793_v24 = vadd.f32 %v4792_v46, %v9155_v22 }
 0x7f5   : > { %v4794_v62 = vpop.f32.mrf.mxu0 }
 0x7f6   : > { %4931 = vst [vmem:[%s9161_s2 + $0x70] sm:$0xff] %v4793_v24  ;;  %v4795_v2 = vadd.f32 %v4794_v62, %v9158_v26 }
 0x7f8   : > { %4932 = vst [vmem:[%s9161_s2 + $0x78] sm:$0xff] %v4795_v2 }
 0x7f9   : > { %v4798_v61 = vpop.f32.mrf.mxu0 }
 0x7fa   : > { %v4799_v28 = vadd.f32 %v4798_v61, %v9155_v22 }
 0x7fb   : > { %v4800_v50 = vpop.f32.mrf.mxu0 }
 0x7fc   : > { %4933 = vst [vmem:[%s9161_s2 + $0x80] sm:$0xff] %v4799_v28  ;;  %v4801_v32 = vadd.f32 %v4800_v50, %v9158_v26 }
 0x7fd   : > { %v4802_v35 = vpop.f32.mrf.mxu0 }
 0x7fe   : > { %4934 = vst [vmem:[%s9161_s2 + $0x88] sm:$0xff] %v4801_v32  ;;  %v4803_v14 = vadd.f32 %v4802_v35, %v9155_v22 }
 0x7ff   : > { %v4804_v52 = vpop.f32.mrf.mxu0 }
 0x800   : > { %4935 = vst [vmem:[%s9161_s2 + $0x90] sm:$0xff] %v4803_v14  ;;  %v4805_v1 = vadd.f32 %v4804_v52, %v9158_v26 }
 0x802   : > { %4936 = vst [vmem:[%s9161_s2 + $0x98] sm:$0xff] %v4805_v1  ;;  %v4808_v23 = vpop.f32.mrf.mxu0 }
 0x803   : > { %v4809_v25 = vadd.f32 %v4808_v23, %v9155_v22 }
 0x804   : > { %v4810_v37 = vpop.f32.mrf.mxu0 }
 0x805   : > { %4937 = vst [vmem:[%s9161_s2 + $0xa0] sm:$0xff] %v4809_v25  ;;  %v4811_v13 = vadd.f32 %v4810_v37, %v9158_v26 }
 0x806   : > { %v4812_v7 = vpop.f32.mrf.mxu0 }
 0x807   : > { %4938 = vst [vmem:[%s9161_s2 + $0xa8] sm:$0xff] %v4811_v13  ;;  %v4813_v39 = vadd.f32 %v4812_v7, %v9155_v22 }
 0x808   : > { %v4814_v0 = vpop.f32.mrf.mxu0 }
 0x809   : > { %4939 = vst [vmem:[%s9161_s2 + $0xb0] sm:$0xff] %v4813_v39  ;;  %v4815_v11 = vadd.f32 %v4814_v0, %v9158_v26 }
 0x80b   : > { %v4818_v17 = vpop.f32.mrf.mxu0  ;;  %4940 = vst [vmem:[%s9161_s2 + $0xb8] sm:$0xff] %v4815_v11 }
 0x80c   : > { %v4819_v5 = vadd.f32 %v4818_v17, %v9155_v22 }
 0x80d   : > { %v4820_v19 = vpop.f32.mrf.mxu0 }
 0x80e   : > { %4941 = vst [vmem:[%s9161_s2 + $0xc0] sm:$0xff] %v4819_v5  ;;  %v4821_v48 = vadd.f32 %v4820_v19, %v9158_v26 }
 0x80f   : > { %v4822_v29 = vpop.f32.mrf.mxu0 }
 0x810   : > { %4942 = vst [vmem:[%s9161_s2 + $0xc8] sm:$0xff] %v4821_v48  ;;  %v4823_v63 = vadd.f32 %v4822_v29, %v9155_v22 }
 0x811   : > { %v4824_v31 = vpop.f32.mrf.mxu0 }
 0x812   : > { %4943 = vst [vmem:[%s9161_s2 + $0xd0] sm:$0xff] %v4823_v63  ;;  %v4825_v38 = vadd.f32 %v4824_v31, %v9158_v26 }
 0x813   : > { %v4828_v9 = vpop.f32.mrf.mxu0 }
 0x814   : > { %4944 = vst [vmem:[%s9161_s2 + $0xd8] sm:$0xff] %v4825_v38  ;;  %v4829_v15 = vadd.f32 %v4828_v9, %v9155_v22 }
 0x815   : > { %v4830_v43 = vpop.f32.mrf.mxu0 }
 0x816   : > { %4945 = vst [vmem:[%s9161_s2 + $0xe0] sm:$0xff] %v4829_v15  ;;  %v4831_v3 = vadd.f32 %v4830_v43, %v9158_v26 }
 0x817   : > { %v4832_v56 = vpop.f32.mrf.mxu0 }
 0x818   : > { %4946 = vst [vmem:[%s9161_s2 + $0xe8] sm:$0xff] %v4831_v3  ;;  %v4833_v6 = vadd.f32 %v4832_v56, %v9155_v22 }
 0x819   : > { %v4834_v54 = vpop.f32.mrf.mxu0 }
 0x81a   : > { %4947 = vst [vmem:[%s9161_s2 + $0xf0] sm:$0xff] %v4833_v6  ;;  %v4835_v4 = vadd.f32 %v4834_v54, %v9158_v26 }
 0x81c   : > { %v4838_v55 = vpop.f32.mrf.mxu0  ;;  %4948 = vst [vmem:[%s9161_s2 + $0xf8] sm:$0xff] %v4835_v4 }
 0x81d   : > { %v4839_v10 = vadd.f32 %v4838_v55, %v9155_v22 }
 0x81e   : > { %v4840_v18 = vpop.f32.mrf.mxu0 }
 0x81f   : > { %4949 = vst [vmem:[%s9161_s2 + $0x100] sm:$0xff] %v4839_v10  ;;  %v4841_v20 = vadd.f32 %v4840_v18, %v9158_v26 }
 0x820   : > { %v4842_v8 = vpop.f32.mrf.mxu0 }
 0x821   : > { %4950 = vst [vmem:[%s9161_s2 + $0x108] sm:$0xff] %v4841_v20  ;;  %v4843_v53 = vadd.f32 %v4842_v8, %v9155_v22 }
 0x822   : > { %v4844_v27 = vpop.f32.mrf.mxu0 }
 0x823   : > { %4951 = vst [vmem:[%s9161_s2 + $0x110] sm:$0xff] %v4843_v53  ;;  %v4845_v34 = vadd.f32 %v4844_v27, %v9158_v26 }
 0x825   : > { %v4848_v21 = vpop.f32.mrf.mxu0  ;;  %4952 = vst [vmem:[%s9161_s2 + $0x118] sm:$0xff] %v4845_v34 }
 0x826   : > { %v4849_v12 = vadd.f32 %v4848_v21, %v9155_v22 }
 0x827   : > { %v4850_v33 = vpop.f32.mrf.mxu0 }
 0x828   : > { %4953 = vst [vmem:[%s9161_s2 + $0x120] sm:$0xff] %v4849_v12  ;;  %v4851_v45 = vadd.f32 %v4850_v33, %v9158_v26 }
 0x829   : > { %v4852_v36 = vpop.f32.mrf.mxu0 }
 0x82a   : > { %4954 = vst [vmem:[%s9161_s2 + $0x128] sm:$0xff] %v4851_v45  ;;  %v4853_v49 = vadd.f32 %v4852_v36, %v9155_v22 }
 0x82b   : > { %v4854_v40 = vpop.f32.mrf.mxu0 }
 0x82c   : > { %4955 = vst [vmem:[%s9161_s2 + $0x130] sm:$0xff] %v4853_v49  ;;  %v4855_v58 = vadd.f32 %v4854_v40, %v9158_v26 }
 0x82d   : > { %v4858_v16 = vpop.f32.mrf.mxu0 }
 0x82e   : > { %4956 = vst [vmem:[%s9161_s2 + $0x138] sm:$0xff] %v4855_v58  ;;  %v4859_v42 = vadd.f32 %v4858_v16, %v9155_v22 }
 0x82f   : > { %v4860_v59 = vpop.f32.mrf.mxu0 }
 0x830   : > { %4957 = vst [vmem:[%s9161_s2 + $0x140] sm:$0xff] %v4859_v42  ;;  %v4861_v41 = vadd.f32 %v4860_v59, %v9158_v26 }
 0x831   : > { %v4862_v44 = vpop.f32.mrf.mxu0 }
 0x832   : > { %4958 = vst [vmem:[%s9161_s2 + $0x148] sm:$0xff] %v4861_v41  ;;  %v4863_v51 = vadd.f32 %v4862_v44, %v9155_v22 }
 0x833   : > { %v4864_v57 = vpop.f32.mrf.mxu0 }
 0x834   : > { %4959 = vst [vmem:[%s9161_s2 + $0x150] sm:$0xff] %v4863_v51  ;;  %v4865_v60 = vadd.f32 %v4864_v57, %v9158_v26 }
 0x836   : > { %v4868_v47 = vpop.f32.mrf.mxu0  ;;  %4960 = vst [vmem:[%s9161_s2 + $0x158] sm:$0xff] %v4865_v60 }
 0x837   : > { %v4869_v30 = vadd.f32 %v4868_v47, %v9155_v22 }
 0x838   : > { %v4870_v46 = vpop.f32.mrf.mxu0 }
 0x839   : > { %4961 = vst [vmem:[%s9161_s2 + $0x160] sm:$0xff] %v4869_v30  ;;  %v4871_v24 = vadd.f32 %v4870_v46, %v9158_v26 }
 0x83a   : > { %v4872_v62 = vpop.f32.mrf.mxu0 }
 0x83b   : > { %4962 = vst [vmem:[%s9161_s2 + $0x168] sm:$0xff] %v4871_v24  ;;  %v4873_v2 = vadd.f32 %v4872_v62, %v9155_v22 }
 0x83c   : > { %v4874_v61 = vpop.f32.mrf.mxu0 }
 0x83d   : > { %4963 = vst [vmem:[%s9161_s2 + $0x170] sm:$0xff] %v4873_v2  ;;  %v4875_v28 = vadd.f32 %v4874_v61, %v9158_v26 }
 0x83e   : > { %v4878_v50 = vpop.f32.mrf.mxu0 }
 0x83f   : > { %4964 = vst [vmem:[%s9161_s2 + $0x178] sm:$0xff] %v4875_v28  ;;  %v4879_v32 = vadd.f32 %v4878_v50, %v9155_v22 }
 0x840   : > { %v4880_v35 = vpop.f32.mrf.mxu0 }
 0x841   : > { %4965 = vst [vmem:[%s9161_s2 + $0x180] sm:$0xff] %v4879_v32  ;;  %v4881_v14 = vadd.f32 %v4880_v35, %v9158_v26 }
 0x842   : > { %v4882_v52 = vpop.f32.mrf.mxu0 }
 0x843   : > { %4966 = vst [vmem:[%s9161_s2 + $0x188] sm:$0xff] %v4881_v14  ;;  %v4883_v1 = vadd.f32 %v4882_v52, %v9155_v22 }
 0x844   : > { %v4884_v23 = vpop.f32.mrf.mxu0 }
 0x845   : > { %4967 = vst [vmem:[%s9161_s2 + $0x190] sm:$0xff] %v4883_v1  ;;  %v4885_v25 = vadd.f32 %v4884_v23, %v9158_v26 }
 0x846   : > { %v4888_v37 = vpop.f32.mrf.mxu0 }
 0x847   : > { %4968 = vst [vmem:[%s9161_s2 + $0x198] sm:$0xff] %v4885_v25  ;;  %v4889_v13 = vadd.f32 %v4888_v37, %v9155_v22 }
 0x848   : > { %v4890_v7 = vpop.f32.mrf.mxu0 }
 0x849   : > { %4969 = vst [vmem:[%s9161_s2 + $0x1a0] sm:$0xff] %v4889_v13  ;;  %v4891_v39 = vadd.f32 %v4890_v7, %v9158_v26 }
 0x84a   : > { %v4892_v0 = vpop.f32.mrf.mxu0 }
 0x84b   : > { %4970 = vst [vmem:[%s9161_s2 + $0x1a8] sm:$0xff] %v4891_v39  ;;  %v4893_v17 = vadd.f32 %v4892_v0, %v9155_v22 }
 0x84c   : > { %v4894_v19 = vpop.f32.mrf.mxu0 }
 0x84d   : > { %v4898_v11 = vpop.f32.mrf.mxu1  ;;  %4971 = vst [vmem:[%s9161_s2 + $0x1b0] sm:$0xff] %v4893_v17  ;;  %v4895_v29 = vadd.f32 %v4894_v19, %v9158_v26 }
 0x84e   : > { %v4899_v5 = vadd.f32 %v4898_v11, %v9155_v22 }
 0x84f   : > { %v4900_v48 = vpop.f32.mrf.mxu1  ;;  %4972 = vst [vmem:[%s9161_s2 + $0x1b8] sm:$0xff] %v4895_v29 }
 0x850   : > { %4973 = vst [vmem:[%s9161_s2 + $0x1c0] sm:$0xff] %v4899_v5  ;;  %v4901_v63 = vadd.f32 %v4900_v48, %v9158_v26 }
 0x851   : > { %v4902_v31 = vpop.f32.mrf.mxu1 }
 0x852   : > { %4974 = vst [vmem:[%s9161_s2 + $0x1c8] sm:$0xff] %v4901_v63  ;;  %v4903_v38 = vadd.f32 %v4902_v31, %v9155_v22 }
 0x853   : > { %v4904_v9 = vpop.f32.mrf.mxu1 }
 0x854   : > { %4975 = vst [vmem:[%s9161_s2 + $0x1d0] sm:$0xff] %v4903_v38  ;;  %v4905_v15 = vadd.f32 %v4904_v9, %v9158_v26 }
 0x855   : > { %v4908_v43 = vpop.f32.mrf.mxu1 }
 0x856   : > { %4976 = vst [vmem:[%s9161_s2 + $0x1d8] sm:$0xff] %v4905_v15  ;;  %v4909_v3 = vadd.f32 %v4908_v43, %v9155_v22 }
 0x857   : > { %v4910_v56 = vpop.f32.mrf.mxu1 }
 0x858   : > { %4977 = vst [vmem:[%s9161_s2 + $0x1e0] sm:$0xff] %v4909_v3  ;;  %v4911_v6 = vadd.f32 %v4910_v56, %v9158_v26 }
 0x859   : > { %v4912_v54 = vpop.f32.mrf.mxu1 }
 0x85a   : > { %4978 = vst [vmem:[%s9161_s2 + $0x1e8] sm:$0xff] %v4911_v6  ;;  %v4913_v4 = vadd.f32 %v4912_v54, %v9155_v22 }
 0x85b   : > { %v4914_v55 = vpop.f32.mrf.mxu1 }
 0x85c   : > { %4979 = vst [vmem:[%s9161_s2 + $0x1f0] sm:$0xff] %v4913_v4  ;;  %v4915_v10 = vadd.f32 %v4914_v55, %v9158_v26 }
 0x85e   : > { %4980 = vst [vmem:[%s9161_s2 + $0x1f8] sm:$0xff] %v4915_v10 }
 0x85f   : > { %7142 = shalt.err (!%p7139_p6)
}
 0x860   : > { %s7143_s12 = scalar_lea.hbm %s9292_s24, 8192  ;;  %s7147_s22 = scalar_lea.hbm %s9350_s10, 16384 }
 0x861   : > { %p7144_p8 = scmp.ne.s32.totalorder %s9292_s24, %s7143_s12  ;;  %p7148_p11 = scmp.lt.s32.totalorder %s9292_s24, %s9350_s10 }
 0x862   : > { %p7149_p13 = scmp.lt.s32.totalorder %s7147_s22, %s7143_s12 }
 0x863   : > { %p7145_p10 = pnand %p7144_p8, %p9391_p5 }
 0x864   : > { %p7150_p0 = por %p7149_p13, %p7148_p11 }
 0x865   : > { %p7146_p7 = pneg %p7145_p10 }
 0x867   : > { %p7151_p2 = pnand %p7150_p0, %p7146_p7 }
 0x869   : > { %7154 = shalt.err (!%p7151_p2)
}
 0x86a   : > { %s7226_s2 = smov 256   ;;  %s7227_s3 = smov 16  }
 0x86b   : > { %6065 = dma.vmem_to_hbm [thread:$0]  (%p9391_p5), %s9294_s4, 8192, %s9292_s24, %s4982_s19, %s7226_s2, %s7226_s2, %s7227_s3  }
 0x86c PF: > { %s5011_s20 = sand.u32 1, %s7197_s13   ;;  %p9392_p9 = scmp.ne.s32.totalorder %s9379_s25, 0 }
 0x86d   : > { %p9393_p12 = scmp.ge.s32.totalorder %s7209_s16, 2  ;;  %s5012_s27 = scalar_lea.sflag [#allocation4], %s5011_s20 }
 0x86f   : > { %p6097_p1 = pnand %p9393_p12, %p9392_p9 }
 0x871   : > { %p6098_p3 = pneg %p6097_p1 }
 0x873   : > { %7192 = dma.done.wait (%p6098_p3), %s5012_s27, 8192  }
 0x874   : > { %7194 = vsyncadd (%p6098_p3), %s5012_s27, 4294959104  ;;  %p27_p4 = scmp.ge.s32.totalorder %s7420_s26, 4   ;;  %s9394_s13 = smov %s7201_s14 }
 0x875   : > { %s9395_s14 = smov %s7205_s15  ;;  %s9396_s15 = smov %s7431_s28 }
 0x876   : > { %s9397_s16 = smov %s7420_s26  ;;  %29 = sbr.rel (!%p27_p4) target bundleno = 16 (0x10), region = 139 }
 0x87b   :  { %5017 = vsyncpa [#allocation3], 1 }
 0x87c   :  { %5019 = vsyncpa [#allocation3 + $0x1], 1 }
 0x87d   :  { %5020 = vsyncpa [#allocation6], 1 }
 0x87e   :  { %5021 = vsyncpa [#allocation9], 1 }
 0x87f   :  { %5022 = vsyncpa [#allocation12], 1 }
 0x880   :  { %5023 = vsyncpa [#allocation15], 1 }
 0x881   :  { %5024 = vsyncpa [#allocation4], 1 }
 0x882   :  { %5026 = vsyncpa [#allocation4 + $0x1], 1 }

</bundles_post_ra>
